<compile_context>
chip_gen: v7x
topology: tpu7x:2x2x1
jax: 0.10.0
libtpu: 0.0.40
codegen_flags: <defaults>
</compile_context>

<pallas_src>
import jax
import jax.numpy as jnp
from jax.experimental import pallas as pl
from jax.experimental.pallas import tpu as pltpu

# ---- scaled-down BERT config (module implies hidden=768; scaled to 256) ----
H = 256                  # hidden size (multiple of 128 -> aligned lane slices)
NHEADS = 2
DH = H // NHEADS         # 128 -> one full lane tile per head
FF = 512                 # FFN intermediate size
NLAYERS = 2
VOCAB = 32
B = 2                    # per-input batch
S = 8                    # sequence length
BT = 3 * B               # main + aux_org + aux_corrupt batched together
N = BT * S               # flattened rows fed to the encoder
LN_EPS = 1e-12
ATTN_SCALE = 1.0 / float(DH) ** 0.5


# ------------------------------ fused kernel ------------------------------

def _bert_fused_kernel(x_ref, mbias_ref, eg_ref, eb_ref,
                       wqkv_ref, bqkv_ref, wo_ref, bo_ref,
                       ln1g_ref, ln1b_ref, w1_ref, b1_ref,
                       w2_ref, b2_ref, ln2g_ref, ln2b_ref,
                       headw_ref, out_ref):
    """Whole encoder + both heads, fully VMEM-resident, single invocation."""

    def layernorm(y, g, b):
        mu = jnp.mean(y, axis=-1, keepdims=True)
        var = jnp.mean((y - mu) ** 2, axis=-1, keepdims=True)
        return (y - mu) * jax.lax.rsqrt(var + LN_EPS) * g + b

    def mm(a, w):
        # bf16 operands (MXU-native on v5e/v6e/v7x), f32 accumulation.
        return jnp.dot(a.astype(jnp.bfloat16), w,
                       preferred_element_type=jnp.float32)

    x = layernorm(x_ref[...], eg_ref[...], eb_ref[...])            # (N, H) f32

    for l in range(NLAYERS):
        # ---- fused QKV projection: one (N,H) x (H,3H) MXU pass ------------
        qkv = mm(x, wqkv_ref[l]) + bqkv_ref[l]                     # (N, 3H)

        # ---- multi-head self-attention (all slices 8/128-tile aligned) ----
        ctx_rows = []
        for b in range(BT):                                        # unrolled
            rows = slice(b * S, (b + 1) * S)
            mb = mbias_ref[b]                                      # (S, S)
            head_outs = []
            for h in range(NHEADS):                                # unrolled
                q_bh = qkv[rows, h * DH:(h + 1) * DH]              # (S, DH)
                k_bh = qkv[rows, H + h * DH:H + (h + 1) * DH]
                v_bh = qkv[rows, 2 * H + h * DH:2 * H + (h + 1) * DH]
                s = jax.lax.dot_general(
                    q_bh.astype(jnp.bfloat16), k_bh.astype(jnp.bfloat16),
                    (((1,), (1,)), ((), ())),
                    preferred_element_type=jnp.float32) * ATTN_SCALE
                s = s + mb                                         # key mask
                m = jnp.max(s, axis=-1, keepdims=True)
                p = jnp.exp(s - m)
                p = p / jnp.sum(p, axis=-1, keepdims=True)
                head_outs.append(
                    jnp.dot(p.astype(jnp.bfloat16),
                            v_bh.astype(jnp.bfloat16),
                            preferred_element_type=jnp.float32))   # (S, DH)
            ctx_rows.append(jnp.concatenate(head_outs, axis=-1))   # (S, H)
        ctx = jnp.concatenate(ctx_rows, axis=0)                    # (N, H)

        # ---- attention output projection + residual LayerNorm -------------
        attn_out = mm(ctx, wo_ref[l]) + bo_ref[l]
        x = layernorm(attn_out + x, ln1g_ref[l], ln1b_ref[l])

        # ---- feed-forward (exact-erf GELU) + residual LayerNorm -----------
        ff = mm(x, w1_ref[l]) + b1_ref[l]
        ff = 0.5 * ff * (1.0 + jax.lax.erf(ff * 0.7071067811865476))
        ff = mm(ff, w2_ref[l]) + b2_ref[l]
        x = layernorm(ff + x, ln2g_ref[l], ln2b_ref[l])

    # ---- CLS rows -> both heads in one matmul ------------------------------
    cls = jnp.concatenate([x[b * S:b * S + 1, :] for b in range(BT)], axis=0)
    logits = jnp.dot(cls, headw_ref[...],
                     preferred_element_type=jnp.float32)            # (BT, 2)
    # column 0 = selection head (raw), column 1 = auxiliary head (sigmoid)
    col = jax.lax.broadcasted_iota(jnp.int32, logits.shape, 1)
    out_ref[...] = jnp.where(col == 0, logits, jax.nn.sigmoid(logits))


# ------------------------------ forward pass ------------------------------

def bert_select_auxilary_forward(params, ids, mask,
                                 aux_org_ids, aux_org_mask,
                                 aux_corrupt_ids, aux_corrupt_mask):
    # Batch the three encoder passes into one (3x fewer encodes).
    ids_all = jnp.concatenate([ids, aux_org_ids, aux_corrupt_ids], axis=0)
    mask_all = jnp.concatenate([mask, aux_org_mask, aux_corrupt_mask], axis=0)

    # Embedding gather + sums stay in JAX glue; LayerNorm runs in the kernel.
    emb = (jnp.take(params["word_emb"], ids_all, axis=0)
           + params["pos_emb"][None, :S]
           + params["type_emb"][0][None, None])                    # (BT, S, H)
    x = emb.reshape(N, H).astype(jnp.float32)

    # Additive key mask, pre-broadcast to (BT, S, S) so the kernel just adds.
    mbias = jnp.broadcast_to(
        ((1.0 - mask_all.astype(jnp.float32)) * (-1e9))[:, None, :],
        (BT, S, S))

    vmem = pl.BlockSpec(memory_space=pltpu.MemorySpace.VMEM)
    inputs = (x, mbias,
              params["emb_ln_g"], params["emb_ln_b"],
              params["wqkv"], params["bqkv"],
              params["wo"], params["bo"],
              params["ln1_g"], params["ln1_b"],
              params["w1"], params["b1"],
              params["w2"], params["b2"],
              params["ln2_g"], params["ln2_b"],
              params["head_w"])
    logits = pl.pallas_call(
        _bert_fused_kernel,
        out_shape=jax.ShapeDtypeStruct((BT, 2), jnp.float32),
        in_specs=[vmem] * len(inputs),
        out_specs=vmem,
    )(*inputs)

    selection_output = logits[:B, 0:1]                 # Linear, no sigmoid
    aux_org_output = logits[B:2 * B, 1:2]              # sigmoid(auxlinear)
    aux_corrupt_output = logits[2 * B:3 * B, 1:2]      # sigmoid(auxlinear)
    return selection_output, aux_org_output, aux_corrupt_output


# ---------------------------- parameter setup ----------------------------

def init_params(key):
    kit = iter(jax.random.split(key, 8))

    def w(shape, dtype=jnp.float32):
        return (0.02 * jax.random.normal(next(kit), shape)).astype(dtype)

    ones_l = lambda d: jnp.ones((NLAYERS, 1, d), jnp.float32)
    zeros_l = lambda d: jnp.zeros((NLAYERS, 1, d), jnp.float32)

    return {
        # embeddings
        "word_emb": w((VOCAB, H)),
        "pos_emb": w((S, H)),
        "type_emb": w((2, H)),
        "emb_ln_g": jnp.ones((1, H), jnp.float32),
        "emb_ln_b": jnp.zeros((1, H), jnp.float32),
        # per-layer weights stacked on a leading NLAYERS axis; matmul weights
        # are stored (in, out) and kept in bf16 (MXU-native operands).
        "wqkv": w((NLAYERS, H, 3 * H), jnp.bfloat16),   # [Wq | Wk | Wv]
        "bqkv": zeros_l(3 * H),
        "wo": w((NLAYERS, H, H), jnp.bfloat16),
        "bo": zeros_l(H),
        "ln1_g": ones_l(H), "ln1_b": zeros_l(H),
        "w1": w((NLAYERS, H, FF), jnp.bfloat16),
        "b1": zeros_l(FF),
        "w2": w((NLAYERS, FF, H), jnp.bfloat16),
        "b2": zeros_l(H),
        "ln2_g": ones_l(H), "ln2_b": zeros_l(H),
        # heads: column 0 = Linear(H,1,bias=False), column 1 = auxlinear
        "head_w": w((H, 2)),
    }


# ---------------------------------- main ----------------------------------

if __name__ == "__main__":
    key = jax.random.PRNGKey(0)
    pkey, k1, k2, k3 = jax.random.split(key, 4)
    params = init_params(pkey)

    ids = jax.random.randint(k1, (B, S), 0, VOCAB, dtype=jnp.int32)
    aux_org_ids = jax.random.randint(k2, (B, S), 0, VOCAB, dtype=jnp.int32)
    aux_corrupt_ids = jax.random.randint(k3, (B, S), 0, VOCAB, dtype=jnp.int32)

    mask = jnp.ones((B, S), jnp.int32).at[:, S - 2:].set(0)
    aux_org_mask = jnp.ones((B, S), jnp.int32)
    aux_corrupt_mask = jnp.ones((B, S), jnp.int32).at[:, S - 1:].set(0)

    fwd = jax.jit(bert_select_auxilary_forward)
    sel, aux_org, aux_cor = fwd(params, ids, mask,
                                aux_org_ids, aux_org_mask,
                                aux_corrupt_ids, aux_corrupt_mask)
    jax.block_until_ready((sel, aux_org, aux_cor))

    assert sel.shape == (B, 1) and aux_org.shape == (B, 1) and aux_cor.shape == (B, 1)
    assert bool(jnp.all(jnp.isfinite(sel)))
    assert bool(jnp.all((aux_org > 0.0) & (aux_org < 1.0)))
    assert bool(jnp.all((aux_cor > 0.0) & (aux_cor < 1.0)))
    print("KERNEL_OK")
</pallas_src>

<mosaic_0001>
module attributes {stable_mosaic.version = 11 : i64} {
  func.func @_bert_fused_kernel(%arg0: memref<48x256xf32, #tpu.memory_space<vmem>>, %arg1: memref<6x8x8xf32, #tpu.memory_space<vmem>>, %arg2: memref<1x256xf32, #tpu.memory_space<vmem>>, %arg3: memref<1x256xf32, #tpu.memory_space<vmem>>, %arg4: memref<2x256x768xbf16, #tpu.memory_space<vmem>>, %arg5: memref<2x1x768xf32, #tpu.memory_space<vmem>>, %arg6: memref<2x256x256xbf16, #tpu.memory_space<vmem>>, %arg7: memref<2x1x256xf32, #tpu.memory_space<vmem>>, %arg8: memref<2x1x256xf32, #tpu.memory_space<vmem>>, %arg9: memref<2x1x256xf32, #tpu.memory_space<vmem>>, %arg10: memref<2x256x512xbf16, #tpu.memory_space<vmem>>, %arg11: memref<2x1x512xf32, #tpu.memory_space<vmem>>, %arg12: memref<2x512x256xbf16, #tpu.memory_space<vmem>>, %arg13: memref<2x1x256xf32, #tpu.memory_space<vmem>>, %arg14: memref<2x1x256xf32, #tpu.memory_space<vmem>>, %arg15: memref<2x1x256xf32, #tpu.memory_space<vmem>>, %arg16: memref<256x2xf32, #tpu.memory_space<vmem>>, %arg17: memref<6x2xf32, #tpu.memory_space<vmem>>) attributes {dimension_semantics = [], scalar_prefetch = 0 : i64, scratch_operands = 0 : i64, tpu.core_type = #tpu.core_type<tc>} {
    %c0 = arith.constant 0 : index
    %c0_0 = arith.constant 0 : index
    %0 = vector.load %arg0[%c0, %c0_0] : memref<48x256xf32, #tpu.memory_space<vmem>>, vector<48x256xf32>
    %c0_1 = arith.constant 0 : index
    %c0_2 = arith.constant 0 : index
    %1 = vector.load %arg2[%c0_1, %c0_2] : memref<1x256xf32, #tpu.memory_space<vmem>>, vector<1x256xf32>
    %c0_3 = arith.constant 0 : index
    %c0_4 = arith.constant 0 : index
    %2 = vector.load %arg3[%c0_3, %c0_4] : memref<1x256xf32, #tpu.memory_space<vmem>>, vector<1x256xf32>
    %cst = arith.constant dense<0.000000e+00> : vector<48xf32>
    %3 = vector.multi_reduction <add>, %0, %cst [1] : vector<48x256xf32> to vector<48xf32>
    %4 = vector.shape_cast %3 : vector<48xf32> to vector<48x1xf32>
    %cst_5 = arith.constant 2.560000e+02 : f32
    %5 = vector.broadcast %cst_5 : f32 to vector<48x1xf32>
    %6 = arith.divf %4, %5 : vector<48x1xf32>
    %7 = vector.broadcast %6 : vector<48x1xf32> to vector<48x256xf32>
    %8 = arith.subf %0, %7 : vector<48x256xf32>
    %9 = arith.mulf %8, %8 : vector<48x256xf32>
    %cst_6 = arith.constant dense<0.000000e+00> : vector<48xf32>
    %10 = vector.multi_reduction <add>, %9, %cst_6 [1] : vector<48x256xf32> to vector<48xf32>
    %11 = vector.shape_cast %10 : vector<48xf32> to vector<48x1xf32>
    %cst_7 = arith.constant 2.560000e+02 : f32
    %12 = vector.broadcast %cst_7 : f32 to vector<48x1xf32>
    %13 = arith.divf %11, %12 : vector<48x1xf32>
    %14 = vector.broadcast %6 : vector<48x1xf32> to vector<48x256xf32>
    %15 = arith.subf %0, %14 : vector<48x256xf32>
    %cst_8 = arith.constant 9.99999996E-13 : f32
    %16 = vector.broadcast %cst_8 : f32 to vector<48x1xf32>
    %17 = arith.addf %13, %16 : vector<48x1xf32>
    %18 = math.rsqrt %17 : vector<48x1xf32>
    %19 = vector.broadcast %18 : vector<48x1xf32> to vector<48x256xf32>
    %20 = arith.mulf %15, %19 : vector<48x256xf32>
    %21 = vector.broadcast %1 : vector<1x256xf32> to vector<48x256xf32>
    %22 = arith.mulf %20, %21 : vector<48x256xf32>
    %23 = vector.broadcast %2 : vector<1x256xf32> to vector<48x256xf32>
    %24 = arith.addf %22, %23 : vector<48x256xf32>
    %c0_9 = arith.constant 0 : index
    %c0_10 = arith.constant 0 : index
    %c0_11 = arith.constant 0 : index
    %25 = vector.load %arg4[%c0_9, %c0_10, %c0_11] : memref<2x256x768xbf16, #tpu.memory_space<vmem>>, vector<1x256x768xbf16>
    %26 = vector.shape_cast %25 : vector<1x256x768xbf16> to vector<256x768xbf16>
    %27 = arith.truncf %24 : vector<48x256xf32> to vector<48x256xbf16>
    %cst_12 = arith.constant dense<0.000000e+00> : vector<48x768xf32>
    %28 = tpu.matmul %27, %26, %cst_12 {dimension_numbers = #tpu.dot_dimension_numbers<[1], [0], [0], [1], [0, 0, 1, 1], [], []>} : vector<48x256xbf16>, vector<256x768xbf16>, vector<48x768xf32> -> vector<48x768xf32>
    %c0_13 = arith.constant 0 : index
    %c0_14 = arith.constant 0 : index
    %c0_15 = arith.constant 0 : index
    %29 = vector.load %arg5[%c0_13, %c0_14, %c0_15] : memref<2x1x768xf32, #tpu.memory_space<vmem>>, vector<1x1x768xf32>
    %30 = vector.shape_cast %29 : vector<1x1x768xf32> to vector<1x768xf32>
    %31 = vector.broadcast %30 : vector<1x768xf32> to vector<48x768xf32>
    %32 = arith.addf %28, %31 : vector<48x768xf32>
    %c0_16 = arith.constant 0 : index
    %c0_17 = arith.constant 0 : index
    %c0_18 = arith.constant 0 : index
    %33 = vector.load %arg1[%c0_16, %c0_17, %c0_18] : memref<6x8x8xf32, #tpu.memory_space<vmem>>, vector<1x8x8xf32>
    %34 = vector.shape_cast %33 : vector<1x8x8xf32> to vector<8x8xf32>
    %35 = vector.extract_strided_slice %32 {offsets = [0, 0], sizes = [8, 128], strides = [1, 1]} : vector<48x768xf32> to vector<8x128xf32>
    %36 = vector.extract_strided_slice %32 {offsets = [0, 256], sizes = [8, 128], strides = [1, 1]} : vector<48x768xf32> to vector<8x128xf32>
    %37 = vector.extract_strided_slice %32 {offsets = [0, 512], sizes = [8, 128], strides = [1, 1]} : vector<48x768xf32> to vector<8x128xf32>
    %38 = arith.truncf %35 : vector<8x128xf32> to vector<8x128xbf16>
    %39 = arith.truncf %36 : vector<8x128xf32> to vector<8x128xbf16>
    %cst_19 = arith.constant dense<0.000000e+00> : vector<8x8xf32>
    %40 = tpu.matmul %38, %39, %cst_19 {dimension_numbers = #tpu.dot_dimension_numbers<[1], [1], [0], [0], [0, 0, 1, 0], [], []>} : vector<8x128xbf16>, vector<8x128xbf16>, vector<8x8xf32> -> vector<8x8xf32>
    %cst_20 = arith.constant 0.0883883461 : f32
    %41 = vector.broadcast %cst_20 : f32 to vector<8x8xf32>
    %42 = arith.mulf %40, %41 : vector<8x8xf32>
    %43 = arith.addf %42, %34 : vector<8x8xf32>
    %cst_21 = arith.constant dense<0xFF800000> : vector<8xf32>
    %44 = vector.multi_reduction <maximumf>, %43, %cst_21 [1] : vector<8x8xf32> to vector<8xf32>
    %45 = vector.shape_cast %44 : vector<8xf32> to vector<8x1xf32>
    %46 = vector.broadcast %45 : vector<8x1xf32> to vector<8x8xf32>
    %47 = arith.subf %43, %46 : vector<8x8xf32>
    %48 = math.exp %47 : vector<8x8xf32>
    %cst_22 = arith.constant dense<0.000000e+00> : vector<8xf32>
    %49 = vector.multi_reduction <add>, %48, %cst_22 [1] : vector<8x8xf32> to vector<8xf32>
    %50 = vector.shape_cast %49 : vector<8xf32> to vector<8x1xf32>
    %51 = vector.broadcast %50 : vector<8x1xf32> to vector<8x8xf32>
    %52 = arith.divf %48, %51 : vector<8x8xf32>
    %53 = arith.truncf %52 : vector<8x8xf32> to vector<8x8xbf16>
    %54 = arith.truncf %37 : vector<8x128xf32> to vector<8x128xbf16>
    %cst_23 = arith.constant dense<0.000000e+00> : vector<8x128xf32>
    %55 = tpu.matmul %53, %54, %cst_23 {dimension_numbers = #tpu.dot_dimension_numbers<[1], [0], [0], [1], [0, 0, 1, 1], [], []>} : vector<8x8xbf16>, vector<8x128xbf16>, vector<8x128xf32> -> vector<8x128xf32>
    %56 = vector.extract_strided_slice %32 {offsets = [0, 128], sizes = [8, 128], strides = [1, 1]} : vector<48x768xf32> to vector<8x128xf32>
    %57 = vector.extract_strided_slice %32 {offsets = [0, 384], sizes = [8, 128], strides = [1, 1]} : vector<48x768xf32> to vector<8x128xf32>
    %58 = vector.extract_strided_slice %32 {offsets = [0, 640], sizes = [8, 128], strides = [1, 1]} : vector<48x768xf32> to vector<8x128xf32>
    %59 = arith.truncf %56 : vector<8x128xf32> to vector<8x128xbf16>
    %60 = arith.truncf %57 : vector<8x128xf32> to vector<8x128xbf16>
    %cst_24 = arith.constant dense<0.000000e+00> : vector<8x8xf32>
    %61 = tpu.matmul %59, %60, %cst_24 {dimension_numbers = #tpu.dot_dimension_numbers<[1], [1], [0], [0], [0, 0, 1, 0], [], []>} : vector<8x128xbf16>, vector<8x128xbf16>, vector<8x8xf32> -> vector<8x8xf32>
    %cst_25 = arith.constant 0.0883883461 : f32
    %62 = vector.broadcast %cst_25 : f32 to vector<8x8xf32>
    %63 = arith.mulf %61, %62 : vector<8x8xf32>
    %64 = arith.addf %63, %34 : vector<8x8xf32>
    %cst_26 = arith.constant dense<0xFF800000> : vector<8xf32>
    %65 = vector.multi_reduction <maximumf>, %64, %cst_26 [1] : vector<8x8xf32> to vector<8xf32>
    %66 = vector.shape_cast %65 : vector<8xf32> to vector<8x1xf32>
    %67 = vector.broadcast %66 : vector<8x1xf32> to vector<8x8xf32>
    %68 = arith.subf %64, %67 : vector<8x8xf32>
    %69 = math.exp %68 : vector<8x8xf32>
    %cst_27 = arith.constant dense<0.000000e+00> : vector<8xf32>
    %70 = vector.multi_reduction <add>, %69, %cst_27 [1] : vector<8x8xf32> to vector<8xf32>
    %71 = vector.shape_cast %70 : vector<8xf32> to vector<8x1xf32>
    %72 = vector.broadcast %71 : vector<8x1xf32> to vector<8x8xf32>
    %73 = arith.divf %69, %72 : vector<8x8xf32>
    %74 = arith.truncf %73 : vector<8x8xf32> to vector<8x8xbf16>
    %75 = arith.truncf %58 : vector<8x128xf32> to vector<8x128xbf16>
    %cst_28 = arith.constant dense<0.000000e+00> : vector<8x128xf32>
    %76 = tpu.matmul %74, %75, %cst_28 {dimension_numbers = #tpu.dot_dimension_numbers<[1], [0], [0], [1], [0, 0, 1, 1], [], []>} : vector<8x8xbf16>, vector<8x128xbf16>, vector<8x128xf32> -> vector<8x128xf32>
    %77 = tpu.concatenate %55, %76 in 1 : vector<8x128xf32>, vector<8x128xf32> -> vector<8x256xf32>
    %c1 = arith.constant 1 : index
    %c0_29 = arith.constant 0 : index
    %c0_30 = arith.constant 0 : index
    %78 = vector.load %arg1[%c1, %c0_29, %c0_30] : memref<6x8x8xf32, #tpu.memory_space<vmem>>, vector<1x8x8xf32>
    %79 = vector.shape_cast %78 : vector<1x8x8xf32> to vector<8x8xf32>
    %80 = vector.extract_strided_slice %32 {offsets = [8, 0], sizes = [8, 128], strides = [1, 1]} : vector<48x768xf32> to vector<8x128xf32>
    %81 = vector.extract_strided_slice %32 {offsets = [8, 256], sizes = [8, 128], strides = [1, 1]} : vector<48x768xf32> to vector<8x128xf32>
    %82 = vector.extract_strided_slice %32 {offsets = [8, 512], sizes = [8, 128], strides = [1, 1]} : vector<48x768xf32> to vector<8x128xf32>
    %83 = arith.truncf %80 : vector<8x128xf32> to vector<8x128xbf16>
    %84 = arith.truncf %81 : vector<8x128xf32> to vector<8x128xbf16>
    %cst_31 = arith.constant dense<0.000000e+00> : vector<8x8xf32>
    %85 = tpu.matmul %83, %84, %cst_31 {dimension_numbers = #tpu.dot_dimension_numbers<[1], [1], [0], [0], [0, 0, 1, 0], [], []>} : vector<8x128xbf16>, vector<8x128xbf16>, vector<8x8xf32> -> vector<8x8xf32>
    %cst_32 = arith.constant 0.0883883461 : f32
    %86 = vector.broadcast %cst_32 : f32 to vector<8x8xf32>
    %87 = arith.mulf %85, %86 : vector<8x8xf32>
    %88 = arith.addf %87, %79 : vector<8x8xf32>
    %cst_33 = arith.constant dense<0xFF800000> : vector<8xf32>
    %89 = vector.multi_reduction <maximumf>, %88, %cst_33 [1] : vector<8x8xf32> to vector<8xf32>
    %90 = vector.shape_cast %89 : vector<8xf32> to vector<8x1xf32>
    %91 = vector.broadcast %90 : vector<8x1xf32> to vector<8x8xf32>
    %92 = arith.subf %88, %91 : vector<8x8xf32>
    %93 = math.exp %92 : vector<8x8xf32>
    %cst_34 = arith.constant dense<0.000000e+00> : vector<8xf32>
    %94 = vector.multi_reduction <add>, %93, %cst_34 [1] : vector<8x8xf32> to vector<8xf32>
    %95 = vector.shape_cast %94 : vector<8xf32> to vector<8x1xf32>
    %96 = vector.broadcast %95 : vector<8x1xf32> to vector<8x8xf32>
    %97 = arith.divf %93, %96 : vector<8x8xf32>
    %98 = arith.truncf %97 : vector<8x8xf32> to vector<8x8xbf16>
    %99 = arith.truncf %82 : vector<8x128xf32> to vector<8x128xbf16>
    %cst_35 = arith.constant dense<0.000000e+00> : vector<8x128xf32>
    %100 = tpu.matmul %98, %99, %cst_35 {dimension_numbers = #tpu.dot_dimension_numbers<[1], [0], [0], [1], [0, 0, 1, 1], [], []>} : vector<8x8xbf16>, vector<8x128xbf16>, vector<8x128xf32> -> vector<8x128xf32>
    %101 = vector.extract_strided_slice %32 {offsets = [8, 128], sizes = [8, 128], strides = [1, 1]} : vector<48x768xf32> to vector<8x128xf32>
    %102 = vector.extract_strided_slice %32 {offsets = [8, 384], sizes = [8, 128], strides = [1, 1]} : vector<48x768xf32> to vector<8x128xf32>
    %103 = vector.extract_strided_slice %32 {offsets = [8, 640], sizes = [8, 128], strides = [1, 1]} : vector<48x768xf32> to vector<8x128xf32>
    %104 = arith.truncf %101 : vector<8x128xf32> to vector<8x128xbf16>
    %105 = arith.truncf %102 : vector<8x128xf32> to vector<8x128xbf16>
    %cst_36 = arith.constant dense<0.000000e+00> : vector<8x8xf32>
    %106 = tpu.matmul %104, %105, %cst_36 {dimension_numbers = #tpu.dot_dimension_numbers<[1], [1], [0], [0], [0, 0, 1, 0], [], []>} : vector<8x128xbf16>, vector<8x128xbf16>, vector<8x8xf32> -> vector<8x8xf32>
    %cst_37 = arith.constant 0.0883883461 : f32
    %107 = vector.broadcast %cst_37 : f32 to vector<8x8xf32>
    %108 = arith.mulf %106, %107 : vector<8x8xf32>
    %109 = arith.addf %108, %79 : vector<8x8xf32>
    %cst_38 = arith.constant dense<0xFF800000> : vector<8xf32>
    %110 = vector.multi_reduction <maximumf>, %109, %cst_38 [1] : vector<8x8xf32> to vector<8xf32>
    %111 = vector.shape_cast %110 : vector<8xf32> to vector<8x1xf32>
    %112 = vector.broadcast %111 : vector<8x1xf32> to vector<8x8xf32>
    %113 = arith.subf %109, %112 : vector<8x8xf32>
    %114 = math.exp %113 : vector<8x8xf32>
    %cst_39 = arith.constant dense<0.000000e+00> : vector<8xf32>
    %115 = vector.multi_reduction <add>, %114, %cst_39 [1] : vector<8x8xf32> to vector<8xf32>
    %116 = vector.shape_cast %115 : vector<8xf32> to vector<8x1xf32>
    %117 = vector.broadcast %116 : vector<8x1xf32> to vector<8x8xf32>
    %118 = arith.divf %114, %117 : vector<8x8xf32>
    %119 = arith.truncf %118 : vector<8x8xf32> to vector<8x8xbf16>
    %120 = arith.truncf %103 : vector<8x128xf32> to vector<8x128xbf16>
    %cst_40 = arith.constant dense<0.000000e+00> : vector<8x128xf32>
    %121 = tpu.matmul %119, %120, %cst_40 {dimension_numbers = #tpu.dot_dimension_numbers<[1], [0], [0], [1], [0, 0, 1, 1], [], []>} : vector<8x8xbf16>, vector<8x128xbf16>, vector<8x128xf32> -> vector<8x128xf32>
    %122 = tpu.concatenate %100, %121 in 1 : vector<8x128xf32>, vector<8x128xf32> -> vector<8x256xf32>
    %c2 = arith.constant 2 : index
    %c0_41 = arith.constant 0 : index
    %c0_42 = arith.constant 0 : index
    %123 = vector.load %arg1[%c2, %c0_41, %c0_42] : memref<6x8x8xf32, #tpu.memory_space<vmem>>, vector<1x8x8xf32>
    %124 = vector.shape_cast %123 : vector<1x8x8xf32> to vector<8x8xf32>
    %125 = vector.extract_strided_slice %32 {offsets = [16, 0], sizes = [8, 128], strides = [1, 1]} : vector<48x768xf32> to vector<8x128xf32>
    %126 = vector.extract_strided_slice %32 {offsets = [16, 256], sizes = [8, 128], strides = [1, 1]} : vector<48x768xf32> to vector<8x128xf32>
    %127 = vector.extract_strided_slice %32 {offsets = [16, 512], sizes = [8, 128], strides = [1, 1]} : vector<48x768xf32> to vector<8x128xf32>
    %128 = arith.truncf %125 : vector<8x128xf32> to vector<8x128xbf16>
    %129 = arith.truncf %126 : vector<8x128xf32> to vector<8x128xbf16>
    %cst_43 = arith.constant dense<0.000000e+00> : vector<8x8xf32>
    %130 = tpu.matmul %128, %129, %cst_43 {dimension_numbers = #tpu.dot_dimension_numbers<[1], [1], [0], [0], [0, 0, 1, 0], [], []>} : vector<8x128xbf16>, vector<8x128xbf16>, vector<8x8xf32> -> vector<8x8xf32>
    %cst_44 = arith.constant 0.0883883461 : f32
    %131 = vector.broadcast %cst_44 : f32 to vector<8x8xf32>
    %132 = arith.mulf %130, %131 : vector<8x8xf32>
    %133 = arith.addf %132, %124 : vector<8x8xf32>
    %cst_45 = arith.constant dense<0xFF800000> : vector<8xf32>
    %134 = vector.multi_reduction <maximumf>, %133, %cst_45 [1] : vector<8x8xf32> to vector<8xf32>
    %135 = vector.shape_cast %134 : vector<8xf32> to vector<8x1xf32>
    %136 = vector.broadcast %135 : vector<8x1xf32> to vector<8x8xf32>
    %137 = arith.subf %133, %136 : vector<8x8xf32>
    %138 = math.exp %137 : vector<8x8xf32>
    %cst_46 = arith.constant dense<0.000000e+00> : vector<8xf32>
    %139 = vector.multi_reduction <add>, %138, %cst_46 [1] : vector<8x8xf32> to vector<8xf32>
    %140 = vector.shape_cast %139 : vector<8xf32> to vector<8x1xf32>
    %141 = vector.broadcast %140 : vector<8x1xf32> to vector<8x8xf32>
    %142 = arith.divf %138, %141 : vector<8x8xf32>
    %143 = arith.truncf %142 : vector<8x8xf32> to vector<8x8xbf16>
    %144 = arith.truncf %127 : vector<8x128xf32> to vector<8x128xbf16>
    %cst_47 = arith.constant dense<0.000000e+00> : vector<8x128xf32>
    %145 = tpu.matmul %143, %144, %cst_47 {dimension_numbers = #tpu.dot_dimension_numbers<[1], [0], [0], [1], [0, 0, 1, 1], [], []>} : vector<8x8xbf16>, vector<8x128xbf16>, vector<8x128xf32> -> vector<8x128xf32>
    %146 = vector.extract_strided_slice %32 {offsets = [16, 128], sizes = [8, 128], strides = [1, 1]} : vector<48x768xf32> to vector<8x128xf32>
    %147 = vector.extract_strided_slice %32 {offsets = [16, 384], sizes = [8, 128], strides = [1, 1]} : vector<48x768xf32> to vector<8x128xf32>
    %148 = vector.extract_strided_slice %32 {offsets = [16, 640], sizes = [8, 128], strides = [1, 1]} : vector<48x768xf32> to vector<8x128xf32>
    %149 = arith.truncf %146 : vector<8x128xf32> to vector<8x128xbf16>
    %150 = arith.truncf %147 : vector<8x128xf32> to vector<8x128xbf16>
    %cst_48 = arith.constant dense<0.000000e+00> : vector<8x8xf32>
    %151 = tpu.matmul %149, %150, %cst_48 {dimension_numbers = #tpu.dot_dimension_numbers<[1], [1], [0], [0], [0, 0, 1, 0], [], []>} : vector<8x128xbf16>, vector<8x128xbf16>, vector<8x8xf32> -> vector<8x8xf32>
    %cst_49 = arith.constant 0.0883883461 : f32
    %152 = vector.broadcast %cst_49 : f32 to vector<8x8xf32>
    %153 = arith.mulf %151, %152 : vector<8x8xf32>
    %154 = arith.addf %153, %124 : vector<8x8xf32>
    %cst_50 = arith.constant dense<0xFF800000> : vector<8xf32>
    %155 = vector.multi_reduction <maximumf>, %154, %cst_50 [1] : vector<8x8xf32> to vector<8xf32>
    %156 = vector.shape_cast %155 : vector<8xf32> to vector<8x1xf32>
    %157 = vector.broadcast %156 : vector<8x1xf32> to vector<8x8xf32>
    %158 = arith.subf %154, %157 : vector<8x8xf32>
    %159 = math.exp %158 : vector<8x8xf32>
    %cst_51 = arith.constant dense<0.000000e+00> : vector<8xf32>
    %160 = vector.multi_reduction <add>, %159, %cst_51 [1] : vector<8x8xf32> to vector<8xf32>
    %161 = vector.shape_cast %160 : vector<8xf32> to vector<8x1xf32>
    %162 = vector.broadcast %161 : vector<8x1xf32> to vector<8x8xf32>
    %163 = arith.divf %159, %162 : vector<8x8xf32>
    %164 = arith.truncf %163 : vector<8x8xf32> to vector<8x8xbf16>
    %165 = arith.truncf %148 : vector<8x128xf32> to vector<8x128xbf16>
    %cst_52 = arith.constant dense<0.000000e+00> : vector<8x128xf32>
    %166 = tpu.matmul %164, %165, %cst_52 {dimension_numbers = #tpu.dot_dimension_numbers<[1], [0], [0], [1], [0, 0, 1, 1], [], []>} : vector<8x8xbf16>, vector<8x128xbf16>, vector<8x128xf32> -> vector<8x128xf32>
    %167 = tpu.concatenate %145, %166 in 1 : vector<8x128xf32>, vector<8x128xf32> -> vector<8x256xf32>
    %c3 = arith.constant 3 : index
    %c0_53 = arith.constant 0 : index
    %c0_54 = arith.constant 0 : index
    %168 = vector.load %arg1[%c3, %c0_53, %c0_54] : memref<6x8x8xf32, #tpu.memory_space<vmem>>, vector<1x8x8xf32>
    %169 = vector.shape_cast %168 : vector<1x8x8xf32> to vector<8x8xf32>
    %170 = vector.extract_strided_slice %32 {offsets = [24, 0], sizes = [8, 128], strides = [1, 1]} : vector<48x768xf32> to vector<8x128xf32>
    %171 = vector.extract_strided_slice %32 {offsets = [24, 256], sizes = [8, 128], strides = [1, 1]} : vector<48x768xf32> to vector<8x128xf32>
    %172 = vector.extract_strided_slice %32 {offsets = [24, 512], sizes = [8, 128], strides = [1, 1]} : vector<48x768xf32> to vector<8x128xf32>
    %173 = arith.truncf %170 : vector<8x128xf32> to vector<8x128xbf16>
    %174 = arith.truncf %171 : vector<8x128xf32> to vector<8x128xbf16>
    %cst_55 = arith.constant dense<0.000000e+00> : vector<8x8xf32>
    %175 = tpu.matmul %173, %174, %cst_55 {dimension_numbers = #tpu.dot_dimension_numbers<[1], [1], [0], [0], [0, 0, 1, 0], [], []>} : vector<8x128xbf16>, vector<8x128xbf16>, vector<8x8xf32> -> vector<8x8xf32>
    %cst_56 = arith.constant 0.0883883461 : f32
    %176 = vector.broadcast %cst_56 : f32 to vector<8x8xf32>
    %177 = arith.mulf %175, %176 : vector<8x8xf32>
    %178 = arith.addf %177, %169 : vector<8x8xf32>
    %cst_57 = arith.constant dense<0xFF800000> : vector<8xf32>
    %179 = vector.multi_reduction <maximumf>, %178, %cst_57 [1] : vector<8x8xf32> to vector<8xf32>
    %180 = vector.shape_cast %179 : vector<8xf32> to vector<8x1xf32>
    %181 = vector.broadcast %180 : vector<8x1xf32> to vector<8x8xf32>
    %182 = arith.subf %178, %181 : vector<8x8xf32>
    %183 = math.exp %182 : vector<8x8xf32>
    %cst_58 = arith.constant dense<0.000000e+00> : vector<8xf32>
    %184 = vector.multi_reduction <add>, %183, %cst_58 [1] : vector<8x8xf32> to vector<8xf32>
    %185 = vector.shape_cast %184 : vector<8xf32> to vector<8x1xf32>
    %186 = vector.broadcast %185 : vector<8x1xf32> to vector<8x8xf32>
    %187 = arith.divf %183, %186 : vector<8x8xf32>
    %188 = arith.truncf %187 : vector<8x8xf32> to vector<8x8xbf16>
    %189 = arith.truncf %172 : vector<8x128xf32> to vector<8x128xbf16>
    %cst_59 = arith.constant dense<0.000000e+00> : vector<8x128xf32>
    %190 = tpu.matmul %188, %189, %cst_59 {dimension_numbers = #tpu.dot_dimension_numbers<[1], [0], [0], [1], [0, 0, 1, 1], [], []>} : vector<8x8xbf16>, vector<8x128xbf16>, vector<8x128xf32> -> vector<8x128xf32>
    %191 = vector.extract_strided_slice %32 {offsets = [24, 128], sizes = [8, 128], strides = [1, 1]} : vector<48x768xf32> to vector<8x128xf32>
    %192 = vector.extract_strided_slice %32 {offsets = [24, 384], sizes = [8, 128], strides = [1, 1]} : vector<48x768xf32> to vector<8x128xf32>
    %193 = vector.extract_strided_slice %32 {offsets = [24, 640], sizes = [8, 128], strides = [1, 1]} : vector<48x768xf32> to vector<8x128xf32>
    %194 = arith.truncf %191 : vector<8x128xf32> to vector<8x128xbf16>
    %195 = arith.truncf %192 : vector<8x128xf32> to vector<8x128xbf16>
    %cst_60 = arith.constant dense<0.000000e+00> : vector<8x8xf32>
    %196 = tpu.matmul %194, %195, %cst_60 {dimension_numbers = #tpu.dot_dimension_numbers<[1], [1], [0], [0], [0, 0, 1, 0], [], []>} : vector<8x128xbf16>, vector<8x128xbf16>, vector<8x8xf32> -> vector<8x8xf32>
    %cst_61 = arith.constant 0.0883883461 : f32
    %197 = vector.broadcast %cst_61 : f32 to vector<8x8xf32>
    %198 = arith.mulf %196, %197 : vector<8x8xf32>
    %199 = arith.addf %198, %169 : vector<8x8xf32>
    %cst_62 = arith.constant dense<0xFF800000> : vector<8xf32>
    %200 = vector.multi_reduction <maximumf>, %199, %cst_62 [1] : vector<8x8xf32> to vector<8xf32>
    %201 = vector.shape_cast %200 : vector<8xf32> to vector<8x1xf32>
    %202 = vector.broadcast %201 : vector<8x1xf32> to vector<8x8xf32>
    %203 = arith.subf %199, %202 : vector<8x8xf32>
    %204 = math.exp %203 : vector<8x8xf32>
    %cst_63 = arith.constant dense<0.000000e+00> : vector<8xf32>
    %205 = vector.multi_reduction <add>, %204, %cst_63 [1] : vector<8x8xf32> to vector<8xf32>
    %206 = vector.shape_cast %205 : vector<8xf32> to vector<8x1xf32>
    %207 = vector.broadcast %206 : vector<8x1xf32> to vector<8x8xf32>
    %208 = arith.divf %204, %207 : vector<8x8xf32>
    %209 = arith.truncf %208 : vector<8x8xf32> to vector<8x8xbf16>
    %210 = arith.truncf %193 : vector<8x128xf32> to vector<8x128xbf16>
    %cst_64 = arith.constant dense<0.000000e+00> : vector<8x128xf32>
    %211 = tpu.matmul %209, %210, %cst_64 {dimension_numbers = #tpu.dot_dimension_numbers<[1], [0], [0], [1], [0, 0, 1, 1], [], []>} : vector<8x8xbf16>, vector<8x128xbf16>, vector<8x128xf32> -> vector<8x128xf32>
    %212 = tpu.concatenate %190, %211 in 1 : vector<8x128xf32>, vector<8x128xf32> -> vector<8x256xf32>
    %c4 = arith.constant 4 : index
    %c0_65 = arith.constant 0 : index
    %c0_66 = arith.constant 0 : index
    %213 = vector.load %arg1[%c4, %c0_65, %c0_66] : memref<6x8x8xf32, #tpu.memory_space<vmem>>, vector<1x8x8xf32>
    %214 = vector.shape_cast %213 : vector<1x8x8xf32> to vector<8x8xf32>
    %215 = vector.extract_strided_slice %32 {offsets = [32, 0], sizes = [8, 128], strides = [1, 1]} : vector<48x768xf32> to vector<8x128xf32>
    %216 = vector.extract_strided_slice %32 {offsets = [32, 256], sizes = [8, 128], strides = [1, 1]} : vector<48x768xf32> to vector<8x128xf32>
    %217 = vector.extract_strided_slice %32 {offsets = [32, 512], sizes = [8, 128], strides = [1, 1]} : vector<48x768xf32> to vector<8x128xf32>
    %218 = arith.truncf %215 : vector<8x128xf32> to vector<8x128xbf16>
    %219 = arith.truncf %216 : vector<8x128xf32> to vector<8x128xbf16>
    %cst_67 = arith.constant dense<0.000000e+00> : vector<8x8xf32>
    %220 = tpu.matmul %218, %219, %cst_67 {dimension_numbers = #tpu.dot_dimension_numbers<[1], [1], [0], [0], [0, 0, 1, 0], [], []>} : vector<8x128xbf16>, vector<8x128xbf16>, vector<8x8xf32> -> vector<8x8xf32>
    %cst_68 = arith.constant 0.0883883461 : f32
    %221 = vector.broadcast %cst_68 : f32 to vector<8x8xf32>
    %222 = arith.mulf %220, %221 : vector<8x8xf32>
    %223 = arith.addf %222, %214 : vector<8x8xf32>
    %cst_69 = arith.constant dense<0xFF800000> : vector<8xf32>
    %224 = vector.multi_reduction <maximumf>, %223, %cst_69 [1] : vector<8x8xf32> to vector<8xf32>
    %225 = vector.shape_cast %224 : vector<8xf32> to vector<8x1xf32>
    %226 = vector.broadcast %225 : vector<8x1xf32> to vector<8x8xf32>
    %227 = arith.subf %223, %226 : vector<8x8xf32>
    %228 = math.exp %227 : vector<8x8xf32>
    %cst_70 = arith.constant dense<0.000000e+00> : vector<8xf32>
    %229 = vector.multi_reduction <add>, %228, %cst_70 [1] : vector<8x8xf32> to vector<8xf32>
    %230 = vector.shape_cast %229 : vector<8xf32> to vector<8x1xf32>
    %231 = vector.broadcast %230 : vector<8x1xf32> to vector<8x8xf32>
    %232 = arith.divf %228, %231 : vector<8x8xf32>
    %233 = arith.truncf %232 : vector<8x8xf32> to vector<8x8xbf16>
    %234 = arith.truncf %217 : vector<8x128xf32> to vector<8x128xbf16>
    %cst_71 = arith.constant dense<0.000000e+00> : vector<8x128xf32>
    %235 = tpu.matmul %233, %234, %cst_71 {dimension_numbers = #tpu.dot_dimension_numbers<[1], [0], [0], [1], [0, 0, 1, 1], [], []>} : vector<8x8xbf16>, vector<8x128xbf16>, vector<8x128xf32> -> vector<8x128xf32>
    %236 = vector.extract_strided_slice %32 {offsets = [32, 128], sizes = [8, 128], strides = [1, 1]} : vector<48x768xf32> to vector<8x128xf32>
    %237 = vector.extract_strided_slice %32 {offsets = [32, 384], sizes = [8, 128], strides = [1, 1]} : vector<48x768xf32> to vector<8x128xf32>
    %238 = vector.extract_strided_slice %32 {offsets = [32, 640], sizes = [8, 128], strides = [1, 1]} : vector<48x768xf32> to vector<8x128xf32>
    %239 = arith.truncf %236 : vector<8x128xf32> to vector<8x128xbf16>
    %240 = arith.truncf %237 : vector<8x128xf32> to vector<8x128xbf16>
    %cst_72 = arith.constant dense<0.000000e+00> : vector<8x8xf32>
    %241 = tpu.matmul %239, %240, %cst_72 {dimension_numbers = #tpu.dot_dimension_numbers<[1], [1], [0], [0], [0, 0, 1, 0], [], []>} : vector<8x128xbf16>, vector<8x128xbf16>, vector<8x8xf32> -> vector<8x8xf32>
    %cst_73 = arith.constant 0.0883883461 : f32
    %242 = vector.broadcast %cst_73 : f32 to vector<8x8xf32>
    %243 = arith.mulf %241, %242 : vector<8x8xf32>
    %244 = arith.addf %243, %214 : vector<8x8xf32>
    %cst_74 = arith.constant dense<0xFF800000> : vector<8xf32>
    %245 = vector.multi_reduction <maximumf>, %244, %cst_74 [1] : vector<8x8xf32> to vector<8xf32>
    %246 = vector.shape_cast %245 : vector<8xf32> to vector<8x1xf32>
    %247 = vector.broadcast %246 : vector<8x1xf32> to vector<8x8xf32>
    %248 = arith.subf %244, %247 : vector<8x8xf32>
    %249 = math.exp %248 : vector<8x8xf32>
    %cst_75 = arith.constant dense<0.000000e+00> : vector<8xf32>
    %250 = vector.multi_reduction <add>, %249, %cst_75 [1] : vector<8x8xf32> to vector<8xf32>
    %251 = vector.shape_cast %250 : vector<8xf32> to vector<8x1xf32>
    %252 = vector.broadcast %251 : vector<8x1xf32> to vector<8x8xf32>
    %253 = arith.divf %249, %252 : vector<8x8xf32>
    %254 = arith.truncf %253 : vector<8x8xf32> to vector<8x8xbf16>
    %255 = arith.truncf %238 : vector<8x128xf32> to vector<8x128xbf16>
    %cst_76 = arith.constant dense<0.000000e+00> : vector<8x128xf32>
    %256 = tpu.matmul %254, %255, %cst_76 {dimension_numbers = #tpu.dot_dimension_numbers<[1], [0], [0], [1], [0, 0, 1, 1], [], []>} : vector<8x8xbf16>, vector<8x128xbf16>, vector<8x128xf32> -> vector<8x128xf32>
    %257 = tpu.concatenate %235, %256 in 1 : vector<8x128xf32>, vector<8x128xf32> -> vector<8x256xf32>
    %c5 = arith.constant 5 : index
    %c0_77 = arith.constant 0 : index
    %c0_78 = arith.constant 0 : index
    %258 = vector.load %arg1[%c5, %c0_77, %c0_78] : memref<6x8x8xf32, #tpu.memory_space<vmem>>, vector<1x8x8xf32>
    %259 = vector.shape_cast %258 : vector<1x8x8xf32> to vector<8x8xf32>
    %260 = vector.extract_strided_slice %32 {offsets = [40, 0], sizes = [8, 128], strides = [1, 1]} : vector<48x768xf32> to vector<8x128xf32>
    %261 = vector.extract_strided_slice %32 {offsets = [40, 256], sizes = [8, 128], strides = [1, 1]} : vector<48x768xf32> to vector<8x128xf32>
    %262 = vector.extract_strided_slice %32 {offsets = [40, 512], sizes = [8, 128], strides = [1, 1]} : vector<48x768xf32> to vector<8x128xf32>
    %263 = arith.truncf %260 : vector<8x128xf32> to vector<8x128xbf16>
    %264 = arith.truncf %261 : vector<8x128xf32> to vector<8x128xbf16>
    %cst_79 = arith.constant dense<0.000000e+00> : vector<8x8xf32>
    %265 = tpu.matmul %263, %264, %cst_79 {dimension_numbers = #tpu.dot_dimension_numbers<[1], [1], [0], [0], [0, 0, 1, 0], [], []>} : vector<8x128xbf16>, vector<8x128xbf16>, vector<8x8xf32> -> vector<8x8xf32>
    %cst_80 = arith.constant 0.0883883461 : f32
    %266 = vector.broadcast %cst_80 : f32 to vector<8x8xf32>
    %267 = arith.mulf %265, %266 : vector<8x8xf32>
    %268 = arith.addf %267, %259 : vector<8x8xf32>
    %cst_81 = arith.constant dense<0xFF800000> : vector<8xf32>
    %269 = vector.multi_reduction <maximumf>, %268, %cst_81 [1] : vector<8x8xf32> to vector<8xf32>
    %270 = vector.shape_cast %269 : vector<8xf32> to vector<8x1xf32>
    %271 = vector.broadcast %270 : vector<8x1xf32> to vector<8x8xf32>
    %272 = arith.subf %268, %271 : vector<8x8xf32>
    %273 = math.exp %272 : vector<8x8xf32>
    %cst_82 = arith.constant dense<0.000000e+00> : vector<8xf32>
    %274 = vector.multi_reduction <add>, %273, %cst_82 [1] : vector<8x8xf32> to vector<8xf32>
    %275 = vector.shape_cast %274 : vector<8xf32> to vector<8x1xf32>
    %276 = vector.broadcast %275 : vector<8x1xf32> to vector<8x8xf32>
    %277 = arith.divf %273, %276 : vector<8x8xf32>
    %278 = arith.truncf %277 : vector<8x8xf32> to vector<8x8xbf16>
    %279 = arith.truncf %262 : vector<8x128xf32> to vector<8x128xbf16>
    %cst_83 = arith.constant dense<0.000000e+00> : vector<8x128xf32>
    %280 = tpu.matmul %278, %279, %cst_83 {dimension_numbers = #tpu.dot_dimension_numbers<[1], [0], [0], [1], [0, 0, 1, 1], [], []>} : vector<8x8xbf16>, vector<8x128xbf16>, vector<8x128xf32> -> vector<8x128xf32>
    %281 = vector.extract_strided_slice %32 {offsets = [40, 128], sizes = [8, 128], strides = [1, 1]} : vector<48x768xf32> to vector<8x128xf32>
    %282 = vector.extract_strided_slice %32 {offsets = [40, 384], sizes = [8, 128], strides = [1, 1]} : vector<48x768xf32> to vector<8x128xf32>
    %283 = vector.extract_strided_slice %32 {offsets = [40, 640], sizes = [8, 128], strides = [1, 1]} : vector<48x768xf32> to vector<8x128xf32>
    %284 = arith.truncf %281 : vector<8x128xf32> to vector<8x128xbf16>
    %285 = arith.truncf %282 : vector<8x128xf32> to vector<8x128xbf16>
    %cst_84 = arith.constant dense<0.000000e+00> : vector<8x8xf32>
    %286 = tpu.matmul %284, %285, %cst_84 {dimension_numbers = #tpu.dot_dimension_numbers<[1], [1], [0], [0], [0, 0, 1, 0], [], []>} : vector<8x128xbf16>, vector<8x128xbf16>, vector<8x8xf32> -> vector<8x8xf32>
    %cst_85 = arith.constant 0.0883883461 : f32
    %287 = vector.broadcast %cst_85 : f32 to vector<8x8xf32>
    %288 = arith.mulf %286, %287 : vector<8x8xf32>
    %289 = arith.addf %288, %259 : vector<8x8xf32>
    %cst_86 = arith.constant dense<0xFF800000> : vector<8xf32>
    %290 = vector.multi_reduction <maximumf>, %289, %cst_86 [1] : vector<8x8xf32> to vector<8xf32>
    %291 = vector.shape_cast %290 : vector<8xf32> to vector<8x1xf32>
    %292 = vector.broadcast %291 : vector<8x1xf32> to vector<8x8xf32>
    %293 = arith.subf %289, %292 : vector<8x8xf32>
    %294 = math.exp %293 : vector<8x8xf32>
    %cst_87 = arith.constant dense<0.000000e+00> : vector<8xf32>
    %295 = vector.multi_reduction <add>, %294, %cst_87 [1] : vector<8x8xf32> to vector<8xf32>
    %296 = vector.shape_cast %295 : vector<8xf32> to vector<8x1xf32>
    %297 = vector.broadcast %296 : vector<8x1xf32> to vector<8x8xf32>
    %298 = arith.divf %294, %297 : vector<8x8xf32>
    %299 = arith.truncf %298 : vector<8x8xf32> to vector<8x8xbf16>
    %300 = arith.truncf %283 : vector<8x128xf32> to vector<8x128xbf16>
    %cst_88 = arith.constant dense<0.000000e+00> : vector<8x128xf32>
    %301 = tpu.matmul %299, %300, %cst_88 {dimension_numbers = #tpu.dot_dimension_numbers<[1], [0], [0], [1], [0, 0, 1, 1], [], []>} : vector<8x8xbf16>, vector<8x128xbf16>, vector<8x128xf32> -> vector<8x128xf32>
    %302 = tpu.concatenate %280, %301 in 1 : vector<8x128xf32>, vector<8x128xf32> -> vector<8x256xf32>
    %303 = tpu.concatenate %77, %122, %167, %212, %257, %302 in 0 : vector<8x256xf32>, vector<8x256xf32>, vector<8x256xf32>, vector<8x256xf32>, vector<8x256xf32>, vector<8x256xf32> -> vector<48x256xf32>
    %c0_89 = arith.constant 0 : index
    %c0_90 = arith.constant 0 : index
    %c0_91 = arith.constant 0 : index
    %304 = vector.load %arg6[%c0_89, %c0_90, %c0_91] : memref<2x256x256xbf16, #tpu.memory_space<vmem>>, vector<1x256x256xbf16>
    %305 = vector.shape_cast %304 : vector<1x256x256xbf16> to vector<256x256xbf16>
    %306 = arith.truncf %303 : vector<48x256xf32> to vector<48x256xbf16>
    %cst_92 = arith.constant dense<0.000000e+00> : vector<48x256xf32>
    %307 = tpu.matmul %306, %305, %cst_92 {dimension_numbers = #tpu.dot_dimension_numbers<[1], [0], [0], [1], [0, 0, 1, 1], [], []>} : vector<48x256xbf16>, vector<256x256xbf16>, vector<48x256xf32> -> vector<48x256xf32>
    %c0_93 = arith.constant 0 : index
    %c0_94 = arith.constant 0 : index
    %c0_95 = arith.constant 0 : index
    %308 = vector.load %arg7[%c0_93, %c0_94, %c0_95] : memref<2x1x256xf32, #tpu.memory_space<vmem>>, vector<1x1x256xf32>
    %309 = vector.shape_cast %308 : vector<1x1x256xf32> to vector<1x256xf32>
    %310 = vector.broadcast %309 : vector<1x256xf32> to vector<48x256xf32>
    %311 = arith.addf %307, %310 : vector<48x256xf32>
    %312 = arith.addf %311, %24 : vector<48x256xf32>
    %c0_96 = arith.constant 0 : index
    %c0_97 = arith.constant 0 : index
    %c0_98 = arith.constant 0 : index
    %313 = vector.load %arg8[%c0_96, %c0_97, %c0_98] : memref<2x1x256xf32, #tpu.memory_space<vmem>>, vector<1x1x256xf32>
    %314 = vector.shape_cast %313 : vector<1x1x256xf32> to vector<1x256xf32>
    %c0_99 = arith.constant 0 : index
    %c0_100 = arith.constant 0 : index
    %c0_101 = arith.constant 0 : index
    %315 = vector.load %arg9[%c0_99, %c0_100, %c0_101] : memref<2x1x256xf32, #tpu.memory_space<vmem>>, vector<1x1x256xf32>
    %316 = vector.shape_cast %315 : vector<1x1x256xf32> to vector<1x256xf32>
    %cst_102 = arith.constant dense<0.000000e+00> : vector<48xf32>
    %317 = vector.multi_reduction <add>, %312, %cst_102 [1] : vector<48x256xf32> to vector<48xf32>
    %318 = vector.shape_cast %317 : vector<48xf32> to vector<48x1xf32>
    %cst_103 = arith.constant 2.560000e+02 : f32
    %319 = vector.broadcast %cst_103 : f32 to vector<48x1xf32>
    %320 = arith.divf %318, %319 : vector<48x1xf32>
    %321 = vector.broadcast %320 : vector<48x1xf32> to vector<48x256xf32>
    %322 = arith.subf %312, %321 : vector<48x256xf32>
    %323 = arith.mulf %322, %322 : vector<48x256xf32>
    %cst_104 = arith.constant dense<0.000000e+00> : vector<48xf32>
    %324 = vector.multi_reduction <add>, %323, %cst_104 [1] : vector<48x256xf32> to vector<48xf32>
    %325 = vector.shape_cast %324 : vector<48xf32> to vector<48x1xf32>
    %cst_105 = arith.constant 2.560000e+02 : f32
    %326 = vector.broadcast %cst_105 : f32 to vector<48x1xf32>
    %327 = arith.divf %325, %326 : vector<48x1xf32>
    %328 = vector.broadcast %320 : vector<48x1xf32> to vector<48x256xf32>
    %329 = arith.subf %312, %328 : vector<48x256xf32>
    %cst_106 = arith.constant 9.99999996E-13 : f32
    %330 = vector.broadcast %cst_106 : f32 to vector<48x1xf32>
    %331 = arith.addf %327, %330 : vector<48x1xf32>
    %332 = math.rsqrt %331 : vector<48x1xf32>
    %333 = vector.broadcast %332 : vector<48x1xf32> to vector<48x256xf32>
    %334 = arith.mulf %329, %333 : vector<48x256xf32>
    %335 = vector.broadcast %314 : vector<1x256xf32> to vector<48x256xf32>
    %336 = arith.mulf %334, %335 : vector<48x256xf32>
    %337 = vector.broadcast %316 : vector<1x256xf32> to vector<48x256xf32>
    %338 = arith.addf %336, %337 : vector<48x256xf32>
    %c0_107 = arith.constant 0 : index
    %c0_108 = arith.constant 0 : index
    %c0_109 = arith.constant 0 : index
    %339 = vector.load %arg10[%c0_107, %c0_108, %c0_109] : memref<2x256x512xbf16, #tpu.memory_space<vmem>>, vector<1x256x512xbf16>
    %340 = vector.shape_cast %339 : vector<1x256x512xbf16> to vector<256x512xbf16>
    %341 = arith.truncf %338 : vector<48x256xf32> to vector<48x256xbf16>
    %cst_110 = arith.constant dense<0.000000e+00> : vector<48x512xf32>
    %342 = tpu.matmul %341, %340, %cst_110 {dimension_numbers = #tpu.dot_dimension_numbers<[1], [0], [0], [1], [0, 0, 1, 1], [], []>} : vector<48x256xbf16>, vector<256x512xbf16>, vector<48x512xf32> -> vector<48x512xf32>
    %c0_111 = arith.constant 0 : index
    %c0_112 = arith.constant 0 : index
    %c0_113 = arith.constant 0 : index
    %343 = vector.load %arg11[%c0_111, %c0_112, %c0_113] : memref<2x1x512xf32, #tpu.memory_space<vmem>>, vector<1x1x512xf32>
    %344 = vector.shape_cast %343 : vector<1x1x512xf32> to vector<1x512xf32>
    %345 = vector.broadcast %344 : vector<1x512xf32> to vector<48x512xf32>
    %346 = arith.addf %342, %345 : vector<48x512xf32>
    %cst_114 = arith.constant 5.000000e-01 : f32
    %347 = vector.broadcast %cst_114 : f32 to vector<48x512xf32>
    %348 = arith.mulf %347, %346 : vector<48x512xf32>
    %cst_115 = arith.constant 0.707106769 : f32
    %349 = vector.broadcast %cst_115 : f32 to vector<48x512xf32>
    %350 = arith.mulf %346, %349 : vector<48x512xf32>
    %351 = math.erf %350 : vector<48x512xf32>
    %cst_116 = arith.constant 1.000000e+00 : f32
    %352 = vector.broadcast %cst_116 : f32 to vector<48x512xf32>
    %353 = arith.addf %352, %351 : vector<48x512xf32>
    %354 = arith.mulf %348, %353 : vector<48x512xf32>
    %c0_117 = arith.constant 0 : index
    %c0_118 = arith.constant 0 : index
    %c0_119 = arith.constant 0 : index
    %355 = vector.load %arg12[%c0_117, %c0_118, %c0_119] : memref<2x512x256xbf16, #tpu.memory_space<vmem>>, vector<1x512x256xbf16>
    %356 = vector.shape_cast %355 : vector<1x512x256xbf16> to vector<512x256xbf16>
    %357 = arith.truncf %354 : vector<48x512xf32> to vector<48x512xbf16>
    %cst_120 = arith.constant dense<0.000000e+00> : vector<48x256xf32>
    %358 = tpu.matmul %357, %356, %cst_120 {dimension_numbers = #tpu.dot_dimension_numbers<[1], [0], [0], [1], [0, 0, 1, 1], [], []>} : vector<48x512xbf16>, vector<512x256xbf16>, vector<48x256xf32> -> vector<48x256xf32>
    %c0_121 = arith.constant 0 : index
    %c0_122 = arith.constant 0 : index
    %c0_123 = arith.constant 0 : index
    %359 = vector.load %arg13[%c0_121, %c0_122, %c0_123] : memref<2x1x256xf32, #tpu.memory_space<vmem>>, vector<1x1x256xf32>
    %360 = vector.shape_cast %359 : vector<1x1x256xf32> to vector<1x256xf32>
    %361 = vector.broadcast %360 : vector<1x256xf32> to vector<48x256xf32>
    %362 = arith.addf %358, %361 : vector<48x256xf32>
    %363 = arith.addf %362, %338 : vector<48x256xf32>
    %c0_124 = arith.constant 0 : index
    %c0_125 = arith.constant 0 : index
    %c0_126 = arith.constant 0 : index
    %364 = vector.load %arg14[%c0_124, %c0_125, %c0_126] : memref<2x1x256xf32, #tpu.memory_space<vmem>>, vector<1x1x256xf32>
    %365 = vector.shape_cast %364 : vector<1x1x256xf32> to vector<1x256xf32>
    %c0_127 = arith.constant 0 : index
    %c0_128 = arith.constant 0 : index
    %c0_129 = arith.constant 0 : index
    %366 = vector.load %arg15[%c0_127, %c0_128, %c0_129] : memref<2x1x256xf32, #tpu.memory_space<vmem>>, vector<1x1x256xf32>
    %367 = vector.shape_cast %366 : vector<1x1x256xf32> to vector<1x256xf32>
    %cst_130 = arith.constant dense<0.000000e+00> : vector<48xf32>
    %368 = vector.multi_reduction <add>, %363, %cst_130 [1] : vector<48x256xf32> to vector<48xf32>
    %369 = vector.shape_cast %368 : vector<48xf32> to vector<48x1xf32>
    %cst_131 = arith.constant 2.560000e+02 : f32
    %370 = vector.broadcast %cst_131 : f32 to vector<48x1xf32>
    %371 = arith.divf %369, %370 : vector<48x1xf32>
    %372 = vector.broadcast %371 : vector<48x1xf32> to vector<48x256xf32>
    %373 = arith.subf %363, %372 : vector<48x256xf32>
    %374 = arith.mulf %373, %373 : vector<48x256xf32>
    %cst_132 = arith.constant dense<0.000000e+00> : vector<48xf32>
    %375 = vector.multi_reduction <add>, %374, %cst_132 [1] : vector<48x256xf32> to vector<48xf32>
    %376 = vector.shape_cast %375 : vector<48xf32> to vector<48x1xf32>
    %cst_133 = arith.constant 2.560000e+02 : f32
    %377 = vector.broadcast %cst_133 : f32 to vector<48x1xf32>
    %378 = arith.divf %376, %377 : vector<48x1xf32>
    %379 = vector.broadcast %371 : vector<48x1xf32> to vector<48x256xf32>
    %380 = arith.subf %363, %379 : vector<48x256xf32>
    %cst_134 = arith.constant 9.99999996E-13 : f32
    %381 = vector.broadcast %cst_134 : f32 to vector<48x1xf32>
    %382 = arith.addf %378, %381 : vector<48x1xf32>
    %383 = math.rsqrt %382 : vector<48x1xf32>
    %384 = vector.broadcast %383 : vector<48x1xf32> to vector<48x256xf32>
    %385 = arith.mulf %380, %384 : vector<48x256xf32>
    %386 = vector.broadcast %365 : vector<1x256xf32> to vector<48x256xf32>
    %387 = arith.mulf %385, %386 : vector<48x256xf32>
    %388 = vector.broadcast %367 : vector<1x256xf32> to vector<48x256xf32>
    %389 = arith.addf %387, %388 : vector<48x256xf32>
    %c1_135 = arith.constant 1 : index
    %c0_136 = arith.constant 0 : index
    %c0_137 = arith.constant 0 : index
    %390 = vector.load %arg4[%c1_135, %c0_136, %c0_137] : memref<2x256x768xbf16, #tpu.memory_space<vmem>>, vector<1x256x768xbf16>
    %391 = vector.shape_cast %390 : vector<1x256x768xbf16> to vector<256x768xbf16>
    %392 = arith.truncf %389 : vector<48x256xf32> to vector<48x256xbf16>
    %cst_138 = arith.constant dense<0.000000e+00> : vector<48x768xf32>
    %393 = tpu.matmul %392, %391, %cst_138 {dimension_numbers = #tpu.dot_dimension_numbers<[1], [0], [0], [1], [0, 0, 1, 1], [], []>} : vector<48x256xbf16>, vector<256x768xbf16>, vector<48x768xf32> -> vector<48x768xf32>
    %c1_139 = arith.constant 1 : index
    %c0_140 = arith.constant 0 : index
    %c0_141 = arith.constant 0 : index
    %394 = vector.load %arg5[%c1_139, %c0_140, %c0_141] : memref<2x1x768xf32, #tpu.memory_space<vmem>>, vector<1x1x768xf32>
    %395 = vector.shape_cast %394 : vector<1x1x768xf32> to vector<1x768xf32>
    %396 = vector.broadcast %395 : vector<1x768xf32> to vector<48x768xf32>
    %397 = arith.addf %393, %396 : vector<48x768xf32>
    %c0_142 = arith.constant 0 : index
    %c0_143 = arith.constant 0 : index
    %c0_144 = arith.constant 0 : index
    %398 = vector.load %arg1[%c0_142, %c0_143, %c0_144] : memref<6x8x8xf32, #tpu.memory_space<vmem>>, vector<1x8x8xf32>
    %399 = vector.shape_cast %398 : vector<1x8x8xf32> to vector<8x8xf32>
    %400 = vector.extract_strided_slice %397 {offsets = [0, 0], sizes = [8, 128], strides = [1, 1]} : vector<48x768xf32> to vector<8x128xf32>
    %401 = vector.extract_strided_slice %397 {offsets = [0, 256], sizes = [8, 128], strides = [1, 1]} : vector<48x768xf32> to vector<8x128xf32>
    %402 = vector.extract_strided_slice %397 {offsets = [0, 512], sizes = [8, 128], strides = [1, 1]} : vector<48x768xf32> to vector<8x128xf32>
    %403 = arith.truncf %400 : vector<8x128xf32> to vector<8x128xbf16>
    %404 = arith.truncf %401 : vector<8x128xf32> to vector<8x128xbf16>
    %cst_145 = arith.constant dense<0.000000e+00> : vector<8x8xf32>
    %405 = tpu.matmul %403, %404, %cst_145 {dimension_numbers = #tpu.dot_dimension_numbers<[1], [1], [0], [0], [0, 0, 1, 0], [], []>} : vector<8x128xbf16>, vector<8x128xbf16>, vector<8x8xf32> -> vector<8x8xf32>
    %cst_146 = arith.constant 0.0883883461 : f32
    %406 = vector.broadcast %cst_146 : f32 to vector<8x8xf32>
    %407 = arith.mulf %405, %406 : vector<8x8xf32>
    %408 = arith.addf %407, %399 : vector<8x8xf32>
    %cst_147 = arith.constant dense<0xFF800000> : vector<8xf32>
    %409 = vector.multi_reduction <maximumf>, %408, %cst_147 [1] : vector<8x8xf32> to vector<8xf32>
    %410 = vector.shape_cast %409 : vector<8xf32> to vector<8x1xf32>
    %411 = vector.broadcast %410 : vector<8x1xf32> to vector<8x8xf32>
    %412 = arith.subf %408, %411 : vector<8x8xf32>
    %413 = math.exp %412 : vector<8x8xf32>
    %cst_148 = arith.constant dense<0.000000e+00> : vector<8xf32>
    %414 = vector.multi_reduction <add>, %413, %cst_148 [1] : vector<8x8xf32> to vector<8xf32>
    %415 = vector.shape_cast %414 : vector<8xf32> to vector<8x1xf32>
    %416 = vector.broadcast %415 : vector<8x1xf32> to vector<8x8xf32>
    %417 = arith.divf %413, %416 : vector<8x8xf32>
    %418 = arith.truncf %417 : vector<8x8xf32> to vector<8x8xbf16>
    %419 = arith.truncf %402 : vector<8x128xf32> to vector<8x128xbf16>
    %cst_149 = arith.constant dense<0.000000e+00> : vector<8x128xf32>
    %420 = tpu.matmul %418, %419, %cst_149 {dimension_numbers = #tpu.dot_dimension_numbers<[1], [0], [0], [1], [0, 0, 1, 1], [], []>} : vector<8x8xbf16>, vector<8x128xbf16>, vector<8x128xf32> -> vector<8x128xf32>
    %421 = vector.extract_strided_slice %397 {offsets = [0, 128], sizes = [8, 128], strides = [1, 1]} : vector<48x768xf32> to vector<8x128xf32>
    %422 = vector.extract_strided_slice %397 {offsets = [0, 384], sizes = [8, 128], strides = [1, 1]} : vector<48x768xf32> to vector<8x128xf32>
    %423 = vector.extract_strided_slice %397 {offsets = [0, 640], sizes = [8, 128], strides = [1, 1]} : vector<48x768xf32> to vector<8x128xf32>
    %424 = arith.truncf %421 : vector<8x128xf32> to vector<8x128xbf16>
    %425 = arith.truncf %422 : vector<8x128xf32> to vector<8x128xbf16>
    %cst_150 = arith.constant dense<0.000000e+00> : vector<8x8xf32>
    %426 = tpu.matmul %424, %425, %cst_150 {dimension_numbers = #tpu.dot_dimension_numbers<[1], [1], [0], [0], [0, 0, 1, 0], [], []>} : vector<8x128xbf16>, vector<8x128xbf16>, vector<8x8xf32> -> vector<8x8xf32>
    %cst_151 = arith.constant 0.0883883461 : f32
    %427 = vector.broadcast %cst_151 : f32 to vector<8x8xf32>
    %428 = arith.mulf %426, %427 : vector<8x8xf32>
    %429 = arith.addf %428, %399 : vector<8x8xf32>
    %cst_152 = arith.constant dense<0xFF800000> : vector<8xf32>
    %430 = vector.multi_reduction <maximumf>, %429, %cst_152 [1] : vector<8x8xf32> to vector<8xf32>
    %431 = vector.shape_cast %430 : vector<8xf32> to vector<8x1xf32>
    %432 = vector.broadcast %431 : vector<8x1xf32> to vector<8x8xf32>
    %433 = arith.subf %429, %432 : vector<8x8xf32>
    %434 = math.exp %433 : vector<8x8xf32>
    %cst_153 = arith.constant dense<0.000000e+00> : vector<8xf32>
    %435 = vector.multi_reduction <add>, %434, %cst_153 [1] : vector<8x8xf32> to vector<8xf32>
    %436 = vector.shape_cast %435 : vector<8xf32> to vector<8x1xf32>
    %437 = vector.broadcast %436 : vector<8x1xf32> to vector<8x8xf32>
    %438 = arith.divf %434, %437 : vector<8x8xf32>
    %439 = arith.truncf %438 : vector<8x8xf32> to vector<8x8xbf16>
    %440 = arith.truncf %423 : vector<8x128xf32> to vector<8x128xbf16>
    %cst_154 = arith.constant dense<0.000000e+00> : vector<8x128xf32>
    %441 = tpu.matmul %439, %440, %cst_154 {dimension_numbers = #tpu.dot_dimension_numbers<[1], [0], [0], [1], [0, 0, 1, 1], [], []>} : vector<8x8xbf16>, vector<8x128xbf16>, vector<8x128xf32> -> vector<8x128xf32>
    %442 = tpu.concatenate %420, %441 in 1 : vector<8x128xf32>, vector<8x128xf32> -> vector<8x256xf32>
    %c1_155 = arith.constant 1 : index
    %c0_156 = arith.constant 0 : index
    %c0_157 = arith.constant 0 : index
    %443 = vector.load %arg1[%c1_155, %c0_156, %c0_157] : memref<6x8x8xf32, #tpu.memory_space<vmem>>, vector<1x8x8xf32>
    %444 = vector.shape_cast %443 : vector<1x8x8xf32> to vector<8x8xf32>
    %445 = vector.extract_strided_slice %397 {offsets = [8, 0], sizes = [8, 128], strides = [1, 1]} : vector<48x768xf32> to vector<8x128xf32>
    %446 = vector.extract_strided_slice %397 {offsets = [8, 256], sizes = [8, 128], strides = [1, 1]} : vector<48x768xf32> to vector<8x128xf32>
    %447 = vector.extract_strided_slice %397 {offsets = [8, 512], sizes = [8, 128], strides = [1, 1]} : vector<48x768xf32> to vector<8x128xf32>
    %448 = arith.truncf %445 : vector<8x128xf32> to vector<8x128xbf16>
    %449 = arith.truncf %446 : vector<8x128xf32> to vector<8x128xbf16>
    %cst_158 = arith.constant dense<0.000000e+00> : vector<8x8xf32>
    %450 = tpu.matmul %448, %449, %cst_158 {dimension_numbers = #tpu.dot_dimension_numbers<[1], [1], [0], [0], [0, 0, 1, 0], [], []>} : vector<8x128xbf16>, vector<8x128xbf16>, vector<8x8xf32> -> vector<8x8xf32>
    %cst_159 = arith.constant 0.0883883461 : f32
    %451 = vector.broadcast %cst_159 : f32 to vector<8x8xf32>
    %452 = arith.mulf %450, %451 : vector<8x8xf32>
    %453 = arith.addf %452, %444 : vector<8x8xf32>
    %cst_160 = arith.constant dense<0xFF800000> : vector<8xf32>
    %454 = vector.multi_reduction <maximumf>, %453, %cst_160 [1] : vector<8x8xf32> to vector<8xf32>
    %455 = vector.shape_cast %454 : vector<8xf32> to vector<8x1xf32>
    %456 = vector.broadcast %455 : vector<8x1xf32> to vector<8x8xf32>
    %457 = arith.subf %453, %456 : vector<8x8xf32>
    %458 = math.exp %457 : vector<8x8xf32>
    %cst_161 = arith.constant dense<0.000000e+00> : vector<8xf32>
    %459 = vector.multi_reduction <add>, %458, %cst_161 [1] : vector<8x8xf32> to vector<8xf32>
    %460 = vector.shape_cast %459 : vector<8xf32> to vector<8x1xf32>
    %461 = vector.broadcast %460 : vector<8x1xf32> to vector<8x8xf32>
    %462 = arith.divf %458, %461 : vector<8x8xf32>
    %463 = arith.truncf %462 : vector<8x8xf32> to vector<8x8xbf16>
    %464 = arith.truncf %447 : vector<8x128xf32> to vector<8x128xbf16>
    %cst_162 = arith.constant dense<0.000000e+00> : vector<8x128xf32>
    %465 = tpu.matmul %463, %464, %cst_162 {dimension_numbers = #tpu.dot_dimension_numbers<[1], [0], [0], [1], [0, 0, 1, 1], [], []>} : vector<8x8xbf16>, vector<8x128xbf16>, vector<8x128xf32> -> vector<8x128xf32>
    %466 = vector.extract_strided_slice %397 {offsets = [8, 128], sizes = [8, 128], strides = [1, 1]} : vector<48x768xf32> to vector<8x128xf32>
    %467 = vector.extract_strided_slice %397 {offsets = [8, 384], sizes = [8, 128], strides = [1, 1]} : vector<48x768xf32> to vector<8x128xf32>
    %468 = vector.extract_strided_slice %397 {offsets = [8, 640], sizes = [8, 128], strides = [1, 1]} : vector<48x768xf32> to vector<8x128xf32>
    %469 = arith.truncf %466 : vector<8x128xf32> to vector<8x128xbf16>
    %470 = arith.truncf %467 : vector<8x128xf32> to vector<8x128xbf16>
    %cst_163 = arith.constant dense<0.000000e+00> : vector<8x8xf32>
    %471 = tpu.matmul %469, %470, %cst_163 {dimension_numbers = #tpu.dot_dimension_numbers<[1], [1], [0], [0], [0, 0, 1, 0], [], []>} : vector<8x128xbf16>, vector<8x128xbf16>, vector<8x8xf32> -> vector<8x8xf32>
    %cst_164 = arith.constant 0.0883883461 : f32
    %472 = vector.broadcast %cst_164 : f32 to vector<8x8xf32>
    %473 = arith.mulf %471, %472 : vector<8x8xf32>
    %474 = arith.addf %473, %444 : vector<8x8xf32>
    %cst_165 = arith.constant dense<0xFF800000> : vector<8xf32>
    %475 = vector.multi_reduction <maximumf>, %474, %cst_165 [1] : vector<8x8xf32> to vector<8xf32>
    %476 = vector.shape_cast %475 : vector<8xf32> to vector<8x1xf32>
    %477 = vector.broadcast %476 : vector<8x1xf32> to vector<8x8xf32>
    %478 = arith.subf %474, %477 : vector<8x8xf32>
    %479 = math.exp %478 : vector<8x8xf32>
    %cst_166 = arith.constant dense<0.000000e+00> : vector<8xf32>
    %480 = vector.multi_reduction <add>, %479, %cst_166 [1] : vector<8x8xf32> to vector<8xf32>
    %481 = vector.shape_cast %480 : vector<8xf32> to vector<8x1xf32>
    %482 = vector.broadcast %481 : vector<8x1xf32> to vector<8x8xf32>
    %483 = arith.divf %479, %482 : vector<8x8xf32>
    %484 = arith.truncf %483 : vector<8x8xf32> to vector<8x8xbf16>
    %485 = arith.truncf %468 : vector<8x128xf32> to vector<8x128xbf16>
    %cst_167 = arith.constant dense<0.000000e+00> : vector<8x128xf32>
    %486 = tpu.matmul %484, %485, %cst_167 {dimension_numbers = #tpu.dot_dimension_numbers<[1], [0], [0], [1], [0, 0, 1, 1], [], []>} : vector<8x8xbf16>, vector<8x128xbf16>, vector<8x128xf32> -> vector<8x128xf32>
    %487 = tpu.concatenate %465, %486 in 1 : vector<8x128xf32>, vector<8x128xf32> -> vector<8x256xf32>
    %c2_168 = arith.constant 2 : index
    %c0_169 = arith.constant 0 : index
    %c0_170 = arith.constant 0 : index
    %488 = vector.load %arg1[%c2_168, %c0_169, %c0_170] : memref<6x8x8xf32, #tpu.memory_space<vmem>>, vector<1x8x8xf32>
    %489 = vector.shape_cast %488 : vector<1x8x8xf32> to vector<8x8xf32>
    %490 = vector.extract_strided_slice %397 {offsets = [16, 0], sizes = [8, 128], strides = [1, 1]} : vector<48x768xf32> to vector<8x128xf32>
    %491 = vector.extract_strided_slice %397 {offsets = [16, 256], sizes = [8, 128], strides = [1, 1]} : vector<48x768xf32> to vector<8x128xf32>
    %492 = vector.extract_strided_slice %397 {offsets = [16, 512], sizes = [8, 128], strides = [1, 1]} : vector<48x768xf32> to vector<8x128xf32>
    %493 = arith.truncf %490 : vector<8x128xf32> to vector<8x128xbf16>
    %494 = arith.truncf %491 : vector<8x128xf32> to vector<8x128xbf16>
    %cst_171 = arith.constant dense<0.000000e+00> : vector<8x8xf32>
    %495 = tpu.matmul %493, %494, %cst_171 {dimension_numbers = #tpu.dot_dimension_numbers<[1], [1], [0], [0], [0, 0, 1, 0], [], []>} : vector<8x128xbf16>, vector<8x128xbf16>, vector<8x8xf32> -> vector<8x8xf32>
    %cst_172 = arith.constant 0.0883883461 : f32
    %496 = vector.broadcast %cst_172 : f32 to vector<8x8xf32>
    %497 = arith.mulf %495, %496 : vector<8x8xf32>
    %498 = arith.addf %497, %489 : vector<8x8xf32>
    %cst_173 = arith.constant dense<0xFF800000> : vector<8xf32>
    %499 = vector.multi_reduction <maximumf>, %498, %cst_173 [1] : vector<8x8xf32> to vector<8xf32>
    %500 = vector.shape_cast %499 : vector<8xf32> to vector<8x1xf32>
    %501 = vector.broadcast %500 : vector<8x1xf32> to vector<8x8xf32>
    %502 = arith.subf %498, %501 : vector<8x8xf32>
    %503 = math.exp %502 : vector<8x8xf32>
    %cst_174 = arith.constant dense<0.000000e+00> : vector<8xf32>
    %504 = vector.multi_reduction <add>, %503, %cst_174 [1] : vector<8x8xf32> to vector<8xf32>
    %505 = vector.shape_cast %504 : vector<8xf32> to vector<8x1xf32>
    %506 = vector.broadcast %505 : vector<8x1xf32> to vector<8x8xf32>
    %507 = arith.divf %503, %506 : vector<8x8xf32>
    %508 = arith.truncf %507 : vector<8x8xf32> to vector<8x8xbf16>
    %509 = arith.truncf %492 : vector<8x128xf32> to vector<8x128xbf16>
    %cst_175 = arith.constant dense<0.000000e+00> : vector<8x128xf32>
    %510 = tpu.matmul %508, %509, %cst_175 {dimension_numbers = #tpu.dot_dimension_numbers<[1], [0], [0], [1], [0, 0, 1, 1], [], []>} : vector<8x8xbf16>, vector<8x128xbf16>, vector<8x128xf32> -> vector<8x128xf32>
    %511 = vector.extract_strided_slice %397 {offsets = [16, 128], sizes = [8, 128], strides = [1, 1]} : vector<48x768xf32> to vector<8x128xf32>
    %512 = vector.extract_strided_slice %397 {offsets = [16, 384], sizes = [8, 128], strides = [1, 1]} : vector<48x768xf32> to vector<8x128xf32>
    %513 = vector.extract_strided_slice %397 {offsets = [16, 640], sizes = [8, 128], strides = [1, 1]} : vector<48x768xf32> to vector<8x128xf32>
    %514 = arith.truncf %511 : vector<8x128xf32> to vector<8x128xbf16>
    %515 = arith.truncf %512 : vector<8x128xf32> to vector<8x128xbf16>
    %cst_176 = arith.constant dense<0.000000e+00> : vector<8x8xf32>
    %516 = tpu.matmul %514, %515, %cst_176 {dimension_numbers = #tpu.dot_dimension_numbers<[1], [1], [0], [0], [0, 0, 1, 0], [], []>} : vector<8x128xbf16>, vector<8x128xbf16>, vector<8x8xf32> -> vector<8x8xf32>
    %cst_177 = arith.constant 0.0883883461 : f32
    %517 = vector.broadcast %cst_177 : f32 to vector<8x8xf32>
    %518 = arith.mulf %516, %517 : vector<8x8xf32>
    %519 = arith.addf %518, %489 : vector<8x8xf32>
    %cst_178 = arith.constant dense<0xFF800000> : vector<8xf32>
    %520 = vector.multi_reduction <maximumf>, %519, %cst_178 [1] : vector<8x8xf32> to vector<8xf32>
    %521 = vector.shape_cast %520 : vector<8xf32> to vector<8x1xf32>
    %522 = vector.broadcast %521 : vector<8x1xf32> to vector<8x8xf32>
    %523 = arith.subf %519, %522 : vector<8x8xf32>
    %524 = math.exp %523 : vector<8x8xf32>
    %cst_179 = arith.constant dense<0.000000e+00> : vector<8xf32>
    %525 = vector.multi_reduction <add>, %524, %cst_179 [1] : vector<8x8xf32> to vector<8xf32>
    %526 = vector.shape_cast %525 : vector<8xf32> to vector<8x1xf32>
    %527 = vector.broadcast %526 : vector<8x1xf32> to vector<8x8xf32>
    %528 = arith.divf %524, %527 : vector<8x8xf32>
    %529 = arith.truncf %528 : vector<8x8xf32> to vector<8x8xbf16>
    %530 = arith.truncf %513 : vector<8x128xf32> to vector<8x128xbf16>
    %cst_180 = arith.constant dense<0.000000e+00> : vector<8x128xf32>
    %531 = tpu.matmul %529, %530, %cst_180 {dimension_numbers = #tpu.dot_dimension_numbers<[1], [0], [0], [1], [0, 0, 1, 1], [], []>} : vector<8x8xbf16>, vector<8x128xbf16>, vector<8x128xf32> -> vector<8x128xf32>
    %532 = tpu.concatenate %510, %531 in 1 : vector<8x128xf32>, vector<8x128xf32> -> vector<8x256xf32>
    %c3_181 = arith.constant 3 : index
    %c0_182 = arith.constant 0 : index
    %c0_183 = arith.constant 0 : index
    %533 = vector.load %arg1[%c3_181, %c0_182, %c0_183] : memref<6x8x8xf32, #tpu.memory_space<vmem>>, vector<1x8x8xf32>
    %534 = vector.shape_cast %533 : vector<1x8x8xf32> to vector<8x8xf32>
    %535 = vector.extract_strided_slice %397 {offsets = [24, 0], sizes = [8, 128], strides = [1, 1]} : vector<48x768xf32> to vector<8x128xf32>
    %536 = vector.extract_strided_slice %397 {offsets = [24, 256], sizes = [8, 128], strides = [1, 1]} : vector<48x768xf32> to vector<8x128xf32>
    %537 = vector.extract_strided_slice %397 {offsets = [24, 512], sizes = [8, 128], strides = [1, 1]} : vector<48x768xf32> to vector<8x128xf32>
    %538 = arith.truncf %535 : vector<8x128xf32> to vector<8x128xbf16>
    %539 = arith.truncf %536 : vector<8x128xf32> to vector<8x128xbf16>
    %cst_184 = arith.constant dense<0.000000e+00> : vector<8x8xf32>
    %540 = tpu.matmul %538, %539, %cst_184 {dimension_numbers = #tpu.dot_dimension_numbers<[1], [1], [0], [0], [0, 0, 1, 0], [], []>} : vector<8x128xbf16>, vector<8x128xbf16>, vector<8x8xf32> -> vector<8x8xf32>
    %cst_185 = arith.constant 0.0883883461 : f32
    %541 = vector.broadcast %cst_185 : f32 to vector<8x8xf32>
    %542 = arith.mulf %540, %541 : vector<8x8xf32>
    %543 = arith.addf %542, %534 : vector<8x8xf32>
    %cst_186 = arith.constant dense<0xFF800000> : vector<8xf32>
    %544 = vector.multi_reduction <maximumf>, %543, %cst_186 [1] : vector<8x8xf32> to vector<8xf32>
    %545 = vector.shape_cast %544 : vector<8xf32> to vector<8x1xf32>
    %546 = vector.broadcast %545 : vector<8x1xf32> to vector<8x8xf32>
    %547 = arith.subf %543, %546 : vector<8x8xf32>
    %548 = math.exp %547 : vector<8x8xf32>
    %cst_187 = arith.constant dense<0.000000e+00> : vector<8xf32>
    %549 = vector.multi_reduction <add>, %548, %cst_187 [1] : vector<8x8xf32> to vector<8xf32>
    %550 = vector.shape_cast %549 : vector<8xf32> to vector<8x1xf32>
    %551 = vector.broadcast %550 : vector<8x1xf32> to vector<8x8xf32>
    %552 = arith.divf %548, %551 : vector<8x8xf32>
    %553 = arith.truncf %552 : vector<8x8xf32> to vector<8x8xbf16>
    %554 = arith.truncf %537 : vector<8x128xf32> to vector<8x128xbf16>
    %cst_188 = arith.constant dense<0.000000e+00> : vector<8x128xf32>
    %555 = tpu.matmul %553, %554, %cst_188 {dimension_numbers = #tpu.dot_dimension_numbers<[1], [0], [0], [1], [0, 0, 1, 1], [], []>} : vector<8x8xbf16>, vector<8x128xbf16>, vector<8x128xf32> -> vector<8x128xf32>
    %556 = vector.extract_strided_slice %397 {offsets = [24, 128], sizes = [8, 128], strides = [1, 1]} : vector<48x768xf32> to vector<8x128xf32>
    %557 = vector.extract_strided_slice %397 {offsets = [24, 384], sizes = [8, 128], strides = [1, 1]} : vector<48x768xf32> to vector<8x128xf32>
    %558 = vector.extract_strided_slice %397 {offsets = [24, 640], sizes = [8, 128], strides = [1, 1]} : vector<48x768xf32> to vector<8x128xf32>
    %559 = arith.truncf %556 : vector<8x128xf32> to vector<8x128xbf16>
    %560 = arith.truncf %557 : vector<8x128xf32> to vector<8x128xbf16>
    %cst_189 = arith.constant dense<0.000000e+00> : vector<8x8xf32>
    %561 = tpu.matmul %559, %560, %cst_189 {dimension_numbers = #tpu.dot_dimension_numbers<[1], [1], [0], [0], [0, 0, 1, 0], [], []>} : vector<8x128xbf16>, vector<8x128xbf16>, vector<8x8xf32> -> vector<8x8xf32>
    %cst_190 = arith.constant 0.0883883461 : f32
    %562 = vector.broadcast %cst_190 : f32 to vector<8x8xf32>
    %563 = arith.mulf %561, %562 : vector<8x8xf32>
    %564 = arith.addf %563, %534 : vector<8x8xf32>
    %cst_191 = arith.constant dense<0xFF800000> : vector<8xf32>
    %565 = vector.multi_reduction <maximumf>, %564, %cst_191 [1] : vector<8x8xf32> to vector<8xf32>
    %566 = vector.shape_cast %565 : vector<8xf32> to vector<8x1xf32>
    %567 = vector.broadcast %566 : vector<8x1xf32> to vector<8x8xf32>
    %568 = arith.subf %564, %567 : vector<8x8xf32>
    %569 = math.exp %568 : vector<8x8xf32>
    %cst_192 = arith.constant dense<0.000000e+00> : vector<8xf32>
    %570 = vector.multi_reduction <add>, %569, %cst_192 [1] : vector<8x8xf32> to vector<8xf32>
    %571 = vector.shape_cast %570 : vector<8xf32> to vector<8x1xf32>
    %572 = vector.broadcast %571 : vector<8x1xf32> to vector<8x8xf32>
    %573 = arith.divf %569, %572 : vector<8x8xf32>
    %574 = arith.truncf %573 : vector<8x8xf32> to vector<8x8xbf16>
    %575 = arith.truncf %558 : vector<8x128xf32> to vector<8x128xbf16>
    %cst_193 = arith.constant dense<0.000000e+00> : vector<8x128xf32>
    %576 = tpu.matmul %574, %575, %cst_193 {dimension_numbers = #tpu.dot_dimension_numbers<[1], [0], [0], [1], [0, 0, 1, 1], [], []>} : vector<8x8xbf16>, vector<8x128xbf16>, vector<8x128xf32> -> vector<8x128xf32>
    %577 = tpu.concatenate %555, %576 in 1 : vector<8x128xf32>, vector<8x128xf32> -> vector<8x256xf32>
    %c4_194 = arith.constant 4 : index
    %c0_195 = arith.constant 0 : index
    %c0_196 = arith.constant 0 : index
    %578 = vector.load %arg1[%c4_194, %c0_195, %c0_196] : memref<6x8x8xf32, #tpu.memory_space<vmem>>, vector<1x8x8xf32>
    %579 = vector.shape_cast %578 : vector<1x8x8xf32> to vector<8x8xf32>
    %580 = vector.extract_strided_slice %397 {offsets = [32, 0], sizes = [8, 128], strides = [1, 1]} : vector<48x768xf32> to vector<8x128xf32>
    %581 = vector.extract_strided_slice %397 {offsets = [32, 256], sizes = [8, 128], strides = [1, 1]} : vector<48x768xf32> to vector<8x128xf32>
    %582 = vector.extract_strided_slice %397 {offsets = [32, 512], sizes = [8, 128], strides = [1, 1]} : vector<48x768xf32> to vector<8x128xf32>
    %583 = arith.truncf %580 : vector<8x128xf32> to vector<8x128xbf16>
    %584 = arith.truncf %581 : vector<8x128xf32> to vector<8x128xbf16>
    %cst_197 = arith.constant dense<0.000000e+00> : vector<8x8xf32>
    %585 = tpu.matmul %583, %584, %cst_197 {dimension_numbers = #tpu.dot_dimension_numbers<[1], [1], [0], [0], [0, 0, 1, 0], [], []>} : vector<8x128xbf16>, vector<8x128xbf16>, vector<8x8xf32> -> vector<8x8xf32>
    %cst_198 = arith.constant 0.0883883461 : f32
    %586 = vector.broadcast %cst_198 : f32 to vector<8x8xf32>
    %587 = arith.mulf %585, %586 : vector<8x8xf32>
    %588 = arith.addf %587, %579 : vector<8x8xf32>
    %cst_199 = arith.constant dense<0xFF800000> : vector<8xf32>
    %589 = vector.multi_reduction <maximumf>, %588, %cst_199 [1] : vector<8x8xf32> to vector<8xf32>
    %590 = vector.shape_cast %589 : vector<8xf32> to vector<8x1xf32>
    %591 = vector.broadcast %590 : vector<8x1xf32> to vector<8x8xf32>
    %592 = arith.subf %588, %591 : vector<8x8xf32>
    %593 = math.exp %592 : vector<8x8xf32>
    %cst_200 = arith.constant dense<0.000000e+00> : vector<8xf32>
    %594 = vector.multi_reduction <add>, %593, %cst_200 [1] : vector<8x8xf32> to vector<8xf32>
    %595 = vector.shape_cast %594 : vector<8xf32> to vector<8x1xf32>
    %596 = vector.broadcast %595 : vector<8x1xf32> to vector<8x8xf32>
    %597 = arith.divf %593, %596 : vector<8x8xf32>
    %598 = arith.truncf %597 : vector<8x8xf32> to vector<8x8xbf16>
    %599 = arith.truncf %582 : vector<8x128xf32> to vector<8x128xbf16>
    %cst_201 = arith.constant dense<0.000000e+00> : vector<8x128xf32>
    %600 = tpu.matmul %598, %599, %cst_201 {dimension_numbers = #tpu.dot_dimension_numbers<[1], [0], [0], [1], [0, 0, 1, 1], [], []>} : vector<8x8xbf16>, vector<8x128xbf16>, vector<8x128xf32> -> vector<8x128xf32>
    %601 = vector.extract_strided_slice %397 {offsets = [32, 128], sizes = [8, 128], strides = [1, 1]} : vector<48x768xf32> to vector<8x128xf32>
    %602 = vector.extract_strided_slice %397 {offsets = [32, 384], sizes = [8, 128], strides = [1, 1]} : vector<48x768xf32> to vector<8x128xf32>
    %603 = vector.extract_strided_slice %397 {offsets = [32, 640], sizes = [8, 128], strides = [1, 1]} : vector<48x768xf32> to vector<8x128xf32>
    %604 = arith.truncf %601 : vector<8x128xf32> to vector<8x128xbf16>
    %605 = arith.truncf %602 : vector<8x128xf32> to vector<8x128xbf16>
    %cst_202 = arith.constant dense<0.000000e+00> : vector<8x8xf32>
    %606 = tpu.matmul %604, %605, %cst_202 {dimension_numbers = #tpu.dot_dimension_numbers<[1], [1], [0], [0], [0, 0, 1, 0], [], []>} : vector<8x128xbf16>, vector<8x128xbf16>, vector<8x8xf32> -> vector<8x8xf32>
    %cst_203 = arith.constant 0.0883883461 : f32
    %607 = vector.broadcast %cst_203 : f32 to vector<8x8xf32>
    %608 = arith.mulf %606, %607 : vector<8x8xf32>
    %609 = arith.addf %608, %579 : vector<8x8xf32>
    %cst_204 = arith.constant dense<0xFF800000> : vector<8xf32>
    %610 = vector.multi_reduction <maximumf>, %609, %cst_204 [1] : vector<8x8xf32> to vector<8xf32>
    %611 = vector.shape_cast %610 : vector<8xf32> to vector<8x1xf32>
    %612 = vector.broadcast %611 : vector<8x1xf32> to vector<8x8xf32>
    %613 = arith.subf %609, %612 : vector<8x8xf32>
    %614 = math.exp %613 : vector<8x8xf32>
    %cst_205 = arith.constant dense<0.000000e+00> : vector<8xf32>
    %615 = vector.multi_reduction <add>, %614, %cst_205 [1] : vector<8x8xf32> to vector<8xf32>
    %616 = vector.shape_cast %615 : vector<8xf32> to vector<8x1xf32>
    %617 = vector.broadcast %616 : vector<8x1xf32> to vector<8x8xf32>
    %618 = arith.divf %614, %617 : vector<8x8xf32>
    %619 = arith.truncf %618 : vector<8x8xf32> to vector<8x8xbf16>
    %620 = arith.truncf %603 : vector<8x128xf32> to vector<8x128xbf16>
    %cst_206 = arith.constant dense<0.000000e+00> : vector<8x128xf32>
    %621 = tpu.matmul %619, %620, %cst_206 {dimension_numbers = #tpu.dot_dimension_numbers<[1], [0], [0], [1], [0, 0, 1, 1], [], []>} : vector<8x8xbf16>, vector<8x128xbf16>, vector<8x128xf32> -> vector<8x128xf32>
    %622 = tpu.concatenate %600, %621 in 1 : vector<8x128xf32>, vector<8x128xf32> -> vector<8x256xf32>
    %c5_207 = arith.constant 5 : index
    %c0_208 = arith.constant 0 : index
    %c0_209 = arith.constant 0 : index
    %623 = vector.load %arg1[%c5_207, %c0_208, %c0_209] : memref<6x8x8xf32, #tpu.memory_space<vmem>>, vector<1x8x8xf32>
    %624 = vector.shape_cast %623 : vector<1x8x8xf32> to vector<8x8xf32>
    %625 = vector.extract_strided_slice %397 {offsets = [40, 0], sizes = [8, 128], strides = [1, 1]} : vector<48x768xf32> to vector<8x128xf32>
    %626 = vector.extract_strided_slice %397 {offsets = [40, 256], sizes = [8, 128], strides = [1, 1]} : vector<48x768xf32> to vector<8x128xf32>
    %627 = vector.extract_strided_slice %397 {offsets = [40, 512], sizes = [8, 128], strides = [1, 1]} : vector<48x768xf32> to vector<8x128xf32>
    %628 = arith.truncf %625 : vector<8x128xf32> to vector<8x128xbf16>
    %629 = arith.truncf %626 : vector<8x128xf32> to vector<8x128xbf16>
    %cst_210 = arith.constant dense<0.000000e+00> : vector<8x8xf32>
    %630 = tpu.matmul %628, %629, %cst_210 {dimension_numbers = #tpu.dot_dimension_numbers<[1], [1], [0], [0], [0, 0, 1, 0], [], []>} : vector<8x128xbf16>, vector<8x128xbf16>, vector<8x8xf32> -> vector<8x8xf32>
    %cst_211 = arith.constant 0.0883883461 : f32
    %631 = vector.broadcast %cst_211 : f32 to vector<8x8xf32>
    %632 = arith.mulf %630, %631 : vector<8x8xf32>
    %633 = arith.addf %632, %624 : vector<8x8xf32>
    %cst_212 = arith.constant dense<0xFF800000> : vector<8xf32>
    %634 = vector.multi_reduction <maximumf>, %633, %cst_212 [1] : vector<8x8xf32> to vector<8xf32>
    %635 = vector.shape_cast %634 : vector<8xf32> to vector<8x1xf32>
    %636 = vector.broadcast %635 : vector<8x1xf32> to vector<8x8xf32>
    %637 = arith.subf %633, %636 : vector<8x8xf32>
    %638 = math.exp %637 : vector<8x8xf32>
    %cst_213 = arith.constant dense<0.000000e+00> : vector<8xf32>
    %639 = vector.multi_reduction <add>, %638, %cst_213 [1] : vector<8x8xf32> to vector<8xf32>
    %640 = vector.shape_cast %639 : vector<8xf32> to vector<8x1xf32>
    %641 = vector.broadcast %640 : vector<8x1xf32> to vector<8x8xf32>
    %642 = arith.divf %638, %641 : vector<8x8xf32>
    %643 = arith.truncf %642 : vector<8x8xf32> to vector<8x8xbf16>
    %644 = arith.truncf %627 : vector<8x128xf32> to vector<8x128xbf16>
    %cst_214 = arith.constant dense<0.000000e+00> : vector<8x128xf32>
    %645 = tpu.matmul %643, %644, %cst_214 {dimension_numbers = #tpu.dot_dimension_numbers<[1], [0], [0], [1], [0, 0, 1, 1], [], []>} : vector<8x8xbf16>, vector<8x128xbf16>, vector<8x128xf32> -> vector<8x128xf32>
    %646 = vector.extract_strided_slice %397 {offsets = [40, 128], sizes = [8, 128], strides = [1, 1]} : vector<48x768xf32> to vector<8x128xf32>
    %647 = vector.extract_strided_slice %397 {offsets = [40, 384], sizes = [8, 128], strides = [1, 1]} : vector<48x768xf32> to vector<8x128xf32>
    %648 = vector.extract_strided_slice %397 {offsets = [40, 640], sizes = [8, 128], strides = [1, 1]} : vector<48x768xf32> to vector<8x128xf32>
    %649 = arith.truncf %646 : vector<8x128xf32> to vector<8x128xbf16>
    %650 = arith.truncf %647 : vector<8x128xf32> to vector<8x128xbf16>
    %cst_215 = arith.constant dense<0.000000e+00> : vector<8x8xf32>
    %651 = tpu.matmul %649, %650, %cst_215 {dimension_numbers = #tpu.dot_dimension_numbers<[1], [1], [0], [0], [0, 0, 1, 0], [], []>} : vector<8x128xbf16>, vector<8x128xbf16>, vector<8x8xf32> -> vector<8x8xf32>
    %cst_216 = arith.constant 0.0883883461 : f32
    %652 = vector.broadcast %cst_216 : f32 to vector<8x8xf32>
    %653 = arith.mulf %651, %652 : vector<8x8xf32>
    %654 = arith.addf %653, %624 : vector<8x8xf32>
    %cst_217 = arith.constant dense<0xFF800000> : vector<8xf32>
    %655 = vector.multi_reduction <maximumf>, %654, %cst_217 [1] : vector<8x8xf32> to vector<8xf32>
    %656 = vector.shape_cast %655 : vector<8xf32> to vector<8x1xf32>
    %657 = vector.broadcast %656 : vector<8x1xf32> to vector<8x8xf32>
    %658 = arith.subf %654, %657 : vector<8x8xf32>
    %659 = math.exp %658 : vector<8x8xf32>
    %cst_218 = arith.constant dense<0.000000e+00> : vector<8xf32>
    %660 = vector.multi_reduction <add>, %659, %cst_218 [1] : vector<8x8xf32> to vector<8xf32>
    %661 = vector.shape_cast %660 : vector<8xf32> to vector<8x1xf32>
    %662 = vector.broadcast %661 : vector<8x1xf32> to vector<8x8xf32>
    %663 = arith.divf %659, %662 : vector<8x8xf32>
    %664 = arith.truncf %663 : vector<8x8xf32> to vector<8x8xbf16>
    %665 = arith.truncf %648 : vector<8x128xf32> to vector<8x128xbf16>
    %cst_219 = arith.constant dense<0.000000e+00> : vector<8x128xf32>
    %666 = tpu.matmul %664, %665, %cst_219 {dimension_numbers = #tpu.dot_dimension_numbers<[1], [0], [0], [1], [0, 0, 1, 1], [], []>} : vector<8x8xbf16>, vector<8x128xbf16>, vector<8x128xf32> -> vector<8x128xf32>
    %667 = tpu.concatenate %645, %666 in 1 : vector<8x128xf32>, vector<8x128xf32> -> vector<8x256xf32>
    %668 = tpu.concatenate %442, %487, %532, %577, %622, %667 in 0 : vector<8x256xf32>, vector<8x256xf32>, vector<8x256xf32>, vector<8x256xf32>, vector<8x256xf32>, vector<8x256xf32> -> vector<48x256xf32>
    %c1_220 = arith.constant 1 : index
    %c0_221 = arith.constant 0 : index
    %c0_222 = arith.constant 0 : index
    %669 = vector.load %arg6[%c1_220, %c0_221, %c0_222] : memref<2x256x256xbf16, #tpu.memory_space<vmem>>, vector<1x256x256xbf16>
    %670 = vector.shape_cast %669 : vector<1x256x256xbf16> to vector<256x256xbf16>
    %671 = arith.truncf %668 : vector<48x256xf32> to vector<48x256xbf16>
    %cst_223 = arith.constant dense<0.000000e+00> : vector<48x256xf32>
    %672 = tpu.matmul %671, %670, %cst_223 {dimension_numbers = #tpu.dot_dimension_numbers<[1], [0], [0], [1], [0, 0, 1, 1], [], []>} : vector<48x256xbf16>, vector<256x256xbf16>, vector<48x256xf32> -> vector<48x256xf32>
    %c1_224 = arith.constant 1 : index
    %c0_225 = arith.constant 0 : index
    %c0_226 = arith.constant 0 : index
    %673 = vector.load %arg7[%c1_224, %c0_225, %c0_226] : memref<2x1x256xf32, #tpu.memory_space<vmem>>, vector<1x1x256xf32>
    %674 = vector.shape_cast %673 : vector<1x1x256xf32> to vector<1x256xf32>
    %675 = vector.broadcast %674 : vector<1x256xf32> to vector<48x256xf32>
    %676 = arith.addf %672, %675 : vector<48x256xf32>
    %677 = arith.addf %676, %389 : vector<48x256xf32>
    %c1_227 = arith.constant 1 : index
    %c0_228 = arith.constant 0 : index
    %c0_229 = arith.constant 0 : index
    %678 = vector.load %arg8[%c1_227, %c0_228, %c0_229] : memref<2x1x256xf32, #tpu.memory_space<vmem>>, vector<1x1x256xf32>
    %679 = vector.shape_cast %678 : vector<1x1x256xf32> to vector<1x256xf32>
    %c1_230 = arith.constant 1 : index
    %c0_231 = arith.constant 0 : index
    %c0_232 = arith.constant 0 : index
    %680 = vector.load %arg9[%c1_230, %c0_231, %c0_232] : memref<2x1x256xf32, #tpu.memory_space<vmem>>, vector<1x1x256xf32>
    %681 = vector.shape_cast %680 : vector<1x1x256xf32> to vector<1x256xf32>
    %cst_233 = arith.constant dense<0.000000e+00> : vector<48xf32>
    %682 = vector.multi_reduction <add>, %677, %cst_233 [1] : vector<48x256xf32> to vector<48xf32>
    %683 = vector.shape_cast %682 : vector<48xf32> to vector<48x1xf32>
    %cst_234 = arith.constant 2.560000e+02 : f32
    %684 = vector.broadcast %cst_234 : f32 to vector<48x1xf32>
    %685 = arith.divf %683, %684 : vector<48x1xf32>
    %686 = vector.broadcast %685 : vector<48x1xf32> to vector<48x256xf32>
    %687 = arith.subf %677, %686 : vector<48x256xf32>
    %688 = arith.mulf %687, %687 : vector<48x256xf32>
    %cst_235 = arith.constant dense<0.000000e+00> : vector<48xf32>
    %689 = vector.multi_reduction <add>, %688, %cst_235 [1] : vector<48x256xf32> to vector<48xf32>
    %690 = vector.shape_cast %689 : vector<48xf32> to vector<48x1xf32>
    %cst_236 = arith.constant 2.560000e+02 : f32
    %691 = vector.broadcast %cst_236 : f32 to vector<48x1xf32>
    %692 = arith.divf %690, %691 : vector<48x1xf32>
    %693 = vector.broadcast %685 : vector<48x1xf32> to vector<48x256xf32>
    %694 = arith.subf %677, %693 : vector<48x256xf32>
    %cst_237 = arith.constant 9.99999996E-13 : f32
    %695 = vector.broadcast %cst_237 : f32 to vector<48x1xf32>
    %696 = arith.addf %692, %695 : vector<48x1xf32>
    %697 = math.rsqrt %696 : vector<48x1xf32>
    %698 = vector.broadcast %697 : vector<48x1xf32> to vector<48x256xf32>
    %699 = arith.mulf %694, %698 : vector<48x256xf32>
    %700 = vector.broadcast %679 : vector<1x256xf32> to vector<48x256xf32>
    %701 = arith.mulf %699, %700 : vector<48x256xf32>
    %702 = vector.broadcast %681 : vector<1x256xf32> to vector<48x256xf32>
    %703 = arith.addf %701, %702 : vector<48x256xf32>
    %c1_238 = arith.constant 1 : index
    %c0_239 = arith.constant 0 : index
    %c0_240 = arith.constant 0 : index
    %704 = vector.load %arg10[%c1_238, %c0_239, %c0_240] : memref<2x256x512xbf16, #tpu.memory_space<vmem>>, vector<1x256x512xbf16>
    %705 = vector.shape_cast %704 : vector<1x256x512xbf16> to vector<256x512xbf16>
    %706 = arith.truncf %703 : vector<48x256xf32> to vector<48x256xbf16>
    %cst_241 = arith.constant dense<0.000000e+00> : vector<48x512xf32>
    %707 = tpu.matmul %706, %705, %cst_241 {dimension_numbers = #tpu.dot_dimension_numbers<[1], [0], [0], [1], [0, 0, 1, 1], [], []>} : vector<48x256xbf16>, vector<256x512xbf16>, vector<48x512xf32> -> vector<48x512xf32>
    %c1_242 = arith.constant 1 : index
    %c0_243 = arith.constant 0 : index
    %c0_244 = arith.constant 0 : index
    %708 = vector.load %arg11[%c1_242, %c0_243, %c0_244] : memref<2x1x512xf32, #tpu.memory_space<vmem>>, vector<1x1x512xf32>
    %709 = vector.shape_cast %708 : vector<1x1x512xf32> to vector<1x512xf32>
    %710 = vector.broadcast %709 : vector<1x512xf32> to vector<48x512xf32>
    %711 = arith.addf %707, %710 : vector<48x512xf32>
    %cst_245 = arith.constant 5.000000e-01 : f32
    %712 = vector.broadcast %cst_245 : f32 to vector<48x512xf32>
    %713 = arith.mulf %712, %711 : vector<48x512xf32>
    %cst_246 = arith.constant 0.707106769 : f32
    %714 = vector.broadcast %cst_246 : f32 to vector<48x512xf32>
    %715 = arith.mulf %711, %714 : vector<48x512xf32>
    %716 = math.erf %715 : vector<48x512xf32>
    %cst_247 = arith.constant 1.000000e+00 : f32
    %717 = vector.broadcast %cst_247 : f32 to vector<48x512xf32>
    %718 = arith.addf %717, %716 : vector<48x512xf32>
    %719 = arith.mulf %713, %718 : vector<48x512xf32>
    %c1_248 = arith.constant 1 : index
    %c0_249 = arith.constant 0 : index
    %c0_250 = arith.constant 0 : index
    %720 = vector.load %arg12[%c1_248, %c0_249, %c0_250] : memref<2x512x256xbf16, #tpu.memory_space<vmem>>, vector<1x512x256xbf16>
    %721 = vector.shape_cast %720 : vector<1x512x256xbf16> to vector<512x256xbf16>
    %722 = arith.truncf %719 : vector<48x512xf32> to vector<48x512xbf16>
    %cst_251 = arith.constant dense<0.000000e+00> : vector<48x256xf32>
    %723 = tpu.matmul %722, %721, %cst_251 {dimension_numbers = #tpu.dot_dimension_numbers<[1], [0], [0], [1], [0, 0, 1, 1], [], []>} : vector<48x512xbf16>, vector<512x256xbf16>, vector<48x256xf32> -> vector<48x256xf32>
    %c1_252 = arith.constant 1 : index
    %c0_253 = arith.constant 0 : index
    %c0_254 = arith.constant 0 : index
    %724 = vector.load %arg13[%c1_252, %c0_253, %c0_254] : memref<2x1x256xf32, #tpu.memory_space<vmem>>, vector<1x1x256xf32>
    %725 = vector.shape_cast %724 : vector<1x1x256xf32> to vector<1x256xf32>
    %726 = vector.broadcast %725 : vector<1x256xf32> to vector<48x256xf32>
    %727 = arith.addf %723, %726 : vector<48x256xf32>
    %728 = arith.addf %727, %703 : vector<48x256xf32>
    %c1_255 = arith.constant 1 : index
    %c0_256 = arith.constant 0 : index
    %c0_257 = arith.constant 0 : index
    %729 = vector.load %arg14[%c1_255, %c0_256, %c0_257] : memref<2x1x256xf32, #tpu.memory_space<vmem>>, vector<1x1x256xf32>
    %730 = vector.shape_cast %729 : vector<1x1x256xf32> to vector<1x256xf32>
    %c1_258 = arith.constant 1 : index
    %c0_259 = arith.constant 0 : index
    %c0_260 = arith.constant 0 : index
    %731 = vector.load %arg15[%c1_258, %c0_259, %c0_260] : memref<2x1x256xf32, #tpu.memory_space<vmem>>, vector<1x1x256xf32>
    %732 = vector.shape_cast %731 : vector<1x1x256xf32> to vector<1x256xf32>
    %cst_261 = arith.constant dense<0.000000e+00> : vector<48xf32>
    %733 = vector.multi_reduction <add>, %728, %cst_261 [1] : vector<48x256xf32> to vector<48xf32>
    %734 = vector.shape_cast %733 : vector<48xf32> to vector<48x1xf32>
    %cst_262 = arith.constant 2.560000e+02 : f32
    %735 = vector.broadcast %cst_262 : f32 to vector<48x1xf32>
    %736 = arith.divf %734, %735 : vector<48x1xf32>
    %737 = vector.broadcast %736 : vector<48x1xf32> to vector<48x256xf32>
    %738 = arith.subf %728, %737 : vector<48x256xf32>
    %739 = arith.mulf %738, %738 : vector<48x256xf32>
    %cst_263 = arith.constant dense<0.000000e+00> : vector<48xf32>
    %740 = vector.multi_reduction <add>, %739, %cst_263 [1] : vector<48x256xf32> to vector<48xf32>
    %741 = vector.shape_cast %740 : vector<48xf32> to vector<48x1xf32>
    %cst_264 = arith.constant 2.560000e+02 : f32
    %742 = vector.broadcast %cst_264 : f32 to vector<48x1xf32>
    %743 = arith.divf %741, %742 : vector<48x1xf32>
    %744 = vector.broadcast %736 : vector<48x1xf32> to vector<48x256xf32>
    %745 = arith.subf %728, %744 : vector<48x256xf32>
    %cst_265 = arith.constant 9.99999996E-13 : f32
    %746 = vector.broadcast %cst_265 : f32 to vector<48x1xf32>
    %747 = arith.addf %743, %746 : vector<48x1xf32>
    %748 = math.rsqrt %747 : vector<48x1xf32>
    %749 = vector.broadcast %748 : vector<48x1xf32> to vector<48x256xf32>
    %750 = arith.mulf %745, %749 : vector<48x256xf32>
    %751 = vector.broadcast %730 : vector<1x256xf32> to vector<48x256xf32>
    %752 = arith.mulf %750, %751 : vector<48x256xf32>
    %753 = vector.broadcast %732 : vector<1x256xf32> to vector<48x256xf32>
    %754 = arith.addf %752, %753 : vector<48x256xf32>
    %755 = vector.extract_strided_slice %754 {offsets = [0, 0], sizes = [1, 256], strides = [1, 1]} : vector<48x256xf32> to vector<1x256xf32>
    %756 = vector.extract_strided_slice %754 {offsets = [8, 0], sizes = [1, 256], strides = [1, 1]} : vector<48x256xf32> to vector<1x256xf32>
    %757 = vector.extract_strided_slice %754 {offsets = [16, 0], sizes = [1, 256], strides = [1, 1]} : vector<48x256xf32> to vector<1x256xf32>
    %758 = vector.extract_strided_slice %754 {offsets = [24, 0], sizes = [1, 256], strides = [1, 1]} : vector<48x256xf32> to vector<1x256xf32>
    %759 = vector.extract_strided_slice %754 {offsets = [32, 0], sizes = [1, 256], strides = [1, 1]} : vector<48x256xf32> to vector<1x256xf32>
    %760 = vector.extract_strided_slice %754 {offsets = [40, 0], sizes = [1, 256], strides = [1, 1]} : vector<48x256xf32> to vector<1x256xf32>
    %761 = tpu.concatenate %755, %756, %757, %758, %759, %760 in 0 : vector<1x256xf32>, vector<1x256xf32>, vector<1x256xf32>, vector<1x256xf32>, vector<1x256xf32>, vector<1x256xf32> -> vector<6x256xf32>
    %c0_266 = arith.constant 0 : index
    %c0_267 = arith.constant 0 : index
    %762 = vector.load %arg16[%c0_266, %c0_267] : memref<256x2xf32, #tpu.memory_space<vmem>>, vector<256x2xf32>
    %cst_268 = arith.constant dense<0.000000e+00> : vector<6x2xf32>
    %763 = tpu.matmul %761, %762, %cst_268 {dimension_numbers = #tpu.dot_dimension_numbers<[1], [0], [0], [1], [0, 0, 1, 1], [], []>} : vector<6x256xf32>, vector<256x2xf32>, vector<6x2xf32> -> vector<6x2xf32>
    %764 = tpu.iota {dimensions = array<i32: 1>} : vector<6x2xi32>
    %c0_i32 = arith.constant 0 : i32
    %765 = vector.broadcast %c0_i32 : i32 to vector<6x2xi32>
    %766 = arith.cmpi eq, %764, %765 : vector<6x2xi32>
    %767 = arith.negf %763 : vector<6x2xf32>
    %768 = math.exp %767 : vector<6x2xf32>
    %cst_269 = arith.constant 1.000000e+00 : f32
    %769 = vector.broadcast %cst_269 : f32 to vector<6x2xf32>
    %770 = arith.addf %769, %768 : vector<6x2xf32>
    %771 = arith.divf %769, %770 : vector<6x2xf32>
    %772 = arith.select %766, %763, %771 : vector<6x2xi1>, vector<6x2xf32>
    %c0_270 = arith.constant 0 : index
    %c0_271 = arith.constant 0 : index
    %773 = vector.load %arg17[%c0_270, %c0_271] : memref<6x2xf32, #tpu.memory_space<vmem>>, vector<6x2xf32>
    tpu.vector_store %arg17[%c0_270, %c0_271], %772 {strides = array<i32>} : memref<6x2xf32, #tpu.memory_space<vmem>>, vector<6x2xf32>,
    return
  }
}

</mosaic_0001>

<bundles_post_ra>
// kernel: bert_select_auxilary_forward.1
= control target key start
LH: loop header
LB: loop body
LE: loop exit
PB: predicated region body
PF: predicated region fallthrough
CT: control target
= control target key end

     0   :  { %s13406_s0 = inlined_call_operand.vmem [shape: f32[48,256], index: 0, kind: input, shape index: {}]   ;;  %s13407_s1 = inlined_call_operand.vmem [shape: f32[6,8,8], index: 1, kind: input, shape index: {}]   ;;  %s13408_s2 = inlined_call_operand.hbm [shape: f32[1,256], index: 2, kind: input, shape index: {}]   ;;  %s13409_s3 = inlined_call_operand.hbm [shape: f32[1,256], index: 3, kind: input, shape index: {}]   ;;  %s13410_s4 = inlined_call_operand.vmem [shape: bf16[2,256,768], index: 4, kind: input, shape index: {}]   ;;  %s13411_s5 = inlined_call_operand.vmem [shape: f32[2,1,768], index: 5, kind: input, shape index: {}]   ;;  %s13412_s6 = inlined_call_operand.hbm [shape: bf16[2,256,256], index: 6, kind: input, shape index: {}]   ;;  %s13413_s7 = inlined_call_operand.vmem [shape: f32[2,1,256], index: 7, kind: input, shape index: {}]   ;;  %s13414_s8 = inlined_call_operand.hbm [shape: f32[2,1,256], index: 8, kind: input, shape index: {}]   ;;  %s13415_s9 = inlined_call_operand.hbm [shape: f32[2,1,256], index: 9, kind: input, shape index: {}]   ;;  %s13416_s10 = inlined_call_operand.hbm [shape: bf16[2,256,512], index: 10, kind: input, shape index: {}]   ;;  %s13417_s11 = inlined_call_operand.hbm [shape: f32[2,1,512], index: 11, kind: input, shape index: {}]   ;;  %s13418_s12 = inlined_call_operand.hbm [shape: bf16[2,512,256], index: 12, kind: input, shape index: {}]   ;;  %s13419_s13 = inlined_call_operand.hbm [shape: f32[2,1,256], index: 13, kind: input, shape index: {}]   ;;  %s13420_s14 = inlined_call_operand.hbm [shape: f32[2,1,256], index: 14, kind: input, shape index: {}]   ;;  %s13421_s15 = inlined_call_operand.hbm [shape: f32[2,1,256], index: 15, kind: input, shape index: {}]   ;;  %s13422_s16 = inlined_call_operand.vmem [shape: f32[256,2], index: 16, kind: input, shape index: {}]   ;;  %s13423_s17 = inlined_call_operand.vmem [shape: f32[6,2], index: 17, kind: output, shape index: {}]  }
   0x1   :  { %13435 = sst [smem:[#allocation26_spill]] %s13406_s0 }
   0x2   :  { %13436 = sst [smem:[#allocation27_spill]] %s13407_s1 }
   0x3   :  { %22 = vsyncpa [#allocation3], 0 }
   0x4   :  { %23 = vsyncpa [#allocation5], 0 }
   0x5   :  { %24 = vsyncpa [#allocation8], 0 }
   0x6   :  { %25 = vsyncpa [#allocation11], 0 }
   0x7   :  { %26 = vsyncpa [#allocation14], 0 }
   0x8   :  { %27 = vsyncpa [#allocation17], 0  ;;  %s10632_s24 = smov [#allocation4]   ;;  %s10633_s26 = smov [#allocation7]  }
   0x9   :  { %s48_s25 = sshll.u32 %s10632_s24, 4  ;;  %s75_s27 = sshll.u32 %s10633_s26, 4  ;;  %s49_s25 = int_to_ptr.vmem [resolvable:$true] %s48_s25  ;;  %s10743_s27 = int_to_ptr.vmem [resolvable:$true] %s75_s27 }
   0xa   :  { %s10378_s0 = scalar_lea.hbm %s13409_s3, 32 }
   0xb   :  { %p10379_p0 = scmp.ne.s32.totalorder %s13409_s3, %s10378_s0  ;;  %p10382_p1 = scmp.lt.u32.totalorder %s10378_s0, %s13409_s3 }
   0xd   :  { %p10384_p2 = pnand %p10382_p1, %p10379_p0 }
   0xf   :  { %10387 = shalt.err (!%p10384_p2)
}
  0x10   :  { %s10388_s20 = scalar_lea.vmem %s49_s25, 32  ;;  %p10393_p4 = scmp.lt.s32.totalorder %s49_s25, %s49_s25 }
  0x11   :  { %p10389_p3 = scmp.ne.s32.totalorder %s49_s25, %s10388_s20  ;;  %p10394_p5 = scmp.lt.s32.totalorder %s10388_s20, %s10388_s20 }
  0x13   :  { %p10395_p6 = por %p10394_p5, %p10393_p4 }
  0x15   :  { %p10396_p7 = pnand %p10395_p6, %p10389_p3 }
  0x17   :  { %10399 = shalt.err (!%p10396_p7)
}
  0x18   :  { %51 = dma.hbm_to_vmem [thread:$0]  %s13409_s3, 32, %s49_s25, [#allocation5]  }
  0x19   :  { %s10400_s26 = scalar_lea.hbm %s13414_s8, 64 }
  0x1a   :  { %p10401_p8 = scmp.ne.s32.totalorder %s13414_s8, %s10400_s26  ;;  %p10404_p9 = scmp.lt.u32.totalorder %s10400_s26, %s13414_s8 }
  0x1c   :  { %p10406_p10 = pnand %p10404_p9, %p10401_p8 }
  0x1e   :  { %10409 = shalt.err (!%p10406_p10)
}
  0x1f   :  { %s10410_s18 = scalar_lea.vmem %s10743_s27, 64  ;;  %p10415_p12 = scmp.lt.s32.totalorder %s10743_s27, %s10743_s27 }
  0x20   :  { %p10411_p11 = scmp.ne.s32.totalorder %s10743_s27, %s10410_s18  ;;  %p10416_p13 = scmp.lt.s32.totalorder %s10410_s18, %s10410_s18 }
  0x22   :  { %p10417_p0 = por %p10416_p13, %p10415_p12 }
  0x24   :  { %p10418_p1 = pnand %p10417_p0, %p10411_p11 }
  0x26   :  { %10421 = shalt.err (!%p10418_p1)
}
  0x27   :  { %s13426_s3 = smov 32   ;;  %s10635_s25 = smov 2  }
  0x28   :  { %81 = dma.hbm_to_vmem [thread:$0]  %s13414_s8, 64, %s10743_s27, [#allocation8], %s13426_s3, %s13426_s3, %s10635_s25  }
  0x29   :  { %s10636_s20 = smov [#allocation10]   ;;  %s10422_s24 = scalar_lea.hbm %s13416_s10, 16384 }
  0x2a   :  { %s99_s21 = sshll.u32 %s10636_s20, 4  ;;  %p10423_p2 = scmp.ne.s32.totalorder %s13416_s10, %s10422_s24  ;;  %s100_s21 = int_to_ptr.vmem [resolvable:$true] %s99_s21 }
  0x2b   :  { %p10426_p3 = scmp.lt.u32.totalorder %s10422_s24, %s13416_s10 }
  0x2d   :  { %p10428_p4 = pnand %p10426_p3, %p10423_p2 }
  0x2f   :  { %10431 = shalt.err (!%p10428_p4)
}
  0x30   :  { %s10432_s30 = scalar_lea.vmem %s100_s21, 16384  ;;  %p10437_p6 = scmp.lt.s32.totalorder %s100_s21, %s100_s21 }
  0x31   :  { %p10433_p5 = scmp.ne.s32.totalorder %s100_s21, %s10432_s30  ;;  %p10438_p7 = scmp.lt.s32.totalorder %s10432_s30, %s10432_s30 }
  0x33   :  { %p10439_p8 = por %p10438_p7, %p10437_p6 }
  0x35   :  { %p10440_p9 = pnand %p10439_p8, %p10433_p5 }
  0x37   :  { %10443 = shalt.err (!%p10440_p9)
}
  0x38   :  { %s10637_s8 = smov 256   ;;  %s10638_s27 = smov 16  }
  0x39   :  { %105 = dma.hbm_to_vmem [thread:$0]  %s13416_s10, 16384, %s100_s21, [#allocation11], %s10637_s8, %s10637_s8, %s10638_s27  }
  0x3a   :  { %s10639_s1 = smov [#allocation13]   ;;  %s10640_s22 = smov [#allocation16]  }
  0x3b   :  { %s123_s20 = sshll.u32 %s10639_s1, 4  ;;  %s147_s23 = sshll.u32 %s10640_s22, 4  ;;  %s124_s20 = int_to_ptr.vmem [resolvable:$true] %s123_s20  ;;  %s148_s23 = int_to_ptr.vmem [resolvable:$true] %s147_s23 }
  0x3c   :  { %s10444_s28 = scalar_lea.hbm %s13418_s12, 16384 }
  0x3d   :  { %p10445_p10 = scmp.ne.s32.totalorder %s13418_s12, %s10444_s28  ;;  %p10448_p11 = scmp.lt.u32.totalorder %s10444_s28, %s13418_s12 }
  0x3f   :  { %p10450_p12 = pnand %p10448_p11, %p10445_p10 }
  0x41   :  { %10453 = shalt.err (!%p10450_p12)
}
  0x42   :  { %s10454_s10 = scalar_lea.vmem %s124_s20, 16384  ;;  %p10459_p0 = scmp.lt.s32.totalorder %s124_s20, %s124_s20 }
  0x43   :  { %p10455_p13 = scmp.ne.s32.totalorder %s124_s20, %s10454_s10  ;;  %p10460_p1 = scmp.lt.s32.totalorder %s10454_s10, %s10454_s10 }
  0x45   :  { %p10461_p2 = por %p10460_p1, %p10459_p0 }
  0x47   :  { %p10462_p3 = pnand %p10461_p2, %p10455_p13 }
  0x49   :  { %10465 = shalt.err (!%p10462_p3)
}
  0x4a   :  { %s10641_s21 = smov 128   ;;  %s10642_s8 = smov 8  }
  0x4b   :  { %129 = dma.hbm_to_vmem [thread:$0]  %s13418_s12, 16384, %s124_s20, [#allocation14], %s10641_s21, %s10641_s21, %s10642_s8  }
  0x4c   :  { %s10466_s1 = scalar_lea.hbm %s13420_s14, 64 }
  0x4d   :  { %p10467_p4 = scmp.ne.s32.totalorder %s13420_s14, %s10466_s1  ;;  %p10470_p5 = scmp.lt.u32.totalorder %s10466_s1, %s13420_s14 }
  0x4f   :  { %p10472_p6 = pnand %p10470_p5, %p10467_p4 }
  0x51   :  { %10475 = shalt.err (!%p10472_p6)
}
  0x52   :  { %s10476_s29 = scalar_lea.vmem %s148_s23, 64  ;;  %p10481_p8 = scmp.lt.s32.totalorder %s148_s23, %s148_s23 }
  0x53   :  { %p10477_p7 = scmp.ne.s32.totalorder %s148_s23, %s10476_s29  ;;  %p10482_p9 = scmp.lt.s32.totalorder %s10476_s29, %s10476_s29 }
  0x55   :  { %p10483_p10 = por %p10482_p9, %p10481_p8 }
  0x57   :  { %p10484_p11 = pnand %p10483_p10, %p10477_p7 }
  0x59   :  { %10487 = shalt.err (!%p10484_p11)
}
  0x5a   :  { %s13437_s12 = smov 32   ;;  %s10643_s30 = smov [#allocation2]  }
  0x5b   :  { %153 = dma.hbm_to_vmem [thread:$0]  %s13420_s14, 64, %s148_s23, [#allocation17], %s13437_s12, %s13437_s12, %s10635_s25  }
  0x5c   :  { %s38_s10 = sshll.u32 %s10643_s30, 4  ;;  %s10644_s27 = smov [#allocation6]   ;;  %s39_s10 = int_to_ptr.vmem [resolvable:$true] %s38_s10 }
  0x5d   :  { %s61_s18 = sshll.u32 %s10644_s27, 4  ;;  %s10488_s1 = scalar_lea.hbm %s13408_s2, 32  ;;  %s62_s18 = int_to_ptr.vmem [resolvable:$true] %s61_s18 }
  0x5e   :  { %p10489_p12 = scmp.ne.s32.totalorder %s13408_s2, %s10488_s1  ;;  %p10492_p13 = scmp.lt.u32.totalorder %s10488_s1, %s13408_s2 }
  0x60   :  { %p10494_p0 = pnand %p10492_p13, %p10489_p12 }
  0x62   :  { %10497 = shalt.err (!%p10494_p0)
}
  0x63   :  { %s10498_s14 = scalar_lea.vmem %s39_s10, 32  ;;  %p10503_p2 = scmp.lt.s32.totalorder %s39_s10, %s39_s10 }
  0x64   :  { %p10499_p1 = scmp.ne.s32.totalorder %s39_s10, %s10498_s14  ;;  %p10504_p3 = scmp.lt.s32.totalorder %s10498_s14, %s10498_s14 }
  0x66   :  { %p10505_p4 = por %p10504_p3, %p10503_p2 }
  0x68   :  { %p10506_p5 = pnand %p10505_p4, %p10499_p1 }
  0x6a   :  { %10509 = shalt.err (!%p10506_p5)
}
  0x6b   :  { %41 = dma.hbm_to_vmem [thread:$0]  %s13408_s2, 32, %s39_s10, [#allocation3]  }
  0x6c   :  { %s10510_s30 = scalar_lea.hbm %s13412_s6, 8192 }
  0x6d   :  { %p10511_p6 = scmp.ne.s32.totalorder %s13412_s6, %s10510_s30  ;;  %p10514_p7 = scmp.lt.u32.totalorder %s10510_s30, %s13412_s6 }
  0x6f   :  { %p10516_p8 = pnand %p10514_p7, %p10511_p6 }
  0x71   :  { %10519 = shalt.err (!%p10516_p8)
}
  0x72   :  { %s10520_s22 = scalar_lea.vmem %s62_s18, 8192  ;;  %p10525_p10 = scmp.lt.s32.totalorder %s62_s18, %s62_s18 }
  0x73   :  { %p10521_p9 = scmp.ne.s32.totalorder %s62_s18, %s10520_s22  ;;  %p10526_p11 = scmp.lt.s32.totalorder %s10520_s22, %s10520_s22 }
  0x75   :  { %p10527_p12 = por %p10526_p11, %p10525_p10 }
  0x77   :  { %p10528_p13 = pnand %p10527_p12, %p10521_p9 }
  0x79   :  { %10531 = shalt.err (!%p10528_p13)
}
  0x7a   :  { %67 = dma.hbm_to_vmem [thread:$0]  %s13412_s6, 8192, %s62_s18, [#allocation5], %s10641_s21, %s10641_s21, %s10642_s8  }
  0x7b   :  { %s10645_s24 = smov [#allocation9]   ;;  %s10646_s28 = smov [#allocation12]  }
  0x7c   :  { %s87_s26 = sshll.u32 %s10645_s24, 4  ;;  %s111_s14 = sshll.u32 %s10646_s28, 4  ;;  %s88_s26 = int_to_ptr.vmem [resolvable:$true] %s87_s26  ;;  %s112_s14 = int_to_ptr.vmem [resolvable:$true] %s111_s14 }
  0x7d   :  { %s10532_s20 = scalar_lea.hbm %s13415_s9, 64 }
  0x7e   :  { %p10533_p0 = scmp.ne.s32.totalorder %s13415_s9, %s10532_s20  ;;  %p10536_p1 = scmp.lt.u32.totalorder %s10532_s20, %s13415_s9 }
  0x80   :  { %p10538_p2 = pnand %p10536_p1, %p10533_p0 }
  0x82   :  { %10541 = shalt.err (!%p10538_p2)
}
  0x83   :  { %s10542_s6 = scalar_lea.vmem %s88_s26, 64  ;;  %p10547_p4 = scmp.lt.s32.totalorder %s88_s26, %s88_s26 }
  0x84   :  { %p10543_p3 = scmp.ne.s32.totalorder %s88_s26, %s10542_s6  ;;  %p10548_p5 = scmp.lt.s32.totalorder %s10542_s6, %s10542_s6 }
  0x86   :  { %p10549_p6 = por %p10548_p5, %p10547_p4 }
  0x88   :  { %p10550_p7 = pnand %p10549_p6, %p10543_p3 }
  0x8a   :  { %10553 = shalt.err (!%p10550_p7)
}
  0x8b   :  { %93 = dma.hbm_to_vmem [thread:$0]  %s13415_s9, 64, %s88_s26, [#allocation8], %s13437_s12, %s13437_s12, %s10635_s25  }
  0x8c   :  { %s10554_s1 = scalar_lea.hbm %s13417_s11, 128 }
  0x8d   :  { %p10555_p8 = scmp.ne.s32.totalorder %s13417_s11, %s10554_s1  ;;  %p10558_p9 = scmp.lt.u32.totalorder %s10554_s1, %s13417_s11 }
  0x8f   :  { %p10560_p10 = pnand %p10558_p9, %p10555_p8 }
  0x91   :  { %10563 = shalt.err (!%p10560_p10)
}
  0x92   :  { %s10564_s28 = scalar_lea.vmem %s112_s14, 128  ;;  %p10569_p12 = scmp.lt.s32.totalorder %s112_s14, %s112_s14 }
  0x93   :  { %p10565_p11 = scmp.ne.s32.totalorder %s112_s14, %s10564_s28  ;;  %p10570_p13 = scmp.lt.s32.totalorder %s10564_s28, %s10564_s28 }
  0x95   :  { %p10571_p0 = por %p10570_p13, %p10569_p12 }
  0x97   :  { %p10572_p1 = pnand %p10571_p0, %p10565_p11 }
  0x99   :  { %10575 = shalt.err (!%p10572_p1)
}
  0x9a   :  { %s10647_s9 = smov 64   ;;  %s10648_s26 = smov 4  }
  0x9b   :  { %117 = dma.hbm_to_vmem [thread:$0]  %s13417_s11, 128, %s112_s14, [#allocation11], %s10647_s9, %s10647_s9, %s10648_s26  }
  0x9c   :  { %s10649_s20 = smov [#allocation15]   ;;  %s10650_s30 = smov [#allocation18]  }
  0x9d   :  { %s135_s0 = sshll.u32 %s10649_s20, 4  ;;  %s159_s27 = sshll.u32 %s10650_s30, 4  ;;  %s136_s0 = int_to_ptr.vmem [resolvable:$true] %s135_s0  ;;  %s160_s27 = int_to_ptr.vmem [resolvable:$true] %s159_s27 }
  0x9e   :  { %s10576_s21 = scalar_lea.hbm %s13419_s13, 64 }
  0x9f   :  { %p10577_p2 = scmp.ne.s32.totalorder %s13419_s13, %s10576_s21  ;;  %p10580_p3 = scmp.lt.u32.totalorder %s10576_s21, %s13419_s13 }
  0xa1   :  { %p10582_p4 = pnand %p10580_p3, %p10577_p2 }
  0xa3   :  { %10585 = shalt.err (!%p10582_p4)
}
  0xa4   :  { %s10586_s11 = scalar_lea.vmem %s136_s0, 64  ;;  %p10591_p6 = scmp.lt.s32.totalorder %s136_s0, %s136_s0 }
  0xa5   :  { %p10587_p5 = scmp.ne.s32.totalorder %s136_s0, %s10586_s11  ;;  %p10592_p7 = scmp.lt.s32.totalorder %s10586_s11, %s10586_s11 }
  0xa7   :  { %p10593_p8 = por %p10592_p7, %p10591_p6 }
  0xa9   :  { %p10594_p9 = pnand %p10593_p8, %p10587_p5 }
  0xab   :  { %10597 = shalt.err (!%p10594_p9)
}
  0xac   :  { %141 = dma.hbm_to_vmem [thread:$0]  %s13419_s13, 64, %s136_s0, [#allocation14], %s13437_s12, %s13437_s12, %s10635_s25  }
  0xad   :  { %s10598_s24 = scalar_lea.hbm %s13421_s15, 64 }
  0xae   :  { %p10599_p10 = scmp.ne.s32.totalorder %s13421_s15, %s10598_s24  ;;  %p10602_p11 = scmp.lt.u32.totalorder %s10598_s24, %s13421_s15 }
  0xb0   :  { %p10604_p12 = pnand %p10602_p11, %p10599_p10 }
  0xb2   :  { %10607 = shalt.err (!%p10604_p12)
}
  0xb3   :  { %s10608_s29 = scalar_lea.vmem %s160_s27, 64  ;;  %p10613_p0 = scmp.lt.s32.totalorder %s160_s27, %s160_s27 }
  0xb4   :  { %p10609_p13 = scmp.ne.s32.totalorder %s160_s27, %s10608_s29  ;;  %p10614_p1 = scmp.lt.s32.totalorder %s10608_s29, %s10608_s29 }
  0xb6   :  { %p10615_p2 = por %p10614_p1, %p10613_p0 }
  0xb8   :  { %p10616_p3 = pnand %p10615_p2, %p10609_p13 }
  0xba   :  { %10619 = shalt.err (!%p10616_p3)
}
  0xbb   :  { %165 = dma.hbm_to_vmem [thread:$0]  %s13421_s15, 64, %s160_s27, [#allocation17], %s13437_s12, %s13437_s12, %s10635_s25  }
  0xbc   :  { %10620 = dma.done.wait [#allocation3], 32  }
  0xbd   :  { %10621 = vsyncadd [#allocation3], 4294967264 }
  0xbe   :  { %10622 = dma.done.wait [#allocation5], 8224  }
  0xbf   :  { %10623 = vsyncadd [#allocation5], 4294959072 }
  0xc0   :  { %10624 = dma.done.wait [#allocation8], 128  }
  0xc1   :  { %10625 = vsyncadd [#allocation8], 4294967168 }
  0xc2   :  { %10626 = dma.done.wait [#allocation11], 16512  }
  0xc3   :  { %10627 = vsyncadd [#allocation11], 4294950784 }
  0xc4   :  { %10628 = dma.done.wait [#allocation14], 16448  }
  0xc5   :  { %10629 = vsyncadd [#allocation14], 4294950848 }
  0xc6   :  { %10630 = dma.done.wait [#allocation17], 128  }
  0xc7   :  { %10631 = vsyncadd [#allocation17], 4294967168  ;;  %s13438_s3 = sld [smem:[#allocation26_spill]]  ;;  %v9344_v12 = vld [vmem:[%s13410_s4 + $0x4] ss:$24 sps:$4 sm:$0xff]   ;;  %vm10652_vm0 = vmmov 0  }
  0xc8   :  { %v9346_v13 = vld [vmem:[%s13410_s4 + $0xc] ss:$24 sps:$4 sm:$0xff]   ;;  %v9348_v14 = vld [vmem:[%s13410_s4] ss:$24 sps:$4 sm:$0xff]   ;;  %v9352_v17 = vld [vmem:[%s13410_s4 + $0x3c] ss:$24 sps:$4 sm:$0xff]   ;;  %973 = vmatprep.subr.bf16.mxu0 %v9344_v12 }
  0xc9   :  { %v9349_v15 = vld [vmem:[%s13410_s4 + $0x8] ss:$24 sps:$4 sm:$0xff]   ;;  %v9350_v16 = vld [vmem:[%s13410_s4 + $0x34] ss:$24 sps:$4 sm:$0xff]   ;;  %1036 = vmatprep.subr.bf16.mxu1 %v9346_v13  ;;  %974 = vmatpush1.bf16.msra.mxu0 %v9348_v14  ;;  %v9355_v19 = vld [vmem:[%s13410_s4 + $0x38] ss:$24 sps:$4 sm:$0xff]  }
  0xca   :  { %1037 = vmatpush1.bf16.msra.mxu1 %v9349_v15  ;;  %v9354_v18 = vld [vmem:[%s13410_s4 + $0x30] ss:$24 sps:$4 sm:$0xff]   ;;  %975 = vmatprep.subr.bf16.mxu0 %v9350_v16  ;;  %v9356_v20 = vld [vmem:[%s13410_s4 + $0x64] ss:$24 sps:$4 sm:$0xff]   ;;  %v9360_v22 = vld [vmem:[%s13410_s4 + $0x60] ss:$24 sps:$4 sm:$0xff]  }
  0xcb   :  { %1038 = vmatprep.subr.bf16.mxu1 %v9352_v17  ;;  %v9358_v21 = vld [vmem:[%s13410_s4 + $0x6c] ss:$24 sps:$4 sm:$0xff]   ;;  %v9361_v23 = vld [vmem:[%s13410_s4 + $0x68] ss:$24 sps:$4 sm:$0xff]   ;;  %v9364_v25 = vld [vmem:[%s13410_s4 + $0x9c] ss:$24 sps:$4 sm:$0xff]  }
  0xcc   :  { %v9362_v24 = vld [vmem:[%s13410_s4 + $0x94] ss:$24 sps:$4 sm:$0xff]   ;;  %v9366_v26 = vld [vmem:[%s13410_s4 + $0x90] ss:$24 sps:$4 sm:$0xff]   ;;  %v9368_v28 = vld [vmem:[%s13410_s4 + $0xc4] ss:$24 sps:$4 sm:$0xff]  }
  0xcd   :  { %v10906_v0 = vld [vmem:[%s13438_s3] sm:$0xff]  ;;  %v10911_v1 = vld [vmem:[%s13438_s3 + $0x8] sm:$0xff]  ;;  %v10916_v2 = vld [vmem:[%s13438_s3 + $0x10] sm:$0xff]  ;;  %976 = vmatpush1.bf16.msra.mxu0 %v9354_v18  ;;  %vm1224_vm1 = vcmask 1043456   ;;  %s13440_s13 = sld [smem:[#allocation27_spill]]  ;;  %vm1207_vm2 = vcmask 64512  }
  0xce   :  { %v216_v3 = vadd.f32 %v10911_v1, %v10906_v0  ;;  %v10923_v4 = vld [vmem:[%s13438_s3 + $0x18] sm:$0xff]  ;;  %v206_v5 = vld [vmem:[%s13438_s3 + $0x20] sm:$0xff]  ;;  %v207_v6 = vld [vmem:[%s13438_s3 + $0x28] sm:$0xff]  ;;  %1039 = vmatpush1.bf16.msra.mxu1 %v9355_v19  ;;  %977 = vmatprep.subr.bf16.mxu0 %v9356_v20  ;;  %vm8046_vm3 = vcmask 1040384   ;;  %vm8049_vm4 = vcmask 1041408   ;;  %vm8052_vm5 = vcmask 1042432  }
  0xcf   :  { %v219_v7 = vadd.f32 %v10923_v4, %v10916_v2  ;;  %v210_v8 = vld [vmem:[%s13438_s3 + $0x40] sm:$0xff]  ;;  %v211_v9 = vld [vmem:[%s13438_s3 + $0x48] sm:$0xff]  ;;  %v222_v10 = vadd.f32 %v207_v6, %v206_v5  ;;  %1040 = vmatprep.subr.bf16.mxu1 %v9358_v21  ;;  %v9367_v27 = vld [vmem:[%s13410_s4 + $0x98] ss:$24 sps:$4 sm:$0xff]   ;;  %vm8057_vm6 = vcmask 1044480   ;;  %vm8172_vm8 = vcmask 13312  }
  0xd0   :  { %217 = vadd.xlane.f32.xlu0 %v216_v3  ;;  %v228_v11 = vadd.f32 %v211_v9, %v210_v8  ;;  %v9370_v29 = vld [vmem:[%s13410_s4 + $0xcc] ss:$24 sps:$4 sm:$0xff]   ;;  %v9372_v30 = vld [vmem:[%s13410_s4 + $0xc0] ss:$24 sps:$4 sm:$0xff]   ;;  %v9376_v33 = vld [vmem:[%s13410_s4 + $0xfc] ss:$24 sps:$4 sm:$0xff]  }
  0xd1   :  { %978 = vmatpush1.bf16.msra.mxu0 %v9360_v22  ;;  %v9373_v31 = vld [vmem:[%s13410_s4 + $0xc8] ss:$24 sps:$4 sm:$0xff]   ;;  %v9374_v32 = vld [vmem:[%s13410_s4 + $0xf4] ss:$24 sps:$4 sm:$0xff]   ;;  %v9379_v35 = vld [vmem:[%s13410_s4 + $0xf8] ss:$24 sps:$4 sm:$0xff]  }
  0xd2   :  { %1041 = vmatpush1.bf16.msra.mxu1 %v9361_v23  ;;  %979 = vmatprep.subr.bf16.mxu0 %v9362_v24  ;;  %v9378_v34 = vld [vmem:[%s13410_s4 + $0xf0] ss:$24 sps:$4 sm:$0xff]   ;;  %v9380_v36 = vld [vmem:[%s13410_s4 + $0x124] ss:$24 sps:$4 sm:$0xff]   ;;  %v9384_v38 = vld [vmem:[%s13410_s4 + $0x120] ss:$24 sps:$4 sm:$0xff]  }
  0xd3   :  { %1042 = vmatprep.subr.bf16.mxu1 %v9364_v25  ;;  %v9382_v37 = vld [vmem:[%s13410_s4 + $0x12c] ss:$24 sps:$4 sm:$0xff]   ;;  %v9385_v39 = vld [vmem:[%s13410_s4 + $0x128] ss:$24 sps:$4 sm:$0xff]   ;;  %v9388_v41 = vld [vmem:[%s13410_s4 + $0x15c] ss:$24 sps:$4 sm:$0xff]  }
  0xd4   :  { %220 = vadd.xlane.f32.xlu0 %v219_v7  ;;  %v9386_v40 = vld [vmem:[%s13410_s4 + $0x154] ss:$24 sps:$4 sm:$0xff]   ;;  %v9390_v42 = vld [vmem:[%s13410_s4 + $0x150] ss:$24 sps:$4 sm:$0xff]   ;;  %v9392_v44 = vld [vmem:[%s13410_s4 + $0x184] ss:$24 sps:$4 sm:$0xff]  }
  0xd5   :  { %980 = vmatpush1.bf16.msra.mxu0 %v9366_v26  ;;  %v9391_v43 = vld [vmem:[%s13410_s4 + $0x158] ss:$24 sps:$4 sm:$0xff]   ;;  %v9394_v45 = vld [vmem:[%s13410_s4 + $0x18c] ss:$24 sps:$4 sm:$0xff]   ;;  %v9397_v47 = vld [vmem:[%s13410_s4 + $0x188] ss:$24 sps:$4 sm:$0xff]  }
  0xd6   :  { %1043 = vmatpush1.bf16.msra.mxu1 %v9367_v27  ;;  %981 = vmatprep.subr.bf16.mxu0 %v9368_v28  ;;  %v9396_v46 = vld [vmem:[%s13410_s4 + $0x180] ss:$24 sps:$4 sm:$0xff]   ;;  %v11066_v59 = vld [vmem:[%s13438_s3 + $0x30] sm:$0xff]  ;;  %v10371_v15 = vld [vmem:[%s13438_s3 + $0x48] sm:$0xff] }
  0xd7   :  { %1044 = vmatprep.subr.bf16.mxu1 %v9370_v29  ;;  %v11071_v60 = vld [vmem:[%s13438_s3 + $0x38] sm:$0xff]  ;;  %v11090_v6 = vld [vmem:[%s13438_s3 + $0x50] sm:$0xff]  ;;  %v10370_v13 = vld [vmem:[%s13438_s3 + $0x40] sm:$0xff] }
  0xd8   :  { %223 = vadd.xlane.f32.xlu0 %v222_v10  ;;  %v11095_v7 = vld [vmem:[%s13438_s3 + $0x58] sm:$0xff]  ;;  %v225_v9 = vadd.f32 %v11071_v60, %v11066_v59  ;;  %v9398_v22 = vld [vmem:[%s13410_s4 + $0x1b4] ss:$24 sps:$4 sm:$0xff]   ;;  %v9402_v24 = vld [vmem:[%s13410_s4 + $0x1b0] ss:$24 sps:$4 sm:$0xff]  }
  0xd9   :  { %982 = vmatpush1.bf16.msra.mxu0 %v9372_v30  ;;  %v231_v18 = vadd.f32 %v11095_v7, %v11090_v6  ;;  %v9400_v23 = vld [vmem:[%s13410_s4 + $0x1bc] ss:$24 sps:$4 sm:$0xff]   ;;  %v9403_v25 = vld [vmem:[%s13410_s4 + $0x1b8] ss:$24 sps:$4 sm:$0xff]   ;;  %v9406_v27 = vld [vmem:[%s13410_s4 + $0x1ec] ss:$24 sps:$4 sm:$0xff]  }
  0xda   :  { %1045 = vmatpush1.bf16.msra.mxu1 %v9373_v31  ;;  %983 = vmatprep.subr.bf16.mxu0 %v9374_v32  ;;  %v9404_v26 = vld [vmem:[%s13410_s4 + $0x1e4] ss:$24 sps:$4 sm:$0xff]   ;;  %v9408_v28 = vld [vmem:[%s13410_s4 + $0x1e0] ss:$24 sps:$4 sm:$0xff]   ;;  %v9410_v30 = vld [vmem:[%s13410_s4 + $0x214] ss:$24 sps:$4 sm:$0xff]  }
  0xdb   :  { %1046 = vmatprep.subr.bf16.mxu1 %v9376_v33  ;;  %v9409_v29 = vld [vmem:[%s13410_s4 + $0x1e8] ss:$24 sps:$4 sm:$0xff]   ;;  %v9412_v31 = vld [vmem:[%s13410_s4 + $0x21c] ss:$24 sps:$4 sm:$0xff]   ;;  %v9415_v33 = vld [vmem:[%s13410_s4 + $0x218] ss:$24 sps:$4 sm:$0xff]  }
  0xdc   :  { %229 = vadd.xlane.f32.xlu0 %v228_v11  ;;  %v9414_v32 = vld [vmem:[%s13410_s4 + $0x210] ss:$24 sps:$4 sm:$0xff]  }
  0xdd   :  { %984 = vmatpush1.bf16.msra.mxu0 %v9378_v34  ;;  %v9416_v34 = vld [vmem:[%s13410_s4 + $0x244] ss:$24 sps:$4 sm:$0xff]  }
  0xde   :  { %1047 = vmatpush1.bf16.msra.mxu1 %v9379_v35  ;;  %985 = vmatprep.subr.bf16.mxu0 %v9380_v36  ;;  %v9418_v35 = vld [vmem:[%s13410_s4 + $0x24c] ss:$24 sps:$4 sm:$0xff]   ;;  %v9420_v36 = vld [vmem:[%s13410_s4 + $0x240] ss:$24 sps:$4 sm:$0xff]  }
  0xdf   :  { %1048 = vmatprep.subr.bf16.mxu1 %v9382_v37  ;;  %v9421_v37 = vld [vmem:[%s13410_s4 + $0x248] ss:$24 sps:$4 sm:$0xff]  }
  0xe1   :  { %986 = vmatpush1.bf16.msra.mxu0 %v9384_v38  ;;  %v9422_v38 = vld [vmem:[%s13410_s4 + $0x274] ss:$24 sps:$4 sm:$0xff]  }
  0xe2   :  { %1049 = vmatpush1.bf16.msra.mxu1 %v9385_v39  ;;  %987 = vmatprep.subr.bf16.mxu0 %v9386_v40  ;;  %v9424_v39 = vld [vmem:[%s13410_s4 + $0x27c] ss:$24 sps:$4 sm:$0xff]   ;;  %v9426_v40 = vld [vmem:[%s13410_s4 + $0x270] ss:$24 sps:$4 sm:$0xff]  }
  0xe3   :  { %1050 = vmatprep.subr.bf16.mxu1 %v9388_v41  ;;  %v9427_v41 = vld [vmem:[%s13410_s4 + $0x278] ss:$24 sps:$4 sm:$0xff]  }
  0xe5   :  { %988 = vmatpush1.bf16.msra.mxu0 %v9390_v42  ;;  %v9428_v42 = vld [vmem:[%s13410_s4 + $0x2a4] ss:$24 sps:$4 sm:$0xff]  }
  0xe6   :  { %1051 = vmatpush1.bf16.msra.mxu1 %v9391_v43  ;;  %989 = vmatprep.subr.bf16.mxu0 %v9392_v44  ;;  %v9430_v43 = vld [vmem:[%s13410_s4 + $0x2ac] ss:$24 sps:$4 sm:$0xff]   ;;  %v9432_v44 = vld [vmem:[%s13410_s4 + $0x2a0] ss:$24 sps:$4 sm:$0xff]  }
  0xe7   :  { %1052 = vmatprep.subr.bf16.mxu1 %v9394_v45  ;;  %v9433_v45 = vld [vmem:[%s13410_s4 + $0x2a8] ss:$24 sps:$4 sm:$0xff]  }
  0xe9   :  { %990 = vmatpush1.bf16.msra.mxu0 %v9396_v46  ;;  %v9434_v46 = vld [vmem:[%s13410_s4 + $0x2d4] ss:$24 sps:$4 sm:$0xff]  }
  0xea   :  { %1053 = vmatpush1.bf16.msra.mxu1 %v9397_v47  ;;  %991 = vmatprep.subr.bf16.mxu0 %v9398_v22  ;;  %v9436_v47 = vld [vmem:[%s13410_s4 + $0x2dc] ss:$24 sps:$4 sm:$0xff]  }
  0xeb   :  { %1054 = vmatprep.subr.bf16.mxu1 %v9400_v23 }
  0xed   :  { %992 = vmatpush1.bf16.msra.mxu0 %v9402_v24 }
  0xee   :  { %1055 = vmatpush1.bf16.msra.mxu1 %v9403_v25  ;;  %993 = vmatprep.subr.bf16.mxu0 %v9404_v26 }
  0xef   :  { %1056 = vmatprep.subr.bf16.mxu1 %v9406_v27 }
  0xf1   :  { %994 = vmatpush1.bf16.msra.mxu0 %v9408_v28 }
  0xf2   :  { %1057 = vmatpush1.bf16.msra.mxu1 %v9409_v29  ;;  %995 = vmatprep.subr.bf16.mxu0 %v9410_v30 }
  0xf3   :  { %1058 = vmatprep.subr.bf16.mxu1 %v9412_v31 }
  0xf5   :  { %996 = vmatpush1.bf16.msra.mxu0 %v9414_v32 }
  0xf6   :  { %1059 = vmatpush1.bf16.msra.mxu1 %v9415_v33  ;;  %997 = vmatprep.subr.bf16.mxu0 %v9416_v34 }
  0xf7   :  { %1060 = vmatprep.subr.bf16.mxu1 %v9418_v35 }
  0xf9   :  { %998 = vmatpush1.bf16.msra.mxu0 %v9420_v36 }
  0xfa   :  { %1061 = vmatpush1.bf16.msra.mxu1 %v9421_v37  ;;  %999 = vmatprep.subr.bf16.mxu0 %v9422_v38  ;;  %v9440_v37 = vld [vmem:[%s13410_s4 + $0x10] ss:$24 sps:$4 sm:$0xff]   ;;  %v9445_v38 = vld [vmem:[%s13410_s4 + $0x44] ss:$24 sps:$4 sm:$0xff]  }
  0xfb   :  { %1062 = vmatprep.subr.bf16.mxu1 %v9424_v39  ;;  %v9443_v39 = vld [vmem:[%s13410_s4 + $0x40] ss:$24 sps:$4 sm:$0xff]  }
  0xfd   :  { %1000 = vmatpush1.bf16.msra.mxu0 %v9426_v40  ;;  %v9448_v40 = vld [vmem:[%s13410_s4 + $0x74] ss:$24 sps:$4 sm:$0xff]  }
  0xfe   :  { %1063 = vmatpush1.bf16.msra.mxu1 %v9427_v41  ;;  %1001 = vmatprep.subr.bf16.mxu0 %v9428_v42  ;;  %v9446_v41 = vld [vmem:[%s13410_s4 + $0x70] ss:$24 sps:$4 sm:$0xff]   ;;  %v9451_v42 = vld [vmem:[%s13410_s4 + $0xa4] ss:$24 sps:$4 sm:$0xff]  }
  0xff   :  { %1064 = vmatprep.subr.bf16.mxu1 %v9430_v43  ;;  %v9449_v43 = vld [vmem:[%s13410_s4 + $0xa0] ss:$24 sps:$4 sm:$0xff]  }
 0x101   :  { %1002 = vmatpush1.bf16.msra.mxu0 %v9432_v44  ;;  %v9454_v44 = vld [vmem:[%s13410_s4 + $0xd4] ss:$24 sps:$4 sm:$0xff]  }
 0x102   :  { %1065 = vmatpush1.bf16.msra.mxu1 %v9433_v45  ;;  %1003 = vmatprep.subr.bf16.mxu0 %v9434_v46  ;;  %v9452_v45 = vld [vmem:[%s13410_s4 + $0xd0] ss:$24 sps:$4 sm:$0xff]   ;;  %v9457_v46 = vld [vmem:[%s13410_s4 + $0x104] ss:$24 sps:$4 sm:$0xff]  }
 0x103   :  { %1066 = vmatprep.subr.bf16.mxu1 %v9436_v47  ;;  %v9455_v47 = vld [vmem:[%s13410_s4 + $0x100] ss:$24 sps:$4 sm:$0xff]  }
 0x15d   :  { %v218_v48 = vpop.xlane.xlu0 %217 }
 0x15e   :  { %v235_v49 = vmul.f32 0.00390625, %v218_v48  ;;  %v9438_v48 = vld [vmem:[%s13410_s4 + $0x2d0] ss:$24 sps:$4 sm:$0xff]  }
 0x15f   :  { %1004 = vmatpush1.bf16.msra.mxu0 %v9438_v48  ;;  %v9460_v48 = vld [vmem:[%s13410_s4 + $0x134] ss:$24 sps:$4 sm:$0xff]  }
 0x160   :  { %v11048_v50 = vsub.f32 %v10906_v0, %v235_v49  ;;  %v11051_v51 = vsub.f32 %v10911_v1, %v235_v49  ;;  %v9439_v49 = vld [vmem:[%s13410_s4 + $0x2d8] ss:$24 sps:$4 sm:$0xff]  }
 0x161   :  { %v221_v52 = vpop.xlane.xlu0 %220  ;;  %1067 = vmatpush1.bf16.msra.mxu1 %v9439_v49  ;;  %v9458_v49 = vld [vmem:[%s13410_s4 + $0x130] ss:$24 sps:$4 sm:$0xff]  }
 0x162   :  { %v236_v53 = vmul.f32 0.00390625, %v221_v52  ;;  %v253_v54 = vmul.f32 %v11048_v50, %v11048_v50  ;;  %v254_v55 = vmul.f32 %v11051_v51, %v11051_v51  ;;  %v9442_v52 = vld [vmem:[%s13410_s4 + $0x14] ss:$24 sps:$4 sm:$0xff]  }
 0x163   :  { %1099 = vmatprep.subr.bf16.mxu0 %v9442_v52  ;;  %v9463_v52 = vld [vmem:[%s13410_s4 + $0x164] ss:$24 sps:$4 sm:$0xff]  }
 0x164   :  { %v11058_v56 = vsub.f32 %v10916_v2, %v236_v53  ;;  %v11061_v57 = vsub.f32 %v10923_v4, %v236_v53  ;;  %v265_v58 = vadd.f32 %v254_v55, %v253_v54  ;;  %v10368_v2 = vld [vmem:[%s13438_s3 + $0x20] sm:$0xff]  ;;  %v10369_v4 = vld [vmem:[%s13438_s3 + $0x28] sm:$0xff] }
 0x165   :  { %v224_v61 = vpop.xlane.xlu0 %223 }
 0x166   :  { %266 = vadd.xlane.f32.xlu1 %v265_v58  ;;  %v255_v62 = vmul.f32 %v11058_v56, %v11058_v56  ;;  %v256_v63 = vmul.f32 %v11061_v57, %v11061_v57  ;;  %v237_v0 = vmul.f32 0.00390625, %v224_v61  ;;  %v13428_v61 = vlaneseq }
 0x168   :  { %v268_v1 = vadd.f32 %v256_v63, %v255_v62  ;;  %v11080_v3 = vsub.f32 %v10368_v2, %v237_v0  ;;  %v11085_v5 = vsub.f32 %v10369_v4, %v237_v0 }
 0x169   :  { %v230_v8 = vpop.xlane.xlu0 %229 }
 0x16a   :  { %269 = vadd.xlane.f32.xlu1 %v268_v1  ;;  %v239_v10 = vmul.f32 0.00390625, %v230_v8  ;;  %v257_v11 = vmul.f32 %v11080_v3, %v11080_v3  ;;  %v258_v12 = vmul.f32 %v11085_v5, %v11085_v5  ;;  %v11207_v1 = vshrl.u32 %v13428_v61, 7 }
 0x16c   :  { %v11106_v14 = vsub.f32 %v10370_v13, %v239_v10  ;;  %v11111_v16 = vsub.f32 %v10371_v15, %v239_v10  ;;  %v271_v17 = vadd.f32 %v258_v12, %v257_v11  ;;  %v11216_v10 = vsub.s32 1, %v11207_v1 }
 0x16d   :  { %v11219_v11 = vsub.s32 0, %v11207_v1 }
 0x16e   :  { %226 = vadd.xlane.f32.xlu1 %v225_v9  ;;  %272 = vadd.xlane.f32.xlu0 %v271_v17  ;;  %v261_v19 = vmul.f32 %v11106_v14, %v11106_v14  ;;  %v262_v20 = vmul.f32 %v11111_v16, %v11111_v16  ;;  %v214_v17 = vld [vmem:[#allocation2] sm:$0x3] }
 0x16f   :  { %v11233_v22 = vrot.slane %v214_v17, %v11216_v10  ;;  %v11237_v24 = vrot.slane %v214_v17, %v11219_v11  ;;  %v9479_v17 = vld [vmem:[%s13410_s4 + $0x280] ss:$24 sps:$4 sm:$0xff]  }
 0x170   :  { %v277_v21 = vadd.f32 %v262_v20, %v261_v19  ;;  %v215_v20 = vld [vmem:[#allocation4] sm:$0x3] }
 0x171   :  { %v11244_v27 = vrot.slane %v215_v20, %v11216_v10 }
 0x172   :  { %232 = vadd.xlane.f32.xlu1 %v231_v18  ;;  %278 = vadd.xlane.f32.xlu0 %v277_v21 }
 0x1f3   :  { %v267_v53 = vpop.xlane.xlu1 %266 }
 0x1f4   :  { %v283_v54 = vmul.f32 0.00390625, %v267_v53  ;;  %v9461_v53 = vld [vmem:[%s13410_s4 + $0x160] ss:$24 sps:$4 sm:$0xff]  }
 0x1f6   :  { %v289_v55 = vadd.f32 1e-12, %v283_v54  ;;  %v9466_v54 = vld [vmem:[%s13410_s4 + $0x194] ss:$24 sps:$4 sm:$0xff]  }
 0x1f7   :  { %v270_v58 = vpop.xlane.xlu1 %269 }
 0x1f8   :  { %10112 = vrsqrt.f32 %v289_v55  ;;  %v284_v62 = vmul.f32 0.00390625, %v270_v58  ;;  %v9464_v55 = vld [vmem:[%s13410_s4 + $0x190] ss:$24 sps:$4 sm:$0xff]   ;;  %v9469_v58 = vld [vmem:[%s13410_s4 + $0x1c4] ss:$24 sps:$4 sm:$0xff]  }
 0x1fa   :  { %v290_v63 = vadd.f32 1e-12, %v284_v62  ;;  %v9467_v62 = vld [vmem:[%s13410_s4 + $0x1c0] ss:$24 sps:$4 sm:$0xff]  }
 0x1fb   :  { %v227_v0 = vpop.xlane.xlu1 %226 }
 0x1fc   :  { %10114 = vrsqrt.f32 %v290_v63  ;;  %v238_v2 = vmul.f32 0.00390625, %v227_v0  ;;  %v9472_v63 = vld [vmem:[%s13410_s4 + $0x1f4] ss:$24 sps:$4 sm:$0xff]   ;;  %v9470_v0 = vld [vmem:[%s13410_s4 + $0x1f0] ss:$24 sps:$4 sm:$0xff]  }
 0x1fe   :  { %v11210_v4 = vsub.f32 %v11066_v59, %v238_v2  ;;  %v11213_v8 = vsub.f32 %v11071_v60, %v238_v2  ;;  %v9475_v2 = vld [vmem:[%s13410_s4 + $0x224] ss:$24 sps:$4 sm:$0xff]  }
 0x1ff   :  { %v233_v9 = vpop.xlane.xlu1 %232 }
 0x200   :  { %v240_v12 = vmul.f32 0.00390625, %v233_v9  ;;  %v259_v13 = vmul.f32 %v11210_v4, %v11210_v4  ;;  %v260_v15 = vmul.f32 %v11213_v8, %v11213_v8  ;;  %v9473_v9 = vld [vmem:[%s13410_s4 + $0x220] ss:$24 sps:$4 sm:$0xff]  }
 0x202   :  { %v10113_v59 = vpop.eup %10112  ;;  %v11226_v18 = vsub.f32 %v11090_v6, %v240_v12  ;;  %v11229_v60 = vsub.f32 %v11095_v7, %v240_v12  ;;  %v274_v19 = vadd.f32 %v260_v15, %v259_v13  ;;  %v9478_v12 = vld [vmem:[%s13410_s4 + $0x254] ss:$24 sps:$4 sm:$0xff]   ;;  %v9476_v13 = vld [vmem:[%s13410_s4 + $0x250] ss:$24 sps:$4 sm:$0xff]   ;;  %v9481_v15 = vld [vmem:[%s13410_s4 + $0x284] ss:$24 sps:$4 sm:$0xff]  }
 0x203   :  { %v302_v21 = vmul.f32 %v10113_v59, %v11051_v51  ;;  %v301_v23 = vmul.f32 %v10113_v59, %v11048_v50  ;;  %v11247_v51 = vrot.slane %v215_v20, %v11219_v11  ;;  %v9484_v59 = vld [vmem:[%s13410_s4 + $0x2b4] ss:$24 sps:$4 sm:$0xff]   ;;  %v9487_v20 = vld [vmem:[%s13410_s4 + $0x2e4] ss:$24 sps:$4 sm:$0xff]  }
 0x204   :  { %275 = vadd.xlane.f32.xlu1 %v274_v19  ;;  %v263_v6 = vmul.f32 %v11226_v18, %v11226_v18  ;;  %v264_v7 = vmul.f32 %v11229_v60, %v11229_v60  ;;  %v9482_v19 = vld [vmem:[%s13410_s4 + $0x2b0] ss:$24 sps:$4 sm:$0xff]  }
 0x205   :  { %v325_v28 = vmul.f32 %v11233_v22, %v302_v21  ;;  %v324_v30 = vmul.f32 %v11237_v24, %v301_v23  ;;  %v9485_v21 = vld [vmem:[%s13410_s4 + $0x2e0] ss:$24 sps:$4 sm:$0xff]   ;;  %v13431_v23 = vmov 0.0  }
 0x206   :  { %v10115_v25 = vpop.eup %10114  ;;  %v280_v26 = vadd.f32 %v264_v7, %v263_v6  ;;  %8973 = vmatprep.subr.bf16.mxu1 %v13431_v23  ;;  %v273_v6 = vpop.xlane.xlu0 %272 }
 0x207   :  { %v304_v50 = vmul.f32 %v10115_v25, %v11061_v57  ;;  %v303_v29 = vmul.f32 %v10115_v25, %v11058_v56  ;;  %v11256_v33 = vadd.f32 %v11244_v27, %v325_v28  ;;  %v11262_v35 = vadd.f32 %v11247_v51, %v324_v30 }
 0x208   :  { %281 = vadd.xlane.f32.xlu1 %v280_v26  ;;  %v285_v7 = vmul.f32 0.00390625, %v273_v6 }
 0x209   :  { %v327_v31 = vmul.f32 %v11233_v22, %v304_v50  ;;  %v326_v32 = vmul.f32 %v11237_v24, %v303_v29 }
 0x20a   :  { %v279_v25 = vpop.xlane.xlu0 %278  ;;  %v291_v26 = vadd.f32 1e-12, %v285_v7 }
 0x20b   :  { %v11259_v34 = vadd.f32 %v11244_v27, %v327_v31  ;;  %v11265_v57 = vadd.f32 %v11247_v51, %v326_v32  ;;  %v287_v50 = vmul.f32 0.00390625, %v279_v25 }
 0x20c   :  { %10116 = vrsqrt.f32 %v291_v26 }
 0x20d   :  { %v11269_v56 = vpack.c.bf16 %v11259_v34, %v11256_v33  ;;  %v11273_v36 = vpack.c.bf16 %v11265_v57, %v11262_v35  ;;  %v293_v28 = vadd.f32 1e-12, %v287_v50 }
 0x20f   :  { %1005 = vmatprep.mubr.bf16.mxu0 %v11269_v56  ;;  %1068 = vmatprep.mubr.bf16.mxu1 %v11269_v56  ;;  %10118 = vrsqrt.f32 %v293_v28 }
 0x210   :  { %1006 = vmatmul.mubr.bf16.vlgmr.msra.gmra.mrb[0].mxu0 %v11273_v36  ;;  %1069 = vmatmul.mubr.bf16.vlgmr.msra.gmra.mrb[0].mxu1 %v11273_v36 }
 0x211   :  { %1100 = vmatpush1.bf16.msra.mxu0 %v9440_v37 }
 0x212   :  { %1101 = vmatprep.subr.bf16.mxu0 %v9445_v38 }
 0x215   :  { %1102 = vmatpush1.bf16.msra.mxu0 %v9443_v39 }
 0x216   :  { %1103 = vmatprep.subr.bf16.mxu0 %v9448_v40  ;;  %v10117_v39 = vpop.eup %10116 }
 0x217   :  { %v306_v40 = vmul.f32 %v10117_v39, %v11085_v5 }
 0x219   :  { %1104 = vmatpush1.bf16.msra.mxu0 %v9446_v41  ;;  %v305_v41 = vmul.f32 %v10117_v39, %v11080_v3 }
 0x21a   :  { %1105 = vmatprep.subr.bf16.mxu0 %v9451_v42  ;;  %v10119_v42 = vpop.eup %10118 }
 0x21d   :  { %1106 = vmatpush1.bf16.msra.mxu0 %v9449_v43 }
 0x21e   :  { %1107 = vmatprep.subr.bf16.mxu0 %v9454_v44  ;;  %v329_v44 = vmul.f32 %v11233_v22, %v306_v40 }
 0x220   :  { %v11384_v5 = vadd.f32 %v11244_v27, %v329_v44  ;;  %v13430_v44 = vsub.s32 4, %v11207_v1 }
 0x221   :  { %1108 = vmatpush1.bf16.msra.mxu0 %v9452_v45  ;;  %v328_v45 = vmul.f32 %v11237_v24, %v305_v41 }
 0x222   :  { %1109 = vmatprep.subr.bf16.mxu0 %v9457_v46  ;;  %v310_v46 = vmul.f32 %v10119_v42, %v11111_v16 }
 0x223   :  { %v11387_v3 = vadd.f32 %v11247_v51, %v328_v45 }
 0x225   :  { %1110 = vmatpush1.bf16.msra.mxu0 %v9455_v47 }
 0x226   :  { %1111 = vmatprep.subr.bf16.mxu0 %v9460_v48 }
 0x229   :  { %1112 = vmatpush1.bf16.msra.mxu0 %v9458_v49 }
 0x22a   :  { %1113 = vmatprep.subr.bf16.mxu0 %v9463_v52 }
 0x22d   :  { %1114 = vmatpush1.bf16.msra.mxu0 %v9461_v53 }
 0x22e   :  { %1115 = vmatprep.subr.bf16.mxu0 %v9466_v54  ;;  %v333_v54 = vmul.f32 %v11233_v22, %v310_v46 }
 0x231   :  { %1116 = vmatpush1.bf16.msra.mxu0 %v9464_v55 }
 0x232   :  { %1117 = vmatprep.subr.bf16.mxu0 %v9469_v58  ;;  %v309_v58 = vmul.f32 %v10119_v42, %v11106_v14 }
 0x234   :  { %v332_v14 = vmul.f32 %v11237_v24, %v309_v58 }
 0x235   :  { %1118 = vmatpush1.bf16.msra.mxu0 %v9467_v62 }
 0x236   :  { %1119 = vmatprep.subr.bf16.mxu0 %v9472_v63 }
 0x239   :  { %1120 = vmatpush1.bf16.msra.mxu0 %v9470_v0 }
 0x23a   :  { %1121 = vmatprep.subr.bf16.mxu0 %v9475_v2 }
 0x23d   :  { %1122 = vmatpush1.bf16.msra.mxu0 %v9473_v9  ;;  %v11406_v9 = vadd.f32 %v11244_v27, %v333_v54 }
 0x23e   :  { %1123 = vmatprep.subr.bf16.mxu0 %v9478_v12 }
 0x241   :  { %1124 = vmatpush1.bf16.msra.mxu0 %v9476_v13 }
 0x242   :  { %1125 = vmatprep.subr.bf16.mxu0 %v9481_v15 }
 0x245   :  { %1126 = vmatpush1.bf16.msra.mxu0 %v9479_v17 }
 0x246   :  { %1127 = vmatprep.subr.bf16.mxu0 %v9484_v59 }
 0x249   :  { %1128 = vmatpush1.bf16.msra.mxu0 %v9482_v19 }
 0x24a   :  { %1129 = vmatprep.subr.bf16.mxu0 %v9487_v20 }
 0x24d   :  { %1130 = vmatpush1.bf16.msra.mxu0 %v9485_v21 }
 0x24e   :  { %8955 = vmatprep.subr.bf16.mxu0 %v13431_v23 }
 0x291   :  { %v276_v29 = vpop.xlane.xlu1 %275 }
 0x292   :  { %v286_v30 = vmul.f32 0.00390625, %v276_v29 }
 0x294   :  { %v292_v31 = vadd.f32 1e-12, %v286_v30 }
 0x295   :  { %v282_v32 = vpop.xlane.xlu1 %281 }
 0x296   :  { %10120 = vrsqrt.f32 %v292_v31  ;;  %v288_v37 = vmul.f32 0.00390625, %v282_v32 }
 0x298   :  { %v294_v38 = vadd.f32 1e-12, %v288_v37 }
 0x29a   :  { %10122 = vrsqrt.f32 %v294_v38 }
 0x2a0   :  { %v10121_v43 = vpop.eup %10120 }
 0x2a1   :  { %v308_v47 = vmul.f32 %v10121_v43, %v11213_v8  ;;  %v307_v48 = vmul.f32 %v10121_v43, %v11210_v4 }
 0x2a3   :  { %v331_v49 = vmul.f32 %v11233_v22, %v308_v47  ;;  %v330_v52 = vmul.f32 %v11237_v24, %v307_v48  ;;  %v13429_v47 = vsub.s32 5, %v11207_v1 }
 0x2a4   :  { %v10123_v53 = vpop.eup %10122 }
 0x2a5   :  { %v11391_v55 = vadd.f32 %v11244_v27, %v331_v49  ;;  %v11394_v16 = vadd.f32 %v11247_v51, %v330_v52  ;;  %v312_v4 = vmul.f32 %v10123_v53, %v11229_v60  ;;  %v311_v8 = vmul.f32 %v10123_v53, %v11226_v18 }
 0x2a7   :  { %v458_v62 = vpack.c.bf16 %v11391_v55, %v11384_v5  ;;  %v457_v63 = vpack.c.bf16 %v11394_v16, %v11387_v3  ;;  %v335_v0 = vmul.f32 %v11233_v22, %v312_v4  ;;  %v334_v2 = vmul.f32 %v11237_v24, %v311_v8 }
 0x2a8   :  { %v11418_v22 = vadd.f32 %v11247_v51, %v332_v14  ;;  %v11429_v24 = vsub.s32 2, %v11207_v1 }
 0x2a9   :  { %1015 = vmatprep.mubr.bf16.mxu0 %v458_v62  ;;  %1078 = vmatprep.mubr.bf16.mxu1 %v458_v62  ;;  %v11409_v60 = vadd.f32 %v11244_v27, %v335_v0  ;;  %v11415_v12 = vadd.f32 %v11247_v51, %v334_v2  ;;  %v11434_v27 = vld [vmem:[%s13411_s5] sm:$0x3f] }
 0x2aa   :  { %1016 = vmatmul.mubr.bf16.gmra.mrb[4].mxu0 %v457_v63  ;;  %1079 = vmatmul.mubr.bf16.gmra.mrb[4].mxu1 %v457_v63  ;;  %13439 = vst [vmem:[#allocation25_spill] sm:$0xff] %v11429_v24  ;;  %v11438_v51 = vrot.slane %v11434_v27, %v11429_v24  ;;  %v11447_v19 = vrot.slane %v11434_v27, %v11219_v11 }
 0x2ab   :  { %v460_v18 = vpack.c.bf16 %v11409_v60, %v11406_v9  ;;  %v459_v13 = vpack.c.bf16 %v11415_v12, %v11418_v22  ;;  %v482_v52 = vrot.slane %v11434_v27, %v13430_v44  ;;  %v486_v53 = vrot.slane %v11434_v27, %v13429_v47 }
 0x2ad   :  { %1025 = vmatprep.mubr.bf16.mxu0 %v460_v18  ;;  %1088 = vmatprep.mubr.bf16.mxu1 %v460_v18 }
 0x2b2   :  { %1026 = vmatmul.mubr.bf16.gmra.mrb[8].mxu0 %v459_v13  ;;  %1089 = vmatmul.mubr.bf16.gmra.mrb[8].mxu1 %v459_v13 }
 0x2b3   :  { %1131 = vmatprep.mubr.bf16.mxu0 %v11269_v56  ;;  %8975 = vmatprep.mubr.msk.bf16.mxu1 %vm10652_vm0, %v13431_v23 }
 0x2ba   :  { %1132 = vmatmul.mubr.bf16.vlgmr.msra.gmra.mrb[12].mxu0 %v11273_v36 }
 0x2bb   :  { %1141 = vmatprep.mubr.bf16.mxu0 %v458_v62 }
 0x2c2   :  { %1142 = vmatmul.mubr.bf16.gmra.mrb[16].mxu0 %v457_v63 }
 0x2c3   :  { %1151 = vmatprep.mubr.bf16.mxu0 %v460_v18 }
 0x2ca   :  { %1152 = vmatmul.mubr.bf16.gmra.mrb[20].mxu0 %v459_v13 }
 0x2cb   :  { %8957 = vmatprep.mubr.msk.bf16.mxu0 %vm10652_vm0, %v13431_v23 }
 0x2e3   :  { %v1007_v56 = vpop.f32.mrb[0].mxu0  ;;  %v1070_v36 = vpop.f32.mrb[0].mxu1 }
 0x2e4   :  { %v1071_v15 = vadd.f32 %v1070_v36, %v11438_v51  ;;  %v11441_v17 = vpop.f32.mrb[1].mxu0  ;;  %v11443_v59 = vpop.f32.mrb[1].mxu1  ;;  %v1008_v26 = vadd.f32 %v1007_v56, %v11447_v19 }
 0x2e5   :  { %v11449_v20 = vpop.f32.mrb[2].mxu0  ;;  %v11451_v21 = vpop.f32.mrb[2].mxu1 }
 0x2e6   :  { %v1164_v6 = vpack.c.bf16 %v1071_v15, %v1071_v15  ;;  %v11453_v7 = vpop.f32.mrb[3].mxu0  ;;  %v11455_v25 = vpop.f32.mrb[3].mxu1  ;;  %v1163_v50 = vpack.c.bf16 %v1008_v26, %v1008_v26 }
 0x2e8   :  { %8956 = vmatpush3.bf16.xpose.msra.mxu0 %v1164_v6 }
 0x2e9   :  { %8961 = vmatprep.subr.bf16.mxu0 %v13431_v23 }
 0x2ef   :  { %8958 = vmatmul.mubr.bf16.vlgmr.msra.gmra.mrb[24].mxu0 %v1163_v50 }
 0x2f0   :  { %8963 = vmatprep.mubr.msk.bf16.mxu0 %vm10652_vm0, %v13431_v23 }
 0x37d   :  { %v11461_v28 = vpop.f32.mrb[4].mxu0  ;;  %v11463_v29 = vpop.f32.mrb[4].mxu1 }
 0x37e   :  { %v11465_v30 = vpop.f32.mrb[5].mxu0  ;;  %v11467_v31 = vpop.f32.mrb[5].mxu1 }
 0x37f   :  { %v11469_v32 = vpop.f32.mrb[6].mxu0  ;;  %v11471_v37 = vpop.f32.mrb[6].mxu1 }
 0x380   :  { %v11473_v38 = vpop.f32.mrb[7].mxu0  ;;  %v11475_v39 = vpop.f32.mrb[7].mxu1 }
 0x385   :  { %v11477_v40 = vpop.f32.mrb[8].mxu0  ;;  %v11479_v41 = vpop.f32.mrb[8].mxu1 }
 0x386   :  { %v11481_v42 = vpop.f32.mrb[9].mxu0  ;;  %v11483_v43 = vpop.f32.mrb[9].mxu1 }
 0x387   :  { %v11486_v45 = vpop.f32.mrb[10].mxu0  ;;  %v11488_v46 = vpop.f32.mrb[10].mxu1 }
 0x388   :  { %v11491_v48 = vpop.f32.mrb[11].mxu0  ;;  %v11493_v49 = vpop.f32.mrb[11].mxu1 }
 0x38d   :  { %v1133_v54 = vpop.f32.mrb[12].mxu0 }
 0x38e   :  { %v1134_v4 = vadd.f32 %v1133_v54, %v482_v52  ;;  %v1135_v8 = vpop.f32.mrb[13].mxu0 }
 0x38f   :  { %v1136_v58 = vadd.f32 %v1135_v8, %v486_v53  ;;  %v1137_v62 = vpop.f32.mrb[14].mxu0 }
 0x390   :  { %v1220_v63 = vpack.c.bf16 %v1134_v4, %v1134_v4  ;;  %v11501_v0 = vadd.f32 %v1137_v62, %v482_v52  ;;  %v1139_v2 = vpop.f32.mrb[15].mxu0 }
 0x391   :  { %v1324_v14 = vpack.c.bf16 %v1136_v58, %v1136_v58  ;;  %v11503_v18 = vadd.f32 %v1139_v2, %v486_v53 }
 0x392   :  { %v1226_v13 = vsel %vm1224_vm1, %v1220_v63, 0 }
 0x393   :  { %v1329_v56 = vsel %vm1224_vm1, %v1324_v14, 0  ;;  %8962 = vmatpush3.bf16.msra.mxu0 %v1226_v13 }
 0x394   :  { %8974 = vmatpush3.bf16.msra.mxu1 %v1329_v56  ;;  %8967 = vmatprep.subr.bf16.mxu0 %v13431_v23 }
 0x395   :  { %v1143_v36 = vpop.f32.mrb[16].mxu0  ;;  %8979 = vmatprep.subr.bf16.mxu1 %v13431_v23 }
 0x396   :  { %v11509_v15 = vadd.f32 %v1143_v36, %v482_v52  ;;  %v1145_v6 = vpop.f32.mrb[17].mxu0 }
 0x397   :  { %v11511_v26 = vadd.f32 %v1145_v6, %v486_v53  ;;  %v1147_v50 = vpop.f32.mrb[18].mxu0 }
 0x398   :  { %v11513_v54 = vadd.f32 %v1147_v50, %v482_v52  ;;  %v1149_v4 = vpop.f32.mrb[19].mxu0  ;;  %v11528_v50 = vld [vmem:[%s13440_s13] sm:$0xff] }
 0x399   :  { %v11515_v8 = vadd.f32 %v1149_v4, %v486_v53 }
 0x39d   :  { %v1153_v58 = vpop.f32.mrb[20].mxu0 }
 0x39e   :  { %v11517_v62 = vadd.f32 %v1153_v58, %v482_v52  ;;  %v1155_v63 = vpop.f32.mrb[21].mxu0 }
 0x39f   :  { %v11519_v2 = vadd.f32 %v1155_v63, %v486_v53  ;;  %v1157_v14 = vpop.f32.mrb[22].mxu0 }
 0x3a0   :  { %v11521_v13 = vadd.f32 %v1157_v14, %v482_v52  ;;  %v1159_v56 = vpop.f32.mrb[23].mxu0 }
 0x3a1   :  { %v11523_v36 = vadd.f32 %v1159_v56, %v486_v53 }
 0x3c2   :  { %v1199_v6 = vpop.f32.mrb[24].mxu0 }
 0x3c3   :  { %v1205_v4 = vmul.f32 0.088388346, %v1199_v6  ;;  %v8959_v61 = vpop.f32.mrb[25].mxu0 }
 0x3c4   :  { %v1202_v47 = vpop.f32.mrb[26].mxu0  ;;  %v11534_v61 = vsub.s32 3, %v11207_v1 }
 0x3c5   :  { %v8960_v58 = vpop.f32.mrb[27].mxu0  ;;  %v1206_v63 = vadd.f32 %v1205_v4, %v11528_v50 }
 0x3c6   :  { %v11538_v47 = vrot.slane %v11434_v27, %v11534_v61  ;;  %v11544_v58 = vrot.slane %v11434_v27, %v11216_v10  ;;  %v1018_v27 = vadd.f32 %v11461_v28, %v11447_v19  ;;  %v1085_v28 = vadd.f32 %v11471_v37, %v11438_v51 }
 0x3c7   :  { %v1208_v44 = vsel %vm1207_vm2, %v1206_v63, -inf }
 0x3c8   :  { %1209 = vmax.xlane.f32.xlu0 %v1208_v44  ;;  %v1073_v44 = vadd.f32 %v11443_v59, %v11538_v47  ;;  %v1081_v59 = vadd.f32 %v11463_v29, %v11438_v51  ;;  %v1020_v29 = vadd.f32 %v11465_v30, %v11544_v58  ;;  %v1087_v30 = vadd.f32 %v11475_v39, %v11538_v47 }
 0x3c9   :  { %v1024_v37 = vadd.f32 %v11473_v38, %v11544_v58  ;;  %v1028_v39 = vadd.f32 %v11477_v40, %v11447_v19  ;;  %v1093_v38 = vadd.f32 %v11483_v43, %v11538_v47  ;;  %v1095_v40 = vadd.f32 %v11488_v46, %v11438_v51 }
 0x3ca   :  { %v1032_v43 = vadd.f32 %v11486_v45, %v11447_v19  ;;  %v1034_v46 = vadd.f32 %v11491_v48, %v11544_v58 }
 0x455   :  { %v1210_v52 = vpop.xlane.xlu0 %1209 }
 0x456   :  { %v1211_v14 = vsub.f32 %v1206_v63, %v1210_v52  ;;  %v1010_v52 = vadd.f32 %v11441_v17, %v11544_v58  ;;  %v1083_v17 = vadd.f32 %v11467_v31, %v11538_v47  ;;  %v1022_v31 = vadd.f32 %v11469_v32, %v11447_v19 }
 0x457   :  { %v1091_v32 = vadd.f32 %v11479_v41, %v11438_v51  ;;  %v1030_v41 = vadd.f32 %v11481_v42, %v11544_v58  ;;  %v1097_v42 = vadd.f32 %v11493_v49, %v11538_v47 }
 0x458   :  { %v1212_v53 = vmul.f32 1.442695, %v1211_v14  ;;  %v1268_v14 = vpack.c.bf16 %v1010_v52, %v1010_v52  ;;  %v1892_v52 = vpack.c.bf16 %v1024_v37, %v1024_v37 }
 0x45a   :  { %10124 = vpow2.f32 %v1212_v53  ;;  %v1582_v53 = vpack.c.bf16 %v1081_v59, %v1081_v59  ;;  %v1998_v59 = vpack.c.bf16 %v1091_v32, %v1091_v32 }
 0x464   :  { %v10125_v56 = vpop.eup %10124 }
 0x465   :  { %v1214_v23 = vsel %vm1207_vm2, %v10125_v56, 0.0 }
 0x466   :  { %1215 = vadd.xlane.f32.xlu1 %v1214_v23  ;;  %v1269_v23 = vpack.c.bf16 %v1073_v44, %v1073_v44  ;;  %v1684_v44 = vpack.c.bf16 %v1020_v29, %v1020_v29  ;;  %v2308_v29 = vpack.c.bf16 %v1034_v46, %v1034_v46 }
 0x4f3   :  { %v1216_v24 = vpop.xlane.xlu1 %1215 }
 0x4f4   :  { %10126 = vrcp.f32 %v1216_v24  ;;  %v13441_v24 = vmov 0.0  }
 0x4fe   :  { %v10127_v6 = vpop.eup %10126 }
 0x4ff   :  { %v1218_v4 = vmul.f32 %v10127_v6, %v10125_v56  ;;  %v1581_v56 = vpack.c.bf16 %v1018_v27, %v1018_v27  ;;  %v1685_v6 = vpack.c.bf16 %v1083_v17, %v1083_v17  ;;  %v2100_v27 = vpack.c.bf16 %v1030_v41, %v1030_v41 }
 0x500   :  { %v2206_v17 = vpack.c.bf16 %v1095_v40, %v1095_v40 }
 0x501   :  { %v1219_v63 = vpack.c.bf16 %v1218_v4, %v1218_v4  ;;  %v1790_v4 = vpack.c.bf16 %v1085_v28, %v1085_v28 }
 0x503   :  { %8964 = vmatmul.mubr.msk.bf16.vlgmr.msra.gmra.mrb[28].mxu0 %vm1207_vm2, %v1219_v63  ;;  %v1789_v63 = vpack.c.bf16 %v1022_v31, %v1022_v31 }
 0x504   :  { %8968 = vmatpush3.bf16.xpose.msra.mxu0 %v1269_v23  ;;  %8969 = vmatprep.mubr.msk.bf16.mxu0 %vm10652_vm0, %v13441_v24  ;;  %v1893_v23 = vpack.c.bf16 %v1087_v30, %v1087_v30 }
 0x505   :  { %9003 = vmatprep.subr.bf16.mxu0 %v13441_v24 }
 0x50b   :  { %8970 = vmatmul.mubr.bf16.vlgmr.msra.gmra.mrb[32].mxu0 %v1268_v14  ;;  %v1997_v14 = vpack.c.bf16 %v1028_v39, %v1028_v39 }
 0x50c   :  { %9004 = vmatpush3.bf16.xpose.msra.mxu0 %v1582_v53  ;;  %9005 = vmatprep.mubr.msk.bf16.mxu0 %vm10652_vm0, %v13441_v24  ;;  %v2101_v53 = vpack.c.bf16 %v1093_v38, %v1093_v38 }
 0x50d   :  { %9015 = vmatprep.subr.bf16.mxu0 %v13441_v24 }
 0x513   :  { %9006 = vmatmul.mubr.bf16.vlgmr.msra.gmra.mrb[36].mxu0 %v1581_v56  ;;  %v2205_v56 = vpack.c.bf16 %v1032_v43, %v1032_v43 }
 0x514   :  { %9016 = vmatpush3.bf16.xpose.msra.mxu0 %v1685_v6  ;;  %9017 = vmatprep.mubr.msk.bf16.mxu0 %vm10652_vm0, %v13441_v24  ;;  %v2309_v6 = vpack.c.bf16 %v1097_v42, %v1097_v42 }
 0x515   :  { %9027 = vmatprep.subr.bf16.mxu0 %v13441_v24 }
 0x51b   :  { %9018 = vmatmul.mubr.bf16.vlgmr.msra.gmra.mrb[40].mxu0 %v1684_v44 }
 0x51c   :  { %9028 = vmatpush3.bf16.xpose.msra.mxu0 %v1790_v4  ;;  %9029 = vmatprep.mubr.msk.bf16.mxu0 %vm10652_vm0, %v13441_v24 }
 0x51d   :  { %9039 = vmatprep.subr.bf16.mxu0 %v13441_v24 }
 0x523   :  { %9030 = vmatmul.mubr.bf16.vlgmr.msra.gmra.mrb[44].mxu0 %v1789_v63 }
 0x524   :  { %9040 = vmatpush3.bf16.xpose.msra.mxu0 %v1893_v23  ;;  %9041 = vmatprep.mubr.msk.bf16.mxu0 %vm10652_vm0, %v13441_v24 }
 0x525   :  { %9051 = vmatprep.subr.bf16.mxu0 %v13441_v24 }
 0x52b   :  { %9042 = vmatmul.mubr.bf16.vlgmr.msra.gmra.mrb[48].mxu0 %v1892_v52 }
 0x52c   :  { %9052 = vmatpush3.bf16.xpose.msra.mxu0 %v1998_v59  ;;  %9053 = vmatprep.mubr.msk.bf16.mxu0 %vm10652_vm0, %v13441_v24 }
 0x52d   :  { %9063 = vmatprep.subr.bf16.mxu0 %v13441_v24 }
 0x533   :  { %9054 = vmatmul.mubr.bf16.vlgmr.msra.gmra.mrb[52].mxu0 %v1997_v14 }
 0x534   :  { %9064 = vmatpush3.bf16.xpose.msra.mxu0 %v2101_v53  ;;  %9065 = vmatprep.mubr.msk.bf16.mxu0 %vm10652_vm0, %v13441_v24 }
 0x535   :  { %9075 = vmatprep.subr.bf16.mxu0 %v13441_v24 }
 0x53b   :  { %9066 = vmatmul.mubr.bf16.vlgmr.msra.gmra.mrb[56].mxu0 %v2100_v27 }
 0x53c   :  { %9076 = vmatpush3.bf16.xpose.msra.mxu0 %v2206_v17  ;;  %9077 = vmatprep.mubr.msk.bf16.mxu0 %vm10652_vm0, %v13441_v24 }
 0x53d   :  { %9087 = vmatprep.subr.bf16.mxu0 %v13441_v24 }
 0x543   :  { %9078 = vmatmul.mubr.bf16.vlgmr.msra.gmra.mrb[60].mxu0 %v2205_v56 }
 0x544   :  { %9088 = vmatpush3.bf16.xpose.msra.mxu0 %v2309_v6  ;;  %9089 = vmatprep.mubr.msk.bf16.mxu0 %vm10652_vm0, %v13441_v24 }
 0x54b   :  { %9090 = vmatmul.mubr.bf16.vlgmr.msra.gmra.mrb[64].mxu0 %v2308_v29 }
 0x5d6   :  { %v11607_v28 = vpop.f32.mrb[28].mxu0 }
 0x5d7   :  { %v8965_v45 = vpop.f32.mrb[29].mxu0 }
 0x5d8   :  { %v1265_v44 = vpop.f32.mrb[30].mxu0 }
 0x5d9   :  { %v8966_v4 = vpop.f32.mrb[31].mxu0 }
 0x5de   :  { %v1304_v31 = vpop.f32.mrb[32].mxu0 }
 0x5df   :  { %v1310_v30 = vmul.f32 0.088388346, %v1304_v31  ;;  %v8971_v49 = vpop.f32.mrb[33].mxu0 }
 0x5e0   :  { %v1307_v63 = vpop.f32.mrb[34].mxu0 }
 0x5e1   :  { %v8972_v23 = vpop.f32.mrb[35].mxu0  ;;  %v1311_v37 = vadd.f32 %v1310_v30, %v11528_v50 }
 0x5e3   :  { %v1312_v32 = vsel %vm1207_vm2, %v1311_v37, -inf }
 0x5e4   :  { %1313 = vmax.xlane.f32.xlu0 %v1312_v32 }
 0x5e6   :  { %v11611_v52 = vpop.f32.mrb[36].mxu0 }
 0x5e7   :  { %v9007_v48 = vpop.f32.mrb[37].mxu0 }
 0x5e8   :  { %v1620_v59 = vpop.f32.mrb[38].mxu0 }
 0x5e9   :  { %v9008_v39 = vpop.f32.mrb[39].mxu0 }
 0x5ee   :  { %v11613_v38 = vpop.f32.mrb[40].mxu0 }
 0x5ef   :  { %v9019_v14 = vpop.f32.mrb[41].mxu0 }
 0x5f0   :  { %v1723_v53 = vpop.f32.mrb[42].mxu0 }
 0x5f1   :  { %v9020_v41 = vpop.f32.mrb[43].mxu0 }
 0x5f6   :  { %v11615_v40 = vpop.f32.mrb[44].mxu0 }
 0x5f7   :  { %v9031_v27 = vpop.f32.mrb[45].mxu0 }
 0x5f8   :  { %v1828_v17 = vpop.f32.mrb[46].mxu0 }
 0x5f9   :  { %v9032_v43 = vpop.f32.mrb[47].mxu0 }
 0x5fe   :  { %v11617_v42 = vpop.f32.mrb[48].mxu0 }
 0x5ff   :  { %v9043_v50 = vpop.f32.mrb[49].mxu0 }
 0x600   :  { %v1931_v56 = vpop.f32.mrb[50].mxu0 }
 0x601   :  { %v9044_v6 = vpop.f32.mrb[51].mxu0 }
 0x606   :  { %v11619_v46 = vpop.f32.mrb[52].mxu0 }
 0x607   :  { %v9055_v29 = vpop.f32.mrb[53].mxu0 }
 0x608   :  { %v2036_v45 = vpop.f32.mrb[54].mxu0  ;;  %v1075_v29 = vadd.f32 %v11451_v21, %v11438_v51 }
 0x609   :  { %v9056_v44 = vpop.f32.mrb[55].mxu0 }
 0x60e   :  { %v11621_v4 = vpop.f32.mrb[56].mxu0 }
 0x60f   :  { %v9067_v31 = vpop.f32.mrb[57].mxu0 }
 0x610   :  { %v2139_v30 = vpop.f32.mrb[58].mxu0  ;;  %v1374_v31 = vpack.c.bf16 %v1075_v29, %v1075_v29 }
 0x611   :  { %v9068_v49 = vpop.f32.mrb[59].mxu0  ;;  %v1429_v30 = vpack.c.bf16 %v11501_v0, %v11501_v0  ;;  %v11647_v0 = vld [vmem:[%s13440_s13 + $0x8] sm:$0xff] }
 0x613   :  { %v1434_v51 = vsel %vm1224_vm1, %v1429_v30, 0  ;;  %v2039_v30 = vmul.f32 0.088388346, %v11619_v46 }
 0x616   :  { %v11623_v63 = vpop.f32.mrb[60].mxu0 }
 0x617   :  { %v9079_v23 = vpop.f32.mrb[61].mxu0 }
 0x618   :  { %v2244_v32 = vpop.f32.mrb[62].mxu0 }
 0x619   :  { %v9080_v48 = vpop.f32.mrb[63].mxu0 }
 0x61e   :  { %v11625_v59 = vpop.f32.mrb[64].mxu0 }
 0x61f   :  { %v9091_v39 = vpop.f32.mrb[65].mxu0 }
 0x620   :  { %v2347_v14 = vpop.f32.mrb[66].mxu0 }
 0x621   :  { %v9092_v53 = vpop.f32.mrb[67].mxu0 }
 0x671   :  { %v1314_v41 = vpop.xlane.xlu0 %1313 }
 0x672   :  { %v1315_v27 = vsub.f32 %v1311_v37, %v1314_v41  ;;  %v1012_v37 = vadd.f32 %v11449_v20, %v11447_v19 }
 0x674   :  { %v1316_v17 = vmul.f32 1.442695, %v1315_v27  ;;  %v1373_v49 = vpack.c.bf16 %v1012_v37, %v1012_v37  ;;  %v8288_v37 = vld [vmem:[%s13440_s13 + $0x18] sm:$0xff] }
 0x676   :  { %10128 = vpow2.f32 %v1316_v17 }
 0x680   :  { %v10129_v43 = vpop.eup %10128 }
 0x681   :  { %v1318_v50 = vsel %vm1207_vm2, %v10129_v43, 0.0 }
 0x682   :  { %1319 = vadd.xlane.f32.xlu1 %v1318_v50 }
 0x70f   :  { %v1320_v56 = vpop.xlane.xlu1 %1319 }
 0x710   :  { %10130 = vrcp.f32 %v1320_v56  ;;  %v1623_v56 = vmul.f32 0.088388346, %v11611_v52 }
 0x71a   :  { %v10131_v6 = vpop.eup %10130 }
 0x71b   :  { %v1322_v45 = vmul.f32 %v10131_v6, %v10129_v43  ;;  %v8285_v6 = vld [vmem:[%s13440_s13 + $0x10] sm:$0xff] }
 0x71d   :  { %v1323_v44 = vpack.c.bf16 %v1322_v45, %v1322_v45  ;;  %v1831_v45 = vmul.f32 0.088388346, %v11615_v40  ;;  %v2247_v40 = vmul.f32 0.088388346, %v11623_v63 }
 0x71f   :  { %8976 = vmatmul.mubr.msk.bf16.vlgmr.msra.gmra.mrb[12].mxu1 %vm1207_vm2, %v1323_v44  ;;  %v1832_v52 = vadd.f32 %v8288_v37, %v1831_v45 }
 0x720   :  { %8980 = vmatpush3.bf16.xpose.msra.mxu1 %v1374_v31  ;;  %8981 = vmatprep.mubr.msk.bf16.mxu1 %vm10652_vm0, %v13441_v24  ;;  %v1624_v31 = vadd.f32 %v8285_v6, %v1623_v56 }
 0x721   :  { %8985 = vmatprep.subr.bf16.mxu1 %v13441_v24 }
 0x727   :  { %8982 = vmatmul.mubr.bf16.vlgmr.msra.gmra.mrb[16].mxu1 %v1373_v49  ;;  %v1625_v49 = vsel %vm1207_vm2, %v1624_v31, -inf }
 0x728   :  { %8986 = vmatpush3.bf16.msra.mxu1 %v1434_v51  ;;  %8987 = vmatprep.mubr.msk.bf16.mxu1 %vm10652_vm0, %v13441_v24  ;;  %v8291_v51 = vld [vmem:[%s13440_s13 + $0x20] sm:$0xff] }
 0x729   :  { %8991 = vmatprep.subr.bf16.mxu1 %v13441_v24 }
 0x7f2   :  { %v11642_v21 = vpop.f32.mrb[12].mxu1 }
 0x7f3   :  { %v8977_v23 = vpop.f32.mrb[13].mxu1 }
 0x7f4   :  { %v1368_v32 = vpop.f32.mrb[14].mxu1  ;;  %v1833_v23 = vsel %vm1207_vm2, %v1832_v52, -inf }
 0x7f5   :  { %v8978_v19 = vpop.f32.mrb[15].mxu1  ;;  %v2040_v32 = vadd.f32 %v8291_v51, %v2039_v30 }
 0x7f6   :  { %v11670_v19 = vld [vmem:[%s13440_s13 + $0x28] sm:$0xff] }
 0x7f7   :  { %v2041_v46 = vsel %vm1207_vm2, %v2040_v32, -inf }
 0x7fa   :  { %v1409_v20 = vpop.f32.mrb[16].mxu1 }
 0x7fb   :  { %v1415_v48 = vmul.f32 0.088388346, %v1409_v20  ;;  %v8983_v39 = vpop.f32.mrb[17].mxu1  ;;  %v11674_v20 = vadd.f32 %v11670_v19, %v2247_v40 }
 0x7fc   :  { %v1412_v14 = vpop.f32.mrb[18].mxu1 }
 0x7fd   :  { %v8984_v53 = vpop.f32.mrb[19].mxu1  ;;  %v1416_v41 = vadd.f32 %v11647_v0, %v1415_v48  ;;  %v2249_v48 = vsel %vm1207_vm2, %v11674_v20, -inf  ;;  %v1077_v14 = vadd.f32 %v11455_v25, %v11538_v47 }
 0x7ff   :  { %v1417_v27 = vsel %vm1207_vm2, %v1416_v41, -inf }
 0x800   :  { %1418 = vmax.xlane.f32.xlu0 %v1417_v27  ;;  %v1477_v27 = vpack.c.bf16 %v1077_v14, %v1077_v14 }
 0x88d   :  { %v1419_v17 = vpop.xlane.xlu0 %1418 }
 0x88e   :  { %v1420_v43 = vsub.f32 %v1416_v41, %v1419_v17  ;;  %v1014_v17 = vadd.f32 %v11453_v7, %v11544_v58 }
 0x890   :  { %v1421_v50 = vmul.f32 1.442695, %v1420_v43  ;;  %v1532_v43 = vpack.c.bf16 %v11503_v18, %v11503_v18 }
 0x892   :  { %10132 = vpow2.f32 %v1421_v50  ;;  %v1476_v50 = vpack.c.bf16 %v1014_v17, %v1014_v17  ;;  %v1537_v25 = vsel %vm1224_vm1, %v1532_v43, 0  ;;  %v2142_v43 = vmul.f32 0.088388346, %v11621_v4 }
 0x89c   :  { %v10133_v29 = vpop.eup %10132 }
 0x89d   :  { %v1423_v44 = vsel %vm1207_vm2, %v10133_v29, 0.0 }
 0x89e   :  { %1424 = vadd.xlane.f32.xlu1 %v1423_v44  ;;  %v1726_v44 = vmul.f32 0.088388346, %v11613_v38 }
 0x8a2   :  { %1626 = vmax.xlane.f32.xlu1 %v1625_v49 }
 0x8a6   :  { %1834 = vmax.xlane.f32.xlu1 %v1833_v23 }
 0x8aa   :  { %2042 = vmax.xlane.f32.xlu1 %v2041_v46 }
 0x8ae   :  { %2250 = vmax.xlane.f32.xlu1 %v2249_v48 }
 0x92b   :  { %v1425_v63 = vpop.xlane.xlu1 %1424 }
 0x92c   :  { %10134 = vrcp.f32 %v1425_v63 }
 0x936   :  { %v10135_v39 = vpop.eup %10134 }
 0x937   :  { %v1427_v53 = vmul.f32 %v10135_v39, %v10133_v29  ;;  %v1627_v29 = vpop.xlane.xlu1 %1626  ;;  %v1934_v39 = vmul.f32 0.088388346, %v11617_v42 }
 0x938   :  { %v1628_v63 = vsub.f32 %v1624_v31, %v1627_v29 }
 0x939   :  { %v1428_v41 = vpack.c.bf16 %v1427_v53, %v1427_v53  ;;  %v1727_v53 = vadd.f32 %v8285_v6, %v1726_v44 }
 0x93b   :  { %8988 = vmatmul.mubr.msk.bf16.vlgmr.msra.gmra.mrb[20].mxu1 %vm1207_vm2, %v1428_v41  ;;  %v1835_v30 = vpop.xlane.xlu1 %1834  ;;  %v1728_v38 = vsel %vm1207_vm2, %v1727_v53, -inf }
 0x93c   :  { %8992 = vmatpush3.bf16.xpose.msra.mxu1 %v1477_v27  ;;  %8993 = vmatprep.mubr.msk.bf16.mxu1 %vm10652_vm0, %v13441_v24  ;;  %v1629_v27 = vmul.f32 1.442695, %v1628_v63  ;;  %v1836_v17 = vsub.f32 %v1832_v52, %v1835_v30 }
 0x93d   :  { %8997 = vmatprep.subr.bf16.mxu1 %v13441_v24 }
 0x93e   :  { %10136 = vpow2.f32 %v1629_v27 }
 0x93f   :  { %v2043_v41 = vpop.xlane.xlu1 %2042 }
 0x943   :  { %8994 = vmatmul.mubr.bf16.vlgmr.msra.gmra.mrb[24].mxu1 %v1476_v50  ;;  %v1935_v50 = vadd.f32 %v8288_v37, %v1934_v39  ;;  %v2251_v31 = vpop.xlane.xlu1 %2250 }
 0x944   :  { %8998 = vmatpush3.bf16.msra.mxu1 %v1537_v25  ;;  %8999 = vmatprep.mubr.msk.bf16.mxu1 %vm10652_vm0, %v13441_v24  ;;  %v1837_v25 = vmul.f32 1.442695, %v1836_v17  ;;  %v2252_v52 = vsub.f32 %v11674_v20, %v2251_v31 }
 0x945   :  { %9009 = vmatprep.subr.bf16.mxu1 %v13441_v24  ;;  %v1936_v42 = vsel %vm1207_vm2, %v1935_v50, -inf }
 0x946   :  { %10138 = vpow2.f32 %v1837_v25  ;;  %v2253_v37 = vmul.f32 1.442695, %v2252_v52 }
 0xa0e   :  { %v11692_v47 = vpop.f32.mrb[20].mxu1 }
 0xa0f   :  { %v2443_v7 = vpack.c.bf16 %v11692_v47, %v11607_v28  ;;  %v8989_v58 = vpop.f32.mrb[21].mxu1 }
 0xa10   :  { %v1473_v56 = vpop.f32.mrb[22].mxu1  ;;  %v2044_v58 = vsub.f32 %v2040_v32, %v2043_v41 }
 0xa11   :  { %v8990_v45 = vpop.f32.mrb[23].mxu1  ;;  %v2143_v56 = vadd.f32 %v8291_v51, %v2142_v43 }
 0xa12   :  { %v2045_v6 = vmul.f32 1.442695, %v2044_v58  ;;  %v11708_v45 = vpop.eup %10136 }
 0xa13   :  { %v2144_v4 = vsel %vm1207_vm2, %v2143_v56, -inf  ;;  %v11712_v51 = vpop.eup %10138 }
 0xa14   :  { %10140 = vpow2.f32 %v2045_v6  ;;  %v1839_v20 = vsel %vm1207_vm2, %v11712_v51, 0.0 }
 0xa15   :  { %10142 = vpow2.f32 %v2253_v37  ;;  %v9488_v37 = vld [vmem:[#allocation6] ss:$8 sps:$4 sm:$0xff]  }
 0xa16   :  { %v1512_v18 = vpop.f32.mrb[24].mxu1 }
 0xa17   :  { %v1518_v49 = vmul.f32 0.088388346, %v1512_v18  ;;  %v8995_v40 = vpop.f32.mrb[25].mxu1 }
 0xa18   :  { %v1515_v23 = vpop.f32.mrb[26].mxu1 }
 0xa19   :  { %v8996_v46 = vpop.f32.mrb[27].mxu1  ;;  %v1519_v48 = vadd.f32 %v11647_v0, %v1518_v49  ;;  %v2350_v0 = vmul.f32 0.088388346, %v11625_v59  ;;  %v1631_v59 = vsel %vm1207_vm2, %v11708_v45, 0.0 }
 0xa1b   :  { %v1520_v14 = vsel %vm1207_vm2, %v1519_v48, -inf  ;;  %v2351_v29 = vadd.f32 %v11670_v19, %v2350_v0 }
 0xa1c   :  { %1521 = vmax.xlane.f32.xlu0 %v1520_v14 }
 0xa1d   :  { %v2352_v32 = vsel %vm1207_vm2, %v2351_v29, -inf }
 0xa1e   :  { %v11716_v18 = vpop.eup %10140 }
 0xa1f   :  { %v2047_v19 = vsel %vm1207_vm2, %v11716_v18, 0.0  ;;  %v11720_v44 = vpop.eup %10142 }
 0xa20   :  { %1729 = vmax.xlane.f32.xlu0 %v1728_v38  ;;  %v2255_v30 = vsel %vm1207_vm2, %v11720_v44, 0.0 }
 0xa24   :  { %1937 = vmax.xlane.f32.xlu0 %v1936_v42 }
 0xa28   :  { %2145 = vmax.xlane.f32.xlu0 %v2144_v4 }
 0xa2c   :  { %2353 = vmax.xlane.f32.xlu0 %v2352_v32  ;;  %v9490_v32 = vld [vmem:[#allocation6 + $0x4] ss:$8 sps:$4 sm:$0xff]  }
 0xa2d   :  { %2621 = vmatprep.subr.bf16.mxu0 %v9490_v32  ;;  %v9529_v32 = vld [vmem:[#allocation6 + $0xd4] ss:$8 sps:$4 sm:$0xff]  }
 0xa2e   :  { %2622 = vmatpush1.bf16.msra.mxu0 %v9488_v37 }
 0xa30   :  { %1632 = vadd.xlane.f32.xlu0 %v1631_v59  ;;  %v9493_v59 = vld [vmem:[#allocation6 + $0x14] ss:$8 sps:$4 sm:$0xff]  }
 0xa31   :  { %2623 = vmatprep.subr.bf16.mxu0 %v9493_v59 }
 0xa34   :  { %1840 = vadd.xlane.f32.xlu0 %v1839_v20  ;;  %v9491_v20 = vld [vmem:[#allocation6 + $0x10] ss:$8 sps:$4 sm:$0xff]  }
 0xa35   :  { %2624 = vmatpush1.bf16.msra.mxu0 %v9491_v20  ;;  %v9527_v20 = vld [vmem:[#allocation6 + $0xd0] ss:$8 sps:$4 sm:$0xff]  }
 0xa38   :  { %2048 = vadd.xlane.f32.xlu0 %v2047_v19  ;;  %v9496_v19 = vld [vmem:[#allocation6 + $0x24] ss:$8 sps:$4 sm:$0xff]  }
 0xa39   :  { %2625 = vmatprep.subr.bf16.mxu0 %v9496_v19  ;;  %v9532_v19 = vld [vmem:[#allocation6 + $0xe4] ss:$8 sps:$4 sm:$0xff]  }
 0xa3c   :  { %2256 = vadd.xlane.f32.xlu0 %v2255_v30  ;;  %v9494_v30 = vld [vmem:[#allocation6 + $0x20] ss:$8 sps:$4 sm:$0xff]  }
 0xa3d   :  { %2626 = vmatpush1.bf16.msra.mxu0 %v9494_v30  ;;  %v9530_v30 = vld [vmem:[#allocation6 + $0xe0] ss:$8 sps:$4 sm:$0xff]  }
 0xaa9   :  { %v1522_v49 = vpop.xlane.xlu0 %1521 }
 0xaaa   :  { %v1523_v40 = vsub.f32 %v1519_v48, %v1522_v49  ;;  %v9499_v49 = vld [vmem:[#allocation6 + $0x34] ss:$8 sps:$4 sm:$0xff]  }
 0xaab   :  { %2627 = vmatprep.subr.bf16.mxu0 %v9499_v49 }
 0xaac   :  { %v1524_v23 = vmul.f32 1.442695, %v1523_v40  ;;  %v9497_v40 = vld [vmem:[#allocation6 + $0x30] ss:$8 sps:$4 sm:$0xff]  }
 0xaad   :  { %v1730_v46 = vpop.xlane.xlu0 %1729  ;;  %2628 = vmatpush1.bf16.msra.mxu0 %v9497_v40 }
 0xaae   :  { %10144 = vpow2.f32 %v1524_v23  ;;  %v1731_v63 = vsub.f32 %v1727_v53, %v1730_v46  ;;  %v9502_v23 = vld [vmem:[#allocation6 + $0x44] ss:$8 sps:$4 sm:$0xff]   ;;  %v9500_v46 = vld [vmem:[#allocation6 + $0x40] ss:$8 sps:$4 sm:$0xff]  }
 0xaaf   :  { %2629 = vmatprep.subr.bf16.mxu0 %v9502_v23  ;;  %v1637_v23 = vpack.c.bf16 %v11509_v15, %v11509_v15  ;;  %v1740_v15 = vpack.c.bf16 %v11511_v26, %v11511_v26 }
 0xab0   :  { %v1732_v39 = vmul.f32 1.442695, %v1731_v63  ;;  %v9505_v63 = vld [vmem:[#allocation6 + $0x54] ss:$8 sps:$4 sm:$0xff]  }
 0xab1   :  { %v1938_v14 = vpop.xlane.xlu0 %1937  ;;  %2630 = vmatpush1.bf16.msra.mxu0 %v9500_v46 }
 0xab2   :  { %10146 = vpow2.f32 %v1732_v39  ;;  %v1939_v41 = vsub.f32 %v1935_v50, %v1938_v14  ;;  %v9503_v39 = vld [vmem:[#allocation6 + $0x50] ss:$8 sps:$4 sm:$0xff]   ;;  %2631 = vmatprep.subr.bf16.mxu0 %v9505_v63  ;;  %v9508_v14 = vld [vmem:[#allocation6 + $0x64] ss:$8 sps:$4 sm:$0xff]  }
 0xab4   :  { %v1940_v27 = vmul.f32 1.442695, %v1939_v41  ;;  %v9506_v41 = vld [vmem:[#allocation6 + $0x60] ss:$8 sps:$4 sm:$0xff]  }
 0xab5   :  { %v2146_v17 = vpop.xlane.xlu0 %2145  ;;  %2632 = vmatpush1.bf16.msra.mxu0 %v9503_v39 }
 0xab6   :  { %10148 = vpow2.f32 %v1940_v27  ;;  %v2147_v43 = vsub.f32 %v2143_v56, %v2146_v17  ;;  %2633 = vmatprep.subr.bf16.mxu0 %v9508_v14  ;;  %v9511_v27 = vld [vmem:[#allocation6 + $0x74] ss:$8 sps:$4 sm:$0xff]   ;;  %v9509_v17 = vld [vmem:[#allocation6 + $0x70] ss:$8 sps:$4 sm:$0xff]   ;;  %v1642_v14 = vsel %vm1224_vm1, %v1637_v23, 0  ;;  %v2261_v23 = vpack.c.bf16 %v11521_v13, %v11521_v13 }
 0xab8   :  { %v11724_v38 = vpop.eup %10144  ;;  %v2148_v25 = vmul.f32 1.442695, %v2147_v43  ;;  %v9514_v43 = vld [vmem:[#allocation6 + $0x84] ss:$8 sps:$4 sm:$0xff]  }
 0xab9   :  { %v2354_v58 = vpop.xlane.xlu0 %2353  ;;  %v1526_v0 = vsel %vm1207_vm2, %v11724_v38, 0.0  ;;  %2634 = vmatpush1.bf16.msra.mxu0 %v9506_v41 }
 0xaba   :  { %10150 = vpow2.f32 %v2148_v25  ;;  %v2355_v48 = vsub.f32 %v2351_v29, %v2354_v58  ;;  %1527 = vadd.xlane.f32.xlu1 %v1526_v0  ;;  %2635 = vmatprep.subr.bf16.mxu0 %v9511_v27  ;;  %v9512_v25 = vld [vmem:[#allocation6 + $0x80] ss:$8 sps:$4 sm:$0xff]   ;;  %v9517_v58 = vld [vmem:[#allocation6 + $0x94] ss:$8 sps:$4 sm:$0xff]   ;;  %v9515_v0 = vld [vmem:[#allocation6 + $0x90] ss:$8 sps:$4 sm:$0xff]  }
 0xabc   :  { %v11728_v31 = vpop.eup %10146  ;;  %v2356_v53 = vmul.f32 1.442695, %v2355_v48  ;;  %v9520_v48 = vld [vmem:[#allocation6 + $0xa4] ss:$8 sps:$4 sm:$0xff]  }
 0xabd   :  { %v1734_v50 = vsel %vm1207_vm2, %v11728_v31, 0.0  ;;  %2636 = vmatpush1.bf16.msra.mxu0 %v9509_v17  ;;  %v1633_v59 = vpop.xlane.xlu0 %1632 }
 0xabe   :  { %10152 = vpow2.f32 %v2356_v53  ;;  %1735 = vadd.xlane.f32.xlu1 %v1734_v50  ;;  %2637 = vmatprep.subr.bf16.mxu0 %v9514_v43  ;;  %v9518_v53 = vld [vmem:[#allocation6 + $0xa0] ss:$8 sps:$4 sm:$0xff]   ;;  %v9523_v50 = vld [vmem:[#allocation6 + $0xb4] ss:$8 sps:$4 sm:$0xff]   ;;  %v1745_v43 = vsel %vm1224_vm1, %v1740_v15, 0 }
 0xac0   :  { %v11732_v42 = vpop.eup %10148 }
 0xac1   :  { %v1942_v56 = vsel %vm1207_vm2, %v11732_v42, 0.0  ;;  %2638 = vmatpush1.bf16.msra.mxu0 %v9512_v25  ;;  %v1841_v27 = vpop.xlane.xlu0 %1840 }
 0xac2   :  { %1943 = vadd.xlane.f32.xlu1 %v1942_v56  ;;  %2639 = vmatprep.subr.bf16.mxu0 %v9517_v58  ;;  %v9521_v56 = vld [vmem:[#allocation6 + $0xb0] ss:$8 sps:$4 sm:$0xff]   ;;  %v1845_v58 = vpack.c.bf16 %v11513_v54, %v11513_v54 }
 0xac4   :  { %v11736_v6 = vpop.eup %10150 }
 0xac5   :  { %v2150_v52 = vsel %vm1207_vm2, %v11736_v6, 0.0  ;;  %2640 = vmatpush1.bf16.msra.mxu0 %v9515_v0 }
 0xac6   :  { %2151 = vadd.xlane.f32.xlu1 %v2150_v52  ;;  %2641 = vmatprep.subr.bf16.mxu0 %v9520_v48  ;;  %v9526_v52 = vld [vmem:[#allocation6 + $0xc4] ss:$8 sps:$4 sm:$0xff]   ;;  %v1850_v48 = vsel %vm1224_vm1, %v1845_v58, 0 }
 0xac8   :  { %v11740_v4 = vpop.eup %10152 }
 0xac9   :  { %v2358_v29 = vsel %vm1207_vm2, %v11740_v4, 0.0  ;;  %2642 = vmatpush1.bf16.msra.mxu0 %v9518_v53 }
 0xaca   :  { %2359 = vadd.xlane.f32.xlu1 %v2358_v29  ;;  %2643 = vmatprep.subr.bf16.mxu0 %v9523_v50  ;;  %v9524_v29 = vld [vmem:[#allocation6 + $0xc0] ss:$8 sps:$4 sm:$0xff]   ;;  %v1948_v50 = vpack.c.bf16 %v11515_v8, %v11515_v8 }
 0xacd   :  { %2644 = vmatpush1.bf16.msra.mxu0 %v9521_v56 }
 0xace   :  { %2645 = vmatprep.subr.bf16.mxu0 %v9526_v52  ;;  %v1953_v52 = vsel %vm1224_vm1, %v1948_v50, 0 }
 0xad1   :  { %2646 = vmatpush1.bf16.msra.mxu0 %v9524_v29 }
 0xad2   :  { %2647 = vmatprep.subr.bf16.mxu0 %v9529_v32 }
 0xad5   :  { %2648 = vmatpush1.bf16.msra.mxu0 %v9527_v20 }
 0xad6   :  { %2649 = vmatprep.subr.bf16.mxu0 %v9532_v19  ;;  %v2156_v19 = vpack.c.bf16 %v11519_v2, %v11519_v2 }
 0xad9   :  { %2650 = vmatpush1.bf16.msra.mxu0 %v9530_v30 }
 0xb47   :  { %v1528_v37 = vpop.xlane.xlu1 %1527 }
 0xb48   :  { %10154 = vrcp.f32 %v1528_v37  ;;  %v2053_v37 = vpack.c.bf16 %v11517_v62, %v11517_v62 }
 0xb49   :  { %10156 = vrcp.f32 %v1633_v59 }
 0xb4a   :  { %v2058_v59 = vsel %vm1224_vm1, %v2053_v37, 0 }
 0xb4b   :  { %v1736_v49 = vpop.xlane.xlu1 %1735 }
 0xb4c   :  { %10158 = vrcp.f32 %v1736_v49  ;;  %v2161_v49 = vsel %vm1224_vm1, %v2156_v19, 0 }
 0xb4d   :  { %10160 = vrcp.f32 %v1841_v27 }
 0xb52   :  { %v10155_v40 = vpop.eup %10154 }
 0xb53   :  { %v1530_v46 = vmul.f32 %v10155_v40, %v11724_v38  ;;  %v10157_v39 = vpop.eup %10156 }
 0xb54   :  { %v1635_v41 = vmul.f32 %v10157_v39, %v11708_v45  ;;  %v1944_v45 = vpop.xlane.xlu1 %1943 }
 0xb55   :  { %v1531_v63 = vpack.c.bf16 %v1530_v46, %v1530_v46  ;;  %10162 = vrcp.f32 %v1944_v45 }
 0xb56   :  { %v1636_v38 = vpack.c.bf16 %v1635_v41, %v1635_v41  ;;  %v10159_v17 = vpop.eup %10158 }
 0xb57   :  { %9000 = vmatmul.mubr.msk.bf16.vlgmr.msra.gmra.mrb[28].mxu1 %vm1207_vm2, %v1531_v63  ;;  %v1738_v25 = vmul.f32 %v10159_v17, %v11728_v31  ;;  %v10161_v0 = vpop.eup %10160  ;;  %v2049_v31 = vpop.xlane.xlu0 %2048  ;;  %v2266_v63 = vsel %vm1224_vm1, %v2261_v23, 0 }
 0xb58   :  { %9010 = vmatpush3.bf16.msra.mxu1 %v1642_v14  ;;  %9011 = vmatprep.mubr.msk.bf16.mxu1 %vm10652_vm0, %v13441_v24  ;;  %v1843_v53 = vmul.f32 %v10161_v0, %v11712_v51  ;;  %10164 = vrcp.f32 %v2049_v31  ;;  %v2152_v51 = vpop.xlane.xlu1 %2151 }
 0xb59   :  { %9021 = vmatprep.subr.bf16.mxu1 %v13441_v24  ;;  %v1739_v26 = vpack.c.bf16 %v1738_v25, %v1738_v25  ;;  %10166 = vrcp.f32 %v2152_v51 }
 0xb5a   :  { %v1844_v54 = vpack.c.bf16 %v1843_v53, %v1843_v53 }
 0xb5f   :  { %9012 = vmatmul.mubr.msk.bf16.vlgmr.msra.gmra.mrb[32].mxu1 %vm1207_vm2, %v1636_v38  ;;  %v10163_v56 = vpop.eup %10162  ;;  %v9533_v38 = vld [vmem:[#allocation6 + $0xf0] ss:$8 sps:$4 sm:$0xff]  }
 0xb60   :  { %9022 = vmatpush3.bf16.msra.mxu1 %v1745_v43  ;;  %9023 = vmatprep.mubr.msk.bf16.mxu1 %vm10652_vm0, %v13441_v24  ;;  %v1946_v29 = vmul.f32 %v10163_v56, %v11732_v42  ;;  %v2257_v42 = vpop.xlane.xlu0 %2256 }
 0xb61   :  { %9033 = vmatprep.subr.bf16.mxu1 %v13441_v24  ;;  %10168 = vrcp.f32 %v2257_v42 }
 0xb62   :  { %v1947_v8 = vpack.c.bf16 %v1946_v29, %v1946_v29  ;;  %v10165_v32 = vpop.eup %10164 }
 0xb63   :  { %v2051_v20 = vmul.f32 %v10165_v32, %v11716_v18  ;;  %v10167_v30 = vpop.eup %10166  ;;  %v2360_v18 = vpop.xlane.xlu1 %2359 }
 0xb64   :  { %v2154_v40 = vmul.f32 %v10167_v30, %v11736_v6  ;;  %10170 = vrcp.f32 %v2360_v18  ;;  %v2364_v6 = vpack.c.bf16 %v11523_v36, %v11523_v36 }
 0xb65   :  { %v2052_v62 = vpack.c.bf16 %v2051_v20, %v2051_v20 }
 0xb66   :  { %v2155_v2 = vpack.c.bf16 %v2154_v40, %v2154_v40  ;;  %v2369_v41 = vsel %vm1224_vm1, %v2364_v6, 0 }
 0xb67   :  { %9024 = vmatmul.mubr.msk.bf16.vlgmr.msra.gmra.mrb[36].mxu1 %vm1207_vm2, %v1739_v26 }
 0xb68   :  { %9034 = vmatpush3.bf16.msra.mxu1 %v1850_v48  ;;  %9035 = vmatprep.mubr.msk.bf16.mxu1 %vm10652_vm0, %v13441_v24 }
 0xb69   :  { %9045 = vmatprep.subr.bf16.mxu1 %v13441_v24 }
 0xb6b   :  { %v10169_v46 = vpop.eup %10168 }
 0xb6c   :  { %v2259_v39 = vmul.f32 %v10169_v46, %v11720_v44  ;;  %v9535_v44 = vld [vmem:[#allocation6 + $0xf4] ss:$8 sps:$4 sm:$0xff]  }
 0xb6d   :  { %2651 = vmatprep.subr.bf16.mxu0 %v9535_v44 }
 0xb6e   :  { %v2260_v14 = vpack.c.bf16 %v2259_v39, %v2259_v39  ;;  %v10171_v13 = vpop.eup %10170  ;;  %2652 = vmatpush1.bf16.msra.mxu0 %v9533_v38 }
 0xb6f   :  { %9036 = vmatmul.mubr.msk.bf16.vlgmr.msra.gmra.mrb[40].mxu1 %vm1207_vm2, %v1844_v54  ;;  %v2362_v27 = vmul.f32 %v10171_v13, %v11740_v4  ;;  %v2449_v13 = vld [vmem:[%s13413_s7] sm:$0x3] }
 0xb70   :  { %9046 = vmatpush3.bf16.msra.mxu1 %v1953_v52  ;;  %9047 = vmatprep.mubr.msk.bf16.mxu1 %vm10652_vm0, %v13441_v24 }
 0xb71   :  { %9057 = vmatprep.subr.bf16.mxu1 %v13441_v24  ;;  %v2363_v15 = vpack.c.bf16 %v2362_v27, %v2362_v27  ;;  %v2458_v27 = vrot.slane %v2449_v13, %v11216_v10 }
 0xb77   :  { %9048 = vmatmul.mubr.msk.bf16.vlgmr.msra.gmra.mrb[44].mxu1 %vm1207_vm2, %v1947_v8 }
 0xb78   :  { %9058 = vmatpush3.bf16.msra.mxu1 %v2058_v59  ;;  %9059 = vmatprep.mubr.msk.bf16.mxu1 %vm10652_vm0, %v13441_v24 }
 0xb79   :  { %9069 = vmatprep.subr.bf16.mxu1 %v13441_v24 }
 0xb7f   :  { %9060 = vmatmul.mubr.msk.bf16.vlgmr.msra.gmra.mrb[48].mxu1 %vm1207_vm2, %v2052_v62 }
 0xb80   :  { %9070 = vmatpush3.bf16.msra.mxu1 %v2161_v49  ;;  %9071 = vmatprep.mubr.msk.bf16.mxu1 %vm10652_vm0, %v13441_v24 }
 0xb81   :  { %9081 = vmatprep.subr.bf16.mxu1 %v13441_v24 }
 0xb87   :  { %9072 = vmatmul.mubr.msk.bf16.vlgmr.msra.gmra.mrb[52].mxu1 %vm1207_vm2, %v2155_v2 }
 0xb88   :  { %9082 = vmatpush3.bf16.msra.mxu1 %v2266_v63  ;;  %9083 = vmatprep.mubr.msk.bf16.mxu1 %vm10652_vm0, %v13441_v24 }
 0xb89   :  { %9093 = vmatprep.subr.bf16.mxu1 %v13441_v24 }
 0xb8f   :  { %9084 = vmatmul.mubr.msk.bf16.vlgmr.msra.gmra.mrb[56].mxu1 %vm1207_vm2, %v2260_v14 }
 0xb90   :  { %9094 = vmatpush3.bf16.msra.mxu1 %v2369_v41  ;;  %9095 = vmatprep.mubr.msk.bf16.mxu1 %vm10652_vm0, %v13441_v24  ;;  %v2454_v41 = vrot.slane %v2449_v13, %v11219_v11  ;;  %v9554_v13 = vld [vmem:[#allocation10 + $0x60] ss:$16 sps:$4 sm:$0xff]  }
 0xb97   :  { %9096 = vmatmul.mubr.msk.bf16.vlgmr.msra.gmra.mrb[60].mxu1 %vm1207_vm2, %v2363_v15 }
 0xc2a   :  { %v1573_v36 = vpop.f32.mrb[28].mxu1 }
 0xc2b   :  { %v2444_v17 = vpack.c.bf16 %v1573_v36, %v11642_v21  ;;  %v9001_v43 = vpop.f32.mrb[29].mxu1 }
 0xc2c   :  { %v1576_v25 = vpop.f32.mrb[30].mxu1 }
 0xc2d   :  { %v9002_v45 = vpop.f32.mrb[31].mxu1  ;;  %2653 = vmatprep.mubr.bf16.mxu0 %v2444_v17 }
 0xc2e   :  { %2654 = vmatmul.mubr.bf16.vlgmr.msra.gmra.mrb[68].mxu0 %v2443_v7 }
 0xc32   :  { %v1678_v58 = vpop.f32.mrb[32].mxu1 }
 0xc33   :  { %v9013_v4 = vpop.f32.mrb[33].mxu1 }
 0xc34   :  { %v1681_v26 = vpop.f32.mrb[34].mxu1 }
 0xc35   :  { %v9014_v0 = vpop.f32.mrb[35].mxu1 }
 0xc3a   :  { %v1781_v48 = vpop.f32.mrb[36].mxu1 }
 0xc3b   :  { %v9025_v53 = vpop.f32.mrb[37].mxu1 }
 0xc3c   :  { %v1784_v31 = vpop.f32.mrb[38].mxu1 }
 0xc3d   :  { %v9026_v50 = vpop.f32.mrb[39].mxu1 }
 0xc42   :  { %v1886_v54 = vpop.f32.mrb[40].mxu1 }
 0xc43   :  { %v2445_v56 = vpack.c.bf16 %v1886_v54, %v1678_v58  ;;  %v9037_v52 = vpop.f32.mrb[41].mxu1 }
 0xc44   :  { %v1889_v21 = vpop.f32.mrb[42].mxu1 }
 0xc45   :  { %v9038_v29 = vpop.f32.mrb[43].mxu1 }
 0xc4a   :  { %v1989_v51 = vpop.f32.mrb[44].mxu1 }
 0xc4b   :  { %v2446_v37 = vpack.c.bf16 %v1989_v51, %v1781_v48  ;;  %v9049_v8 = vpop.f32.mrb[45].mxu1 }
 0xc4c   :  { %v1992_v32 = vpop.f32.mrb[46].mxu1 }
 0xc4d   :  { %v9050_v59 = vpop.f32.mrb[47].mxu1  ;;  %2663 = vmatprep.mubr.bf16.mxu0 %v2446_v37 }
 0xc4e   :  { %2664 = vmatmul.mubr.bf16.gmra.mrb[72].mxu0 %v2445_v56 }
 0xc52   :  { %v2094_v28 = vpop.f32.mrb[48].mxu1 }
 0xc53   :  { %v9061_v47 = vpop.f32.mrb[49].mxu1 }
 0xc54   :  { %v2097_v7 = vpop.f32.mrb[50].mxu1 }
 0xc55   :  { %v9062_v20 = vpop.f32.mrb[51].mxu1 }
 0xc5a   :  { %v2197_v42 = vpop.f32.mrb[52].mxu1 }
 0xc5b   :  { %v9073_v19 = vpop.f32.mrb[53].mxu1 }
 0xc5c   :  { %v2200_v62 = vpop.f32.mrb[54].mxu1 }
 0xc5d   :  { %v9074_v30 = vpop.f32.mrb[55].mxu1 }
 0xc5e   :  { %v9536_v30 = vld [vmem:[#allocation10] ss:$16 sps:$4 sm:$0xff]  }
 0xc62   :  { %v2302_v49 = vpop.f32.mrb[56].mxu1 }
 0xc63   :  { %v2447_v40 = vpack.c.bf16 %v2302_v49, %v2094_v28  ;;  %v9085_v18 = vpop.f32.mrb[57].mxu1  ;;  %v9538_v49 = vld [vmem:[#allocation10 + $0x4] ss:$16 sps:$4 sm:$0xff]  }
 0xc64   :  { %v2305_v23 = vpop.f32.mrb[58].mxu1  ;;  %v9544_v18 = vld [vmem:[#allocation10 + $0x24] ss:$16 sps:$4 sm:$0xff]   ;;  %3252 = vmatprep.subr.bf16.mxu1 %v9538_v49 }
 0xc65   :  { %v9086_v2 = vpop.f32.mrb[59].mxu1  ;;  %v9547_v23 = vld [vmem:[#allocation10 + $0x2c] ss:$16 sps:$4 sm:$0xff]   ;;  %3253 = vmatpush1.bf16.msra.mxu1 %v9536_v30 }
 0xc66   :  { %3254 = vmatprep.subr.bf16.mxu1 %v9544_v18  ;;  %v9550_v2 = vld [vmem:[#allocation10 + $0x44] ss:$16 sps:$4 sm:$0xff]  }
 0xc6a   :  { %v2405_v46 = vpop.f32.mrb[60].mxu1 }
 0xc6b   :  { %v2448_v63 = vpack.c.bf16 %v2405_v46, %v2197_v42  ;;  %v9097_v39 = vpop.f32.mrb[61].mxu1  ;;  %v9553_v46 = vld [vmem:[#allocation10 + $0x4c] ss:$16 sps:$4 sm:$0xff]  }
 0xc6c   :  { %v2408_v6 = vpop.f32.mrb[62].mxu1  ;;  %v9551_v39 = vld [vmem:[#allocation10 + $0x48] ss:$16 sps:$4 sm:$0xff]  }
 0xc6d   :  { %v9098_v14 = vpop.f32.mrb[63].mxu1  ;;  %2673 = vmatprep.mubr.bf16.mxu0 %v2448_v63  ;;  %v9548_v63 = vld [vmem:[#allocation10 + $0x40] ss:$16 sps:$4 sm:$0xff]   ;;  %v9556_v6 = vld [vmem:[#allocation10 + $0x64] ss:$16 sps:$4 sm:$0xff]  }
 0xc6e   :  { %2674 = vmatmul.mubr.bf16.gmra.mrb[76].mxu0 %v2447_v40  ;;  %v9539_v40 = vld [vmem:[#allocation10 + $0x8] ss:$16 sps:$4 sm:$0xff]   ;;  %v9559_v14 = vld [vmem:[#allocation10 + $0x6c] ss:$16 sps:$4 sm:$0xff]  }
 0xd01   :  { %v2655_v15 = vpop.f32.mrb[68].mxu0 }
 0xd02   :  { %v2656_v44 = vadd.f32 %v2655_v15, %v2454_v41  ;;  %v2657_v38 = vpop.f32.mrb[69].mxu0  ;;  %v9565_v15 = vld [vmem:[#allocation10 + $0x8c] ss:$16 sps:$4 sm:$0xff]  }
 0xd03   :  { %v2658_v36 = vadd.f32 %v2657_v38, %v2458_v27  ;;  %v2659_v17 = vpop.f32.mrb[70].mxu0  ;;  %v9563_v38 = vld [vmem:[#allocation10 + $0x88] ss:$16 sps:$4 sm:$0xff]  }
 0xd04   :  { %v11819_v43 = vadd.f32 %v2656_v44, %v11262_v35  ;;  %v2660_v25 = vadd.f32 %v2659_v17, %v2454_v41  ;;  %v2661_v45 = vpop.f32.mrb[71].mxu0  ;;  %v9560_v44 = vld [vmem:[#allocation10 + $0x80] ss:$16 sps:$4 sm:$0xff]   ;;  %v9571_v17 = vld [vmem:[#allocation10 + $0xac] ss:$16 sps:$4 sm:$0xff]  }
 0xd05   :  { %v11822_v58 = vadd.f32 %v2658_v36, %v11256_v33  ;;  %v2662_v4 = vadd.f32 %v2661_v45, %v2458_v27  ;;  %v9568_v36 = vld [vmem:[#allocation10 + $0xa4] ss:$16 sps:$4 sm:$0xff]   ;;  %v9569_v45 = vld [vmem:[#allocation10 + $0xa8] ss:$16 sps:$4 sm:$0xff]  }
 0xd06   :  { %v11825_v26 = vadd.f32 %v2660_v25, %v11265_v57  ;;  %v9566_v25 = vld [vmem:[#allocation10 + $0xa0] ss:$16 sps:$4 sm:$0xff]  }
 0xd07   :  { %v11828_v0 = vadd.f32 %v2662_v4, %v11259_v34  ;;  %v2698_v48 = vadd.f32 %v11822_v58, %v11819_v43  ;;  %v9574_v4 = vld [vmem:[#allocation10 + $0xc4] ss:$16 sps:$4 sm:$0xff]  }
 0xd09   :  { %2699 = vadd.xlane.f32.xlu0 %v2698_v48  ;;  %v2701_v35 = vadd.f32 %v11828_v0, %v11825_v26  ;;  %v9577_v48 = vld [vmem:[#allocation10 + $0xcc] ss:$16 sps:$4 sm:$0xff]  }
 0xd0b   :  { %2702 = vadd.xlane.f32.xlu1 %v2701_v35  ;;  %v9572_v35 = vld [vmem:[#allocation10 + $0xc0] ss:$16 sps:$4 sm:$0xff]  }
 0xd21   :  { %v2665_v53 = vpop.f32.mrb[72].mxu0 }
 0xd22   :  { %v2666_v31 = vadd.f32 %v2665_v53, %v2454_v41  ;;  %v2667_v50 = vpop.f32.mrb[73].mxu0  ;;  %v9575_v53 = vld [vmem:[#allocation10 + $0xc8] ss:$16 sps:$4 sm:$0xff]  }
 0xd23   :  { %v2668_v33 = vadd.f32 %v2667_v50, %v2458_v27  ;;  %v2669_v54 = vpop.f32.mrb[74].mxu0  ;;  %v9583_v50 = vld [vmem:[#allocation10 + $0xec] ss:$16 sps:$4 sm:$0xff]  }
 0xd24   :  { %v11835_v56 = vadd.f32 %v2666_v31, %v11387_v3  ;;  %v2670_v57 = vadd.f32 %v2669_v54, %v2454_v41  ;;  %v2671_v52 = vpop.f32.mrb[75].mxu0  ;;  %v9580_v31 = vld [vmem:[#allocation10 + $0xe4] ss:$16 sps:$4 sm:$0xff]   ;;  %v9581_v54 = vld [vmem:[#allocation10 + $0xe8] ss:$16 sps:$4 sm:$0xff]  }
 0xd25   :  { %v11838_v34 = vadd.f32 %v2668_v33, %v11384_v5  ;;  %v2672_v21 = vadd.f32 %v2671_v52, %v2458_v27  ;;  %v9578_v33 = vld [vmem:[#allocation10 + $0xe0] ss:$16 sps:$4 sm:$0xff]   ;;  %v9589_v52 = vld [vmem:[#allocation10 + $0x10c] ss:$16 sps:$4 sm:$0xff]  }
 0xd26   :  { %v11841_v29 = vadd.f32 %v2670_v57, %v11394_v16  ;;  %v9586_v57 = vld [vmem:[#allocation10 + $0x104] ss:$16 sps:$4 sm:$0xff]  }
 0xd27   :  { %v11844_v51 = vadd.f32 %v2672_v21, %v11391_v55  ;;  %v2704_v37 = vadd.f32 %v11838_v34, %v11835_v56  ;;  %v9584_v21 = vld [vmem:[#allocation10 + $0x100] ss:$16 sps:$4 sm:$0xff]  }
 0xd29   :  { %2705 = vadd.xlane.f32.xlu0 %v2704_v37  ;;  %v2707_v3 = vadd.f32 %v11844_v51, %v11841_v29  ;;  %v9587_v37 = vld [vmem:[#allocation10 + $0x108] ss:$16 sps:$4 sm:$0xff]  }
 0xd2b   :  { %2708 = vadd.xlane.f32.xlu1 %v2707_v3  ;;  %v9592_v3 = vld [vmem:[#allocation10 + $0x124] ss:$16 sps:$4 sm:$0xff]  }
 0xd41   :  { %v2675_v8 = vpop.f32.mrb[76].mxu0 }
 0xd42   :  { %v2676_v32 = vadd.f32 %v2675_v8, %v2454_v41  ;;  %v2677_v59 = vpop.f32.mrb[77].mxu0  ;;  %v9595_v8 = vld [vmem:[#allocation10 + $0x12c] ss:$16 sps:$4 sm:$0xff]  }
 0xd43   :  { %v2678_v5 = vadd.f32 %v2677_v59, %v2458_v27  ;;  %v2679_v28 = vpop.f32.mrb[78].mxu0  ;;  %v9593_v59 = vld [vmem:[#allocation10 + $0x128] ss:$16 sps:$4 sm:$0xff]  }
 0xd44   :  { %v11851_v47 = vadd.f32 %v2676_v32, %v11418_v22  ;;  %v2680_v16 = vadd.f32 %v2679_v28, %v2454_v41  ;;  %v2681_v7 = vpop.f32.mrb[79].mxu0  ;;  %v9557_v41 = vld [vmem:[#allocation10 + $0x68] ss:$16 sps:$4 sm:$0xff]   ;;  %v9590_v32 = vld [vmem:[#allocation10 + $0x120] ss:$16 sps:$4 sm:$0xff]  }
 0xd45   :  { %v11854_v55 = vadd.f32 %v2678_v5, %v11406_v9  ;;  %v2682_v20 = vadd.f32 %v2681_v7, %v2458_v27  ;;  %v9541_v9 = vld [vmem:[#allocation10 + $0xc] ss:$16 sps:$4 sm:$0xff]   ;;  %v9562_v27 = vld [vmem:[#allocation10 + $0x84] ss:$16 sps:$4 sm:$0xff]  }
 0xd46   :  { %v11857_v42 = vadd.f32 %v2680_v16, %v11415_v12  ;;  %3315 = vmatprep.subr.bf16.mxu0 %v9541_v9  ;;  %v9542_v12 = vld [vmem:[#allocation10 + $0x20] ss:$16 sps:$4 sm:$0xff]  }
 0xd47   :  { %v11860_v19 = vadd.f32 %v2682_v20, %v11409_v60  ;;  %v2710_v62 = vadd.f32 %v11854_v55, %v11851_v47  ;;  %3316 = vmatpush1.bf16.msra.mxu0 %v9539_v40  ;;  %v9545_v60 = vld [vmem:[#allocation10 + $0x28] ss:$16 sps:$4 sm:$0xff]   ;;  %3255 = vmatpush1.bf16.msra.mxu1 %v9542_v12 }
 0xd48   :  { %3317 = vmatprep.subr.bf16.mxu0 %v9547_v23  ;;  %3256 = vmatprep.subr.bf16.mxu1 %v9550_v2  ;;  %v9601_v23 = vld [vmem:[#allocation10 + $0x14c] ss:$16 sps:$4 sm:$0xff]   ;;  %v9599_v12 = vld [vmem:[#allocation10 + $0x148] ss:$16 sps:$4 sm:$0xff]  }
 0xd49   :  { %2711 = vadd.xlane.f32.xlu0 %v2710_v62  ;;  %v2713_v22 = vadd.f32 %v11860_v19, %v11857_v42  ;;  %v9607_v2 = vld [vmem:[#allocation10 + $0x16c] ss:$16 sps:$4 sm:$0xff]  }
 0xd4b   :  { %2714 = vadd.xlane.f32.xlu1 %v2713_v22  ;;  %3318 = vmatpush1.bf16.msra.mxu0 %v9545_v60  ;;  %v9604_v60 = vld [vmem:[#allocation10 + $0x164] ss:$16 sps:$4 sm:$0xff]  }
 0xd4c   :  { %3319 = vmatprep.subr.bf16.mxu0 %v9553_v46  ;;  %3257 = vmatpush1.bf16.msra.mxu1 %v9548_v63  ;;  %v9602_v46 = vld [vmem:[#allocation10 + $0x160] ss:$16 sps:$4 sm:$0xff]   ;;  %v9605_v63 = vld [vmem:[#allocation10 + $0x168] ss:$16 sps:$4 sm:$0xff]  }
 0xd4d   :  { %3258 = vmatprep.subr.bf16.mxu1 %v9556_v6  ;;  %v9610_v6 = vld [vmem:[#allocation10 + $0x184] ss:$16 sps:$4 sm:$0xff]  }
 0xd4f   :  { %3320 = vmatpush1.bf16.msra.mxu0 %v9551_v39 }
 0xd50   :  { %3321 = vmatprep.subr.bf16.mxu0 %v9559_v14  ;;  %3259 = vmatpush1.bf16.msra.mxu1 %v9554_v13  ;;  %v9613_v14 = vld [vmem:[#allocation10 + $0x18c] ss:$16 sps:$4 sm:$0xff]  }
 0xd51   :  { %3260 = vmatprep.subr.bf16.mxu1 %v9562_v27  ;;  %v9611_v27 = vld [vmem:[#allocation10 + $0x188] ss:$16 sps:$4 sm:$0xff]  }
 0xd53   :  { %3322 = vmatpush1.bf16.msra.mxu0 %v9557_v41  ;;  %v9608_v41 = vld [vmem:[#allocation10 + $0x180] ss:$16 sps:$4 sm:$0xff]  }
 0xd54   :  { %3323 = vmatprep.subr.bf16.mxu0 %v9565_v15  ;;  %3261 = vmatpush1.bf16.msra.mxu1 %v9560_v44 }
 0xd55   :  { %3262 = vmatprep.subr.bf16.mxu1 %v9568_v36 }
 0xd57   :  { %3324 = vmatpush1.bf16.msra.mxu0 %v9563_v38 }
 0xd58   :  { %3325 = vmatprep.subr.bf16.mxu0 %v9571_v17  ;;  %3263 = vmatpush1.bf16.msra.mxu1 %v9566_v25  ;;  %v9616_v17 = vld [vmem:[#allocation10 + $0x1a4] ss:$16 sps:$4 sm:$0xff]   ;;  %v9619_v25 = vld [vmem:[#allocation10 + $0x1ac] ss:$16 sps:$4 sm:$0xff]  }
 0xd59   :  { %3264 = vmatprep.subr.bf16.mxu1 %v9574_v4 }
 0xd5b   :  { %3326 = vmatpush1.bf16.msra.mxu0 %v9569_v45 }
 0xd5c   :  { %3327 = vmatprep.subr.bf16.mxu0 %v9577_v48  ;;  %3265 = vmatpush1.bf16.msra.mxu1 %v9572_v35  ;;  %v9614_v35 = vld [vmem:[#allocation10 + $0x1a0] ss:$16 sps:$4 sm:$0xff]  }
 0xd5d   :  { %3266 = vmatprep.subr.bf16.mxu1 %v9580_v31 }
 0xd5f   :  { %3328 = vmatpush1.bf16.msra.mxu0 %v9575_v53 }
 0xd60   :  { %3329 = vmatprep.subr.bf16.mxu0 %v9583_v50  ;;  %3267 = vmatpush1.bf16.msra.mxu1 %v9578_v33  ;;  %v9622_v50 = vld [vmem:[#allocation10 + $0x1c4] ss:$16 sps:$4 sm:$0xff]   ;;  %v9623_v33 = vld [vmem:[#allocation10 + $0x1c8] ss:$16 sps:$4 sm:$0xff]  }
 0xd61   :  { %3268 = vmatprep.subr.bf16.mxu1 %v9586_v57  ;;  %v9625_v57 = vld [vmem:[#allocation10 + $0x1cc] ss:$16 sps:$4 sm:$0xff]  }
 0xd63   :  { %3330 = vmatpush1.bf16.msra.mxu0 %v9581_v54 }
 0xd64   :  { %3331 = vmatprep.subr.bf16.mxu0 %v9589_v52  ;;  %3269 = vmatpush1.bf16.msra.mxu1 %v9584_v21  ;;  %v9628_v52 = vld [vmem:[#allocation10 + $0x1e4] ss:$16 sps:$4 sm:$0xff]   ;;  %v9631_v21 = vld [vmem:[#allocation10 + $0x1ec] ss:$16 sps:$4 sm:$0xff]  }
 0xd65   :  { %3270 = vmatprep.subr.bf16.mxu1 %v9592_v3  ;;  %v9629_v3 = vld [vmem:[#allocation10 + $0x1e8] ss:$16 sps:$4 sm:$0xff]  }
 0xd67   :  { %3332 = vmatpush1.bf16.msra.mxu0 %v9587_v37  ;;  %v9626_v37 = vld [vmem:[#allocation10 + $0x1e0] ss:$16 sps:$4 sm:$0xff]  }
 0xd68   :  { %3333 = vmatprep.subr.bf16.mxu0 %v9595_v8  ;;  %3271 = vmatpush1.bf16.msra.mxu1 %v9590_v32 }
 0xd6b   :  { %3334 = vmatpush1.bf16.msra.mxu0 %v9593_v59 }
 0xd6c   :  { %3335 = vmatprep.subr.bf16.mxu0 %v9601_v23 }
 0xd6f   :  { %3336 = vmatpush1.bf16.msra.mxu0 %v9599_v12 }
 0xd70   :  { %3337 = vmatprep.subr.bf16.mxu0 %v9607_v2  ;;  %v2697_v2 = vld [vmem:[#allocation9] sm:$0x3] }
 0xd73   :  { %3338 = vmatpush1.bf16.msra.mxu0 %v9605_v63 }
 0xd74   :  { %3339 = vmatprep.subr.bf16.mxu0 %v9613_v14 }
 0xd77   :  { %3340 = vmatpush1.bf16.msra.mxu0 %v9611_v27  ;;  %v11938_v27 = vrot.slane %v2697_v2, %v11216_v10 }
 0xd78   :  { %3341 = vmatprep.subr.bf16.mxu0 %v9619_v25 }
 0xd96   :  { %v2700_v5 = vpop.xlane.xlu0 %2699 }
 0xd97   :  { %v2716_v28 = vmul.f32 0.00390625, %v2700_v5 }
 0xd98   :  { %v2703_v16 = vpop.xlane.xlu1 %2702 }
 0xd99   :  { %v11867_v7 = vsub.f32 %v11819_v43, %v2716_v28  ;;  %v11870_v20 = vsub.f32 %v11822_v58, %v2716_v28  ;;  %v2717_v62 = vmul.f32 0.00390625, %v2703_v16 }
 0xd9b   :  { %v11873_v22 = vsub.f32 %v11825_v26, %v2717_v62  ;;  %v11876_v30 = vsub.f32 %v11828_v0, %v2717_v62  ;;  %v2734_v49 = vmul.f32 %v11867_v7, %v11867_v7  ;;  %v2735_v40 = vmul.f32 %v11870_v20, %v11870_v20  ;;  %v9598_v26 = vld [vmem:[#allocation10 + $0x144] ss:$16 sps:$4 sm:$0xff]   ;;  %v9596_v0 = vld [vmem:[#allocation10 + $0x140] ss:$16 sps:$4 sm:$0xff]  }
 0xd9c   :  { %3272 = vmatprep.subr.bf16.mxu1 %v9598_v26 }
 0xd9d   :  { %v2746_v9 = vadd.f32 %v2735_v40, %v2734_v49  ;;  %v2736_v43 = vmul.f32 %v11873_v22, %v11873_v22  ;;  %v2737_v58 = vmul.f32 %v11876_v30, %v11876_v30  ;;  %3273 = vmatpush1.bf16.msra.mxu1 %v9596_v0 }
 0xd9e   :  { %3274 = vmatprep.subr.bf16.mxu1 %v9604_v60  ;;  %v2696_v60 = vld [vmem:[#allocation7] sm:$0x3] }
 0xd9f   :  { %2747 = vadd.xlane.f32.xlu0 %v2746_v9  ;;  %v2749_v18 = vadd.f32 %v2737_v58, %v2736_v43  ;;  %v11930_v63 = vrot.slane %v2696_v60, %v11216_v10 }
 0xda1   :  { %2750 = vadd.xlane.f32.xlu1 %v2749_v18  ;;  %3275 = vmatpush1.bf16.msra.mxu1 %v9602_v46  ;;  %v11927_v46 = vrot.slane %v2696_v60, %v11219_v11 }
 0xda2   :  { %3276 = vmatprep.subr.bf16.mxu1 %v9610_v6 }
 0xda5   :  { %3277 = vmatpush1.bf16.msra.mxu1 %v9608_v41  ;;  %v11935_v41 = vrot.slane %v2697_v2, %v11219_v11 }
 0xda6   :  { %3278 = vmatprep.subr.bf16.mxu1 %v9616_v17 }
 0xda9   :  { %3279 = vmatpush1.bf16.msra.mxu1 %v9614_v35 }
 0xdaa   :  { %3280 = vmatprep.subr.bf16.mxu1 %v9622_v50 }
 0xdb6   :  { %v2706_v39 = vpop.xlane.xlu0 %2705 }
 0xdb7   :  { %v2718_v13 = vmul.f32 0.00390625, %v2706_v39 }
 0xdb8   :  { %v2709_v15 = vpop.xlane.xlu1 %2708 }
 0xdb9   :  { %v11887_v44 = vsub.f32 %v11835_v56, %v2718_v13  ;;  %v11890_v38 = vsub.f32 %v11838_v34, %v2718_v13  ;;  %v2719_v36 = vmul.f32 0.00390625, %v2709_v15  ;;  %v9617_v34 = vld [vmem:[#allocation10 + $0x1a8] ss:$16 sps:$4 sm:$0xff]  }
 0xdba   :  { %3342 = vmatpush1.bf16.msra.mxu0 %v9617_v34 }
 0xdbb   :  { %v11893_v45 = vsub.f32 %v11841_v29, %v2719_v36  ;;  %v11896_v4 = vsub.f32 %v11844_v51, %v2719_v36  ;;  %v2738_v48 = vmul.f32 %v11887_v44, %v11887_v44  ;;  %v2739_v56 = vmul.f32 %v11890_v38, %v11890_v38  ;;  %v9620_v51 = vld [vmem:[#allocation10 + $0x1c0] ss:$16 sps:$4 sm:$0xff]   ;;  %3343 = vmatprep.subr.bf16.mxu0 %v9625_v57  ;;  %v9643_v57 = vld [vmem:[#allocation13 + $0x34] ss:$8 sps:$4 sm:$0xff]  }
 0xdbc   :  { %3281 = vmatpush1.bf16.msra.mxu1 %v9620_v51  ;;  %v9640_v51 = vld [vmem:[#allocation13 + $0x24] ss:$8 sps:$4 sm:$0xff]  }
 0xdbd   :  { %v2752_v53 = vadd.f32 %v2739_v56, %v2738_v48  ;;  %v2740_v31 = vmul.f32 %v11893_v45, %v11893_v45  ;;  %v2741_v29 = vmul.f32 %v11896_v4, %v11896_v4  ;;  %3282 = vmatprep.subr.bf16.mxu1 %v9628_v52 }
 0xdbe   :  { %3344 = vmatpush1.bf16.msra.mxu0 %v9623_v33  ;;  %v9638_v33 = vld [vmem:[#allocation13 + $0x20] ss:$8 sps:$4 sm:$0xff]  }
 0xdbf   :  { %2753 = vadd.xlane.f32.xlu0 %v2752_v53  ;;  %v2755_v54 = vadd.f32 %v2741_v29, %v2740_v31  ;;  %3345 = vmatprep.subr.bf16.mxu0 %v9631_v21  ;;  %v9632_v53 = vld [vmem:[#allocation13] ss:$8 sps:$4 sm:$0xff]   ;;  %v9637_v31 = vld [vmem:[#allocation13 + $0x14] ss:$8 sps:$4 sm:$0xff]   ;;  %v9635_v29 = vld [vmem:[#allocation13 + $0x10] ss:$8 sps:$4 sm:$0xff]  }
 0xdc0   :  { %3283 = vmatpush1.bf16.msra.mxu1 %v9626_v37 }
 0xdc1   :  { %2756 = vadd.xlane.f32.xlu1 %v2755_v54 }
 0xdc2   :  { %3346 = vmatpush1.bf16.msra.mxu0 %v9629_v3  ;;  %v9641_v3 = vld [vmem:[#allocation13 + $0x30] ss:$8 sps:$4 sm:$0xff]  }
 0xdd6   :  { %v2712_v8 = vpop.xlane.xlu0 %2711 }
 0xdd7   :  { %v2720_v32 = vmul.f32 0.00390625, %v2712_v8 }
 0xdd8   :  { %v2715_v59 = vpop.xlane.xlu1 %2714 }
 0xdd9   :  { %v11907_v5 = vsub.f32 %v11851_v47, %v2720_v32  ;;  %v11910_v28 = vsub.f32 %v11854_v55, %v2720_v32  ;;  %v2721_v16 = vmul.f32 0.00390625, %v2715_v59  ;;  %v9646_v32 = vld [vmem:[#allocation13 + $0x44] ss:$8 sps:$4 sm:$0xff]   ;;  %v9644_v59 = vld [vmem:[#allocation13 + $0x40] ss:$8 sps:$4 sm:$0xff]  }
 0xddb   :  { %v11913_v62 = vsub.f32 %v11857_v42, %v2721_v16  ;;  %v11916_v49 = vsub.f32 %v11860_v19, %v2721_v16  ;;  %v2742_v40 = vmul.f32 %v11907_v5, %v11907_v5  ;;  %v2743_v9 = vmul.f32 %v11910_v28, %v11910_v28  ;;  %v9634_v42 = vld [vmem:[#allocation13 + $0x4] ss:$8 sps:$4 sm:$0xff]   ;;  %v9649_v16 = vld [vmem:[#allocation13 + $0x54] ss:$8 sps:$4 sm:$0xff]  }
 0xddc   :  { %3906 = vmatprep.subr.bf16.mxu1 %v9634_v42 }
 0xddd   :  { %v2758_v43 = vadd.f32 %v2743_v9, %v2742_v40  ;;  %v2744_v47 = vmul.f32 %v11913_v62, %v11913_v62  ;;  %v2745_v55 = vmul.f32 %v11916_v49, %v11916_v49  ;;  %v9647_v40 = vld [vmem:[#allocation13 + $0x50] ss:$8 sps:$4 sm:$0xff]   ;;  %v9652_v9 = vld [vmem:[#allocation13 + $0x64] ss:$8 sps:$4 sm:$0xff]  }
 0xddf   :  { %2759 = vadd.xlane.f32.xlu0 %v2758_v43  ;;  %v2761_v58 = vadd.f32 %v2745_v55, %v2744_v47 }
 0xde1   :  { %2762 = vadd.xlane.f32.xlu1 %v2761_v58  ;;  %v9650_v58 = vld [vmem:[#allocation13 + $0x60] ss:$8 sps:$4 sm:$0xff]  }
 0xe2c   :  { %v2748_v19 = vpop.xlane.xlu0 %2747 }
 0xe2d   :  { %v2764_v18 = vmul.f32 0.00390625, %v2748_v19  ;;  %v9655_v19 = vld [vmem:[#allocation13 + $0x74] ss:$8 sps:$4 sm:$0xff]  }
 0xe2e   :  { %v2751_v26 = vpop.xlane.xlu1 %2750 }
 0xe2f   :  { %v2770_v23 = vadd.f32 1e-12, %v2764_v18  ;;  %v2765_v0 = vmul.f32 0.00390625, %v2751_v26 }
 0xe31   :  { %10172 = vrsqrt.f32 %v2770_v23  ;;  %v2771_v12 = vadd.f32 1e-12, %v2765_v0 }
 0xe33   :  { %10174 = vrsqrt.f32 %v2771_v12 }
 0xe3b   :  { %v10173_v39 = vpop.eup %10172 }
 0xe3c   :  { %v2782_v6 = vmul.f32 %v10173_v39, %v11867_v7  ;;  %v2783_v14 = vmul.f32 %v10173_v39, %v11870_v20 }
 0xe3d   :  { %v10175_v13 = vpop.eup %10174 }
 0xe3e   :  { %v2784_v15 = vmul.f32 %v10175_v13, %v11873_v22  ;;  %v2785_v36 = vmul.f32 %v10175_v13, %v11876_v30  ;;  %v2806_v17 = vmul.f32 %v11930_v63, %v2783_v14  ;;  %v2805_v25 = vmul.f32 %v11927_v46, %v2782_v6  ;;  %v9656_v13 = vld [vmem:[#allocation13 + $0x80] ss:$8 sps:$4 sm:$0xff]  }
 0xe40   :  { %v2808_v48 = vmul.f32 %v11930_v63, %v2785_v36  ;;  %v2807_v7 = vmul.f32 %v11927_v46, %v2784_v15  ;;  %v11947_v20 = vadd.f32 %v11938_v27, %v2806_v17  ;;  %v11953_v35 = vadd.f32 %v11935_v41, %v2805_v25  ;;  %v9661_v15 = vld [vmem:[#allocation13 + $0x94] ss:$8 sps:$4 sm:$0xff]   ;;  %v9659_v36 = vld [vmem:[#allocation13 + $0x90] ss:$8 sps:$4 sm:$0xff]  }
 0xe42   :  { %v11950_v56 = vadd.f32 %v11938_v27, %v2808_v48  ;;  %v11956_v22 = vadd.f32 %v11935_v41, %v2807_v7 }
 0xe44   :  { %v2905_v30 = vpack.c.bf16 %v11950_v56, %v11947_v20  ;;  %v2904_v34 = vpack.c.bf16 %v11956_v22, %v11953_v35 }
 0xe46   :  { %3284 = vmatprep.mubr.bf16.mxu1 %v2905_v30  ;;  %3347 = vmatprep.mubr.bf16.mxu0 %v2905_v30 }
 0xe47   :  { %3285 = vmatmul.mubr.bf16.vlgmr.msra.gmra.mrb[64].mxu1 %v2904_v34  ;;  %3348 = vmatmul.mubr.bf16.vlgmr.msra.gmra.mrb[80].mxu0 %v2904_v34 }
 0xe48   :  { %3907 = vmatpush1.bf16.msra.mxu1 %v9632_v53 }
 0xe49   :  { %3908 = vmatprep.subr.bf16.mxu1 %v9637_v31 }
 0xe4c   :  { %v2754_v50 = vpop.xlane.xlu0 %2753  ;;  %3909 = vmatpush1.bf16.msra.mxu1 %v9635_v29 }
 0xe4d   :  { %v2766_v54 = vmul.f32 0.00390625, %v2754_v50  ;;  %3910 = vmatprep.subr.bf16.mxu1 %v9640_v51 }
 0xe4e   :  { %v2757_v52 = vpop.xlane.xlu1 %2756 }
 0xe4f   :  { %v2772_v21 = vadd.f32 1e-12, %v2766_v54  ;;  %v2767_v37 = vmul.f32 0.00390625, %v2757_v52 }
 0xe50   :  { %3911 = vmatpush1.bf16.msra.mxu1 %v9638_v33 }
 0xe51   :  { %10176 = vrsqrt.f32 %v2772_v21  ;;  %v2773_v8 = vadd.f32 1e-12, %v2767_v37  ;;  %3912 = vmatprep.subr.bf16.mxu1 %v9643_v57 }
 0xe53   :  { %10178 = vrsqrt.f32 %v2773_v8  ;;  %v9667_v8 = vld [vmem:[#allocation13 + $0xb4] ss:$8 sps:$4 sm:$0xff]  }
 0xe54   :  { %3913 = vmatpush1.bf16.msra.mxu1 %v9641_v3  ;;  %v9662_v3 = vld [vmem:[#allocation13 + $0xa0] ss:$8 sps:$4 sm:$0xff]  }
 0xe55   :  { %3914 = vmatprep.subr.bf16.mxu1 %v9646_v32  ;;  %v9668_v32 = vld [vmem:[#allocation13 + $0xc0] ss:$8 sps:$4 sm:$0xff]  }
 0xe58   :  { %3915 = vmatpush1.bf16.msra.mxu1 %v9644_v59  ;;  %v9673_v59 = vld [vmem:[#allocation13 + $0xd4] ss:$8 sps:$4 sm:$0xff]  }
 0xe59   :  { %3916 = vmatprep.subr.bf16.mxu1 %v9649_v16  ;;  %v9671_v16 = vld [vmem:[#allocation13 + $0xd0] ss:$8 sps:$4 sm:$0xff]  }
 0xe5b   :  { %v10177_v43 = vpop.eup %10176 }
 0xe5c   :  { %v2787_v47 = vmul.f32 %v10177_v43, %v11890_v38  ;;  %v2786_v55 = vmul.f32 %v10177_v43, %v11887_v44  ;;  %3917 = vmatpush1.bf16.msra.mxu1 %v9647_v40  ;;  %v9653_v38 = vld [vmem:[#allocation13 + $0x70] ss:$8 sps:$4 sm:$0xff]   ;;  %v9658_v44 = vld [vmem:[#allocation13 + $0x84] ss:$8 sps:$4 sm:$0xff]   ;;  %v9679_v43 = vld [vmem:[#allocation13 + $0xf4] ss:$8 sps:$4 sm:$0xff]  }
 0xe5d   :  { %v10179_v42 = vpop.eup %10178  ;;  %3918 = vmatprep.subr.bf16.mxu1 %v9652_v9  ;;  %v9676_v40 = vld [vmem:[#allocation13 + $0xe4] ss:$8 sps:$4 sm:$0xff]   ;;  %v9674_v9 = vld [vmem:[#allocation13 + $0xe0] ss:$8 sps:$4 sm:$0xff]  }
 0xe5e   :  { %v2789_v18 = vmul.f32 %v10179_v42, %v11896_v4  ;;  %v2810_v26 = vmul.f32 %v11930_v63, %v2787_v47  ;;  %v2788_v23 = vmul.f32 %v10179_v42, %v11893_v45  ;;  %v2809_v0 = vmul.f32 %v11927_v46, %v2786_v55  ;;  %v9677_v47 = vld [vmem:[#allocation13 + $0xf0] ss:$8 sps:$4 sm:$0xff]   ;;  %v9682_v55 = vld [vmem:[#allocation13 + $0x104] ss:$8 sps:$4 sm:$0xff]  }
 0xe60   :  { %v2812_v12 = vmul.f32 %v11930_v63, %v2789_v18  ;;  %v2811_v60 = vmul.f32 %v11927_v46, %v2788_v23  ;;  %3919 = vmatpush1.bf16.msra.mxu1 %v9650_v58  ;;  %v11971_v2 = vadd.f32 %v11938_v27, %v2810_v26  ;;  %v11977_v4 = vadd.f32 %v11935_v41, %v2809_v0  ;;  %v2910_v58 = vld [vmem:[#allocation12] sm:$0xf] }
 0xe61   :  { %3920 = vmatprep.subr.bf16.mxu1 %v9655_v19  ;;  %v12011_v42 = vrot.slane %v2910_v58, %v11219_v11  ;;  %v13442_v19 = vld [vmem:[#allocation25_spill] sm:$0xff]  ;;  %v12017_v26 = vrot.slane %v2910_v58, %v11216_v10  ;;  %v12020_v23 = vrot.slane %v2910_v58, %v11534_v61 }
 0xe62   :  { %v11974_v39 = vadd.f32 %v11938_v27, %v2812_v12  ;;  %v11980_v45 = vadd.f32 %v11935_v41, %v2811_v60  ;;  %v12014_v18 = vrot.slane %v2910_v58, %v13442_v19 }
 0xe64   :  { %v2907_v6 = vpack.c.bf16 %v11974_v39, %v11971_v2  ;;  %v2906_v14 = vpack.c.bf16 %v11980_v45, %v11977_v4  ;;  %3921 = vmatpush1.bf16.msra.mxu1 %v9653_v38 }
 0xe65   :  { %3922 = vmatprep.subr.bf16.mxu1 %v9658_v44 }
 0xe66   :  { %3294 = vmatprep.mubr.bf16.mxu1 %v2907_v6  ;;  %3357 = vmatprep.mubr.bf16.mxu0 %v2907_v6 }
 0xe67   :  { %3295 = vmatmul.mubr.bf16.gmra.mrb[68].mxu1 %v2906_v14  ;;  %3358 = vmatmul.mubr.bf16.gmra.mrb[84].mxu0 %v2906_v14 }
 0xe68   :  { %3923 = vmatpush1.bf16.msra.mxu1 %v9656_v13 }
 0xe69   :  { %3924 = vmatprep.subr.bf16.mxu1 %v9661_v15 }
 0xe6c   :  { %v2760_v17 = vpop.xlane.xlu0 %2759  ;;  %3925 = vmatpush1.bf16.msra.mxu1 %v9659_v36 }
 0xe6d   :  { %v2768_v25 = vmul.f32 0.00390625, %v2760_v17 }
 0xe6e   :  { %v2763_v48 = vpop.xlane.xlu1 %2762 }
 0xe6f   :  { %v2774_v7 = vadd.f32 1e-12, %v2768_v25  ;;  %v2769_v30 = vmul.f32 0.00390625, %v2763_v48 }
 0xe71   :  { %10180 = vrsqrt.f32 %v2774_v7  ;;  %v2775_v34 = vadd.f32 1e-12, %v2769_v30 }
 0xe73   :  { %10182 = vrsqrt.f32 %v2775_v34 }
 0xe7b   :  { %v10181_v53 = vpop.eup %10180 }
 0xe7c   :  { %v2791_v31 = vmul.f32 %v10181_v53, %v11910_v28  ;;  %v2790_v29 = vmul.f32 %v10181_v53, %v11907_v5 }
 0xe7d   :  { %v10183_v51 = vpop.eup %10182 }
 0xe7e   :  { %v2793_v50 = vmul.f32 %v10183_v51, %v11916_v49  ;;  %v2814_v33 = vmul.f32 %v11930_v63, %v2791_v31  ;;  %v2792_v54 = vmul.f32 %v10183_v51, %v11913_v62  ;;  %v2813_v57 = vmul.f32 %v11927_v46, %v2790_v29 }
 0xe80   :  { %v2816_v52 = vmul.f32 %v11930_v63, %v2793_v50  ;;  %v11994_v21 = vadd.f32 %v11938_v27, %v2814_v33  ;;  %v2815_v37 = vmul.f32 %v11927_v46, %v2792_v54  ;;  %v11998_v28 = vadd.f32 %v11935_v41, %v2813_v57  ;;  %v9664_v46 = vld [vmem:[#allocation13 + $0xa4] ss:$8 sps:$4 sm:$0xff]  }
 0xe81   :  { %3926 = vmatprep.subr.bf16.mxu1 %v9664_v46 }
 0xe82   :  { %v12001_v5 = vadd.f32 %v11938_v27, %v2816_v52  ;;  %v12004_v49 = vadd.f32 %v11935_v41, %v2815_v37  ;;  %3927 = vmatpush1.bf16.msra.mxu1 %v9662_v3  ;;  %v9665_v27 = vld [vmem:[#allocation13 + $0xb0] ss:$8 sps:$4 sm:$0xff]   ;;  %v9670_v41 = vld [vmem:[#allocation13 + $0xc4] ss:$8 sps:$4 sm:$0xff]  }
 0xe83   :  { %3928 = vmatprep.subr.bf16.mxu1 %v9667_v8 }
 0xe84   :  { %v2909_v62 = vpack.c.bf16 %v12001_v5, %v11994_v21  ;;  %v2908_v63 = vpack.c.bf16 %v12004_v49, %v11998_v28 }
 0xe86   :  { %3304 = vmatprep.mubr.bf16.mxu1 %v2909_v62  ;;  %3367 = vmatprep.mubr.bf16.mxu0 %v2909_v62 }
 0xe87   :  { %3305 = vmatmul.mubr.bf16.gmra.mrb[72].mxu1 %v2908_v63  ;;  %3368 = vmatmul.mubr.bf16.gmra.mrb[88].mxu0 %v2908_v63 }
 0xe88   :  { %3929 = vmatpush1.bf16.msra.mxu1 %v9665_v27 }
 0xe89   :  { %3930 = vmatprep.subr.bf16.mxu1 %v9670_v41 }
 0xe8c   :  { %3931 = vmatpush1.bf16.msra.mxu1 %v9668_v32 }
 0xe8d   :  { %3932 = vmatprep.subr.bf16.mxu1 %v9673_v59 }
 0xe90   :  { %3933 = vmatpush1.bf16.msra.mxu1 %v9671_v16 }
 0xe91   :  { %3934 = vmatprep.subr.bf16.mxu1 %v9676_v40 }
 0xe94   :  { %3935 = vmatpush1.bf16.msra.mxu1 %v9674_v9 }
 0xe95   :  { %3936 = vmatprep.subr.bf16.mxu1 %v9679_v43 }
 0xe98   :  { %3937 = vmatpush1.bf16.msra.mxu1 %v9677_v47 }
 0xe99   :  { %3969 = vmatprep.subr.bf16.mxu1 %v9682_v55 }
 0xf1a   :  { %v3286_v0 = vpop.f32.mrb[64].mxu1  ;;  %v3349_v12 = vpop.f32.mrb[80].mxu0 }
 0xf1b   :  { %v3287_v60 = vadd.f32 %v3286_v0, %v12011_v42  ;;  %v3350_v38 = vadd.f32 %v3349_v12, %v12014_v18  ;;  %v3288_v44 = vpop.f32.mrb[65].mxu1  ;;  %v3351_v6 = vpop.f32.mrb[81].mxu0 }
 0xf1c   :  { %v3289_v14 = vadd.f32 %v3288_v44, %v12017_v26  ;;  %v3352_v13 = vadd.f32 %v3351_v6, %v12020_v23  ;;  %v3290_v15 = vpop.f32.mrb[66].mxu1  ;;  %v3353_v36 = vpop.f32.mrb[82].mxu0 }
 0xf1d   :  { %v3402_v17 = vmul.f32 0.70710677, %v3287_v60  ;;  %v3404_v25 = vmul.f32 0.70710677, %v3350_v38  ;;  %v3291_v30 = vadd.f32 %v3290_v15, %v12011_v42  ;;  %v3354_v34 = vadd.f32 %v3353_v36, %v12014_v18  ;;  %v3292_v53 = vpop.f32.mrb[67].mxu1  ;;  %v3355_v31 = vpop.f32.mrb[83].mxu0 }
 0xf1e   :  { %v3403_v48 = vmul.f32 0.70710677, %v3289_v14  ;;  %v3405_v7 = vmul.f32 0.70710677, %v3352_v13  ;;  %v3293_v29 = vadd.f32 %v3292_v53, %v12017_v26  ;;  %v3356_v51 = vadd.f32 %v3355_v31, %v12020_v23  ;;  %v9680_v31 = vld [vmem:[#allocation13 + $0x100] ss:$8 sps:$4 sm:$0xff]  }
 0xf1f   :  { %10184 = verf.f32 %v3402_v17  ;;  %v3406_v50 = vmul.f32 0.70710677, %v3291_v30  ;;  %v3408_v33 = vmul.f32 0.70710677, %v3354_v34  ;;  %v3378_v8 = vmul.f32 0.5, %v3287_v60 }
 0xf20   :  { %10186 = verf.f32 %v3404_v25  ;;  %v3407_v54 = vmul.f32 0.70710677, %v3293_v29  ;;  %v3409_v57 = vmul.f32 0.70710677, %v3356_v51  ;;  %v3380_v27 = vmul.f32 0.5, %v3350_v38 }
 0xf21   :  { %10188 = verf.f32 %v3403_v48  ;;  %v3379_v59 = vmul.f32 0.5, %v3289_v14  ;;  %v3382_v40 = vmul.f32 0.5, %v3291_v30  ;;  %v3381_v47 = vmul.f32 0.5, %v3352_v13 }
 0xf22   :  { %10190 = verf.f32 %v3405_v7  ;;  %v3384_v58 = vmul.f32 0.5, %v3354_v34  ;;  %v3383_v15 = vmul.f32 0.5, %v3293_v29  ;;  %v3385_v38 = vmul.f32 0.5, %v3356_v51  ;;  %v9685_v29 = vld [vmem:[#allocation13 + $0x114] ss:$8 sps:$4 sm:$0xff]  }
 0xf23   :  { %10192 = verf.f32 %v3406_v50  ;;  %v9683_v51 = vld [vmem:[#allocation13 + $0x110] ss:$8 sps:$4 sm:$0xff]  }
 0xf24   :  { %10194 = verf.f32 %v3408_v33  ;;  %v9688_v33 = vld [vmem:[#allocation13 + $0x124] ss:$8 sps:$4 sm:$0xff]  }
 0xf25   :  { %10196 = verf.f32 %v3407_v54 }
 0xf26   :  { %10198 = verf.f32 %v3409_v57 }
 0xf29   :  { %v10185_v52 = vpop.eup %10184 }
 0xf2a   :  { %v10187_v37 = vpop.eup %10186  ;;  %v3450_v46 = vadd.f32 1.0, %v10185_v52 }
 0xf2b   :  { %v10189_v62 = vpop.eup %10188  ;;  %v3452_v41 = vadd.f32 1.0, %v10187_v37 }
 0xf2c   :  { %v10191_v63 = vpop.eup %10190  ;;  %v3451_v16 = vadd.f32 1.0, %v10189_v62  ;;  %v3474_v44 = vmul.f32 %v3450_v46, %v3378_v8 }
 0xf2d   :  { %v10193_v3 = vpop.eup %10192  ;;  %v3453_v55 = vadd.f32 1.0, %v10191_v63  ;;  %v12030_v17 = vmul.f32 %v3452_v41, %v3380_v27  ;;  %v9686_v41 = vld [vmem:[#allocation13 + $0x120] ss:$8 sps:$4 sm:$0xff]  }
 0xf2e   :  { %v10195_v32 = vpop.eup %10194  ;;  %v3454_v9 = vadd.f32 1.0, %v10193_v3  ;;  %v3475_v14 = vmul.f32 %v3451_v16, %v3379_v59  ;;  %v9691_v16 = vld [vmem:[#allocation13 + $0x134] ss:$8 sps:$4 sm:$0xff]  }
 0xf2f   :  { %v10197_v43 = vpop.eup %10196  ;;  %v3456_v0 = vadd.f32 1.0, %v10195_v32  ;;  %v12034_v30 = vmul.f32 %v3453_v55, %v3381_v47 }
 0xf30   :  { %v10199_v12 = vpop.eup %10198  ;;  %v3478_v6 = vmul.f32 %v3454_v9, %v3382_v40  ;;  %v3455_v36 = vadd.f32 1.0, %v10197_v43 }
 0xf31   :  { %v12032_v60 = vmul.f32 %v3456_v0, %v3384_v58  ;;  %v3457_v25 = vadd.f32 1.0, %v10199_v12 }
 0xf32   :  { %v3562_v48 = vpack.c.bf16 %v3478_v6, %v3474_v44  ;;  %v3479_v7 = vmul.f32 %v3455_v36, %v3383_v15  ;;  %v9689_v44 = vld [vmem:[#allocation13 + $0x130] ss:$8 sps:$4 sm:$0xff]   ;;  %v9694_v15 = vld [vmem:[#allocation13 + $0x144] ss:$8 sps:$4 sm:$0xff]  }
 0xf33   :  { %v3564_v13 = vpack.c.bf16 %v12032_v60, %v12030_v17  ;;  %v12038_v34 = vmul.f32 %v3457_v25, %v3385_v38 }
 0xf34   :  { %v3563_v53 = vpack.c.bf16 %v3479_v7, %v3475_v14  ;;  %v9692_v14 = vld [vmem:[#allocation13 + $0x140] ss:$8 sps:$4 sm:$0xff]   ;;  %v9695_v7 = vld [vmem:[#allocation13 + $0x150] ss:$8 sps:$4 sm:$0xff]  }
 0xf35   :  { %v3565_v50 = vpack.c.bf16 %v12038_v34, %v12034_v30 }
 0xf36   :  { %3938 = vmatprep.mubr.bf16.mxu1 %v3563_v53 }
 0xf37   :  { %3939 = vmatmul.mubr.bf16.vlgmr.msra.gmra.mrb[76].mxu1 %v3562_v48  ;;  %v9697_v48 = vld [vmem:[#allocation13 + $0x154] ss:$8 sps:$4 sm:$0xff]  }
 0xf38   :  { %3970 = vmatpush1.bf16.msra.mxu1 %v9680_v31  ;;  %v9700_v31 = vld [vmem:[#allocation13 + $0x164] ss:$8 sps:$4 sm:$0xff]  }
 0xf39   :  { %3971 = vmatprep.subr.bf16.mxu1 %v9685_v29 }
 0xf3a   :  { %v3296_v54 = vpop.f32.mrb[68].mxu1  ;;  %v3359_v57 = vpop.f32.mrb[84].mxu0 }
 0xf3b   :  { %v3297_v52 = vadd.f32 %v3296_v54, %v12011_v42  ;;  %v3360_v37 = vadd.f32 %v3359_v57, %v12014_v18  ;;  %v3298_v62 = vpop.f32.mrb[69].mxu1  ;;  %v3361_v63 = vpop.f32.mrb[85].mxu0  ;;  %v9698_v57 = vld [vmem:[#allocation13 + $0x160] ss:$8 sps:$4 sm:$0xff]  }
 0xf3c   :  { %v3299_v46 = vadd.f32 %v3298_v62, %v12017_v26  ;;  %v3362_v3 = vadd.f32 %v3361_v63, %v12020_v23  ;;  %v3300_v8 = vpop.f32.mrb[70].mxu1  ;;  %v3363_v27 = vpop.f32.mrb[86].mxu0  ;;  %3972 = vmatpush1.bf16.msra.mxu1 %v9683_v51 }
 0xf3d   :  { %v3410_v32 = vmul.f32 0.70710677, %v3297_v52  ;;  %v3412_v59 = vmul.f32 0.70710677, %v3360_v37  ;;  %3973 = vmatprep.subr.bf16.mxu1 %v9688_v33  ;;  %v3301_v43 = vadd.f32 %v3300_v8, %v12011_v42  ;;  %v3364_v47 = vadd.f32 %v3363_v27, %v12014_v18  ;;  %v3302_v55 = vpop.f32.mrb[71].mxu1  ;;  %v3365_v58 = vpop.f32.mrb[87].mxu0 }
 0xf3e   :  { %v3411_v40 = vmul.f32 0.70710677, %v3299_v46  ;;  %v3413_v9 = vmul.f32 0.70710677, %v3362_v3  ;;  %v3303_v0 = vadd.f32 %v3302_v55, %v12017_v26  ;;  %v3366_v12 = vadd.f32 %v3365_v58, %v12020_v23 }
 0xf3f   :  { %10200 = verf.f32 %v3410_v32  ;;  %v3414_v6 = vmul.f32 0.70710677, %v3301_v43  ;;  %v3416_v36 = vmul.f32 0.70710677, %v3364_v47  ;;  %v3386_v63 = vmul.f32 0.5, %v3297_v52 }
 0xf40   :  { %10202 = verf.f32 %v3412_v59  ;;  %3974 = vmatpush1.bf16.msra.mxu1 %v9686_v41  ;;  %v3415_v38 = vmul.f32 0.70710677, %v3303_v0  ;;  %v3417_v25 = vmul.f32 0.70710677, %v3366_v12  ;;  %v3388_v8 = vmul.f32 0.5, %v3360_v37 }
 0xf41   :  { %10204 = verf.f32 %v3411_v40  ;;  %3975 = vmatprep.subr.bf16.mxu1 %v9691_v16  ;;  %v9703_v41 = vld [vmem:[#allocation13 + $0x174] ss:$8 sps:$4 sm:$0xff]   ;;  %v3387_v59 = vmul.f32 0.5, %v3299_v46  ;;  %v3390_v40 = vmul.f32 0.5, %v3301_v43  ;;  %v3389_v58 = vmul.f32 0.5, %v3362_v3 }
 0xf42   :  { %10206 = verf.f32 %v3413_v9  ;;  %v9701_v52 = vld [vmem:[#allocation13 + $0x170] ss:$8 sps:$4 sm:$0xff]   ;;  %v3393_v46 = vmul.f32 0.5, %v3366_v12  ;;  %v9706_v43 = vld [vmem:[#allocation13 + $0x184] ss:$8 sps:$4 sm:$0xff]  }
 0xf43   :  { %10208 = verf.f32 %v3414_v6  ;;  %v3392_v6 = vmul.f32 0.5, %v3364_v47 }
 0xf44   :  { %10210 = verf.f32 %v3416_v36  ;;  %3976 = vmatpush1.bf16.msra.mxu1 %v9689_v44 }
 0xf45   :  { %10212 = verf.f32 %v3415_v38  ;;  %3977 = vmatprep.subr.bf16.mxu1 %v9694_v15 }
 0xf46   :  { %10214 = verf.f32 %v3417_v25 }
 0xf48   :  { %3978 = vmatpush1.bf16.msra.mxu1 %v9692_v14  ;;  %v3391_v14 = vmul.f32 0.5, %v3303_v0 }
 0xf49   :  { %v10201_v53 = vpop.eup %10200  ;;  %3979 = vmatprep.subr.bf16.mxu1 %v9697_v48 }
 0xf4a   :  { %v10203_v29 = vpop.eup %10202  ;;  %v3458_v54 = vadd.f32 1.0, %v10201_v53 }
 0xf4b   :  { %v10205_v51 = vpop.eup %10204  ;;  %v3460_v27 = vadd.f32 1.0, %v10203_v29 }
 0xf4c   :  { %v10207_v33 = vpop.eup %10206  ;;  %3980 = vmatpush1.bf16.msra.mxu1 %v9695_v7  ;;  %v3459_v16 = vadd.f32 1.0, %v10205_v51  ;;  %v3482_v38 = vmul.f32 %v3458_v54, %v3386_v63  ;;  %v9704_v54 = vld [vmem:[#allocation13 + $0x180] ss:$8 sps:$4 sm:$0xff]   ;;  %v9712_v63 = vld [vmem:[#allocation13 + $0x1a4] ss:$8 sps:$4 sm:$0xff]  }
 0xf4d   :  { %v10209_v62 = vpop.eup %10208  ;;  %3981 = vmatprep.subr.bf16.mxu1 %v9700_v31  ;;  %v3461_v44 = vadd.f32 1.0, %v10207_v33  ;;  %v12050_v37 = vmul.f32 %v3460_v27, %v3388_v8 }
 0xf4e   :  { %v10211_v32 = vpop.eup %10210  ;;  %v3462_v9 = vadd.f32 1.0, %v10209_v62  ;;  %v3483_v31 = vmul.f32 %v3459_v16, %v3387_v59  ;;  %v9707_v62 = vld [vmem:[#allocation13 + $0x190] ss:$8 sps:$4 sm:$0xff]  }
 0xf4f   :  { %v10213_v55 = vpop.eup %10212  ;;  %v3464_v15 = vadd.f32 1.0, %v10211_v32  ;;  %v12054_v47 = vmul.f32 %v3461_v44, %v3389_v58  ;;  %v9710_v44 = vld [vmem:[#allocation13 + $0x1a0] ss:$8 sps:$4 sm:$0xff]  }
 0xf50   :  { %v10215_v36 = vpop.eup %10214  ;;  %v3486_v25 = vmul.f32 %v3462_v9, %v3390_v40  ;;  %v3463_v48 = vadd.f32 1.0, %v10213_v55  ;;  %3982 = vmatpush1.bf16.msra.mxu1 %v9698_v57  ;;  %v9709_v57 = vld [vmem:[#allocation13 + $0x194] ss:$8 sps:$4 sm:$0xff]  }
 0xf51   :  { %v12052_v7 = vmul.f32 %v3464_v15, %v3392_v6  ;;  %v3465_v53 = vadd.f32 1.0, %v10215_v36  ;;  %3983 = vmatprep.subr.bf16.mxu1 %v9703_v41  ;;  %v9715_v36 = vld [vmem:[#allocation13 + $0x1b4] ss:$8 sps:$4 sm:$0xff]  }
 0xf52   :  { %v3487_v3 = vmul.f32 %v3463_v48, %v3391_v14  ;;  %v3566_v29 = vpack.c.bf16 %v3486_v25, %v3482_v38 }
 0xf53   :  { %v12056_v51 = vmul.f32 %v3465_v53, %v3393_v46 }
 0xf54   :  { %v3567_v33 = vpack.c.bf16 %v3487_v3, %v3483_v31  ;;  %3984 = vmatpush1.bf16.msra.mxu1 %v9701_v52  ;;  %v9713_v31 = vld [vmem:[#allocation13 + $0x1b0] ss:$8 sps:$4 sm:$0xff]  }
 0xf55   :  { %3985 = vmatprep.subr.bf16.mxu1 %v9706_v43  ;;  %v3569_v12 = vpack.c.bf16 %v12056_v51, %v12054_v47 }
 0xf56   :  { %3948 = vmatprep.mubr.bf16.mxu1 %v3567_v33 }
 0xf57   :  { %3949 = vmatmul.mubr.bf16.gmra.mrb[80].mxu1 %v3566_v29  ;;  %v9718_v29 = vld [vmem:[#allocation13 + $0x1c4] ss:$8 sps:$4 sm:$0xff]  }
 0xf58   :  { %3986 = vmatpush1.bf16.msra.mxu1 %v9704_v54 }
 0xf59   :  { %3987 = vmatprep.subr.bf16.mxu1 %v9709_v57  ;;  %v9721_v57 = vld [vmem:[#allocation13 + $0x1d4] ss:$8 sps:$4 sm:$0xff]  }
 0xf5a   :  { %v3306_v8 = vpop.f32.mrb[72].mxu1  ;;  %v3369_v27 = vpop.f32.mrb[88].mxu0 }
 0xf5b   :  { %v3307_v41 = vadd.f32 %v3306_v8, %v12011_v42  ;;  %v3370_v32 = vadd.f32 %v3369_v27, %v12014_v18  ;;  %v3308_v59 = vpop.f32.mrb[73].mxu1  ;;  %v3371_v16 = vpop.f32.mrb[89].mxu0 }
 0xf5c   :  { %v3309_v40 = vadd.f32 %v3308_v59, %v12017_v26  ;;  %v3372_v9 = vadd.f32 %v3371_v16, %v12020_v23  ;;  %v3310_v55 = vpop.f32.mrb[74].mxu1  ;;  %v3373_v58 = vpop.f32.mrb[90].mxu0  ;;  %3988 = vmatpush1.bf16.msra.mxu1 %v9707_v62  ;;  %v9724_v62 = vld [vmem:[#allocation13 + $0x1e4] ss:$8 sps:$4 sm:$0xff]   ;;  %v9722_v16 = vld [vmem:[#allocation13 + $0x1e0] ss:$8 sps:$4 sm:$0xff]  }
 0xf5d   :  { %v3418_v6 = vmul.f32 0.70710677, %v3307_v41  ;;  %v3420_v15 = vmul.f32 0.70710677, %v3370_v32  ;;  %3989 = vmatprep.subr.bf16.mxu1 %v9712_v63  ;;  %v3311_v14 = vadd.f32 %v3310_v55, %v12011_v42  ;;  %v3374_v48 = vadd.f32 %v3373_v58, %v12014_v18  ;;  %v3312_v52 = vpop.f32.mrb[75].mxu1  ;;  %v3375_v46 = vpop.f32.mrb[91].mxu0 }
 0xf5e   :  { %v3419_v38 = vmul.f32 0.70710677, %v3309_v40  ;;  %v3421_v25 = vmul.f32 0.70710677, %v3372_v9  ;;  %v3313_v53 = vadd.f32 %v3312_v52, %v12017_v26  ;;  %v3376_v43 = vadd.f32 %v3375_v46, %v12020_v23  ;;  %v9716_v18 = vld [vmem:[#allocation13 + $0x1c0] ss:$8 sps:$4 sm:$0xff]  }
 0xf5f   :  { %10216 = verf.f32 %v3418_v6  ;;  %v3422_v3 = vmul.f32 0.70710677, %v3311_v14  ;;  %v3424_v33 = vmul.f32 0.70710677, %v3374_v48  ;;  %v9719_v26 = vld [vmem:[#allocation13 + $0x1d0] ss:$8 sps:$4 sm:$0xff]  }
 0xf60   :  { %10218 = verf.f32 %v3420_v15  ;;  %3990 = vmatpush1.bf16.msra.mxu1 %v9710_v44  ;;  %v3423_v54 = vmul.f32 0.70710677, %v3313_v53  ;;  %v3425_v42 = vmul.f32 0.70710677, %v3376_v43  ;;  %v3394_v58 = vmul.f32 0.5, %v3307_v41 }
 0xf61   :  { %10220 = verf.f32 %v3419_v38  ;;  %3991 = vmatprep.subr.bf16.mxu1 %v9715_v36  ;;  %v3396_v44 = vmul.f32 0.5, %v3370_v32  ;;  %v9727_v15 = vld [vmem:[#allocation13 + $0x1f4] ss:$8 sps:$4 sm:$0xff]   ;;  %v3395_v38 = vmul.f32 0.5, %v3309_v40  ;;  %v3398_v52 = vmul.f32 0.5, %v3311_v14 }
 0xf62   :  { %10222 = verf.f32 %v3421_v25  ;;  %v9725_v41 = vld [vmem:[#allocation13 + $0x1f0] ss:$8 sps:$4 sm:$0xff]  }
 0xf63   :  { %10224 = verf.f32 %v3422_v3  ;;  %v3397_v3 = vmul.f32 0.5, %v3372_v9 }
 0xf64   :  { %10226 = verf.f32 %v3424_v33  ;;  %3992 = vmatpush1.bf16.msra.mxu1 %v9713_v31  ;;  %v3400_v33 = vmul.f32 0.5, %v3374_v48 }
 0xf65   :  { %10228 = verf.f32 %v3423_v54  ;;  %3993 = vmatprep.subr.bf16.mxu1 %v9718_v29 }
 0xf66   :  { %10230 = verf.f32 %v3425_v42 }
 0xf68   :  { %3994 = vmatpush1.bf16.msra.mxu1 %v9716_v18 }
 0xf69   :  { %v10217_v23 = vpop.eup %10216  ;;  %3995 = vmatprep.subr.bf16.mxu1 %v9721_v57 }
 0xf6a   :  { %v10219_v63 = vpop.eup %10218  ;;  %v3466_v59 = vadd.f32 1.0, %v10217_v23 }
 0xf6b   :  { %v10221_v8 = vpop.eup %10220  ;;  %v3468_v6 = vadd.f32 1.0, %v10219_v63  ;;  %v3401_v63 = vmul.f32 0.5, %v3376_v43 }
 0xf6c   :  { %v10223_v27 = vpop.eup %10222  ;;  %3996 = vmatpush1.bf16.msra.mxu1 %v9719_v26  ;;  %v3467_v25 = vadd.f32 1.0, %v10221_v8  ;;  %v3490_v18 = vmul.f32 %v3466_v59, %v3394_v58  ;;  %v3399_v26 = vmul.f32 0.5, %v3313_v53  ;;  %v3574_v53 = vld [vmem:[#allocation15] sm:$0x3] }
 0xf6d   :  { %v10225_v55 = vpop.eup %10224  ;;  %3997 = vmatprep.subr.bf16.mxu1 %v9724_v62  ;;  %v3469_v29 = vadd.f32 1.0, %v10223_v27  ;;  %v3492_v32 = vmul.f32 %v3468_v6, %v3396_v44  ;;  %v3579_v43 = vrot.slane %v3574_v53, %v11219_v11  ;;  %v3583_v30 = vrot.slane %v3574_v53, %v11216_v10  ;;  %v9751_v53 = vld [vmem:[%s13410_s4 + $0x3a4] ss:$24 sps:$4 sm:$0xff]  }
 0xf6e   :  { %v10227_v36 = vpop.eup %10226  ;;  %v3470_v46 = vadd.f32 1.0, %v10225_v55  ;;  %v3491_v40 = vmul.f32 %v3467_v25, %v3395_v38 }
 0xf6f   :  { %v10229_v31 = vpop.eup %10228  ;;  %v3472_v54 = vadd.f32 1.0, %v10227_v36  ;;  %v3493_v55 = vmul.f32 %v3469_v29, %v3397_v3 }
 0xf70   :  { %v10231_v42 = vpop.eup %10230  ;;  %v3494_v57 = vmul.f32 %v3470_v46, %v3398_v52  ;;  %v3471_v23 = vadd.f32 1.0, %v10229_v31  ;;  %3998 = vmatpush1.bf16.msra.mxu1 %v9722_v16 }
 0xf71   :  { %v3496_v62 = vmul.f32 %v3472_v54, %v3400_v33  ;;  %v3473_v0 = vadd.f32 1.0, %v10231_v42  ;;  %3999 = vmatprep.subr.bf16.mxu1 %v9727_v15 }
 0xf72   :  { %v3495_v14 = vmul.f32 %v3471_v23, %v3399_v26  ;;  %v3570_v8 = vpack.c.bf16 %v3494_v57, %v3490_v18 }
 0xf73   :  { %v3497_v9 = vmul.f32 %v3473_v0, %v3401_v63  ;;  %v3572_v27 = vpack.c.bf16 %v3496_v62, %v3492_v32  ;;  %v13443_v0 = vpack.c.bf16 %v12052_v7, %v12050_v37  ;;  %v9733_v63 = vld [vmem:[%s13410_s4 + $0x314] ss:$24 sps:$4 sm:$0xff]  }
 0xf74   :  { %v3571_v48 = vpack.c.bf16 %v3495_v14, %v3491_v40  ;;  %4000 = vmatpush1.bf16.msra.mxu1 %v9725_v41  ;;  %v9736_v40 = vld [vmem:[%s13410_s4 + $0x334] ss:$24 sps:$4 sm:$0xff]   ;;  %v9739_v14 = vld [vmem:[%s13410_s4 + $0x344] ss:$24 sps:$4 sm:$0xff]  }
 0xf75   :  { %v3573_v36 = vpack.c.bf16 %v3497_v9, %v3493_v55  ;;  %4930 = vmatprep.subr.bf16.mxu1 %v9733_v63  ;;  %v9737_v55 = vld [vmem:[%s13410_s4 + $0x340] ss:$24 sps:$4 sm:$0xff]   ;;  %v9742_v9 = vld [vmem:[%s13410_s4 + $0x364] ss:$24 sps:$4 sm:$0xff]  }
 0xf76   :  { %3958 = vmatprep.mubr.bf16.mxu1 %v3571_v48  ;;  %v9740_v48 = vld [vmem:[%s13410_s4 + $0x360] ss:$24 sps:$4 sm:$0xff]  }
 0xf77   :  { %3959 = vmatmul.mubr.bf16.gmra.mrb[84].mxu1 %v3570_v8  ;;  %v9734_v8 = vld [vmem:[%s13410_s4 + $0x330] ss:$24 sps:$4 sm:$0xff]  }
 0xf78   :  { %4001 = vmatprep.mubr.bf16.mxu1 %v3565_v50 }
 0xf7f   :  { %4002 = vmatmul.mubr.bf16.vlgmr.msra.gmra.mrb[76].mxu1 %v3564_v13 }
 0xf80   :  { %4011 = vmatprep.mubr.bf16.mxu1 %v3569_v12 }
 0xf87   :  { %4012 = vmatmul.mubr.bf16.gmra.mrb[80].mxu1 %v13443_v0  ;;  %v9748_v0 = vld [vmem:[%s13410_s4 + $0x394] ss:$24 sps:$4 sm:$0xff]  }
 0xf88   :  { %4021 = vmatprep.mubr.bf16.mxu1 %v3573_v36  ;;  %v9743_v36 = vld [vmem:[%s13410_s4 + $0x370] ss:$24 sps:$4 sm:$0xff]  }
 0xf8f   :  { %4022 = vmatmul.mubr.bf16.gmra.mrb[84].mxu1 %v3572_v27  ;;  %v9745_v27 = vld [vmem:[%s13410_s4 + $0x374] ss:$24 sps:$4 sm:$0xff]  }
0x1052   :  { %v4003_v34 = vpop.f32.mrb[76].mxu1 }
0x1053   :  { %v9275_v50 = vadd.f32 %v4003_v34, %v3579_v43  ;;  %v4005_v59 = vpop.f32.mrb[77].mxu1  ;;  %v9754_v34 = vld [vmem:[%s13410_s4 + $0x3c4] ss:$24 sps:$4 sm:$0xff]  }
0x1054   :  { %v9276_v17 = vadd.f32 %v4005_v59, %v3583_v30  ;;  %v4007_v60 = vpop.f32.mrb[78].mxu1  ;;  %v9752_v59 = vld [vmem:[%s13410_s4 + $0x3c0] ss:$24 sps:$4 sm:$0xff]  }
0x1055   :  { %v12085_v13 = vadd.f32 %v9275_v50, %v11953_v35  ;;  %v9277_v47 = vadd.f32 %v4007_v60, %v3579_v43  ;;  %v4009_v51 = vpop.f32.mrb[79].mxu1  ;;  %v9757_v50 = vld [vmem:[%s13410_s4 + $0x3d4] ss:$24 sps:$4 sm:$0xff]  }
0x1056   :  { %v12088_v37 = vadd.f32 %v9276_v17, %v11947_v20  ;;  %v9278_v7 = vadd.f32 %v4009_v51, %v3583_v30  ;;  %v9755_v17 = vld [vmem:[%s13410_s4 + $0x3d0] ss:$24 sps:$4 sm:$0xff]   ;;  %v9760_v60 = vld [vmem:[%s13410_s4 + $0x3f4] ss:$24 sps:$4 sm:$0xff]  }
0x1057   :  { %v12091_v12 = vadd.f32 %v9277_v47, %v11956_v22  ;;  %v9763_v47 = vld [vmem:[%s13410_s4 + $0x404] ss:$24 sps:$4 sm:$0xff]   ;;  %v9758_v51 = vld [vmem:[%s13410_s4 + $0x3f0] ss:$24 sps:$4 sm:$0xff]  }
0x1058   :  { %v12094_v16 = vadd.f32 %v9278_v7, %v11950_v56  ;;  %v4046_v58 = vadd.f32 %v12088_v37, %v12085_v13  ;;  %v9761_v7 = vld [vmem:[%s13410_s4 + $0x400] ss:$24 sps:$4 sm:$0xff]  }
0x105a   :  { %v4013_v44 = vpop.f32.mrb[80].mxu1  ;;  %4047 = vadd.xlane.f32.xlu0 %v4046_v58  ;;  %v4049_v35 = vadd.f32 %v12094_v16, %v12091_v12  ;;  %v9766_v58 = vld [vmem:[%s13410_s4 + $0x424] ss:$24 sps:$4 sm:$0xff]  }
0x105b   :  { %v9279_v6 = vadd.f32 %v4013_v44, %v3579_v43  ;;  %v4015_v15 = vpop.f32.mrb[81].mxu1  ;;  %v9769_v44 = vld [vmem:[%s13410_s4 + $0x434] ss:$24 sps:$4 sm:$0xff]  }
0x105c   :  { %v9280_v38 = vadd.f32 %v4015_v15, %v3583_v30  ;;  %v4017_v20 = vpop.f32.mrb[82].mxu1  ;;  %4050 = vadd.xlane.f32.xlu1 %v4049_v35  ;;  %v9764_v35 = vld [vmem:[%s13410_s4 + $0x420] ss:$24 sps:$4 sm:$0xff]   ;;  %v9772_v15 = vld [vmem:[%s13410_s4 + $0x454] ss:$24 sps:$4 sm:$0xff]  }
0x105d   :  { %v12101_v25 = vadd.f32 %v9279_v6, %v11977_v4  ;;  %v9281_v22 = vadd.f32 %v4017_v20, %v3579_v43  ;;  %v4019_v52 = vpop.f32.mrb[83].mxu1  ;;  %v9767_v6 = vld [vmem:[%s13410_s4 + $0x430] ss:$24 sps:$4 sm:$0xff]  }
0x105e   :  { %v12104_v56 = vadd.f32 %v9280_v38, %v11971_v2  ;;  %v9282_v46 = vadd.f32 %v4019_v52, %v3583_v30  ;;  %v9775_v38 = vld [vmem:[%s13410_s4 + $0x464] ss:$24 sps:$4 sm:$0xff]   ;;  %v9770_v20 = vld [vmem:[%s13410_s4 + $0x450] ss:$24 sps:$4 sm:$0xff]  }
0x105f   :  { %v12107_v31 = vadd.f32 %v9281_v22, %v11980_v45  ;;  %v9773_v22 = vld [vmem:[%s13410_s4 + $0x460] ss:$24 sps:$4 sm:$0xff]   ;;  %v9778_v52 = vld [vmem:[%s13410_s4 + $0x484] ss:$24 sps:$4 sm:$0xff]  }
0x1060   :  { %v12110_v3 = vadd.f32 %v9282_v46, %v11974_v39  ;;  %v4052_v29 = vadd.f32 %v12104_v56, %v12101_v25  ;;  %v9781_v46 = vld [vmem:[%s13410_s4 + $0x494] ss:$24 sps:$4 sm:$0xff]  }
0x1062   :  { %v4023_v33 = vpop.f32.mrb[84].mxu1  ;;  %4053 = vadd.xlane.f32.xlu0 %v4052_v29  ;;  %v4055_v4 = vadd.f32 %v12110_v3, %v12107_v31  ;;  %v9776_v29 = vld [vmem:[%s13410_s4 + $0x480] ss:$24 sps:$4 sm:$0xff]  }
0x1063   :  { %v9283_v54 = vadd.f32 %v4023_v33, %v3579_v43  ;;  %v4025_v42 = vpop.f32.mrb[85].mxu1  ;;  %v9779_v33 = vld [vmem:[%s13410_s4 + $0x490] ss:$24 sps:$4 sm:$0xff]  }
0x1064   :  { %v9284_v18 = vadd.f32 %v4025_v42, %v3583_v30  ;;  %v4027_v2 = vpop.f32.mrb[86].mxu1  ;;  %4056 = vadd.xlane.f32.xlu1 %v4055_v4  ;;  %v9784_v4 = vld [vmem:[%s13410_s4 + $0x4b4] ss:$24 sps:$4 sm:$0xff]   ;;  %v9782_v42 = vld [vmem:[%s13410_s4 + $0x4b0] ss:$24 sps:$4 sm:$0xff]  }
0x1065   :  { %v12117_v57 = vadd.f32 %v9283_v54, %v11998_v28  ;;  %v9285_v45 = vadd.f32 %v4027_v2, %v3579_v43  ;;  %v4029_v26 = vpop.f32.mrb[87].mxu1  ;;  %v9746_v43 = vld [vmem:[%s13410_s4 + $0x390] ss:$24 sps:$4 sm:$0xff]   ;;  %v9787_v54 = vld [vmem:[%s13410_s4 + $0x4c4] ss:$24 sps:$4 sm:$0xff]  }
0x1066   :  { %v12120_v39 = vadd.f32 %v9284_v18, %v11994_v21  ;;  %v9286_v23 = vadd.f32 %v4029_v26, %v3583_v30  ;;  %v9728_v21 = vld [vmem:[%s13410_s4 + $0x300] ss:$24 sps:$4 sm:$0xff]  }
0x1067   :  { %v12123_v41 = vadd.f32 %v9285_v45, %v12004_v49  ;;  %v9730_v49 = vld [vmem:[%s13410_s4 + $0x304] ss:$24 sps:$4 sm:$0xff]   ;;  %v9749_v30 = vld [vmem:[%s13410_s4 + $0x3a0] ss:$24 sps:$4 sm:$0xff]  }
0x1068   :  { %v12126_v32 = vadd.f32 %v9286_v23, %v12001_v5  ;;  %v4058_v62 = vadd.f32 %v12120_v39, %v12117_v57  ;;  %v9731_v5 = vld [vmem:[%s13410_s4 + $0x310] ss:$24 sps:$4 sm:$0xff]   ;;  %4804 = vmatprep.subr.bf16.mxu0 %v9730_v49  ;;  %v9785_v18 = vld [vmem:[%s13410_s4 + $0x4c0] ss:$24 sps:$4 sm:$0xff]  }
0x1069   :  { %4805 = vmatpush1.bf16.msra.mxu0 %v9728_v21  ;;  %4931 = vmatpush1.bf16.msra.mxu1 %v9731_v5 }
0x106a   :  { %4059 = vadd.xlane.f32.xlu0 %v4058_v62  ;;  %v4061_v28 = vadd.f32 %v12126_v32, %v12123_v41  ;;  %4806 = vmatprep.subr.bf16.mxu0 %v9736_v40 }
0x106b   :  { %4932 = vmatprep.subr.bf16.mxu1 %v9739_v14 }
0x106c   :  { %4062 = vadd.xlane.f32.xlu1 %v4061_v28 }
0x106d   :  { %4807 = vmatpush1.bf16.msra.mxu0 %v9734_v8  ;;  %4933 = vmatpush1.bf16.msra.mxu1 %v9737_v55 }
0x106e   :  { %4808 = vmatprep.subr.bf16.mxu0 %v9742_v9  ;;  %4934 = vmatprep.subr.bf16.mxu1 %v9745_v27 }
0x1071   :  { %4809 = vmatpush1.bf16.msra.mxu0 %v9740_v48  ;;  %4935 = vmatpush1.bf16.msra.mxu1 %v9743_v36 }
0x1072   :  { %4810 = vmatprep.subr.bf16.mxu0 %v9748_v0  ;;  %4936 = vmatprep.subr.bf16.mxu1 %v9751_v53 }
0x1075   :  { %4811 = vmatpush1.bf16.msra.mxu0 %v9746_v43  ;;  %4937 = vmatpush1.bf16.msra.mxu1 %v9749_v30 }
0x1076   :  { %4812 = vmatprep.subr.bf16.mxu0 %v9754_v34  ;;  %4938 = vmatprep.subr.bf16.mxu1 %v9757_v50 }
0x1079   :  { %4813 = vmatpush1.bf16.msra.mxu0 %v9752_v59  ;;  %4939 = vmatpush1.bf16.msra.mxu1 %v9755_v17 }
0x107a   :  { %4814 = vmatprep.subr.bf16.mxu0 %v9760_v60  ;;  %4940 = vmatprep.subr.bf16.mxu1 %v9763_v47 }
0x107d   :  { %4815 = vmatpush1.bf16.msra.mxu0 %v9758_v51  ;;  %4941 = vmatpush1.bf16.msra.mxu1 %v9761_v7 }
0x107e   :  { %4816 = vmatprep.subr.bf16.mxu0 %v9766_v58  ;;  %4942 = vmatprep.subr.bf16.mxu1 %v9769_v44  ;;  %v9793_v44 = vld [vmem:[%s13410_s4 + $0x4f4] ss:$24 sps:$4 sm:$0xff]  }
0x1081   :  { %4817 = vmatpush1.bf16.msra.mxu0 %v9764_v35  ;;  %4943 = vmatpush1.bf16.msra.mxu1 %v9767_v6  ;;  %v9791_v6 = vld [vmem:[%s13410_s4 + $0x4f0] ss:$24 sps:$4 sm:$0xff]  }
0x1082   :  { %4818 = vmatprep.subr.bf16.mxu0 %v9772_v15  ;;  %4944 = vmatprep.subr.bf16.mxu1 %v9775_v38  ;;  %v9796_v15 = vld [vmem:[%s13410_s4 + $0x514] ss:$24 sps:$4 sm:$0xff]   ;;  %v9794_v38 = vld [vmem:[%s13410_s4 + $0x510] ss:$24 sps:$4 sm:$0xff]  }
0x1085   :  { %4819 = vmatpush1.bf16.msra.mxu0 %v9770_v20  ;;  %4945 = vmatpush1.bf16.msra.mxu1 %v9773_v22  ;;  %v9799_v20 = vld [vmem:[%s13410_s4 + $0x524] ss:$24 sps:$4 sm:$0xff]   ;;  %v9797_v22 = vld [vmem:[%s13410_s4 + $0x520] ss:$24 sps:$4 sm:$0xff]  }
0x1086   :  { %4820 = vmatprep.subr.bf16.mxu0 %v9778_v52  ;;  %4946 = vmatprep.subr.bf16.mxu1 %v9781_v46  ;;  %v9802_v52 = vld [vmem:[%s13410_s4 + $0x544] ss:$24 sps:$4 sm:$0xff]   ;;  %v9800_v46 = vld [vmem:[%s13410_s4 + $0x540] ss:$24 sps:$4 sm:$0xff]  }
0x1089   :  { %4821 = vmatpush1.bf16.msra.mxu0 %v9776_v29  ;;  %4947 = vmatpush1.bf16.msra.mxu1 %v9779_v33  ;;  %v9805_v29 = vld [vmem:[%s13410_s4 + $0x554] ss:$24 sps:$4 sm:$0xff]   ;;  %v9803_v33 = vld [vmem:[%s13410_s4 + $0x550] ss:$24 sps:$4 sm:$0xff]  }
0x108a   :  { %4822 = vmatprep.subr.bf16.mxu0 %v9784_v4  ;;  %4948 = vmatprep.subr.bf16.mxu1 %v9787_v54  ;;  %v9808_v4 = vld [vmem:[%s13410_s4 + $0x574] ss:$24 sps:$4 sm:$0xff]   ;;  %v9806_v54 = vld [vmem:[%s13410_s4 + $0x570] ss:$24 sps:$4 sm:$0xff]  }
0x108d   :  { %4823 = vmatpush1.bf16.msra.mxu0 %v9782_v42  ;;  %4949 = vmatpush1.bf16.msra.mxu1 %v9785_v18  ;;  %v9811_v42 = vld [vmem:[%s13410_s4 + $0x584] ss:$24 sps:$4 sm:$0xff]   ;;  %v9809_v18 = vld [vmem:[%s13410_s4 + $0x580] ss:$24 sps:$4 sm:$0xff]  }
0x108e   :  { %4950 = vmatprep.subr.bf16.mxu1 %v9793_v44 }
0x1091   :  { %4951 = vmatpush1.bf16.msra.mxu1 %v9791_v6 }
0x1092   :  { %4952 = vmatprep.subr.bf16.mxu1 %v9799_v20 }
0x1095   :  { %4953 = vmatpush1.bf16.msra.mxu1 %v9797_v22 }
0x1096   :  { %4954 = vmatprep.subr.bf16.mxu1 %v9805_v29 }
0x1099   :  { %4955 = vmatpush1.bf16.msra.mxu1 %v9803_v33 }
0x109a   :  { %4956 = vmatprep.subr.bf16.mxu1 %v9811_v42 }
0x109d   :  { %4957 = vmatpush1.bf16.msra.mxu1 %v9809_v18  ;;  %v9824_v18 = vld [vmem:[%s13410_s4 + $0x308] ss:$24 sps:$4 sm:$0xff]  }
0x10e7   :  { %v4048_v2 = vpop.xlane.xlu0 %4047 }
0x10e8   :  { %v4064_v45 = vmul.f32 0.00390625, %v4048_v2  ;;  %v9814_v2 = vld [vmem:[%s13410_s4 + $0x5a4] ss:$24 sps:$4 sm:$0xff]  }
0x10e9   :  { %v4051_v26 = vpop.xlane.xlu1 %4050 }
0x10ea   :  { %v12253_v23 = vsub.f32 %v12085_v13, %v4064_v45  ;;  %v12256_v62 = vsub.f32 %v12088_v37, %v4064_v45  ;;  %v4065_v28 = vmul.f32 0.00390625, %v4051_v26  ;;  %v9812_v45 = vld [vmem:[%s13410_s4 + $0x5a0] ss:$24 sps:$4 sm:$0xff]   ;;  %v9817_v26 = vld [vmem:[%s13410_s4 + $0x5b4] ss:$24 sps:$4 sm:$0xff]  }
0x10eb   :  { %4958 = vmatprep.subr.bf16.mxu1 %v9817_v26 }
0x10ec   :  { %v12259_v21 = vsub.f32 %v12091_v12, %v4065_v28  ;;  %v12262_v49 = vsub.f32 %v12094_v16, %v4065_v28  ;;  %v4082_v5 = vmul.f32 %v12253_v23, %v12253_v23  ;;  %v4083_v63 = vmul.f32 %v12256_v62, %v12256_v62  ;;  %v9815_v28 = vld [vmem:[%s13410_s4 + $0x5b0] ss:$24 sps:$4 sm:$0xff]  }
0x10ed   :  { %4959 = vmatpush1.bf16.msra.mxu1 %v9815_v28 }
0x10ee   :  { %v4094_v40 = vadd.f32 %v4083_v63, %v4082_v5  ;;  %v4084_v13 = vmul.f32 %v12259_v21, %v12259_v21  ;;  %v4085_v37 = vmul.f32 %v12262_v49, %v12262_v49  ;;  %v9820_v5 = vld [vmem:[%s13410_s4 + $0x5d4] ss:$24 sps:$4 sm:$0xff]   ;;  %v9818_v63 = vld [vmem:[%s13410_s4 + $0x5d0] ss:$24 sps:$4 sm:$0xff]  }
0x10ef   :  { %v4054_v14 = vpop.xlane.xlu0 %4053 }
0x10f0   :  { %v4066_v8 = vmul.f32 0.00390625, %v4054_v14  ;;  %4095 = vadd.xlane.f32.xlu0 %v4094_v40  ;;  %v4097_v12 = vadd.f32 %v4085_v37, %v4084_v13  ;;  %v9823_v40 = vld [vmem:[%s13410_s4 + $0x5e4] ss:$24 sps:$4 sm:$0xff]   ;;  %v9821_v13 = vld [vmem:[%s13410_s4 + $0x5e0] ss:$24 sps:$4 sm:$0xff]  }
0x10f1   :  { %v4057_v55 = vpop.xlane.xlu1 %4056  ;;  %4960 = vmatprep.subr.bf16.mxu1 %v9823_v40  ;;  %v9826_v37 = vld [vmem:[%s13410_s4 + $0x30c] ss:$24 sps:$4 sm:$0xff]  }
0x10f2   :  { %v12273_v16 = vsub.f32 %v12101_v25, %v4066_v8  ;;  %v12276_v9 = vsub.f32 %v12104_v56, %v4066_v8  ;;  %v4067_v27 = vmul.f32 0.00390625, %v4057_v55  ;;  %4098 = vadd.xlane.f32.xlu1 %v4097_v12  ;;  %4961 = vmatpush1.bf16.msra.mxu1 %v9821_v13 }
0x10f3   :  { %9105 = vmatprep.subr.bf16.mxu1 %v13441_v24 }
0x10f4   :  { %v12279_v48 = vsub.f32 %v12107_v31, %v4067_v27  ;;  %v12282_v36 = vsub.f32 %v12110_v3, %v4067_v27  ;;  %v4086_v0 = vmul.f32 %v12273_v16, %v12273_v16  ;;  %v4087_v53 = vmul.f32 %v12276_v9, %v12276_v9 }
0x10f6   :  { %v4100_v43 = vadd.f32 %v4087_v53, %v4086_v0  ;;  %v4088_v25 = vmul.f32 %v12279_v48, %v12279_v48  ;;  %v4089_v56 = vmul.f32 %v12282_v36, %v12282_v36 }
0x10f7   :  { %v4060_v30 = vpop.xlane.xlu0 %4059 }
0x10f8   :  { %v4068_v34 = vmul.f32 0.00390625, %v4060_v30  ;;  %4101 = vadd.xlane.f32.xlu0 %v4100_v43  ;;  %v4103_v31 = vadd.f32 %v4089_v56, %v4088_v25  ;;  %v4044_v56 = vld [vmem:[#allocation16] sm:$0x3] }
0x10f9   :  { %v4063_v50 = vpop.xlane.xlu1 %4062 }
0x10fa   :  { %v12293_v3 = vsub.f32 %v12117_v57, %v4068_v34  ;;  %v12296_v59 = vsub.f32 %v12120_v39, %v4068_v34  ;;  %v4069_v17 = vmul.f32 0.00390625, %v4063_v50  ;;  %4104 = vadd.xlane.f32.xlu1 %v4103_v31  ;;  %v12389_v50 = vrot.slane %v4044_v56, %v11219_v11 }
0x10fc   :  { %v12299_v60 = vsub.f32 %v12123_v41, %v4069_v17  ;;  %v12302_v47 = vsub.f32 %v12126_v32, %v4069_v17  ;;  %v4090_v51 = vmul.f32 %v12293_v3, %v12293_v3  ;;  %v4091_v7 = vmul.f32 %v12296_v59, %v12296_v59  ;;  %v9790_v41 = vld [vmem:[%s13410_s4 + $0x4e4] ss:$24 sps:$4 sm:$0xff]   ;;  %v9788_v32 = vld [vmem:[%s13410_s4 + $0x4e0] ss:$24 sps:$4 sm:$0xff]  }
0x10fd   :  { %4824 = vmatprep.subr.bf16.mxu0 %v9790_v41  ;;  %v4045_v17 = vld [vmem:[#allocation18] sm:$0x3] }
0x10fe   :  { %v4106_v58 = vadd.f32 %v4091_v7, %v4090_v51  ;;  %v4092_v57 = vmul.f32 %v12299_v60, %v12299_v60  ;;  %v4093_v39 = vmul.f32 %v12302_v47, %v12302_v47  ;;  %4825 = vmatpush1.bf16.msra.mxu0 %v9788_v32  ;;  %v12392_v51 = vrot.slane %v4044_v56, %v11216_v10 }
0x10ff   :  { %4826 = vmatprep.subr.bf16.mxu0 %v9796_v15  ;;  %v12397_v44 = vrot.slane %v4045_v17, %v11219_v11 }
0x1100   :  { %4107 = vadd.xlane.f32.xlu0 %v4106_v58  ;;  %v4109_v35 = vadd.f32 %v4093_v39, %v4092_v57 }
0x1102   :  { %4110 = vadd.xlane.f32.xlu1 %v4109_v35  ;;  %4827 = vmatpush1.bf16.msra.mxu0 %v9794_v38  ;;  %v12400_v35 = vrot.slane %v4045_v17, %v11216_v10 }
0x1103   :  { %4828 = vmatprep.subr.bf16.mxu0 %v9802_v52 }
0x1106   :  { %4829 = vmatpush1.bf16.msra.mxu0 %v9800_v46 }
0x1107   :  { %4830 = vmatprep.subr.bf16.mxu0 %v9808_v4 }
0x110a   :  { %4831 = vmatpush1.bf16.msra.mxu0 %v9806_v54 }
0x110b   :  { %4832 = vmatprep.subr.bf16.mxu0 %v9814_v2 }
0x110e   :  { %4833 = vmatpush1.bf16.msra.mxu0 %v9812_v45 }
0x110f   :  { %4834 = vmatprep.subr.bf16.mxu0 %v9820_v5  ;;  %v9829_v5 = vld [vmem:[%s13410_s4 + $0x33c] ss:$24 sps:$4 sm:$0xff]  }
0x1112   :  { %4835 = vmatpush1.bf16.msra.mxu0 %v9818_v63 }
0x1113   :  { %4867 = vmatprep.subr.bf16.mxu0 %v9826_v37 }
0x117d   :  { %v4096_v14 = vpop.xlane.xlu0 %4095 }
0x117e   :  { %v4112_v8 = vmul.f32 0.00390625, %v4096_v14 }
0x117f   :  { %v4099_v12 = vpop.xlane.xlu1 %4098 }
0x1180   :  { %v4118_v55 = vadd.f32 1e-12, %v4112_v8  ;;  %v4113_v27 = vmul.f32 0.00390625, %v4099_v12 }
0x1182   :  { %10232 = vrsqrt.f32 %v4118_v55  ;;  %v4119_v0 = vadd.f32 1e-12, %v4113_v27 }
0x1184   :  { %10234 = vrsqrt.f32 %v4119_v0 }
0x1185   :  { %v4102_v53 = vpop.xlane.xlu0 %4101 }
0x1186   :  { %v4114_v43 = vmul.f32 0.00390625, %v4102_v53  ;;  %v9830_v53 = vld [vmem:[%s13410_s4 + $0x368] ss:$24 sps:$4 sm:$0xff]  }
0x1187   :  { %v4105_v25 = vpop.xlane.xlu1 %4104 }
0x1188   :  { %v4120_v30 = vadd.f32 1e-12, %v4114_v43  ;;  %v4115_v34 = vmul.f32 0.00390625, %v4105_v25 }
0x118a   :  { %10236 = vrsqrt.f32 %v4120_v30  ;;  %v4121_v31 = vadd.f32 1e-12, %v4115_v34  ;;  %v9835_v34 = vld [vmem:[%s13410_s4 + $0x39c] ss:$24 sps:$4 sm:$0xff]  }
0x118c   :  { %v10233_v7 = vpop.eup %10232  ;;  %10238 = vrsqrt.f32 %v4121_v31 }
0x118d   :  { %v4130_v58 = vmul.f32 %v10233_v7, %v12253_v23  ;;  %v4108_v57 = vpop.xlane.xlu0 %4107  ;;  %v4131_v39 = vmul.f32 %v10233_v7, %v12256_v62 }
0x118e   :  { %v10235_v41 = vpop.eup %10234  ;;  %v4116_v32 = vmul.f32 0.00390625, %v4108_v57 }
0x118f   :  { %v4153_v6 = vmul.f32 %v12389_v50, %v4130_v58  ;;  %v4132_v15 = vmul.f32 %v10235_v41, %v12259_v21  ;;  %v4111_v38 = vpop.xlane.xlu1 %4110  ;;  %v4133_v20 = vmul.f32 %v10235_v41, %v12262_v49  ;;  %v4154_v23 = vmul.f32 %v12392_v51, %v4131_v39 }
0x1190   :  { %v4122_v22 = vadd.f32 1e-12, %v4116_v32  ;;  %v4117_v52 = vmul.f32 0.00390625, %v4111_v38  ;;  %v9842_v38 = vld [vmem:[%s13410_s4 + $0x428] ss:$24 sps:$4 sm:$0xff]  }
0x1191   :  { %v4155_v62 = vmul.f32 %v12389_v50, %v4132_v15  ;;  %v4156_v46 = vmul.f32 %v12392_v51, %v4133_v20  ;;  %v12409_v33 = vadd.f32 %v12400_v35, %v4154_v23  ;;  %v12415_v21 = vadd.f32 %v12397_v44, %v4153_v6  ;;  %v9844_v15 = vld [vmem:[%s13410_s4 + $0x42c] ss:$24 sps:$4 sm:$0xff]   ;;  %v9847_v20 = vld [vmem:[%s13410_s4 + $0x45c] ss:$24 sps:$4 sm:$0xff]   ;;  %v9845_v23 = vld [vmem:[%s13410_s4 + $0x458] ss:$24 sps:$4 sm:$0xff]  }
0x1192   :  { %10240 = vrsqrt.f32 %v4122_v22  ;;  %v4123_v29 = vadd.f32 1e-12, %v4117_v52  ;;  %v9850_v22 = vld [vmem:[%s13410_s4 + $0x48c] ss:$24 sps:$4 sm:$0xff]   ;;  %v9848_v52 = vld [vmem:[%s13410_s4 + $0x488] ss:$24 sps:$4 sm:$0xff]  }
0x1193   :  { %v12412_v4 = vadd.f32 %v12400_v35, %v4156_v46  ;;  %v12418_v49 = vadd.f32 %v12397_v44, %v4155_v62  ;;  %v9853_v62 = vld [vmem:[%s13410_s4 + $0x4bc] ss:$24 sps:$4 sm:$0xff]   ;;  %v9851_v46 = vld [vmem:[%s13410_s4 + $0x4b8] ss:$24 sps:$4 sm:$0xff]  }
0x1194   :  { %v10237_v54 = vpop.eup %10236  ;;  %10242 = vrsqrt.f32 %v4123_v29  ;;  %v9856_v29 = vld [vmem:[%s13410_s4 + $0x4ec] ss:$24 sps:$4 sm:$0xff]  }
0x1195   :  { %v12422_v42 = vpack.c.bf16 %v12412_v4, %v12409_v33  ;;  %v12429_v2 = vpack.c.bf16 %v12418_v49, %v12415_v21  ;;  %v4135_v45 = vmul.f32 %v10237_v54, %v12276_v9  ;;  %v4134_v26 = vmul.f32 %v10237_v54, %v12273_v16  ;;  %v9827_v9 = vld [vmem:[%s13410_s4 + $0x338] ss:$24 sps:$4 sm:$0xff]   ;;  %v9854_v54 = vld [vmem:[%s13410_s4 + $0x4e8] ss:$24 sps:$4 sm:$0xff]  }
0x1196   :  { %v10239_v28 = vpop.eup %10238 }
0x1197   :  { %4836 = vmatprep.mubr.bf16.mxu0 %v12422_v42  ;;  %4962 = vmatprep.mubr.bf16.mxu1 %v12422_v42  ;;  %v4137_v63 = vmul.f32 %v10239_v28, %v12282_v36  ;;  %v4158_v40 = vmul.f32 %v12392_v51, %v4135_v45  ;;  %v4136_v13 = vmul.f32 %v10239_v28, %v12279_v48  ;;  %v9832_v48 = vld [vmem:[%s13410_s4 + $0x36c] ss:$24 sps:$4 sm:$0xff]   ;;  %v9865_v28 = vld [vmem:[%s13410_s4 + $0x57c] ss:$24 sps:$4 sm:$0xff]  }
0x1198   :  { %4837 = vmatmul.mubr.bf16.vlgmr.msra.gmra.mrb[92].mxu0 %v12429_v2  ;;  %4963 = vmatmul.mubr.bf16.vlgmr.msra.gmra.mrb[88].mxu1 %v12429_v2  ;;  %v4157_v16 = vmul.f32 %v12389_v50, %v4134_v26  ;;  %v9862_v45 = vld [vmem:[%s13410_s4 + $0x54c] ss:$24 sps:$4 sm:$0xff]   ;;  %v9860_v26 = vld [vmem:[%s13410_s4 + $0x548] ss:$24 sps:$4 sm:$0xff]  }
0x1199   :  { %4868 = vmatpush1.bf16.msra.mxu0 %v9824_v18  ;;  %v4160_v37 = vmul.f32 %v12392_v51, %v4137_v63  ;;  %v4159_v14 = vmul.f32 %v12389_v50, %v4136_v13  ;;  %v12453_v36 = vadd.f32 %v12400_v35, %v4158_v40  ;;  %v9857_v18 = vld [vmem:[%s13410_s4 + $0x518] ss:$24 sps:$4 sm:$0xff]   ;;  %v9868_v63 = vld [vmem:[%s13410_s4 + $0x5ac] ss:$24 sps:$4 sm:$0xff]   ;;  %v9866_v40 = vld [vmem:[%s13410_s4 + $0x5a8] ss:$24 sps:$4 sm:$0xff]  }
0x119a   :  { %4869 = vmatprep.subr.bf16.mxu0 %v9829_v5  ;;  %v12459_v12 = vadd.f32 %v12397_v44, %v4157_v16  ;;  %v9863_v5 = vld [vmem:[%s13410_s4 + $0x578] ss:$24 sps:$4 sm:$0xff]   ;;  %v9871_v13 = vld [vmem:[%s13410_s4 + $0x5dc] ss:$24 sps:$4 sm:$0xff]  }
0x119b   :  { %v12456_v8 = vadd.f32 %v12400_v35, %v4160_v37  ;;  %v12462_v55 = vadd.f32 %v12397_v44, %v4159_v14  ;;  %v9869_v16 = vld [vmem:[%s13410_s4 + $0x5d8] ss:$24 sps:$4 sm:$0xff]   ;;  %v13444_v37 = vsub.s32 4, %v11207_v1 }
0x119c   :  { %v10241_v27 = vpop.eup %10240 }
0x119d   :  { %4870 = vmatpush1.bf16.msra.mxu0 %v9827_v9  ;;  %v12466_v0 = vpack.c.bf16 %v12456_v8, %v12453_v36  ;;  %v12473_v43 = vpack.c.bf16 %v12462_v55, %v12459_v12  ;;  %v4139_v25 = vmul.f32 %v10241_v27, %v12296_v59  ;;  %v4138_v56 = vmul.f32 %v10241_v27, %v12293_v3  ;;  %v9833_v59 = vld [vmem:[%s13410_s4 + $0x398] ss:$24 sps:$4 sm:$0xff]   ;;  %v8553_v9 = vld [vmem:[%s13411_s5 + $0x6] sm:$0x3f] }
0x119e   :  { %v10243_v30 = vpop.eup %10242  ;;  %4871 = vmatprep.subr.bf16.mxu0 %v9832_v48  ;;  %v4313_v14 = vrot.slane %v8553_v9, %v13444_v37 }
0x119f   :  { %4846 = vmatprep.mubr.bf16.mxu0 %v12466_v0  ;;  %4972 = vmatprep.mubr.bf16.mxu1 %v12466_v0  ;;  %v4141_v31 = vmul.f32 %v10243_v30, %v12302_v47  ;;  %v4162_v17 = vmul.f32 %v12392_v51, %v4139_v25  ;;  %v4140_v7 = vmul.f32 %v10243_v30, %v12299_v60  ;;  %v9838_v60 = vld [vmem:[%s13410_s4 + $0x3cc] ss:$24 sps:$4 sm:$0xff]  }
0x11a0   :  { %4847 = vmatmul.mubr.bf16.gmra.mrb[96].mxu0 %v12473_v43  ;;  %4973 = vmatmul.mubr.bf16.gmra.mrb[92].mxu1 %v12473_v43  ;;  %v4161_v3 = vmul.f32 %v12389_v50, %v4138_v56 }
0x11a1   :  { %4872 = vmatpush1.bf16.msra.mxu0 %v9830_v53  ;;  %v4164_v58 = vmul.f32 %v12392_v51, %v4141_v31  ;;  %v4163_v57 = vmul.f32 %v12389_v50, %v4140_v7  ;;  %v12497_v47 = vadd.f32 %v12400_v35, %v4162_v17  ;;  %v9836_v51 = vld [vmem:[%s13410_s4 + $0x3c8] ss:$24 sps:$4 sm:$0xff]  }
0x11a2   :  { %4873 = vmatprep.subr.bf16.mxu0 %v9835_v34  ;;  %v12503_v41 = vadd.f32 %v12397_v44, %v4161_v3 }
0x11a3   :  { %v12500_v39 = vadd.f32 %v12400_v35, %v4164_v58  ;;  %v12506_v32 = vadd.f32 %v12397_v44, %v4163_v57  ;;  %v9841_v35 = vld [vmem:[%s13410_s4 + $0x3fc] ss:$24 sps:$4 sm:$0xff]   ;;  %v9839_v44 = vld [vmem:[%s13410_s4 + $0x3f8] ss:$24 sps:$4 sm:$0xff]  }
0x11a5   :  { %4874 = vmatpush1.bf16.msra.mxu0 %v9833_v59  ;;  %v4290_v50 = vpack.c.bf16 %v12500_v39, %v12497_v47  ;;  %v4289_v6 = vpack.c.bf16 %v12506_v32, %v12503_v41 }
0x11a6   :  { %4875 = vmatprep.subr.bf16.mxu0 %v9838_v60 }
0x11a7   :  { %4856 = vmatprep.mubr.bf16.mxu0 %v4290_v50  ;;  %4982 = vmatprep.mubr.bf16.mxu1 %v4290_v50 }
0x11a8   :  { %4857 = vmatmul.mubr.bf16.gmra.mrb[100].mxu0 %v4289_v6  ;;  %4983 = vmatmul.mubr.bf16.gmra.mrb[96].mxu1 %v4289_v6 }
0x11a9   :  { %4876 = vmatpush1.bf16.msra.mxu0 %v9836_v51  ;;  %4899 = vmatprep.mubr.bf16.mxu0 %v12422_v42  ;;  %v9859_v42 = vld [vmem:[%s13410_s4 + $0x51c] ss:$24 sps:$4 sm:$0xff]  }
0x11aa   :  { %4877 = vmatprep.subr.bf16.mxu0 %v9841_v35  ;;  %9107 = vmatprep.mubr.msk.bf16.mxu1 %vm10652_vm0, %v13441_v24 }
0x11ad   :  { %4878 = vmatpush1.bf16.msra.mxu0 %v9839_v44  ;;  %v12624_v44 = vrot.slane %v8553_v9, %v11219_v11 }
0x11ae   :  { %4879 = vmatprep.subr.bf16.mxu0 %v9844_v15  ;;  %v12627_v15 = vrot.slane %v8553_v9, %v11216_v10 }
0x11b1   :  { %4880 = vmatpush1.bf16.msra.mxu0 %v9842_v38  ;;  %v13445_v38 = vsub.s32 5, %v11207_v1 }
0x11b2   :  { %4881 = vmatprep.subr.bf16.mxu0 %v9847_v20 }
0x11b3   :  { %v12631_v20 = vrot.slane %v8553_v9, %v13445_v38 }
0x11b5   :  { %4882 = vmatpush1.bf16.msra.mxu0 %v9845_v23 }
0x11b6   :  { %4883 = vmatprep.subr.bf16.mxu0 %v9850_v22 }
0x11b9   :  { %4884 = vmatpush1.bf16.msra.mxu0 %v9848_v52 }
0x11ba   :  { %4885 = vmatprep.subr.bf16.mxu0 %v9853_v62 }
0x11bd   :  { %4886 = vmatpush1.bf16.msra.mxu0 %v9851_v46 }
0x11be   :  { %4887 = vmatprep.subr.bf16.mxu0 %v9856_v29 }
0x11c1   :  { %4888 = vmatpush1.bf16.msra.mxu0 %v9854_v54 }
0x11c2   :  { %4889 = vmatprep.subr.bf16.mxu0 %v9859_v42 }
0x11c5   :  { %4890 = vmatpush1.bf16.msra.mxu0 %v9857_v18 }
0x11c6   :  { %4891 = vmatprep.subr.bf16.mxu0 %v9862_v45 }
0x11c9   :  { %4892 = vmatpush1.bf16.msra.mxu0 %v9860_v26 }
0x11ca   :  { %4893 = vmatprep.subr.bf16.mxu0 %v9865_v28 }
0x11cd   :  { %4894 = vmatpush1.bf16.msra.mxu0 %v9863_v5 }
0x11ce   :  { %4895 = vmatprep.subr.bf16.mxu0 %v9868_v63 }
0x11d1   :  { %4896 = vmatpush1.bf16.msra.mxu0 %v9866_v40 }
0x11d2   :  { %4897 = vmatprep.subr.bf16.mxu0 %v9871_v13  ;;  %v12656_v13 = vrot.slane %v8553_v9, %v13442_v19 }
0x11d5   :  { %4898 = vmatpush1.bf16.msra.mxu0 %v9869_v16 }
0x11d6   :  { %9099 = vmatprep.subr.bf16.mxu0 %v13441_v24 }
0x11d8   :  { %4900 = vmatmul.mubr.bf16.vlgmr.msra.gmra.mrb[104].mxu0 %v12429_v2 }
0x11d9   :  { %4909 = vmatprep.mubr.bf16.mxu0 %v12466_v0 }
0x11e0   :  { %4910 = vmatmul.mubr.bf16.gmra.mrb[108].mxu0 %v12473_v43 }
0x11e1   :  { %4919 = vmatprep.mubr.bf16.mxu0 %v4290_v50 }
0x11e8   :  { %4920 = vmatmul.mubr.bf16.gmra.mrb[112].mxu0 %v4289_v6 }
0x11e9   :  { %9101 = vmatprep.mubr.msk.bf16.mxu0 %vm10652_vm0, %v13441_v24 }
0x126b   :  { %v4838_v48 = vpop.f32.mrb[92].mxu0  ;;  %v4964_v27 = vpop.f32.mrb[88].mxu1 }
0x126c   :  { %v4965_v53 = vadd.f32 %v4964_v27, %v4313_v14  ;;  %v4840_v2 = vpop.f32.mrb[93].mxu0  ;;  %v12595_v25 = vpop.f32.mrb[89].mxu1 }
0x126d   :  { %v12597_v0 = vpop.f32.mrb[94].mxu0  ;;  %v4968_v43 = vpop.f32.mrb[90].mxu1 }
0x126e   :  { %v5049_v56 = vpack.c.bf16 %v4965_v53, %v4965_v53  ;;  %v12599_v30 = vadd.f32 %v4968_v43, %v4313_v14  ;;  %v12601_v34 = vpop.f32.mrb[95].mxu0  ;;  %v12603_v31 = vpop.f32.mrb[91].mxu1 }
0x1270   :  { %v5054_v17 = vsel %vm1224_vm1, %v5049_v56, 0 }
0x1271   :  { %9106 = vmatpush3.bf16.msra.mxu1 %v5054_v17  ;;  %v4839_v17 = vadd.f32 %v4838_v48, %v12624_v44 }
0x1272   :  { %9117 = vmatprep.subr.bf16.mxu1 %v13441_v24 }
0x1273   :  { %v12607_v7 = vpop.f32.mrb[96].mxu0  ;;  %v4974_v3 = vpop.f32.mrb[92].mxu1 }
0x1274   :  { %v12609_v59 = vadd.f32 %v4974_v3, %v4313_v14  ;;  %v12611_v58 = vpop.f32.mrb[97].mxu0  ;;  %v12613_v57 = vpop.f32.mrb[93].mxu1 }
0x1275   :  { %v12615_v60 = vpop.f32.mrb[98].mxu0  ;;  %v4978_v50 = vpop.f32.mrb[94].mxu1 }
0x1276   :  { %v12617_v51 = vadd.f32 %v4978_v50, %v4313_v14  ;;  %v12619_v6 = vpop.f32.mrb[99].mxu0  ;;  %v12621_v35 = vpop.f32.mrb[95].mxu1 }
0x127b   :  { %v4858_v23 = vpop.f32.mrb[100].mxu0  ;;  %v4984_v22 = vpop.f32.mrb[96].mxu1 }
0x127c   :  { %v12634_v52 = vadd.f32 %v4858_v23, %v12624_v44  ;;  %v12636_v62 = vadd.f32 %v4984_v22, %v4313_v14  ;;  %v4860_v46 = vpop.f32.mrb[101].mxu0  ;;  %v4986_v29 = vpop.f32.mrb[97].mxu1  ;;  %v4993_v23 = vpack.c.bf16 %v4839_v17, %v4839_v17 }
0x127d   :  { %v12639_v54 = vadd.f32 %v4860_v46, %v12627_v15  ;;  %v12642_v42 = vadd.f32 %v4986_v29, %v12631_v20  ;;  %v4862_v18 = vpop.f32.mrb[102].mxu0  ;;  %v4988_v45 = vpop.f32.mrb[98].mxu1 }
0x127e   :  { %v12645_v1 = vadd.f32 %v4862_v18, %v12624_v44  ;;  %v12647_v26 = vadd.f32 %v4988_v45, %v4313_v14  ;;  %v4864_v28 = vpop.f32.mrb[103].mxu0  ;;  %v4990_v5 = vpop.f32.mrb[99].mxu1  ;;  %v12660_v14 = vrot.slane %v8553_v9, %v11534_v61  ;;  %v4841_v9 = vadd.f32 %v4840_v2, %v12627_v15 }
0x127f   :  { %v12650_v63 = vadd.f32 %v4864_v28, %v12627_v15  ;;  %v12653_v40 = vadd.f32 %v4990_v5, %v12631_v20  ;;  %v4843_v2 = vadd.f32 %v12597_v0, %v12624_v44 }
0x1280   :  { %v5096_v5 = vpack.c.bf16 %v4841_v9, %v4841_v9  ;;  %v4845_v9 = vadd.f32 %v12601_v34, %v12627_v15 }
0x12ab   :  { %v4901_v16 = vpop.f32.mrb[104].mxu0 }
0x12ac   :  { %v4902_v37 = vadd.f32 %v4901_v16, %v12656_v13  ;;  %v4903_v27 = vpop.f32.mrb[105].mxu0 }
0x12ad   :  { %v4905_v53 = vpop.f32.mrb[106].mxu0  ;;  %v4904_v3 = vadd.f32 %v4903_v27, %v12660_v14 }
0x12ae   :  { %v4994_v43 = vpack.c.bf16 %v4902_v37, %v4902_v37  ;;  %v4907_v56 = vpop.f32.mrb[107].mxu0  ;;  %v4906_v48 = vadd.f32 %v4905_v53, %v12656_v13 }
0x12af   :  { %v5097_v46 = vpack.c.bf16 %v4904_v3, %v4904_v3  ;;  %v4908_v53 = vadd.f32 %v4907_v56, %v12660_v14  ;;  %v4849_v56 = vadd.f32 %v12607_v7, %v12624_v44 }
0x12b0   :  { %9100 = vmatpush3.bf16.xpose.msra.mxu0 %v4994_v43  ;;  %v5200_v27 = vpack.c.bf16 %v4906_v48, %v4906_v48 }
0x12b1   :  { %9111 = vmatprep.subr.bf16.mxu0 %v13441_v24 }
0x12b3   :  { %v4911_v50 = vpop.f32.mrb[108].mxu0 }
0x12b4   :  { %v4913_v38 = vpop.f32.mrb[109].mxu0  ;;  %v4912_v48 = vadd.f32 %v4911_v50, %v12656_v13  ;;  %v4851_v50 = vadd.f32 %v12611_v58, %v12627_v15 }
0x12b5   :  { %v4915_v22 = vpop.f32.mrb[110].mxu0 }
0x12b6   :  { %v4917_v29 = vpop.f32.mrb[111].mxu0  ;;  %v5406_v0 = vpack.c.bf16 %v4912_v48, %v4912_v48 }
0x12b7   :  { %9102 = vmatmul.mubr.bf16.vlgmr.msra.gmra.mrb[116].mxu0 %v4993_v23  ;;  %v5199_v23 = vpack.c.bf16 %v4843_v2, %v4843_v2 }
0x12b8   :  { %9112 = vmatpush3.bf16.xpose.msra.mxu0 %v5097_v46  ;;  %9113 = vmatprep.mubr.msk.bf16.mxu0 %vm10652_vm0, %v13441_v24  ;;  %v5303_v46 = vpack.c.bf16 %v4908_v53, %v4908_v53 }
0x12b9   :  { %9123 = vmatprep.subr.bf16.mxu0 %v13441_v24 }
0x12bb   :  { %v4921_v18 = vpop.f32.mrb[112].mxu0 }
0x12bc   :  { %v4922_v45 = vadd.f32 %v4921_v18, %v12656_v13  ;;  %v4923_v28 = vpop.f32.mrb[113].mxu0  ;;  %v5302_v18 = vpack.c.bf16 %v4845_v9, %v4845_v9 }
0x12bd   :  { %v4924_v16 = vadd.f32 %v4923_v28, %v12660_v14  ;;  %v4925_v37 = vpop.f32.mrb[114].mxu0  ;;  %v4914_v28 = vadd.f32 %v4913_v38, %v12660_v14  ;;  %v4853_v38 = vadd.f32 %v12615_v60, %v12624_v44  ;;  %v5817_v60 = vpack.c.bf16 %v12634_v52, %v12634_v52 }
0x12be   :  { %v12673_v43 = vadd.f32 %v4925_v37, %v12656_v13  ;;  %v4927_v17 = vpop.f32.mrb[115].mxu0  ;;  %v4916_v37 = vadd.f32 %v4915_v22, %v12656_v13  ;;  %v4855_v13 = vadd.f32 %v12619_v6, %v12627_v15  ;;  %v5818_v53 = vpack.c.bf16 %v4922_v45, %v4922_v45 }
0x12bf   :  { %v12676_v3 = vadd.f32 %v4927_v17, %v12660_v14  ;;  %9114 = vmatmul.mubr.bf16.vlgmr.msra.gmra.mrb[120].mxu0 %v5096_v5  ;;  %v5405_v5 = vpack.c.bf16 %v4849_v56, %v4849_v56  ;;  %v5509_v34 = vpack.c.bf16 %v4914_v28, %v4914_v28  ;;  %v4918_v17 = vadd.f32 %v4917_v29, %v12660_v14 }
0x12c0   :  { %9124 = vmatpush3.bf16.xpose.msra.mxu0 %v5200_v27  ;;  %9125 = vmatprep.mubr.msk.bf16.mxu0 %vm10652_vm0, %v13441_v24  ;;  %v5508_v27 = vpack.c.bf16 %v4851_v50, %v4851_v50  ;;  %v5612_v7 = vpack.c.bf16 %v4916_v37, %v4916_v37  ;;  %v5611_v2 = vpack.c.bf16 %v4853_v38, %v4853_v38 }
0x12c1   :  { %9135 = vmatprep.subr.bf16.mxu0 %v13441_v24  ;;  %v5715_v58 = vpack.c.bf16 %v4918_v17, %v4918_v17  ;;  %v5714_v22 = vpack.c.bf16 %v4855_v13, %v4855_v13  ;;  %v5921_v44 = vpack.c.bf16 %v4924_v16, %v4924_v16  ;;  %v5920_v6 = vpack.c.bf16 %v12639_v54, %v12639_v54 }
0x12c2   :  { %v6024_v15 = vpack.c.bf16 %v12673_v43, %v12673_v43  ;;  %v6023_v52 = vpack.c.bf16 %v12645_v1, %v12645_v1  ;;  %v6127_v14 = vpack.c.bf16 %v12676_v3, %v12676_v3  ;;  %v6126_v54 = vpack.c.bf16 %v12650_v63, %v12650_v63  ;;  %v10372_v1 = vld [vmem:[%s13440_s13] sm:$0xff] }
0x12c7   :  { %9126 = vmatmul.mubr.bf16.vlgmr.msra.gmra.mrb[124].mxu0 %v5199_v23 }
0x12c8   :  { %9136 = vmatpush3.bf16.xpose.msra.mxu0 %v5303_v46  ;;  %9137 = vmatprep.mubr.msk.bf16.mxu0 %vm10652_vm0, %v13441_v24 }
0x12c9   :  { %9147 = vmatprep.subr.bf16.mxu0 %v13441_v24 }
0x12cf   :  { %9138 = vmatmul.mubr.bf16.vlgmr.msra.gmra.mrb[128].mxu0 %v5302_v18 }
0x12d0   :  { %9148 = vmatpush3.bf16.xpose.msra.mxu0 %v5406_v0  ;;  %9149 = vmatprep.mubr.msk.bf16.mxu0 %vm10652_vm0, %v13441_v24 }
0x12d1   :  { %9159 = vmatprep.subr.bf16.mxu0 %v13441_v24 }
0x12d7   :  { %9150 = vmatmul.mubr.bf16.vlgmr.msra.gmra.mrb[132].mxu0 %v5405_v5 }
0x12d8   :  { %9160 = vmatpush3.bf16.xpose.msra.mxu0 %v5509_v34  ;;  %9161 = vmatprep.mubr.msk.bf16.mxu0 %vm10652_vm0, %v13441_v24 }
0x12d9   :  { %9171 = vmatprep.subr.bf16.mxu0 %v13441_v24 }
0x12df   :  { %9162 = vmatmul.mubr.bf16.vlgmr.msra.gmra.mrb[136].mxu0 %v5508_v27 }
0x12e0   :  { %9172 = vmatpush3.bf16.xpose.msra.mxu0 %v5612_v7  ;;  %9173 = vmatprep.mubr.msk.bf16.mxu0 %vm10652_vm0, %v13441_v24  ;;  %v10373_v7 = vld [vmem:[%s13440_s13 + $0x8] sm:$0xff] }
0x12e1   :  { %9183 = vmatprep.subr.bf16.mxu0 %v13441_v24 }
0x12e7   :  { %9174 = vmatmul.mubr.bf16.vlgmr.msra.gmra.mrb[140].mxu0 %v5611_v2 }
0x12e8   :  { %9184 = vmatpush3.bf16.xpose.msra.mxu0 %v5715_v58  ;;  %9185 = vmatprep.mubr.msk.bf16.mxu0 %vm10652_vm0, %v13441_v24 }
0x12e9   :  { %9195 = vmatprep.subr.bf16.mxu0 %v13441_v24 }
0x12ef   :  { %9186 = vmatmul.mubr.bf16.vlgmr.msra.gmra.mrb[144].mxu0 %v5714_v22 }
0x12f0   :  { %9196 = vmatpush3.bf16.xpose.msra.mxu0 %v5818_v53  ;;  %9197 = vmatprep.mubr.msk.bf16.mxu0 %vm10652_vm0, %v13441_v24 }
0x12f1   :  { %9207 = vmatprep.subr.bf16.mxu0 %v13441_v24 }
0x12f7   :  { %9198 = vmatmul.mubr.bf16.vlgmr.msra.gmra.mrb[148].mxu0 %v5817_v60 }
0x12f8   :  { %9208 = vmatpush3.bf16.xpose.msra.mxu0 %v5921_v44  ;;  %9209 = vmatprep.mubr.msk.bf16.mxu0 %vm10652_vm0, %v13441_v24 }
0x12f9   :  { %9219 = vmatprep.subr.bf16.mxu0 %v13441_v24 }
0x12ff   :  { %9210 = vmatmul.mubr.bf16.vlgmr.msra.gmra.mrb[152].mxu0 %v5920_v6 }
0x1300   :  { %9220 = vmatpush3.bf16.xpose.msra.mxu0 %v6024_v15  ;;  %9221 = vmatprep.mubr.msk.bf16.mxu0 %vm10652_vm0, %v13441_v24 }
0x1301   :  { %9231 = vmatprep.subr.bf16.mxu0 %v13441_v24 }
0x1307   :  { %9222 = vmatmul.mubr.bf16.vlgmr.msra.gmra.mrb[156].mxu0 %v6023_v52 }
0x1308   :  { %9232 = vmatpush3.bf16.xpose.msra.mxu0 %v6127_v14  ;;  %9233 = vmatprep.mubr.msk.bf16.mxu0 %vm10652_vm0, %v13441_v24 }
0x130f   :  { %9234 = vmatmul.mubr.bf16.vlgmr.msra.gmra.mrb[160].mxu0 %v6126_v54 }
0x138a   :  { %v5029_v29 = vpop.f32.mrb[116].mxu0 }
0x138b   :  { %v5035_v45 = vmul.f32 0.088388346, %v5029_v29  ;;  %v9103_v16 = vpop.f32.mrb[117].mxu0  ;;  %v10374_v29 = vld [vmem:[%s13440_s13 + $0x10] sm:$0xff] }
0x138c   :  { %v5032_v43 = vpop.f32.mrb[118].mxu0 }
0x138d   :  { %v9104_v23 = vpop.f32.mrb[119].mxu0  ;;  %v12739_v46 = vadd.f32 %v10372_v1, %v5035_v45 }
0x138f   :  { %v5037_v3 = vsel %vm1207_vm2, %v12739_v46, -inf }
0x1390   :  { %5038 = vmax.xlane.f32.xlu0 %v5037_v3 }
0x1392   :  { %v5132_v9 = vpop.f32.mrb[120].mxu0 }
0x1393   :  { %v5138_v48 = vmul.f32 0.088388346, %v5132_v9  ;;  %v9115_v18 = vpop.f32.mrb[121].mxu0 }
0x1394   :  { %v5135_v63 = vpop.f32.mrb[122].mxu0 }
0x1395   :  { %v9116_v0 = vpop.f32.mrb[123].mxu0  ;;  %v12743_v56 = vadd.f32 %v10372_v1, %v5138_v48 }
0x1397   :  { %v5140_v28 = vsel %vm1207_vm2, %v12743_v56, -inf }
0x1398   :  { %5141 = vmax.xlane.f32.xlu1 %v5140_v28 }
0x139a   :  { %v5235_v5 = vpop.f32.mrb[124].mxu0 }
0x139b   :  { %v5241_v34 = vmul.f32 0.088388346, %v5235_v5  ;;  %v9127_v50 = vpop.f32.mrb[125].mxu0 }
0x139c   :  { %v5238_v37 = vpop.f32.mrb[126].mxu0  ;;  %v10375_v50 = vld [vmem:[%s13440_s13 + $0x18] sm:$0xff] }
0x139d   :  { %v9128_v27 = vpop.f32.mrb[127].mxu0  ;;  %v12750_v38 = vadd.f32 %v10373_v7, %v5241_v34 }
0x139f   :  { %v5243_v17 = vsel %vm1207_vm2, %v12750_v38, -inf }
0x13a0   :  { %5244 = vmax.xlane.f32.xlu0 %v5243_v17 }
0x13a2   :  { %v5338_v2 = vpop.f32.mrb[128].mxu0 }
0x13a3   :  { %v5344_v58 = vmul.f32 0.088388346, %v5338_v2  ;;  %v9139_v13 = vpop.f32.mrb[129].mxu0 }
0x13a4   :  { %v5341_v22 = vpop.f32.mrb[130].mxu0 }
0x13a5   :  { %v9140_v53 = vpop.f32.mrb[131].mxu0  ;;  %v12754_v60 = vadd.f32 %v10373_v7, %v5344_v58 }
0x13a7   :  { %v5346_v44 = vsel %vm1207_vm2, %v12754_v60, -inf }
0x13a8   :  { %5347 = vmax.xlane.f32.xlu1 %v5346_v44 }
0x13aa   :  { %v5441_v6 = vpop.f32.mrb[132].mxu0 }
0x13ab   :  { %v5447_v15 = vmul.f32 0.088388346, %v5441_v6  ;;  %v9151_v52 = vpop.f32.mrb[133].mxu0 }
0x13ac   :  { %v5444_v14 = vpop.f32.mrb[134].mxu0 }
0x13ad   :  { %v9152_v54 = vpop.f32.mrb[135].mxu0  ;;  %v12761_v45 = vadd.f32 %v10374_v29, %v5447_v15 }
0x13ae   :  { %v10376_v54 = vld [vmem:[%s13440_s13 + $0x20] sm:$0xff] }
0x13af   :  { %v5449_v16 = vsel %vm1207_vm2, %v12761_v45, -inf }
0x13b0   :  { %5450 = vmax.xlane.f32.xlu0 %v5449_v16 }
0x13b2   :  { %v5544_v43 = vpop.f32.mrb[136].mxu0 }
0x13b3   :  { %v5550_v23 = vmul.f32 0.088388346, %v5544_v43  ;;  %v9163_v1 = vpop.f32.mrb[137].mxu0 }
0x13b4   :  { %v5547_v3 = vpop.f32.mrb[138].mxu0 }
0x13b5   :  { %v9164_v9 = vpop.f32.mrb[139].mxu0  ;;  %v12765_v48 = vadd.f32 %v10374_v29, %v5550_v23 }
0x13b7   :  { %v5552_v18 = vsel %vm1207_vm2, %v12765_v48, -inf }
0x13b8   :  { %5553 = vmax.xlane.f32.xlu1 %v5552_v18 }
0x13ba   :  { %v5647_v63 = vpop.f32.mrb[140].mxu0 }
0x13bb   :  { %v5653_v0 = vmul.f32 0.088388346, %v5647_v63  ;;  %v9175_v28 = vpop.f32.mrb[141].mxu0 }
0x13bc   :  { %v5650_v5 = vpop.f32.mrb[142].mxu0 }
0x13bd   :  { %v9176_v34 = vpop.f32.mrb[143].mxu0  ;;  %v12772_v37 = vadd.f32 %v10375_v50, %v5653_v0 }
0x13bf   :  { %v5655_v27 = vsel %vm1207_vm2, %v12772_v37, -inf }
0x13c0   :  { %5656 = vmax.xlane.f32.xlu0 %v5655_v27  ;;  %v10377_v27 = vld [vmem:[%s13440_s13 + $0x28] sm:$0xff] }
0x13c2   :  { %v5750_v7 = vpop.f32.mrb[144].mxu0 }
0x13c3   :  { %v5756_v17 = vmul.f32 0.088388346, %v5750_v7  ;;  %v9187_v2 = vpop.f32.mrb[145].mxu0 }
0x13c4   :  { %v5753_v58 = vpop.f32.mrb[146].mxu0 }
0x13c5   :  { %v9188_v13 = vpop.f32.mrb[147].mxu0  ;;  %v12776_v22 = vadd.f32 %v10375_v50, %v5756_v17 }
0x13c7   :  { %v5758_v53 = vsel %vm1207_vm2, %v12776_v22, -inf }
0x13c8   :  { %5759 = vmax.xlane.f32.xlu1 %v5758_v53 }
0x13ca   :  { %v5853_v44 = vpop.f32.mrb[148].mxu0 }
0x13cb   :  { %v5859_v6 = vmul.f32 0.088388346, %v5853_v44  ;;  %v9199_v15 = vpop.f32.mrb[149].mxu0 }
0x13cc   :  { %v5856_v52 = vpop.f32.mrb[150].mxu0 }
0x13cd   :  { %v9200_v14 = vpop.f32.mrb[151].mxu0  ;;  %v12783_v29 = vadd.f32 %v10376_v54, %v5859_v6 }
0x13cf   :  { %v5861_v16 = vsel %vm1207_vm2, %v12783_v29, -inf }
0x13d0   :  { %5862 = vmax.xlane.f32.xlu0 %v5861_v16 }
0x13d2   :  { %v5956_v43 = vpop.f32.mrb[152].mxu0 }
0x13d3   :  { %v5962_v23 = vmul.f32 0.088388346, %v5956_v43  ;;  %v9211_v1 = vpop.f32.mrb[153].mxu0 }
0x13d4   :  { %v5959_v3 = vpop.f32.mrb[154].mxu0 }
0x13d5   :  { %v9212_v9 = vpop.f32.mrb[155].mxu0  ;;  %v12787_v18 = vadd.f32 %v10376_v54, %v5962_v23 }
0x13d7   :  { %v5964_v63 = vsel %vm1207_vm2, %v12787_v18, -inf }
0x13d8   :  { %5965 = vmax.xlane.f32.xlu1 %v5964_v63 }
0x13da   :  { %v6059_v0 = vpop.f32.mrb[156].mxu0 }
0x13db   :  { %v6065_v28 = vmul.f32 0.088388346, %v6059_v0  ;;  %v9223_v5 = vpop.f32.mrb[157].mxu0 }
0x13dc   :  { %v6062_v34 = vpop.f32.mrb[158].mxu0 }
0x13dd   :  { %v9224_v50 = vpop.f32.mrb[159].mxu0  ;;  %v12794_v7 = vadd.f32 %v10377_v27, %v6065_v28 }
0x13df   :  { %v6067_v17 = vsel %vm1207_vm2, %v12794_v7, -inf }
0x13e0   :  { %6068 = vmax.xlane.f32.xlu0 %v6067_v17 }
0x13e2   :  { %v6162_v2 = vpop.f32.mrb[160].mxu0 }
0x13e3   :  { %v6168_v58 = vmul.f32 0.088388346, %v6162_v2  ;;  %v9235_v13 = vpop.f32.mrb[161].mxu0 }
0x13e4   :  { %v6165_v53 = vpop.f32.mrb[162].mxu0 }
0x13e5   :  { %v9236_v44 = vpop.f32.mrb[163].mxu0  ;;  %v12798_v6 = vadd.f32 %v10377_v27, %v6168_v58 }
0x13e7   :  { %v6170_v15 = vsel %vm1207_vm2, %v12798_v6, -inf }
0x13e8   :  { %6171 = vmax.xlane.f32.xlu0 %v6170_v15 }
0x141d   :  { %v5039_v52 = vpop.xlane.xlu0 %5038 }
0x141e   :  { %v5040_v14 = vsub.f32 %v12739_v46, %v5039_v52 }
0x1420   :  { %v5041_v54 = vmul.f32 1.442695, %v5040_v14 }
0x1422   :  { %10244 = vpow2.f32 %v5041_v54 }
0x1425   :  { %v5142_v16 = vpop.xlane.xlu1 %5141 }
0x1426   :  { %v5143_v43 = vsub.f32 %v12743_v56, %v5142_v16 }
0x1428   :  { %v5144_v23 = vmul.f32 1.442695, %v5143_v43 }
0x142a   :  { %10246 = vpow2.f32 %v5144_v23 }
0x142c   :  { %v12804_v1 = vpop.eup %10244 }
0x142d   :  { %v5245_v3 = vpop.xlane.xlu0 %5244  ;;  %v5043_v9 = vsel %vm1207_vm2, %v12804_v1, 0.0 }
0x142e   :  { %v5246_v63 = vsub.f32 %v12750_v38, %v5245_v3  ;;  %5044 = vadd.xlane.f32.xlu1 %v5043_v9 }
0x1430   :  { %v5247_v0 = vmul.f32 1.442695, %v5246_v63 }
0x1432   :  { %10248 = vpow2.f32 %v5247_v0 }
0x1434   :  { %v12809_v28 = vpop.eup %10246 }
0x1435   :  { %v5348_v46 = vpop.xlane.xlu1 %5347  ;;  %v5146_v5 = vsel %vm1207_vm2, %v12809_v28, 0.0 }
0x1436   :  { %v5349_v56 = vsub.f32 %v12754_v60, %v5348_v46  ;;  %5147 = vadd.xlane.f32.xlu1 %v5146_v5 }
0x1438   :  { %v5350_v34 = vmul.f32 1.442695, %v5349_v56 }
0x143a   :  { %10250 = vpow2.f32 %v5350_v34 }
0x143c   :  { %v12814_v50 = vpop.eup %10248 }
0x143d   :  { %v5451_v27 = vpop.xlane.xlu0 %5450  ;;  %v5249_v38 = vsel %vm1207_vm2, %v12814_v50, 0.0 }
0x143e   :  { %v5452_v17 = vsub.f32 %v12761_v45, %v5451_v27  ;;  %5250 = vadd.xlane.f32.xlu0 %v5249_v38 }
0x1440   :  { %v5453_v2 = vmul.f32 1.442695, %v5452_v17 }
0x1442   :  { %10252 = vpow2.f32 %v5453_v2 }
0x1444   :  { %v12819_v58 = vpop.eup %10250 }
0x1445   :  { %v5554_v13 = vpop.xlane.xlu1 %5553  ;;  %v5352_v60 = vsel %vm1207_vm2, %v12819_v58, 0.0 }
0x1446   :  { %v5555_v53 = vsub.f32 %v12765_v48, %v5554_v13  ;;  %5353 = vadd.xlane.f32.xlu1 %v5352_v60 }
0x1448   :  { %v5556_v44 = vmul.f32 1.442695, %v5555_v53 }
0x144a   :  { %10254 = vpow2.f32 %v5556_v44 }
0x144c   :  { %v12824_v15 = vpop.eup %10252 }
0x144d   :  { %v5657_v52 = vpop.xlane.xlu0 %5656  ;;  %v5455_v45 = vsel %vm1207_vm2, %v12824_v15, 0.0 }
0x144e   :  { %v5658_v14 = vsub.f32 %v12772_v37, %v5657_v52  ;;  %5456 = vadd.xlane.f32.xlu0 %v5455_v45 }
0x1450   :  { %v5659_v54 = vmul.f32 1.442695, %v5658_v14 }
0x1452   :  { %10256 = vpow2.f32 %v5659_v54 }
0x1454   :  { %v12829_v16 = vpop.eup %10254 }
0x1455   :  { %v5760_v43 = vpop.xlane.xlu1 %5759  ;;  %v5558_v48 = vsel %vm1207_vm2, %v12829_v16, 0.0 }
0x1456   :  { %v5761_v23 = vsub.f32 %v12776_v22, %v5760_v43  ;;  %5559 = vadd.xlane.f32.xlu1 %v5558_v48  ;;  %v9872_v43 = vld [vmem:[#allocation6 + $0x100] ss:$8 sps:$4 sm:$0xff]   ;;  %v9874_v48 = vld [vmem:[#allocation6 + $0x104] ss:$8 sps:$4 sm:$0xff]  }
0x1457   :  { %6441 = vmatprep.subr.bf16.mxu0 %v9874_v48 }
0x1458   :  { %v5762_v3 = vmul.f32 1.442695, %v5761_v23  ;;  %v9877_v23 = vld [vmem:[#allocation6 + $0x114] ss:$8 sps:$4 sm:$0xff]   ;;  %6442 = vmatpush1.bf16.msra.mxu0 %v9872_v43 }
0x1459   :  { %6443 = vmatprep.subr.bf16.mxu0 %v9877_v23 }
0x145a   :  { %10258 = vpow2.f32 %v5762_v3  ;;  %v9880_v3 = vld [vmem:[#allocation6 + $0x124] ss:$8 sps:$4 sm:$0xff]  }
0x145c   :  { %v12834_v9 = vpop.eup %10256 }
0x145d   :  { %v5863_v63 = vpop.xlane.xlu0 %5862  ;;  %v5661_v37 = vsel %vm1207_vm2, %v12834_v9, 0.0 }
0x145e   :  { %v5864_v0 = vsub.f32 %v12783_v29, %v5863_v63  ;;  %5662 = vadd.xlane.f32.xlu0 %v5661_v37  ;;  %v9878_v63 = vld [vmem:[#allocation6 + $0x120] ss:$8 sps:$4 sm:$0xff]   ;;  %v9883_v37 = vld [vmem:[#allocation6 + $0x134] ss:$8 sps:$4 sm:$0xff]  }
0x1460   :  { %v5865_v46 = vmul.f32 1.442695, %v5864_v0  ;;  %v9881_v0 = vld [vmem:[#allocation6 + $0x130] ss:$8 sps:$4 sm:$0xff]  }
0x1462   :  { %10260 = vpow2.f32 %v5865_v46  ;;  %v9886_v46 = vld [vmem:[#allocation6 + $0x144] ss:$8 sps:$4 sm:$0xff]  }
0x1464   :  { %v12839_v5 = vpop.eup %10258 }
0x1465   :  { %v5966_v56 = vpop.xlane.xlu1 %5965  ;;  %v5764_v22 = vsel %vm1207_vm2, %v12839_v5, 0.0 }
0x1466   :  { %v5967_v34 = vsub.f32 %v12787_v18, %v5966_v56  ;;  %5765 = vadd.xlane.f32.xlu1 %v5764_v22  ;;  %v9884_v56 = vld [vmem:[#allocation6 + $0x140] ss:$8 sps:$4 sm:$0xff]   ;;  %v9889_v22 = vld [vmem:[#allocation6 + $0x154] ss:$8 sps:$4 sm:$0xff]  }
0x1468   :  { %v5968_v27 = vmul.f32 1.442695, %v5967_v34  ;;  %v9887_v34 = vld [vmem:[#allocation6 + $0x150] ss:$8 sps:$4 sm:$0xff]  }
0x146a   :  { %10262 = vpow2.f32 %v5968_v27  ;;  %v9892_v27 = vld [vmem:[#allocation6 + $0x164] ss:$8 sps:$4 sm:$0xff]  }
0x146c   :  { %v12844_v38 = vpop.eup %10260 }
0x146d   :  { %v6069_v17 = vpop.xlane.xlu0 %6068  ;;  %v5867_v29 = vsel %vm1207_vm2, %v12844_v38, 0.0 }
0x146e   :  { %v6070_v2 = vsub.f32 %v12794_v7, %v6069_v17  ;;  %5868 = vadd.xlane.f32.xlu0 %v5867_v29  ;;  %v9890_v17 = vld [vmem:[#allocation6 + $0x160] ss:$8 sps:$4 sm:$0xff]  }
0x1470   :  { %v6071_v13 = vmul.f32 1.442695, %v6070_v2  ;;  %v9895_v2 = vld [vmem:[#allocation6 + $0x174] ss:$8 sps:$4 sm:$0xff]  }
0x1472   :  { %10264 = vpow2.f32 %v6071_v13  ;;  %v9893_v13 = vld [vmem:[#allocation6 + $0x170] ss:$8 sps:$4 sm:$0xff]  }
0x1474   :  { %v12849_v60 = vpop.eup %10262 }
0x1475   :  { %v6172_v53 = vpop.xlane.xlu0 %6171  ;;  %v5970_v18 = vsel %vm1207_vm2, %v12849_v60, 0.0 }
0x1476   :  { %v6173_v44 = vsub.f32 %v12798_v6, %v6172_v53  ;;  %5971 = vadd.xlane.f32.xlu1 %v5970_v18  ;;  %v9875_v6 = vld [vmem:[#allocation6 + $0x110] ss:$8 sps:$4 sm:$0xff]   ;;  %v9898_v53 = vld [vmem:[#allocation6 + $0x184] ss:$8 sps:$4 sm:$0xff]   ;;  %v9896_v18 = vld [vmem:[#allocation6 + $0x180] ss:$8 sps:$4 sm:$0xff]  }
0x1477   :  { %6444 = vmatpush1.bf16.msra.mxu0 %v9875_v6 }
0x1478   :  { %v6174_v52 = vmul.f32 1.442695, %v6173_v44  ;;  %6445 = vmatprep.subr.bf16.mxu0 %v9880_v3  ;;  %v4967_v44 = vadd.f32 %v12595_v25, %v12631_v20  ;;  %v5255_v3 = vpack.c.bf16 %v12599_v30, %v12599_v30 }
0x147a   :  { %10266 = vpow2.f32 %v6174_v52 }
0x147b   :  { %6446 = vmatpush1.bf16.msra.mxu0 %v9878_v63 }
0x147c   :  { %v12854_v45 = vpop.eup %10264  ;;  %6447 = vmatprep.subr.bf16.mxu0 %v9883_v37  ;;  %v5260_v37 = vsel %vm1224_vm1, %v5255_v3, 0 }
0x147d   :  { %v6073_v14 = vsel %vm1207_vm2, %v12854_v45, 0.0 }
0x147e   :  { %6074 = vadd.xlane.f32.xlu0 %v6073_v14 }
0x147f   :  { %6448 = vmatpush1.bf16.msra.mxu0 %v9881_v0  ;;  %v4971_v0 = vadd.f32 %v12603_v31, %v12631_v20 }
0x1480   :  { %6449 = vmatprep.subr.bf16.mxu0 %v9886_v46 }
0x1481   :  { %v5358_v30 = vpack.c.bf16 %v4971_v0, %v4971_v0 }
0x1483   :  { %6450 = vmatpush1.bf16.msra.mxu0 %v9884_v56 }
0x1484   :  { %v12858_v7 = vpop.eup %10266  ;;  %6451 = vmatprep.subr.bf16.mxu0 %v9889_v22 }
0x1485   :  { %v6176_v54 = vsel %vm1207_vm2, %v12858_v7, 0.0 }
0x1486   :  { %6177 = vadd.xlane.f32.xlu1 %v6176_v54  ;;  %v5152_v54 = vpack.c.bf16 %v4967_v44, %v4967_v44 }
0x1487   :  { %6452 = vmatpush1.bf16.msra.mxu0 %v9887_v34  ;;  %v5363_v34 = vsel %vm1224_vm1, %v5358_v30, 0  ;;  %v5976_v30 = vpack.c.bf16 %v12642_v42, %v12642_v42 }
0x1488   :  { %6453 = vmatprep.subr.bf16.mxu0 %v9892_v27  ;;  %v5157_v23 = vsel %vm1224_vm1, %v5152_v54, 0  ;;  %v5667_v54 = vpack.c.bf16 %v12617_v51, %v12617_v51 }
0x148b   :  { %6454 = vmatpush1.bf16.msra.mxu0 %v9890_v17  ;;  %v5461_v17 = vpack.c.bf16 %v12609_v59, %v12609_v59 }
0x148c   :  { %6455 = vmatprep.subr.bf16.mxu0 %v9895_v2 }
0x148d   :  { %v5466_v2 = vsel %vm1224_vm1, %v5461_v17, 0 }
0x148f   :  { %6456 = vmatpush1.bf16.msra.mxu0 %v9893_v13  ;;  %v4977_v13 = vadd.f32 %v12613_v57, %v12631_v20 }
0x1490   :  { %6457 = vmatprep.subr.bf16.mxu0 %v9898_v53 }
0x1491   :  { %v5564_v59 = vpack.c.bf16 %v4977_v13, %v4977_v13  ;;  %v9901_v13 = vld [vmem:[#allocation6 + $0x194] ss:$8 sps:$4 sm:$0xff]  }
0x1493   :  { %6458 = vmatpush1.bf16.msra.mxu0 %v9896_v18 }
0x1494   :  { %6459 = vmatprep.subr.bf16.mxu0 %v9901_v13 }
0x14bb   :  { %v5045_v29 = vpop.xlane.xlu1 %5044 }
0x14bc   :  { %10268 = vrcp.f32 %v5045_v29 }
0x14c3   :  { %v5148_v52 = vpop.xlane.xlu1 %5147 }
0x14c4   :  { %10270 = vrcp.f32 %v5148_v52  ;;  %v5569_v52 = vsel %vm1224_vm1, %v5564_v59, 0 }
0x14c6   :  { %v10269_v14 = vpop.eup %10268 }
0x14c7   :  { %v5047_v43 = vmul.f32 %v10269_v14, %v12804_v1 }
0x14c9   :  { %v5048_v48 = vpack.c.bf16 %v5047_v43, %v5047_v43 }
0x14cb   :  { %9108 = vmatmul.mubr.msk.bf16.vlgmr.msra.gmra.mrb[100].mxu1 %vm1207_vm2, %v5048_v48  ;;  %v5251_v6 = vpop.xlane.xlu0 %5250  ;;  %v5672_v48 = vsel %vm1224_vm1, %v5667_v54, 0  ;;  %v9911_v54 = vld [vmem:[#allocation6 + $0x1d0] ss:$8 sps:$4 sm:$0xff]  }
0x14cc   :  { %9118 = vmatpush3.bf16.msra.mxu1 %v5157_v23  ;;  %10272 = vrcp.f32 %v5251_v6  ;;  %9119 = vmatprep.mubr.msk.bf16.mxu1 %vm10652_vm0, %v13441_v24  ;;  %v4981_v23 = vadd.f32 %v12621_v35, %v12631_v20 }
0x14cd   :  { %9129 = vmatprep.subr.bf16.mxu1 %v13441_v24 }
0x14ce   :  { %v10271_v25 = vpop.eup %10270  ;;  %v5770_v51 = vpack.c.bf16 %v4981_v23, %v4981_v23 }
0x14cf   :  { %v5150_v63 = vmul.f32 %v10271_v25, %v12809_v28 }
0x14d1   :  { %v5151_v1 = vpack.c.bf16 %v5150_v63, %v5150_v63  ;;  %v5775_v63 = vsel %vm1224_vm1, %v5770_v51, 0 }
0x14d3   :  { %9120 = vmatmul.mubr.msk.bf16.vlgmr.msra.gmra.mrb[104].mxu1 %vm1207_vm2, %v5151_v1  ;;  %v5354_v46 = vpop.xlane.xlu1 %5353  ;;  %v5873_v1 = vpack.c.bf16 %v12636_v62, %v12636_v62 }
0x14d4   :  { %9130 = vmatpush3.bf16.msra.mxu1 %v5260_v37  ;;  %10274 = vrcp.f32 %v5354_v46  ;;  %9131 = vmatprep.mubr.msk.bf16.mxu1 %vm10652_vm0, %v13441_v24 }
0x14d5   :  { %9141 = vmatprep.subr.bf16.mxu1 %v13441_v24  ;;  %v5878_v0 = vsel %vm1224_vm1, %v5873_v1, 0 }
0x14d6   :  { %v10273_v56 = vpop.eup %10272 }
0x14d7   :  { %v5253_v28 = vmul.f32 %v10273_v56, %v12814_v50 }
0x14d9   :  { %v5254_v22 = vpack.c.bf16 %v5253_v28, %v5253_v28  ;;  %v5981_v28 = vsel %vm1224_vm1, %v5976_v30, 0 }
0x14db   :  { %9132 = vmatmul.mubr.msk.bf16.vlgmr.msra.gmra.mrb[108].mxu1 %vm1207_vm2, %v5254_v22  ;;  %v5457_v31 = vpop.xlane.xlu0 %5456 }
0x14dc   :  { %9142 = vmatpush3.bf16.msra.mxu1 %v5363_v34  ;;  %10276 = vrcp.f32 %v5457_v31  ;;  %9143 = vmatprep.mubr.msk.bf16.mxu1 %vm10652_vm0, %v13441_v24  ;;  %v6079_v31 = vpack.c.bf16 %v12647_v26, %v12647_v26 }
0x14dd   :  { %9153 = vmatprep.subr.bf16.mxu1 %v13441_v24 }
0x14de   :  { %v10275_v27 = vpop.eup %10274 }
0x14df   :  { %v5356_v29 = vmul.f32 %v10275_v27, %v12819_v58  ;;  %v6084_v27 = vsel %vm1224_vm1, %v6079_v31, 0 }
0x14e1   :  { %v5357_v50 = vpack.c.bf16 %v5356_v29, %v5356_v29 }
0x14e3   :  { %v5560_v53 = vpop.xlane.xlu1 %5559  ;;  %9144 = vmatmul.mubr.msk.bf16.vlgmr.msra.gmra.mrb[112].mxu1 %vm1207_vm2, %v5357_v50  ;;  %v6182_v50 = vpack.c.bf16 %v12653_v40, %v12653_v40  ;;  %v9902_v40 = vld [vmem:[#allocation6 + $0x1a0] ss:$8 sps:$4 sm:$0xff]  }
0x14e4   :  { %10278 = vrcp.f32 %v5560_v53  ;;  %9154 = vmatpush3.bf16.msra.mxu1 %v5466_v2  ;;  %9155 = vmatprep.mubr.msk.bf16.mxu1 %vm10652_vm0, %v13441_v24 }
0x14e5   :  { %9165 = vmatprep.subr.bf16.mxu1 %v13441_v24  ;;  %v6187_v2 = vsel %vm1224_vm1, %v6182_v50, 0 }
0x14e6   :  { %v10277_v18 = vpop.eup %10276 }
0x14e7   :  { %v5459_v58 = vmul.f32 %v10277_v18, %v12824_v15  ;;  %v9899_v18 = vld [vmem:[#allocation6 + $0x190] ss:$8 sps:$4 sm:$0xff]  }
0x14e8   :  { %6460 = vmatpush1.bf16.msra.mxu0 %v9899_v18 }
0x14e9   :  { %v5460_v44 = vpack.c.bf16 %v5459_v58, %v5459_v58 }
0x14eb   :  { %9156 = vmatmul.mubr.msk.bf16.vlgmr.msra.gmra.mrb[116].mxu1 %vm1207_vm2, %v5460_v44  ;;  %v5663_v57 = vpop.xlane.xlu0 %5662  ;;  %v9904_v44 = vld [vmem:[#allocation6 + $0x1a4] ss:$8 sps:$4 sm:$0xff]  }
0x14ec   :  { %9166 = vmatpush3.bf16.msra.mxu1 %v5569_v52  ;;  %10280 = vrcp.f32 %v5663_v57  ;;  %9167 = vmatprep.mubr.msk.bf16.mxu1 %vm10652_vm0, %v13441_v24  ;;  %v9905_v52 = vld [vmem:[#allocation6 + $0x1b0] ss:$8 sps:$4 sm:$0xff]   ;;  %v9908_v57 = vld [vmem:[#allocation6 + $0x1c0] ss:$8 sps:$4 sm:$0xff]  }
0x14ed   :  { %9177 = vmatprep.subr.bf16.mxu1 %v13441_v24  ;;  %6461 = vmatprep.subr.bf16.mxu0 %v9904_v44 }
0x14ee   :  { %v10279_v14 = vpop.eup %10278  ;;  %6462 = vmatpush1.bf16.msra.mxu0 %v9902_v40 }
0x14ef   :  { %v5562_v43 = vmul.f32 %v10279_v14, %v12829_v16  ;;  %v9913_v14 = vld [vmem:[#allocation6 + $0x1d4] ss:$8 sps:$4 sm:$0xff]  }
0x14f1   :  { %v5563_v15 = vpack.c.bf16 %v5562_v43, %v5562_v43  ;;  %v9916_v43 = vld [vmem:[#allocation6 + $0x1e4] ss:$8 sps:$4 sm:$0xff]  }
0x14f3   :  { %v5766_v6 = vpop.xlane.xlu1 %5765  ;;  %9168 = vmatmul.mubr.msk.bf16.vlgmr.msra.gmra.mrb[120].mxu1 %vm1207_vm2, %v5563_v15  ;;  %v9919_v15 = vld [vmem:[#allocation6 + $0x1f4] ss:$8 sps:$4 sm:$0xff]  }
0x14f4   :  { %10282 = vrcp.f32 %v5766_v6  ;;  %9178 = vmatpush3.bf16.msra.mxu1 %v5672_v48  ;;  %9179 = vmatprep.mubr.msk.bf16.mxu1 %vm10652_vm0, %v13441_v24  ;;  %v9917_v48 = vld [vmem:[#allocation6 + $0x1f0] ss:$8 sps:$4 sm:$0xff]  }
0x14f5   :  { %9189 = vmatprep.subr.bf16.mxu1 %v13441_v24 }
0x14f6   :  { %v10281_v25 = vpop.eup %10280 }
0x14f7   :  { %v5665_v16 = vmul.f32 %v10281_v25, %v12834_v9 }
0x14f9   :  { %v5666_v3 = vpack.c.bf16 %v5665_v16, %v5665_v16 }
0x14fb   :  { %9180 = vmatmul.mubr.msk.bf16.vlgmr.msra.gmra.mrb[124].mxu1 %vm1207_vm2, %v5666_v3  ;;  %v5869_v35 = vpop.xlane.xlu0 %5868 }
0x14fc   :  { %9190 = vmatpush3.bf16.msra.mxu1 %v5775_v63  ;;  %10284 = vrcp.f32 %v5869_v35  ;;  %9191 = vmatprep.mubr.msk.bf16.mxu1 %vm10652_vm0, %v13441_v24 }
0x14fd   :  { %9201 = vmatprep.subr.bf16.mxu1 %v13441_v24 }
0x14fe   :  { %v10283_v20 = vpop.eup %10282 }
0x14ff   :  { %v5768_v37 = vmul.f32 %v10283_v20, %v12839_v5 }
0x1501   :  { %v5769_v9 = vpack.c.bf16 %v5768_v37, %v5768_v37 }
0x1503   :  { %v5972_v46 = vpop.xlane.xlu1 %5971  ;;  %9192 = vmatmul.mubr.msk.bf16.vlgmr.msra.gmra.mrb[128].mxu1 %vm1207_vm2, %v5769_v9 }
0x1504   :  { %10286 = vrcp.f32 %v5972_v46  ;;  %9202 = vmatpush3.bf16.msra.mxu1 %v5878_v0  ;;  %9203 = vmatprep.mubr.msk.bf16.mxu1 %vm10652_vm0, %v13441_v24 }
0x1505   :  { %9213 = vmatprep.subr.bf16.mxu1 %v13441_v24 }
0x1506   :  { %v10285_v56 = vpop.eup %10284 }
0x1507   :  { %v5871_v62 = vmul.f32 %v10285_v56, %v12844_v38 }
0x1509   :  { %v5872_v5 = vpack.c.bf16 %v5871_v62, %v5871_v62 }
0x150b   :  { %9204 = vmatmul.mubr.msk.bf16.vlgmr.msra.gmra.mrb[132].mxu1 %vm1207_vm2, %v5872_v5  ;;  %v6075_v22 = vpop.xlane.xlu0 %6074 }
0x150c   :  { %9214 = vmatpush3.bf16.msra.mxu1 %v5981_v28  ;;  %10288 = vrcp.f32 %v6075_v22  ;;  %9215 = vmatprep.mubr.msk.bf16.mxu1 %vm10652_vm0, %v13441_v24 }
0x150d   :  { %9225 = vmatprep.subr.bf16.mxu1 %v13441_v24 }
0x150e   :  { %v10287_v34 = vpop.eup %10286 }
0x150f   :  { %v5974_v42 = vmul.f32 %v10287_v34, %v12849_v60 }
0x1511   :  { %v5975_v38 = vpack.c.bf16 %v5974_v42, %v5974_v42 }
0x1513   :  { %v6178_v17 = vpop.xlane.xlu1 %6177  ;;  %9216 = vmatmul.mubr.msk.bf16.vlgmr.msra.gmra.mrb[136].mxu1 %vm1207_vm2, %v5975_v38 }
0x1514   :  { %10290 = vrcp.f32 %v6178_v17  ;;  %9226 = vmatpush3.bf16.msra.mxu1 %v6084_v27  ;;  %9227 = vmatprep.mubr.msk.bf16.mxu1 %vm10652_vm0, %v13441_v24 }
0x1515   :  { %9237 = vmatprep.subr.bf16.mxu1 %v13441_v24 }
0x1516   :  { %v10289_v29 = vpop.eup %10288 }
0x1517   :  { %v6077_v26 = vmul.f32 %v10289_v29, %v12854_v45  ;;  %v9907_v45 = vld [vmem:[#allocation6 + $0x1b4] ss:$8 sps:$4 sm:$0xff]  }
0x1518   :  { %6463 = vmatprep.subr.bf16.mxu0 %v9907_v45 }
0x1519   :  { %v6078_v60 = vpack.c.bf16 %v6077_v26, %v6077_v26  ;;  %6464 = vmatpush1.bf16.msra.mxu0 %v9905_v52 }
0x151b   :  { %9228 = vmatmul.mubr.msk.bf16.vlgmr.msra.gmra.mrb[140].mxu1 %vm1207_vm2, %v6078_v60 }
0x151c   :  { %9238 = vmatpush3.bf16.msra.mxu1 %v6187_v2  ;;  %9239 = vmatprep.mubr.msk.bf16.mxu1 %vm10652_vm0, %v13441_v24  ;;  %v9910_v24 = vld [vmem:[#allocation6 + $0x1c4] ss:$8 sps:$4 sm:$0xff]  }
0x151d   :  { %6465 = vmatprep.subr.bf16.mxu0 %v9910_v24 }
0x151e   :  { %v10291_v53 = vpop.eup %10290  ;;  %6466 = vmatpush1.bf16.msra.mxu0 %v9908_v57 }
0x151f   :  { %v6180_v59 = vmul.f32 %v10291_v53, %v12858_v7  ;;  %6467 = vmatprep.subr.bf16.mxu0 %v9913_v14  ;;  %v9914_v7 = vld [vmem:[#allocation6 + $0x1e0] ss:$8 sps:$4 sm:$0xff]  }
0x1521   :  { %v6181_v58 = vpack.c.bf16 %v6180_v59, %v6180_v59 }
0x1522   :  { %6468 = vmatpush1.bf16.msra.mxu0 %v9911_v54 }
0x1523   :  { %9240 = vmatmul.mubr.msk.bf16.vlgmr.msra.gmra.mrb[144].mxu1 %vm1207_vm2, %v6181_v58  ;;  %6469 = vmatprep.subr.bf16.mxu0 %v9916_v43 }
0x1526   :  { %6470 = vmatpush1.bf16.msra.mxu0 %v9914_v7 }
0x1527   :  { %6471 = vmatprep.subr.bf16.mxu0 %v9919_v15 }
0x152a   :  { %6472 = vmatpush1.bf16.msra.mxu0 %v9917_v48 }
0x159e   :  { %v5090_v23 = vpop.f32.mrb[100].mxu1 }
0x159f   :  { %v9109_v6 = vpop.f32.mrb[101].mxu1 }
0x15a0   :  { %v5093_v25 = vpop.f32.mrb[102].mxu1 }
0x15a1   :  { %v9110_v51 = vpop.f32.mrb[103].mxu1 }
0x15a6   :  { %v5193_v16 = vpop.f32.mrb[104].mxu1 }
0x15a7   :  { %v9121_v3 = vpop.f32.mrb[105].mxu1 }
0x15a8   :  { %v5196_v63 = vpop.f32.mrb[106].mxu1 }
0x15a9   :  { %v9122_v35 = vpop.f32.mrb[107].mxu1  ;;  %v8662_v63 = vld [vmem:[%s13413_s7 + $0x2] sm:$0x3] }
0x15aa   :  { %v6274_v35 = vrot.slane %v8662_v63, %v11219_v11 }
0x15ae   :  { %v5296_v20 = vpop.f32.mrb[108].mxu1 }
0x15af   :  { %v6262_v1 = vpack.c.bf16 %v5296_v20, %v5090_v23  ;;  %v9133_v37 = vpop.f32.mrb[109].mxu1  ;;  %v6278_v20 = vrot.slane %v8662_v63, %v11216_v10  ;;  %v9941_v63 = vld [vmem:[#allocation10 + $0x268] ss:$16 sps:$4 sm:$0xff]  }
0x15b0   :  { %v5299_v9 = vpop.f32.mrb[110].mxu1 }
0x15b1   :  { %v9134_v0 = vpop.f32.mrb[111].mxu1 }
0x15b6   :  { %v5399_v46 = vpop.f32.mrb[112].mxu1 }
0x15b7   :  { %v6263_v56 = vpack.c.bf16 %v5399_v46, %v5193_v16  ;;  %v9145_v30 = vpop.f32.mrb[113].mxu1 }
0x15b8   :  { %v5402_v62 = vpop.f32.mrb[114].mxu1 }
0x15b9   :  { %v9146_v5 = vpop.f32.mrb[115].mxu1  ;;  %6473 = vmatprep.mubr.bf16.mxu0 %v6263_v56 }
0x15ba   :  { %6474 = vmatmul.mubr.bf16.vlgmr.msra.gmra.mrb[164].mxu0 %v6262_v1 }
0x15be   :  { %v5502_v28 = vpop.f32.mrb[116].mxu1 }
0x15bf   :  { %v9157_v22 = vpop.f32.mrb[117].mxu1 }
0x15c0   :  { %v5505_v34 = vpop.f32.mrb[118].mxu1 }
0x15c1   :  { %v9158_v31 = vpop.f32.mrb[119].mxu1 }
0x15c6   :  { %v5605_v42 = vpop.f32.mrb[120].mxu1 }
0x15c7   :  { %v9169_v38 = vpop.f32.mrb[121].mxu1 }
0x15c8   :  { %v5608_v27 = vpop.f32.mrb[122].mxu1 }
0x15c9   :  { %v9170_v17 = vpop.f32.mrb[123].mxu1 }
0x15ce   :  { %v5708_v29 = vpop.f32.mrb[124].mxu1 }
0x15cf   :  { %v6264_v50 = vpack.c.bf16 %v5708_v29, %v5502_v28  ;;  %v9181_v26 = vpop.f32.mrb[125].mxu1 }
0x15d0   :  { %v5711_v60 = vpop.f32.mrb[126].mxu1 }
0x15d1   :  { %v9182_v2 = vpop.f32.mrb[127].mxu1 }
0x15d6   :  { %v5811_v13 = vpop.f32.mrb[128].mxu1 }
0x15d7   :  { %v6265_v53 = vpack.c.bf16 %v5811_v13, %v5605_v42  ;;  %v9193_v18 = vpop.f32.mrb[129].mxu1 }
0x15d8   :  { %v5814_v59 = vpop.f32.mrb[130].mxu1 }
0x15d9   :  { %v9194_v58 = vpop.f32.mrb[131].mxu1  ;;  %6483 = vmatprep.mubr.bf16.mxu0 %v6265_v53 }
0x15da   :  { %6484 = vmatmul.mubr.bf16.gmra.mrb[168].mxu0 %v6264_v50 }
0x15de   :  { %v5914_v40 = vpop.f32.mrb[132].mxu1 }
0x15df   :  { %v9205_v44 = vpop.f32.mrb[133].mxu1 }
0x15e0   :  { %v5917_v45 = vpop.f32.mrb[134].mxu1 }
0x15e1   :  { %v9206_v52 = vpop.f32.mrb[135].mxu1 }
0x15e6   :  { %v6017_v57 = vpop.f32.mrb[136].mxu1 }
0x15e7   :  { %v9217_v24 = vpop.f32.mrb[137].mxu1 }
0x15e8   :  { %v6020_v14 = vpop.f32.mrb[138].mxu1 }
0x15e9   :  { %v9218_v54 = vpop.f32.mrb[139].mxu1  ;;  %v9920_v14 = vld [vmem:[#allocation10 + $0x200] ss:$16 sps:$4 sm:$0xff]  }
0x15ea   :  { %v9922_v54 = vld [vmem:[#allocation10 + $0x204] ss:$16 sps:$4 sm:$0xff]  }
0x15eb   :  { %7076 = vmatprep.subr.bf16.mxu1 %v9922_v54 }
0x15ec   :  { %7077 = vmatpush1.bf16.msra.mxu1 %v9920_v14 }
0x15ee   :  { %v6120_v7 = vpop.f32.mrb[140].mxu1 }
0x15ef   :  { %v6266_v43 = vpack.c.bf16 %v6120_v7, %v5914_v40  ;;  %v9229_v15 = vpop.f32.mrb[141].mxu1  ;;  %v9923_v7 = vld [vmem:[#allocation10 + $0x208] ss:$16 sps:$4 sm:$0xff]  }
0x15f0   :  { %v6123_v48 = vpop.f32.mrb[142].mxu1  ;;  %v9931_v15 = vld [vmem:[#allocation10 + $0x22c] ss:$16 sps:$4 sm:$0xff]  }
0x15f1   :  { %v9230_v23 = vpop.f32.mrb[143].mxu1  ;;  %v9934_v48 = vld [vmem:[#allocation10 + $0x244] ss:$16 sps:$4 sm:$0xff]  }
0x15f2   :  { %v9937_v23 = vld [vmem:[#allocation10 + $0x24c] ss:$16 sps:$4 sm:$0xff]  }
0x15f6   :  { %v6223_v6 = vpop.f32.mrb[144].mxu1 }
0x15f7   :  { %v6267_v25 = vpack.c.bf16 %v6223_v6, %v6017_v57  ;;  %v9241_v51 = vpop.f32.mrb[145].mxu1  ;;  %v9932_v6 = vld [vmem:[#allocation10 + $0x240] ss:$16 sps:$4 sm:$0xff]  }
0x15f8   :  { %v6226_v16 = vpop.f32.mrb[146].mxu1  ;;  %v9940_v51 = vld [vmem:[#allocation10 + $0x264] ss:$16 sps:$4 sm:$0xff]  }
0x15f9   :  { %v9242_v3 = vpop.f32.mrb[147].mxu1  ;;  %6493 = vmatprep.mubr.bf16.mxu0 %v6267_v25  ;;  %v9935_v25 = vld [vmem:[#allocation10 + $0x248] ss:$16 sps:$4 sm:$0xff]   ;;  %v9943_v16 = vld [vmem:[#allocation10 + $0x26c] ss:$16 sps:$4 sm:$0xff]  }
0x15fa   :  { %6494 = vmatmul.mubr.bf16.gmra.mrb[172].mxu0 %v6266_v43  ;;  %v9928_v43 = vld [vmem:[#allocation10 + $0x224] ss:$16 sps:$4 sm:$0xff]   ;;  %v9938_v3 = vld [vmem:[#allocation10 + $0x260] ss:$16 sps:$4 sm:$0xff]  }
0x15fb   :  { %7078 = vmatprep.subr.bf16.mxu1 %v9928_v43  ;;  %v9985_v43 = vld [vmem:[#allocation10 + $0x34c] ss:$16 sps:$4 sm:$0xff]  }
0x168d   :  { %v6475_v1 = vpop.f32.mrb[164].mxu0 }
0x168e   :  { %v6476_v37 = vadd.f32 %v6475_v1, %v6274_v35  ;;  %v6477_v9 = vpop.f32.mrb[165].mxu0  ;;  %v9944_v1 = vld [vmem:[#allocation10 + $0x280] ss:$16 sps:$4 sm:$0xff]  }
0x168f   :  { %v6478_v0 = vadd.f32 %v6477_v9, %v6278_v20  ;;  %v6479_v46 = vpop.f32.mrb[166].mxu0  ;;  %v9952_v9 = vld [vmem:[#allocation10 + $0x2a4] ss:$16 sps:$4 sm:$0xff]  }
0x1690   :  { %v12957_v56 = vadd.f32 %v6476_v37, %v12415_v21  ;;  %v6480_v30 = vadd.f32 %v6479_v46, %v6274_v35  ;;  %v6481_v62 = vpop.f32.mrb[167].mxu0  ;;  %v9947_v37 = vld [vmem:[#allocation10 + $0x288] ss:$16 sps:$4 sm:$0xff]   ;;  %v9950_v46 = vld [vmem:[#allocation10 + $0x2a0] ss:$16 sps:$4 sm:$0xff]  }
0x1691   :  { %v12960_v5 = vadd.f32 %v6478_v0, %v12409_v33  ;;  %v6482_v28 = vadd.f32 %v6481_v62, %v6278_v20  ;;  %v9955_v0 = vld [vmem:[#allocation10 + $0x2ac] ss:$16 sps:$4 sm:$0xff]   ;;  %v9958_v62 = vld [vmem:[#allocation10 + $0x2c4] ss:$16 sps:$4 sm:$0xff]  }
0x1692   :  { %v12963_v22 = vadd.f32 %v6480_v30, %v12418_v49  ;;  %v9953_v30 = vld [vmem:[#allocation10 + $0x2a8] ss:$16 sps:$4 sm:$0xff]  }
0x1693   :  { %v12966_v34 = vadd.f32 %v6482_v28, %v12412_v4  ;;  %v6520_v31 = vadd.f32 %v12960_v5, %v12957_v56  ;;  %v9961_v28 = vld [vmem:[#allocation10 + $0x2cc] ss:$16 sps:$4 sm:$0xff]  }
0x1695   :  { %6521 = vadd.xlane.f32.xlu0 %v6520_v31  ;;  %v6523_v21 = vadd.f32 %v12966_v34, %v12963_v22  ;;  %v9956_v31 = vld [vmem:[#allocation10 + $0x2c0] ss:$16 sps:$4 sm:$0xff]  }
0x1697   :  { %6524 = vadd.xlane.f32.xlu1 %v6523_v21  ;;  %v9959_v21 = vld [vmem:[#allocation10 + $0x2c8] ss:$16 sps:$4 sm:$0xff]  }
0x16ad   :  { %v6485_v42 = vpop.f32.mrb[168].mxu0 }
0x16ae   :  { %v6486_v38 = vadd.f32 %v6485_v42, %v6274_v35  ;;  %v6487_v27 = vpop.f32.mrb[169].mxu0  ;;  %v9964_v42 = vld [vmem:[#allocation10 + $0x2e4] ss:$16 sps:$4 sm:$0xff]  }
0x16af   :  { %v6488_v33 = vadd.f32 %v6487_v27, %v6278_v20  ;;  %v6489_v17 = vpop.f32.mrb[170].mxu0  ;;  %v9962_v27 = vld [vmem:[#allocation10 + $0x2e0] ss:$16 sps:$4 sm:$0xff]  }
0x16b0   :  { %v12973_v29 = vadd.f32 %v6486_v38, %v12459_v12  ;;  %v6490_v49 = vadd.f32 %v6489_v17, %v6274_v35  ;;  %v6491_v50 = vpop.f32.mrb[171].mxu0  ;;  %v9967_v38 = vld [vmem:[#allocation10 + $0x2ec] ss:$16 sps:$4 sm:$0xff]   ;;  %v9970_v17 = vld [vmem:[#allocation10 + $0x304] ss:$16 sps:$4 sm:$0xff]  }
0x16b1   :  { %v12976_v4 = vadd.f32 %v6488_v33, %v12453_v36  ;;  %v6492_v26 = vadd.f32 %v6491_v50, %v6278_v20  ;;  %v9965_v33 = vld [vmem:[#allocation10 + $0x2e8] ss:$16 sps:$4 sm:$0xff]   ;;  %v9968_v50 = vld [vmem:[#allocation10 + $0x300] ss:$16 sps:$4 sm:$0xff]  }
0x16b2   :  { %v12979_v60 = vadd.f32 %v6490_v49, %v12462_v55  ;;  %v9973_v49 = vld [vmem:[#allocation10 + $0x30c] ss:$16 sps:$4 sm:$0xff]  }
0x16b3   :  { %v12982_v2 = vadd.f32 %v6492_v26, %v12456_v8  ;;  %v6526_v13 = vadd.f32 %v12976_v4, %v12973_v29  ;;  %v9971_v26 = vld [vmem:[#allocation10 + $0x308] ss:$16 sps:$4 sm:$0xff]  }
0x16b5   :  { %6527 = vadd.xlane.f32.xlu0 %v6526_v13  ;;  %v6529_v12 = vadd.f32 %v12982_v2, %v12979_v60  ;;  %v9976_v13 = vld [vmem:[#allocation10 + $0x324] ss:$16 sps:$4 sm:$0xff]  }
0x16b7   :  { %6530 = vadd.xlane.f32.xlu1 %v6529_v12  ;;  %v9979_v12 = vld [vmem:[#allocation10 + $0x32c] ss:$16 sps:$4 sm:$0xff]  }
0x16cd   :  { %v6495_v53 = vpop.f32.mrb[172].mxu0 }
0x16ce   :  { %v6496_v18 = vadd.f32 %v6495_v53, %v6274_v35  ;;  %v6497_v59 = vpop.f32.mrb[173].mxu0  ;;  %v9974_v53 = vld [vmem:[#allocation10 + $0x320] ss:$16 sps:$4 sm:$0xff]  }
0x16cf   :  { %v6498_v36 = vadd.f32 %v6497_v59, %v6278_v20  ;;  %v6499_v58 = vpop.f32.mrb[174].mxu0 }
0x16d0   :  { %v12989_v40 = vadd.f32 %v6496_v18, %v12503_v41  ;;  %v6500_v55 = vadd.f32 %v6499_v58, %v6274_v35  ;;  %v6501_v44 = vpop.f32.mrb[175].mxu0  ;;  %v9946_v35 = vld [vmem:[#allocation10 + $0x284] ss:$16 sps:$4 sm:$0xff]   ;;  %v9977_v18 = vld [vmem:[#allocation10 + $0x328] ss:$16 sps:$4 sm:$0xff]  }
0x16d1   :  { %v12992_v8 = vadd.f32 %v6498_v36, %v12497_v47  ;;  %v6502_v45 = vadd.f32 %v6501_v44, %v6278_v20  ;;  %v9925_v47 = vld [vmem:[#allocation10 + $0x20c] ss:$16 sps:$4 sm:$0xff]  }
0x16d2   :  { %v12995_v52 = vadd.f32 %v6500_v55, %v12506_v32  ;;  %7139 = vmatprep.subr.bf16.mxu0 %v9925_v47  ;;  %v9926_v32 = vld [vmem:[#allocation10 + $0x220] ss:$16 sps:$4 sm:$0xff]   ;;  %v9949_v20 = vld [vmem:[#allocation10 + $0x28c] ss:$16 sps:$4 sm:$0xff]  }
0x16d3   :  { %v12998_v57 = vadd.f32 %v6502_v45, %v12500_v39  ;;  %v6532_v24 = vadd.f32 %v12992_v8, %v12989_v40  ;;  %7140 = vmatpush1.bf16.msra.mxu0 %v9923_v7  ;;  %v9929_v39 = vld [vmem:[#allocation10 + $0x228] ss:$16 sps:$4 sm:$0xff]   ;;  %7079 = vmatpush1.bf16.msra.mxu1 %v9926_v32  ;;  %v9988_v32 = vld [vmem:[#allocation10 + $0x364] ss:$16 sps:$4 sm:$0xff]  }
0x16d4   :  { %7141 = vmatprep.subr.bf16.mxu0 %v9931_v15  ;;  %7080 = vmatprep.subr.bf16.mxu1 %v9934_v48  ;;  %v9983_v15 = vld [vmem:[#allocation10 + $0x348] ss:$16 sps:$4 sm:$0xff]   ;;  %v9986_v48 = vld [vmem:[#allocation10 + $0x360] ss:$16 sps:$4 sm:$0xff]  }
0x16d5   :  { %6533 = vadd.xlane.f32.xlu0 %v6532_v24  ;;  %v6535_v41 = vadd.f32 %v12998_v57, %v12995_v52 }
0x16d7   :  { %6536 = vadd.xlane.f32.xlu1 %v6535_v41  ;;  %7142 = vmatpush1.bf16.msra.mxu0 %v9929_v39  ;;  %v9991_v39 = vld [vmem:[#allocation10 + $0x36c] ss:$16 sps:$4 sm:$0xff]  }
0x16d8   :  { %7143 = vmatprep.subr.bf16.mxu0 %v9937_v23  ;;  %7081 = vmatpush1.bf16.msra.mxu1 %v9932_v6  ;;  %v9989_v23 = vld [vmem:[#allocation10 + $0x368] ss:$16 sps:$4 sm:$0xff]  }
0x16d9   :  { %7082 = vmatprep.subr.bf16.mxu1 %v9940_v51  ;;  %v9997_v51 = vld [vmem:[#allocation10 + $0x38c] ss:$16 sps:$4 sm:$0xff]  }
0x16db   :  { %7144 = vmatpush1.bf16.msra.mxu0 %v9935_v25  ;;  %v9994_v25 = vld [vmem:[#allocation10 + $0x384] ss:$16 sps:$4 sm:$0xff]  }
0x16dc   :  { %7145 = vmatprep.subr.bf16.mxu0 %v9943_v16  ;;  %7083 = vmatpush1.bf16.msra.mxu1 %v9938_v3  ;;  %v9992_v3 = vld [vmem:[#allocation10 + $0x380] ss:$16 sps:$4 sm:$0xff]  }
0x16dd   :  { %7084 = vmatprep.subr.bf16.mxu1 %v9946_v35 }
0x16df   :  { %7146 = vmatpush1.bf16.msra.mxu0 %v9941_v63  ;;  %v9995_v63 = vld [vmem:[#allocation10 + $0x388] ss:$16 sps:$4 sm:$0xff]  }
0x16e0   :  { %7147 = vmatprep.subr.bf16.mxu0 %v9949_v20  ;;  %7085 = vmatpush1.bf16.msra.mxu1 %v9944_v1 }
0x16e1   :  { %7086 = vmatprep.subr.bf16.mxu1 %v9952_v9  ;;  %v10000_v9 = vld [vmem:[#allocation10 + $0x3a4] ss:$16 sps:$4 sm:$0xff]  }
0x16e3   :  { %7148 = vmatpush1.bf16.msra.mxu0 %v9947_v37 }
0x16e4   :  { %7149 = vmatprep.subr.bf16.mxu0 %v9955_v0  ;;  %7087 = vmatpush1.bf16.msra.mxu1 %v9950_v46  ;;  %v10003_v0 = vld [vmem:[#allocation10 + $0x3ac] ss:$16 sps:$4 sm:$0xff]  }
0x16e5   :  { %7088 = vmatprep.subr.bf16.mxu1 %v9958_v62 }
0x16e7   :  { %7150 = vmatpush1.bf16.msra.mxu0 %v9953_v30 }
0x16e8   :  { %7151 = vmatprep.subr.bf16.mxu0 %v9961_v28  ;;  %7089 = vmatpush1.bf16.msra.mxu1 %v9956_v31  ;;  %v9998_v28 = vld [vmem:[#allocation10 + $0x3a0] ss:$16 sps:$4 sm:$0xff]  }
0x16e9   :  { %7090 = vmatprep.subr.bf16.mxu1 %v9964_v42  ;;  %v10006_v42 = vld [vmem:[#allocation10 + $0x3c4] ss:$16 sps:$4 sm:$0xff]  }
0x16eb   :  { %7152 = vmatpush1.bf16.msra.mxu0 %v9959_v21 }
0x16ec   :  { %7153 = vmatprep.subr.bf16.mxu0 %v9967_v38  ;;  %7091 = vmatpush1.bf16.msra.mxu1 %v9962_v27  ;;  %v10007_v38 = vld [vmem:[#allocation10 + $0x3c8] ss:$16 sps:$4 sm:$0xff]  }
0x16ed   :  { %7092 = vmatprep.subr.bf16.mxu1 %v9970_v17  ;;  %v10012_v17 = vld [vmem:[#allocation10 + $0x3e4] ss:$16 sps:$4 sm:$0xff]  }
0x16ef   :  { %7154 = vmatpush1.bf16.msra.mxu0 %v9965_v33  ;;  %v10009_v33 = vld [vmem:[#allocation10 + $0x3cc] ss:$16 sps:$4 sm:$0xff]  }
0x16f0   :  { %7155 = vmatprep.subr.bf16.mxu0 %v9973_v49  ;;  %7093 = vmatpush1.bf16.msra.mxu1 %v9968_v50  ;;  %v10015_v49 = vld [vmem:[#allocation10 + $0x3ec] ss:$16 sps:$4 sm:$0xff]   ;;  %v10010_v50 = vld [vmem:[#allocation10 + $0x3e0] ss:$16 sps:$4 sm:$0xff]  }
0x16f1   :  { %7094 = vmatprep.subr.bf16.mxu1 %v9976_v13 }
0x16f3   :  { %7156 = vmatpush1.bf16.msra.mxu0 %v9971_v26  ;;  %v10013_v26 = vld [vmem:[#allocation10 + $0x3e8] ss:$16 sps:$4 sm:$0xff]  }
0x16f4   :  { %7157 = vmatprep.subr.bf16.mxu0 %v9979_v12  ;;  %7095 = vmatpush1.bf16.msra.mxu1 %v9974_v53 }
0x16f7   :  { %7158 = vmatpush1.bf16.msra.mxu0 %v9977_v18 }
0x16f8   :  { %7159 = vmatprep.subr.bf16.mxu0 %v9985_v43 }
0x16fb   :  { %7160 = vmatpush1.bf16.msra.mxu0 %v9983_v15  ;;  %v6517_v15 = vld [vmem:[#allocation7 + $0x2] sm:$0x3] }
0x16fc   :  { %7161 = vmatprep.subr.bf16.mxu0 %v9991_v39  ;;  %v13065_v39 = vrot.slane %v6517_v15, %v11219_v11 }
0x16ff   :  { %7162 = vmatpush1.bf16.msra.mxu0 %v9989_v23 }
0x1700   :  { %7163 = vmatprep.subr.bf16.mxu0 %v9997_v51 }
0x1703   :  { %7164 = vmatpush1.bf16.msra.mxu0 %v9995_v63 }
0x1704   :  { %7165 = vmatprep.subr.bf16.mxu0 %v10003_v0 }
0x1722   :  { %v6522_v59 = vpop.xlane.xlu0 %6521 }
0x1723   :  { %v6538_v36 = vmul.f32 0.00390625, %v6522_v59 }
0x1724   :  { %v6525_v58 = vpop.xlane.xlu1 %6524 }
0x1725   :  { %v13005_v55 = vsub.f32 %v12957_v56, %v6538_v36  ;;  %v13008_v44 = vsub.f32 %v12960_v5, %v6538_v36  ;;  %v6539_v45 = vmul.f32 0.00390625, %v6525_v58 }
0x1727   :  { %v13011_v24 = vsub.f32 %v12963_v22, %v6539_v45  ;;  %v13014_v41 = vsub.f32 %v12966_v34, %v6539_v45  ;;  %v6556_v14 = vmul.f32 %v13005_v55, %v13005_v55  ;;  %v6557_v54 = vmul.f32 %v13008_v44, %v13008_v44  ;;  %v9982_v22 = vld [vmem:[#allocation10 + $0x344] ss:$16 sps:$4 sm:$0xff]   ;;  %v9980_v34 = vld [vmem:[#allocation10 + $0x340] ss:$16 sps:$4 sm:$0xff]  }
0x1728   :  { %7096 = vmatprep.subr.bf16.mxu1 %v9982_v22 }
0x1729   :  { %v6568_v7 = vadd.f32 %v6557_v54, %v6556_v14  ;;  %v6558_v56 = vmul.f32 %v13011_v24, %v13011_v24  ;;  %v6559_v5 = vmul.f32 %v13014_v41, %v13014_v41  ;;  %7097 = vmatpush1.bf16.msra.mxu1 %v9980_v34 }
0x172a   :  { %7098 = vmatprep.subr.bf16.mxu1 %v9988_v32  ;;  %v6519_v32 = vld [vmem:[#allocation9 + $0x2] sm:$0x3] }
0x172b   :  { %6569 = vadd.xlane.f32.xlu0 %v6568_v7  ;;  %v6571_v47 = vadd.f32 %v6559_v5, %v6558_v56 }
0x172d   :  { %6572 = vadd.xlane.f32.xlu1 %v6571_v47  ;;  %7099 = vmatpush1.bf16.msra.mxu1 %v9986_v48  ;;  %v13068_v48 = vrot.slane %v6517_v15, %v11216_v10 }
0x172e   :  { %7100 = vmatprep.subr.bf16.mxu1 %v9994_v25 }
0x1731   :  { %7101 = vmatpush1.bf16.msra.mxu1 %v9992_v3  ;;  %v13076_v3 = vrot.slane %v6519_v32, %v11216_v10 }
0x1732   :  { %7102 = vmatprep.subr.bf16.mxu1 %v10000_v9 }
0x1735   :  { %7103 = vmatpush1.bf16.msra.mxu1 %v9998_v28 }
0x1736   :  { %7104 = vmatprep.subr.bf16.mxu1 %v10006_v42  ;;  %v10022_v42 = vld [vmem:[#allocation13 + $0x220] ss:$8 sps:$4 sm:$0xff]  }
0x1742   :  { %v6528_v6 = vpop.xlane.xlu0 %6527 }
0x1743   :  { %v6540_v16 = vmul.f32 0.00390625, %v6528_v6 }
0x1744   :  { %v6531_v35 = vpop.xlane.xlu1 %6530 }
0x1745   :  { %v13025_v20 = vsub.f32 %v12973_v29, %v6540_v16  ;;  %v13028_v1 = vsub.f32 %v12976_v4, %v6540_v16  ;;  %v6541_v37 = vmul.f32 0.00390625, %v6531_v35  ;;  %v10001_v4 = vld [vmem:[#allocation10 + $0x3a8] ss:$16 sps:$4 sm:$0xff]   ;;  %v13073_v16 = vrot.slane %v6519_v32, %v11219_v11 }
0x1746   :  { %7166 = vmatpush1.bf16.msra.mxu0 %v10001_v4  ;;  %v10016_v4 = vld [vmem:[#allocation13 + $0x200] ss:$8 sps:$4 sm:$0xff]  }
0x1747   :  { %v13031_v46 = vsub.f32 %v12979_v60, %v6541_v37  ;;  %v13034_v30 = vsub.f32 %v12982_v2, %v6541_v37  ;;  %v6560_v62 = vmul.f32 %v13025_v20, %v13025_v20  ;;  %v6561_v29 = vmul.f32 %v13028_v1, %v13028_v1  ;;  %v10004_v2 = vld [vmem:[#allocation10 + $0x3c0] ss:$16 sps:$4 sm:$0xff]   ;;  %7167 = vmatprep.subr.bf16.mxu0 %v10009_v33 }
0x1748   :  { %7105 = vmatpush1.bf16.msra.mxu1 %v10004_v2 }
0x1749   :  { %v6574_v31 = vadd.f32 %v6561_v29, %v6560_v62  ;;  %v6562_v21 = vmul.f32 %v13031_v46, %v13031_v46  ;;  %v6563_v60 = vmul.f32 %v13034_v30, %v13034_v30  ;;  %7106 = vmatprep.subr.bf16.mxu1 %v10012_v17 }
0x174a   :  { %7168 = vmatpush1.bf16.msra.mxu0 %v10007_v38 }
0x174b   :  { %6575 = vadd.xlane.f32.xlu0 %v6574_v31  ;;  %v6577_v27 = vadd.f32 %v6563_v60, %v6562_v21  ;;  %7169 = vmatprep.subr.bf16.mxu0 %v10015_v49  ;;  %v10021_v31 = vld [vmem:[#allocation13 + $0x214] ss:$8 sps:$4 sm:$0xff]   ;;  %v10019_v21 = vld [vmem:[#allocation13 + $0x210] ss:$8 sps:$4 sm:$0xff]   ;;  %v10024_v60 = vld [vmem:[#allocation13 + $0x224] ss:$8 sps:$4 sm:$0xff]  }
0x174c   :  { %7107 = vmatpush1.bf16.msra.mxu1 %v10010_v50  ;;  %v10025_v50 = vld [vmem:[#allocation13 + $0x230] ss:$8 sps:$4 sm:$0xff]  }
0x174d   :  { %6578 = vadd.xlane.f32.xlu1 %v6577_v27  ;;  %v10027_v27 = vld [vmem:[#allocation13 + $0x234] ss:$8 sps:$4 sm:$0xff]  }
0x174e   :  { %7170 = vmatpush1.bf16.msra.mxu0 %v10013_v26 }
0x1762   :  { %v6534_v13 = vpop.xlane.xlu0 %6533 }
0x1763   :  { %v6542_v12 = vmul.f32 0.00390625, %v6534_v13  ;;  %v10030_v13 = vld [vmem:[#allocation13 + $0x244] ss:$8 sps:$4 sm:$0xff]  }
0x1764   :  { %v6537_v53 = vpop.xlane.xlu1 %6536 }
0x1765   :  { %v13045_v18 = vsub.f32 %v12989_v40, %v6542_v12  ;;  %v13048_v59 = vsub.f32 %v12992_v8, %v6542_v12  ;;  %v6543_v36 = vmul.f32 0.00390625, %v6537_v53  ;;  %v10028_v12 = vld [vmem:[#allocation13 + $0x240] ss:$8 sps:$4 sm:$0xff]   ;;  %v10033_v53 = vld [vmem:[#allocation13 + $0x254] ss:$8 sps:$4 sm:$0xff]  }
0x1767   :  { %v13051_v58 = vsub.f32 %v12995_v52, %v6543_v36  ;;  %v13054_v45 = vsub.f32 %v12998_v57, %v6543_v36  ;;  %v6564_v14 = vmul.f32 %v13045_v18, %v13045_v18  ;;  %v6565_v54 = vmul.f32 %v13048_v59, %v13048_v59  ;;  %v10018_v52 = vld [vmem:[#allocation13 + $0x204] ss:$8 sps:$4 sm:$0xff]   ;;  %v10031_v36 = vld [vmem:[#allocation13 + $0x250] ss:$8 sps:$4 sm:$0xff]  }
0x1768   :  { %7732 = vmatprep.subr.bf16.mxu1 %v10018_v52  ;;  %v10039_v52 = vld [vmem:[#allocation13 + $0x274] ss:$8 sps:$4 sm:$0xff]  }
0x1769   :  { %v6580_v7 = vadd.f32 %v6565_v54, %v6564_v14  ;;  %v6566_v40 = vmul.f32 %v13051_v58, %v13051_v58  ;;  %v6567_v8 = vmul.f32 %v13054_v45, %v13054_v45  ;;  %v10036_v14 = vld [vmem:[#allocation13 + $0x264] ss:$8 sps:$4 sm:$0xff]  }
0x176b   :  { %6581 = vadd.xlane.f32.xlu0 %v6580_v7  ;;  %v6583_v56 = vadd.f32 %v6567_v8, %v6566_v40  ;;  %v10034_v8 = vld [vmem:[#allocation13 + $0x260] ss:$8 sps:$4 sm:$0xff]  }
0x176d   :  { %6584 = vadd.xlane.f32.xlu1 %v6583_v56 }
0x17b8   :  { %v6570_v57 = vpop.xlane.xlu0 %6569 }
0x17b9   :  { %v6586_v5 = vmul.f32 0.00390625, %v6570_v57 }
0x17ba   :  { %v6573_v47 = vpop.xlane.xlu1 %6572 }
0x17bb   :  { %v6592_v22 = vadd.f32 1e-12, %v6586_v5  ;;  %v6587_v43 = vmul.f32 0.00390625, %v6573_v47 }
0x17bd   :  { %10292 = vrsqrt.f32 %v6592_v22  ;;  %v6593_v34 = vadd.f32 1e-12, %v6587_v43 }
0x17bf   :  { %10294 = vrsqrt.f32 %v6593_v34 }
0x17c7   :  { %v10293_v23 = vpop.eup %10292 }
0x17c8   :  { %v6604_v6 = vmul.f32 %v10293_v23, %v13005_v55  ;;  %v6605_v25 = vmul.f32 %v10293_v23, %v13008_v44 }
0x17c9   :  { %v10295_v51 = vpop.eup %10294 }
0x17ca   :  { %v6606_v63 = vmul.f32 %v10295_v51, %v13011_v24  ;;  %v6607_v35 = vmul.f32 %v10295_v51, %v13014_v41  ;;  %v6628_v37 = vmul.f32 %v13068_v48, %v6605_v25  ;;  %v6627_v9 = vmul.f32 %v13065_v39, %v6604_v6  ;;  %v10040_v25 = vld [vmem:[#allocation13 + $0x280] ss:$8 sps:$4 sm:$0xff]   ;;  %v10045_v51 = vld [vmem:[#allocation13 + $0x294] ss:$8 sps:$4 sm:$0xff]  }
0x17cc   :  { %v6630_v0 = vmul.f32 %v13068_v48, %v6607_v35  ;;  %v6629_v55 = vmul.f32 %v13065_v39, %v6606_v63  ;;  %v13085_v44 = vadd.f32 %v13076_v3, %v6628_v37  ;;  %v13091_v29 = vadd.f32 %v13073_v16, %v6627_v9  ;;  %v10043_v63 = vld [vmem:[#allocation13 + $0x290] ss:$8 sps:$4 sm:$0xff]  }
0x17ce   :  { %v13088_v62 = vadd.f32 %v13076_v3, %v6630_v0  ;;  %v13094_v24 = vadd.f32 %v13073_v16, %v6629_v55 }
0x17d0   :  { %v6728_v41 = vpack.c.bf16 %v13088_v62, %v13085_v44  ;;  %v6727_v28 = vpack.c.bf16 %v13094_v24, %v13091_v29 }
0x17d2   :  { %7108 = vmatprep.mubr.bf16.mxu1 %v6728_v41  ;;  %7171 = vmatprep.mubr.bf16.mxu0 %v6728_v41 }
0x17d3   :  { %7109 = vmatmul.mubr.bf16.vlgmr.msra.gmra.mrb[148].mxu1 %v6727_v28  ;;  %7172 = vmatmul.mubr.bf16.vlgmr.msra.gmra.mrb[176].mxu0 %v6727_v28 }
0x17d4   :  { %7733 = vmatpush1.bf16.msra.mxu1 %v10016_v4 }
0x17d5   :  { %7734 = vmatprep.subr.bf16.mxu1 %v10021_v31 }
0x17d8   :  { %v6576_v2 = vpop.xlane.xlu0 %6575  ;;  %7735 = vmatpush1.bf16.msra.mxu1 %v10019_v21 }
0x17d9   :  { %v6588_v38 = vmul.f32 0.00390625, %v6576_v2  ;;  %7736 = vmatprep.subr.bf16.mxu1 %v10024_v60 }
0x17da   :  { %v6579_v33 = vpop.xlane.xlu1 %6578 }
0x17db   :  { %v6594_v17 = vadd.f32 1e-12, %v6588_v38  ;;  %v6589_v49 = vmul.f32 0.00390625, %v6579_v33 }
0x17dc   :  { %7737 = vmatpush1.bf16.msra.mxu1 %v10022_v42 }
0x17dd   :  { %10296 = vrsqrt.f32 %v6594_v17  ;;  %v6595_v26 = vadd.f32 1e-12, %v6589_v49  ;;  %7738 = vmatprep.subr.bf16.mxu1 %v10027_v27  ;;  %v10046_v49 = vld [vmem:[#allocation13 + $0x2a0] ss:$8 sps:$4 sm:$0xff]  }
0x17df   :  { %10298 = vrsqrt.f32 %v6595_v26  ;;  %v10052_v26 = vld [vmem:[#allocation13 + $0x2c0] ss:$8 sps:$4 sm:$0xff]  }
0x17e0   :  { %7739 = vmatpush1.bf16.msra.mxu1 %v10025_v50  ;;  %v10051_v50 = vld [vmem:[#allocation13 + $0x2b4] ss:$8 sps:$4 sm:$0xff]  }
0x17e1   :  { %7740 = vmatprep.subr.bf16.mxu1 %v10030_v13  ;;  %v10057_v13 = vld [vmem:[#allocation13 + $0x2d4] ss:$8 sps:$4 sm:$0xff]  }
0x17e4   :  { %7741 = vmatpush1.bf16.msra.mxu1 %v10028_v12  ;;  %v10055_v12 = vld [vmem:[#allocation13 + $0x2d0] ss:$8 sps:$4 sm:$0xff]  }
0x17e5   :  { %7742 = vmatprep.subr.bf16.mxu1 %v10033_v53  ;;  %v10060_v53 = vld [vmem:[#allocation13 + $0x2e4] ss:$8 sps:$4 sm:$0xff]  }
0x17e7   :  { %v10297_v54 = vpop.eup %10296 }
0x17e8   :  { %v6609_v7 = vmul.f32 %v10297_v54, %v13028_v1  ;;  %v6608_v40 = vmul.f32 %v10297_v54, %v13025_v20  ;;  %7743 = vmatpush1.bf16.msra.mxu1 %v10031_v36  ;;  %v10037_v1 = vld [vmem:[#allocation13 + $0x270] ss:$8 sps:$4 sm:$0xff]   ;;  %v10042_v20 = vld [vmem:[#allocation13 + $0x284] ss:$8 sps:$4 sm:$0xff]   ;;  %v10058_v36 = vld [vmem:[#allocation13 + $0x2e0] ss:$8 sps:$4 sm:$0xff]  }
0x17e9   :  { %v10299_v56 = vpop.eup %10298  ;;  %7744 = vmatprep.subr.bf16.mxu1 %v10036_v14  ;;  %v10063_v14 = vld [vmem:[#allocation13 + $0x2f4] ss:$8 sps:$4 sm:$0xff]   ;;  %v10061_v54 = vld [vmem:[#allocation13 + $0x2f0] ss:$8 sps:$4 sm:$0xff]  }
0x17ea   :  { %v6611_v57 = vmul.f32 %v10299_v56, %v13034_v30  ;;  %v6632_v5 = vmul.f32 %v13068_v48, %v6609_v7  ;;  %v6610_v47 = vmul.f32 %v10299_v56, %v13031_v46  ;;  %v6631_v22 = vmul.f32 %v13065_v39, %v6608_v40  ;;  %v10066_v7 = vld [vmem:[#allocation13 + $0x304] ss:$8 sps:$4 sm:$0xff]   ;;  %v6734_v40 = vld [vmem:[#allocation12 + $0x4] sm:$0xf] }
0x17eb   :  { %v13152_v56 = vrot.slane %v6734_v40, %v13442_v19 }
0x17ec   :  { %v6634_v43 = vmul.f32 %v13068_v48, %v6611_v57  ;;  %v6633_v34 = vmul.f32 %v13065_v39, %v6610_v47  ;;  %7745 = vmatpush1.bf16.msra.mxu1 %v10034_v8  ;;  %v13109_v15 = vadd.f32 %v13076_v3, %v6632_v5  ;;  %v13115_v30 = vadd.f32 %v13073_v16, %v6631_v22 }
0x17ed   :  { %7746 = vmatprep.subr.bf16.mxu1 %v10039_v52  ;;  %v13149_v8 = vrot.slane %v6734_v40, %v11219_v11  ;;  %v13155_v52 = vrot.slane %v6734_v40, %v11216_v10  ;;  %v13158_v57 = vrot.slane %v6734_v40, %v11534_v61 }
0x17ee   :  { %v13112_v32 = vadd.f32 %v13076_v3, %v6634_v43  ;;  %v13118_v46 = vadd.f32 %v13073_v16, %v6633_v34 }
0x17f0   :  { %v6730_v23 = vpack.c.bf16 %v13112_v32, %v13109_v15  ;;  %v6729_v6 = vpack.c.bf16 %v13118_v46, %v13115_v30  ;;  %7747 = vmatpush1.bf16.msra.mxu1 %v10037_v1 }
0x17f1   :  { %7748 = vmatprep.subr.bf16.mxu1 %v10042_v20 }
0x17f2   :  { %7118 = vmatprep.mubr.bf16.mxu1 %v6730_v23  ;;  %7181 = vmatprep.mubr.bf16.mxu0 %v6730_v23 }
0x17f3   :  { %7119 = vmatmul.mubr.bf16.gmra.mrb[152].mxu1 %v6729_v6  ;;  %7182 = vmatmul.mubr.bf16.gmra.mrb[180].mxu0 %v6729_v6 }
0x17f4   :  { %7749 = vmatpush1.bf16.msra.mxu1 %v10040_v25 }
0x17f5   :  { %7750 = vmatprep.subr.bf16.mxu1 %v10045_v51 }
0x17f8   :  { %v6582_v35 = vpop.xlane.xlu0 %6581  ;;  %7751 = vmatpush1.bf16.msra.mxu1 %v10043_v63 }
0x17f9   :  { %v6590_v37 = vmul.f32 0.00390625, %v6582_v35 }
0x17fa   :  { %v6585_v9 = vpop.xlane.xlu1 %6584 }
0x17fb   :  { %v6596_v0 = vadd.f32 1e-12, %v6590_v37  ;;  %v6591_v55 = vmul.f32 0.00390625, %v6585_v9 }
0x17fd   :  { %10300 = vrsqrt.f32 %v6596_v0  ;;  %v6597_v41 = vadd.f32 1e-12, %v6591_v55 }
0x17ff   :  { %10302 = vrsqrt.f32 %v6597_v41 }
0x1807   :  { %v10301_v28 = vpop.eup %10300 }
0x1808   :  { %v6613_v4 = vmul.f32 %v10301_v28, %v13048_v59  ;;  %v6612_v31 = vmul.f32 %v10301_v28, %v13045_v18 }
0x1809   :  { %v10303_v21 = vpop.eup %10302 }
0x180a   :  { %v6615_v60 = vmul.f32 %v10303_v21, %v13054_v45  ;;  %v6636_v2 = vmul.f32 %v13068_v48, %v6613_v4  ;;  %v6614_v42 = vmul.f32 %v10303_v21, %v13051_v58  ;;  %v6635_v38 = vmul.f32 %v13065_v39, %v6612_v31 }
0x180c   :  { %v6638_v27 = vmul.f32 %v13068_v48, %v6615_v60  ;;  %v13132_v33 = vadd.f32 %v13076_v3, %v6636_v2  ;;  %v6637_v17 = vmul.f32 %v13065_v39, %v6614_v42  ;;  %v13136_v59 = vadd.f32 %v13073_v16, %v6635_v38  ;;  %v10048_v39 = vld [vmem:[#allocation13 + $0x2a4] ss:$8 sps:$4 sm:$0xff]  }
0x180d   :  { %7752 = vmatprep.subr.bf16.mxu1 %v10048_v39 }
0x180e   :  { %v13139_v18 = vadd.f32 %v13076_v3, %v6638_v27  ;;  %v13142_v45 = vadd.f32 %v13073_v16, %v6637_v17  ;;  %7753 = vmatpush1.bf16.msra.mxu1 %v10046_v49  ;;  %v10049_v3 = vld [vmem:[#allocation13 + $0x2b0] ss:$8 sps:$4 sm:$0xff]   ;;  %v10054_v16 = vld [vmem:[#allocation13 + $0x2c4] ss:$8 sps:$4 sm:$0xff]  }
0x180f   :  { %7754 = vmatprep.subr.bf16.mxu1 %v10051_v50 }
0x1810   :  { %v6732_v58 = vpack.c.bf16 %v13139_v18, %v13132_v33  ;;  %v6731_v48 = vpack.c.bf16 %v13142_v45, %v13136_v59 }
0x1812   :  { %7128 = vmatprep.mubr.bf16.mxu1 %v6732_v58  ;;  %7191 = vmatprep.mubr.bf16.mxu0 %v6732_v58 }
0x1813   :  { %7129 = vmatmul.mubr.bf16.gmra.mrb[156].mxu1 %v6731_v48  ;;  %7192 = vmatmul.mubr.bf16.gmra.mrb[184].mxu0 %v6731_v48 }
0x1814   :  { %7755 = vmatpush1.bf16.msra.mxu1 %v10049_v3 }
0x1815   :  { %7756 = vmatprep.subr.bf16.mxu1 %v10054_v16 }
0x1818   :  { %7757 = vmatpush1.bf16.msra.mxu1 %v10052_v26 }
0x1819   :  { %7758 = vmatprep.subr.bf16.mxu1 %v10057_v13 }
0x181c   :  { %7759 = vmatpush1.bf16.msra.mxu1 %v10055_v12 }
0x181d   :  { %7760 = vmatprep.subr.bf16.mxu1 %v10060_v53 }
0x1820   :  { %7761 = vmatpush1.bf16.msra.mxu1 %v10058_v36 }
0x1821   :  { %7762 = vmatprep.subr.bf16.mxu1 %v10063_v14 }
0x1824   :  { %7763 = vmatpush1.bf16.msra.mxu1 %v10061_v54 }
0x1825   :  { %7795 = vmatprep.subr.bf16.mxu1 %v10066_v7 }
0x18a6   :  { %v7110_v5 = vpop.f32.mrb[148].mxu1  ;;  %v7173_v47 = vpop.f32.mrb[176].mxu0 }
0x18a7   :  { %v7111_v22 = vadd.f32 %v7110_v5, %v13149_v8  ;;  %v7174_v43 = vadd.f32 %v7173_v47, %v13152_v56  ;;  %v7112_v34 = vpop.f32.mrb[149].mxu1  ;;  %v7175_v1 = vpop.f32.mrb[177].mxu0 }
0x18a8   :  { %v7113_v20 = vadd.f32 %v7112_v34, %v13155_v52  ;;  %v7176_v23 = vadd.f32 %v7175_v1, %v13158_v57  ;;  %v7114_v19 = vpop.f32.mrb[150].mxu1  ;;  %v7177_v6 = vpop.f32.mrb[178].mxu0 }
0x18a9   :  { %v7226_v25 = vmul.f32 0.70710677, %v7111_v22  ;;  %v7228_v51 = vmul.f32 0.70710677, %v7174_v43  ;;  %v7115_v61 = vadd.f32 %v7114_v19, %v13149_v8  ;;  %v7178_v37 = vadd.f32 %v7177_v6, %v13152_v56  ;;  %v7116_v9 = vpop.f32.mrb[151].mxu1  ;;  %v7179_v0 = vpop.f32.mrb[179].mxu0 }
0x18aa   :  { %v7227_v63 = vmul.f32 0.70710677, %v7113_v20  ;;  %v7229_v35 = vmul.f32 0.70710677, %v7176_v23  ;;  %v7117_v55 = vadd.f32 %v7116_v9, %v13155_v52  ;;  %v7180_v41 = vadd.f32 %v7179_v0, %v13158_v57  ;;  %v10067_v9 = vld [vmem:[#allocation13 + $0x310] ss:$8 sps:$4 sm:$0xff]  }
0x18ab   :  { %10304 = verf.f32 %v7226_v25  ;;  %v7230_v28 = vmul.f32 0.70710677, %v7115_v61  ;;  %v7232_v4 = vmul.f32 0.70710677, %v7178_v37  ;;  %v7202_v58 = vmul.f32 0.5, %v7111_v22 }
0x18ac   :  { %10306 = verf.f32 %v7228_v51  ;;  %v7231_v31 = vmul.f32 0.70710677, %v7117_v55  ;;  %v7233_v21 = vmul.f32 0.70710677, %v7180_v41  ;;  %v7204_v48 = vmul.f32 0.5, %v7174_v43 }
0x18ad   :  { %10308 = verf.f32 %v7227_v63  ;;  %v7203_v50 = vmul.f32 0.5, %v7113_v20  ;;  %v7206_v16 = vmul.f32 0.5, %v7115_v61  ;;  %v7205_v12 = vmul.f32 0.5, %v7176_v23  ;;  %v10069_v61 = vld [vmem:[#allocation13 + $0x314] ss:$8 sps:$4 sm:$0xff]  }
0x18ae   :  { %10310 = verf.f32 %v7229_v35  ;;  %v7208_v36 = vmul.f32 0.5, %v7178_v37  ;;  %v7207_v5 = vmul.f32 0.5, %v7117_v55  ;;  %v7209_v43 = vmul.f32 0.5, %v7180_v41  ;;  %v10064_v35 = vld [vmem:[#allocation13 + $0x300] ss:$8 sps:$4 sm:$0xff]  }
0x18af   :  { %10312 = verf.f32 %v7230_v28  ;;  %v10072_v0 = vld [vmem:[#allocation13 + $0x324] ss:$8 sps:$4 sm:$0xff]  }
0x18b0   :  { %10314 = verf.f32 %v7232_v4 }
0x18b1   :  { %10316 = verf.f32 %v7231_v31 }
0x18b2   :  { %10318 = verf.f32 %v7233_v21 }
0x18b5   :  { %v10305_v60 = vpop.eup %10304 }
0x18b6   :  { %v10307_v2 = vpop.eup %10306  ;;  %v7274_v27 = vadd.f32 1.0, %v10305_v60 }
0x18b7   :  { %v10309_v42 = vpop.eup %10308  ;;  %v7276_v39 = vadd.f32 1.0, %v10307_v2 }
0x18b8   :  { %v10311_v38 = vpop.eup %10310  ;;  %v7275_v3 = vadd.f32 1.0, %v10309_v42  ;;  %v7298_v7 = vmul.f32 %v7274_v27, %v7202_v58  ;;  %v10070_v27 = vld [vmem:[#allocation13 + $0x320] ss:$8 sps:$4 sm:$0xff]  }
0x18b9   :  { %v10313_v17 = vpop.eup %10312  ;;  %v7277_v53 = vadd.f32 1.0, %v10311_v38  ;;  %v13168_v34 = vmul.f32 %v7276_v39, %v7204_v48  ;;  %v10075_v48 = vld [vmem:[#allocation13 + $0x334] ss:$8 sps:$4 sm:$0xff]  }
0x18ba   :  { %v10315_v49 = vpop.eup %10314  ;;  %v7278_v26 = vadd.f32 1.0, %v10313_v17  ;;  %v7299_v20 = vmul.f32 %v7275_v3, %v7203_v50 }
0x18bb   :  { %v10317_v13 = vpop.eup %10316  ;;  %v7280_v14 = vadd.f32 1.0, %v10315_v49  ;;  %v13172_v25 = vmul.f32 %v7277_v53, %v7205_v12  ;;  %v10073_v53 = vld [vmem:[#allocation13 + $0x330] ss:$8 sps:$4 sm:$0xff]  }
0x18bc   :  { %v10319_v54 = vpop.eup %10318  ;;  %v7302_v40 = vmul.f32 %v7278_v26, %v7206_v16  ;;  %v7279_v47 = vadd.f32 1.0, %v10317_v13 }
0x18bd   :  { %v13170_v22 = vmul.f32 %v7280_v14, %v7208_v36  ;;  %v7281_v1 = vadd.f32 1.0, %v10319_v54  ;;  %v10078_v14 = vld [vmem:[#allocation13 + $0x344] ss:$8 sps:$4 sm:$0xff]  }
0x18be   :  { %v7387_v19 = vpack.c.bf16 %v7302_v40, %v7298_v7  ;;  %v7303_v6 = vmul.f32 %v7279_v47, %v7207_v5  ;;  %v10076_v5 = vld [vmem:[#allocation13 + $0x340] ss:$8 sps:$4 sm:$0xff]   ;;  %v10081_v47 = vld [vmem:[#allocation13 + $0x354] ss:$8 sps:$4 sm:$0xff]  }
0x18bf   :  { %v7389_v23 = vpack.c.bf16 %v13170_v22, %v13168_v34  ;;  %v13176_v51 = vmul.f32 %v7281_v1, %v7209_v43  ;;  %v10079_v43 = vld [vmem:[#allocation13 + $0x350] ss:$8 sps:$4 sm:$0xff]  }
0x18c0   :  { %v7388_v63 = vpack.c.bf16 %v7303_v6, %v7299_v20  ;;  %v10084_v20 = vld [vmem:[#allocation13 + $0x364] ss:$8 sps:$4 sm:$0xff]  }
0x18c1   :  { %v7390_v37 = vpack.c.bf16 %v13176_v51, %v13172_v25 }
0x18c2   :  { %7764 = vmatprep.mubr.bf16.mxu1 %v7388_v63 }
0x18c3   :  { %7765 = vmatmul.mubr.bf16.vlgmr.msra.gmra.mrb[160].mxu1 %v7387_v19 }
0x18c4   :  { %7796 = vmatpush1.bf16.msra.mxu1 %v10064_v35 }
0x18c5   :  { %7797 = vmatprep.subr.bf16.mxu1 %v10069_v61  ;;  %v10082_v61 = vld [vmem:[#allocation13 + $0x360] ss:$8 sps:$4 sm:$0xff]  }
0x18c6   :  { %v7120_v55 = vpop.f32.mrb[152].mxu1  ;;  %v7183_v41 = vpop.f32.mrb[180].mxu0 }
0x18c7   :  { %v7121_v28 = vadd.f32 %v7120_v55, %v13149_v8  ;;  %v7184_v4 = vadd.f32 %v7183_v41, %v13152_v56  ;;  %v7122_v31 = vpop.f32.mrb[153].mxu1  ;;  %v7185_v21 = vpop.f32.mrb[181].mxu0 }
0x18c8   :  { %v7123_v60 = vadd.f32 %v7122_v31, %v13155_v52  ;;  %v7186_v2 = vadd.f32 %v7185_v21, %v13158_v57  ;;  %v7124_v42 = vpop.f32.mrb[154].mxu1  ;;  %v7187_v38 = vpop.f32.mrb[182].mxu0  ;;  %7798 = vmatpush1.bf16.msra.mxu1 %v10067_v9  ;;  %v10087_v31 = vld [vmem:[#allocation13 + $0x374] ss:$8 sps:$4 sm:$0xff]  }
0x18c9   :  { %v7234_v17 = vmul.f32 0.70710677, %v7121_v28  ;;  %v7236_v58 = vmul.f32 0.70710677, %v7184_v4  ;;  %7799 = vmatprep.subr.bf16.mxu1 %v10072_v0  ;;  %v7125_v50 = vadd.f32 %v7124_v42, %v13149_v8  ;;  %v7188_v3 = vadd.f32 %v7187_v38, %v13152_v56  ;;  %v7126_v16 = vpop.f32.mrb[155].mxu1  ;;  %v7189_v26 = vpop.f32.mrb[183].mxu0 }
0x18ca   :  { %v7235_v39 = vmul.f32 0.70710677, %v7123_v60  ;;  %v7237_v49 = vmul.f32 0.70710677, %v7186_v2  ;;  %v7127_v13 = vadd.f32 %v7126_v16, %v13155_v52  ;;  %v7190_v12 = vadd.f32 %v7189_v26, %v13158_v57 }
0x18cb   :  { %10320 = verf.f32 %v7234_v17  ;;  %v7238_v36 = vmul.f32 0.70710677, %v7125_v50  ;;  %v7240_v54 = vmul.f32 0.70710677, %v7188_v3  ;;  %v7210_v0 = vmul.f32 0.5, %v7121_v28 }
0x18cc   :  { %10322 = verf.f32 %v7236_v58  ;;  %7800 = vmatpush1.bf16.msra.mxu1 %v10070_v27  ;;  %v7239_v7 = vmul.f32 0.70710677, %v7127_v13  ;;  %v7241_v40 = vmul.f32 0.70710677, %v7190_v12  ;;  %v7212_v55 = vmul.f32 0.5, %v7184_v4 }
0x18cd   :  { %10324 = verf.f32 %v7235_v39  ;;  %7801 = vmatprep.subr.bf16.mxu1 %v10075_v48  ;;  %v7211_v42 = vmul.f32 0.5, %v7123_v60  ;;  %v7214_v27 = vmul.f32 0.5, %v7125_v50  ;;  %v7213_v48 = vmul.f32 0.5, %v7186_v2  ;;  %v10085_v28 = vld [vmem:[#allocation13 + $0x370] ss:$8 sps:$4 sm:$0xff]  }
0x18ce   :  { %10326 = verf.f32 %v7237_v49  ;;  %v7216_v49 = vmul.f32 0.5, %v7188_v3  ;;  %v7217_v60 = vmul.f32 0.5, %v7190_v12  ;;  %v10090_v50 = vld [vmem:[#allocation13 + $0x384] ss:$8 sps:$4 sm:$0xff]  }
0x18cf   :  { %10328 = verf.f32 %v7238_v36 }
0x18d0   :  { %10330 = verf.f32 %v7240_v54  ;;  %7802 = vmatpush1.bf16.msra.mxu1 %v10073_v53 }
0x18d1   :  { %10332 = verf.f32 %v7239_v7  ;;  %7803 = vmatprep.subr.bf16.mxu1 %v10078_v14  ;;  %v7215_v14 = vmul.f32 0.5, %v7127_v13 }
0x18d2   :  { %10334 = verf.f32 %v7241_v40 }
0x18d4   :  { %7804 = vmatpush1.bf16.msra.mxu1 %v10076_v5 }
0x18d5   :  { %v10321_v1 = vpop.eup %10320  ;;  %7805 = vmatprep.subr.bf16.mxu1 %v10081_v47 }
0x18d6   :  { %v10323_v19 = vpop.eup %10322  ;;  %v7282_v35 = vadd.f32 1.0, %v10321_v1 }
0x18d7   :  { %v10325_v6 = vpop.eup %10324  ;;  %v7284_v41 = vadd.f32 1.0, %v10323_v19  ;;  %v10093_v19 = vld [vmem:[#allocation13 + $0x394] ss:$8 sps:$4 sm:$0xff]  }
0x18d8   :  { %v10327_v63 = vpop.eup %10326  ;;  %7806 = vmatpush1.bf16.msra.mxu1 %v10079_v43  ;;  %v7283_v38 = vadd.f32 1.0, %v10325_v6  ;;  %v7306_v53 = vmul.f32 %v7282_v35, %v7210_v0  ;;  %v10091_v6 = vld [vmem:[#allocation13 + $0x390] ss:$8 sps:$4 sm:$0xff]  }
0x18d9   :  { %v10329_v9 = vpop.eup %10328  ;;  %7807 = vmatprep.subr.bf16.mxu1 %v10084_v20  ;;  %v7285_v39 = vadd.f32 1.0, %v10327_v63  ;;  %v13188_v4 = vmul.f32 %v7284_v41, %v7212_v55  ;;  %v10088_v20 = vld [vmem:[#allocation13 + $0x380] ss:$8 sps:$4 sm:$0xff]   ;;  %v10096_v63 = vld [vmem:[#allocation13 + $0x3a4] ss:$8 sps:$4 sm:$0xff]  }
0x18da   :  { %v10331_v21 = vpop.eup %10330  ;;  %v7286_v17 = vadd.f32 1.0, %v10329_v9  ;;  %v7307_v5 = vmul.f32 %v7283_v38, %v7211_v42 }
0x18db   :  { %v10333_v58 = vpop.eup %10332  ;;  %v7288_v16 = vadd.f32 1.0, %v10331_v21  ;;  %v13192_v3 = vmul.f32 %v7285_v39, %v7213_v48  ;;  %v10099_v48 = vld [vmem:[#allocation13 + $0x3b4] ss:$8 sps:$4 sm:$0xff]  }
0x18dc   :  { %v10335_v26 = vpop.eup %10334  ;;  %v7310_v36 = vmul.f32 %v7286_v17, %v7214_v27  ;;  %v7287_v54 = vadd.f32 1.0, %v10333_v58  ;;  %7808 = vmatpush1.bf16.msra.mxu1 %v10082_v61  ;;  %v10094_v27 = vld [vmem:[#allocation13 + $0x3a0] ss:$8 sps:$4 sm:$0xff]  }
0x18dd   :  { %v13190_v7 = vmul.f32 %v7288_v16, %v7216_v49  ;;  %v7289_v40 = vadd.f32 1.0, %v10335_v26  ;;  %7809 = vmatprep.subr.bf16.mxu1 %v10087_v31 }
0x18de   :  { %v7311_v2 = vmul.f32 %v7287_v54, %v7215_v14  ;;  %v7391_v47 = vpack.c.bf16 %v7310_v36, %v7306_v53 }
0x18df   :  { %v13194_v43 = vmul.f32 %v7289_v40, %v7217_v60  ;;  %v7393_v13 = vpack.c.bf16 %v13190_v7, %v13188_v4  ;;  %v10102_v40 = vld [vmem:[#allocation13 + $0x3c4] ss:$8 sps:$4 sm:$0xff]  }
0x18e0   :  { %v7392_v1 = vpack.c.bf16 %v7311_v2, %v7307_v5  ;;  %7810 = vmatpush1.bf16.msra.mxu1 %v10085_v28  ;;  %v10097_v28 = vld [vmem:[#allocation13 + $0x3b0] ss:$8 sps:$4 sm:$0xff]   ;;  %v10105_v2 = vld [vmem:[#allocation13 + $0x3d4] ss:$8 sps:$4 sm:$0xff]  }
0x18e1   :  { %7811 = vmatprep.subr.bf16.mxu1 %v10090_v50  ;;  %v7394_v12 = vpack.c.bf16 %v13194_v43, %v13192_v3 }
0x18e2   :  { %7774 = vmatprep.mubr.bf16.mxu1 %v7392_v1 }
0x18e3   :  { %7775 = vmatmul.mubr.bf16.gmra.mrb[164].mxu1 %v7391_v47  ;;  %v10108_v47 = vld [vmem:[#allocation13 + $0x3e4] ss:$8 sps:$4 sm:$0xff]  }
0x18e4   :  { %7812 = vmatpush1.bf16.msra.mxu1 %v10088_v20 }
0x18e5   :  { %7813 = vmatprep.subr.bf16.mxu1 %v10093_v19 }
0x18e6   :  { %v7130_v35 = vpop.f32.mrb[156].mxu1  ;;  %v7193_v61 = vpop.f32.mrb[184].mxu0 }
0x18e7   :  { %v7131_v9 = vadd.f32 %v7130_v35, %v13149_v8  ;;  %v7194_v0 = vadd.f32 %v7193_v61, %v13152_v56  ;;  %v7132_v55 = vpop.f32.mrb[157].mxu1  ;;  %v7195_v41 = vpop.f32.mrb[185].mxu0 }
0x18e8   :  { %v7133_v31 = vadd.f32 %v7132_v55, %v13155_v52  ;;  %v7196_v21 = vadd.f32 %v7195_v41, %v13158_v57  ;;  %v7134_v42 = vpop.f32.mrb[158].mxu1  ;;  %v7197_v38 = vpop.f32.mrb[186].mxu0  ;;  %7814 = vmatpush1.bf16.msra.mxu1 %v10091_v6 }
0x18e9   :  { %v7242_v17 = vmul.f32 0.70710677, %v7131_v9  ;;  %v7244_v58 = vmul.f32 0.70710677, %v7194_v0  ;;  %7815 = vmatprep.subr.bf16.mxu1 %v10096_v63  ;;  %v7135_v16 = vadd.f32 %v7134_v42, %v13149_v8  ;;  %v7198_v26 = vadd.f32 %v7197_v38, %v13152_v56  ;;  %v7136_v53 = vpop.f32.mrb[159].mxu1  ;;  %v7199_v36 = vpop.f32.mrb[187].mxu0 }
0x18ea   :  { %v7243_v39 = vmul.f32 0.70710677, %v7133_v31  ;;  %v7245_v49 = vmul.f32 0.70710677, %v7196_v21  ;;  %v7137_v14 = vadd.f32 %v7136_v53, %v13155_v52  ;;  %v7200_v54 = vadd.f32 %v7199_v36, %v13158_v57  ;;  %v10100_v56 = vld [vmem:[#allocation13 + $0x3c0] ss:$8 sps:$4 sm:$0xff]  }
0x18eb   :  { %10336 = verf.f32 %v7242_v17  ;;  %v7246_v60 = vmul.f32 0.70710677, %v7135_v16  ;;  %v7248_v50 = vmul.f32 0.70710677, %v7198_v26  ;;  %v10103_v52 = vld [vmem:[#allocation13 + $0x3d0] ss:$8 sps:$4 sm:$0xff]  }
0x18ec   :  { %10338 = verf.f32 %v7244_v58  ;;  %7816 = vmatpush1.bf16.msra.mxu1 %v10094_v27  ;;  %v7247_v5 = vmul.f32 0.70710677, %v7137_v14  ;;  %v7249_v8 = vmul.f32 0.70710677, %v7200_v54  ;;  %v10106_v63 = vld [vmem:[#allocation13 + $0x3e0] ss:$8 sps:$4 sm:$0xff]  }
0x18ed   :  { %10340 = verf.f32 %v7243_v39  ;;  %7817 = vmatprep.subr.bf16.mxu1 %v10099_v48  ;;  %v7218_v61 = vmul.f32 0.5, %v7131_v9  ;;  %v7220_v55 = vmul.f32 0.5, %v7194_v0  ;;  %v10111_v42 = vld [vmem:[#allocation13 + $0x3f4] ss:$8 sps:$4 sm:$0xff]   ;;  %v7219_v27 = vmul.f32 0.5, %v7133_v31 }
0x18ee   :  { %10342 = verf.f32 %v7245_v49  ;;  %v7222_v58 = vmul.f32 0.5, %v7135_v16  ;;  %v7221_v49 = vmul.f32 0.5, %v7196_v21  ;;  %v7224_v36 = vmul.f32 0.5, %v7198_v26  ;;  %v10109_v9 = vld [vmem:[#allocation13 + $0x3f0] ss:$8 sps:$4 sm:$0xff]  }
0x18ef   :  { %10344 = verf.f32 %v7246_v60 }
0x18f0   :  { %10346 = verf.f32 %v7248_v50  ;;  %7818 = vmatpush1.bf16.msra.mxu1 %v10097_v28 }
0x18f1   :  { %10348 = verf.f32 %v7247_v5  ;;  %7819 = vmatprep.subr.bf16.mxu1 %v10102_v40  ;;  %v7223_v5 = vmul.f32 0.5, %v7137_v14  ;;  %v7400_v14 = vld [vmem:[#allocation15 + $0x2] sm:$0x3] }
0x18f2   :  { %10350 = verf.f32 %v7249_v8  ;;  %v7409_v25 = vrot.slane %v7400_v14, %v11216_v10 }
0x18f4   :  { %7820 = vmatpush1.bf16.msra.mxu1 %v10100_v56 }
0x18f5   :  { %v10337_v57 = vpop.eup %10336  ;;  %7821 = vmatprep.subr.bf16.mxu1 %v10105_v2  ;;  %v7225_v2 = vmul.f32 0.5, %v7200_v54  ;;  %v7405_v54 = vrot.slane %v7400_v14, %v11219_v11 }
0x18f6   :  { %v10339_v1 = vpop.eup %10338  ;;  %v7290_v6 = vadd.f32 1.0, %v10337_v57 }
0x18f7   :  { %v10341_v20 = vpop.eup %10340  ;;  %v7292_v41 = vadd.f32 1.0, %v10339_v1 }
0x18f8   :  { %v10343_v19 = vpop.eup %10342  ;;  %7822 = vmatpush1.bf16.msra.mxu1 %v10103_v52  ;;  %v7291_v17 = vadd.f32 1.0, %v10341_v20  ;;  %v7314_v40 = vmul.f32 %v7290_v6, %v7218_v61 }
0x18f9   :  { %v10345_v35 = vpop.eup %10344  ;;  %7823 = vmatprep.subr.bf16.mxu1 %v10108_v47  ;;  %v7293_v53 = vadd.f32 1.0, %v10343_v19  ;;  %v7316_v0 = vmul.f32 %v7292_v41, %v7220_v55 }
0x18fa   :  { %v10347_v38 = vpop.eup %10346  ;;  %v7294_v48 = vadd.f32 1.0, %v10345_v35  ;;  %v7315_v31 = vmul.f32 %v7291_v17, %v7219_v27 }
0x18fb   :  { %v10349_v39 = vpop.eup %10348  ;;  %v7296_v28 = vadd.f32 1.0, %v10347_v38  ;;  %v7317_v47 = vmul.f32 %v7293_v53, %v7221_v49 }
0x18fc   :  { %v10351_v60 = vpop.eup %10350  ;;  %v7318_v50 = vmul.f32 %v7294_v48, %v7222_v58  ;;  %v7295_v8 = vadd.f32 1.0, %v10349_v39  ;;  %7824 = vmatpush1.bf16.msra.mxu1 %v10106_v63 }
0x18fd   :  { %v7320_v56 = vmul.f32 %v7296_v28, %v7224_v36  ;;  %v7297_v52 = vadd.f32 1.0, %v10351_v60  ;;  %7825 = vmatprep.subr.bf16.mxu1 %v10111_v42 }
0x18fe   :  { %v7319_v16 = vmul.f32 %v7295_v8, %v7223_v5  ;;  %v7395_v57 = vpack.c.bf16 %v7318_v50, %v7314_v40 }
0x18ff   :  { %v7321_v21 = vmul.f32 %v7297_v52, %v7225_v2  ;;  %v7397_v1 = vpack.c.bf16 %v7320_v56, %v7316_v0 }
0x1900   :  { %v7396_v26 = vpack.c.bf16 %v7319_v16, %v7315_v31  ;;  %7826 = vmatpush1.bf16.msra.mxu1 %v10109_v9 }
0x1901   :  { %v7398_v20 = vpack.c.bf16 %v7321_v21, %v7317_v47 }
0x1902   :  { %7784 = vmatprep.mubr.bf16.mxu1 %v7396_v26 }
0x1903   :  { %7785 = vmatmul.mubr.bf16.gmra.mrb[168].mxu1 %v7395_v57 }
0x1904   :  { %7827 = vmatprep.mubr.bf16.mxu1 %v7390_v37 }
0x190b   :  { %7828 = vmatmul.mubr.bf16.vlgmr.msra.gmra.mrb[160].mxu1 %v7389_v23 }
0x190c   :  { %7837 = vmatprep.mubr.bf16.mxu1 %v7394_v12 }
0x1913   :  { %7838 = vmatmul.mubr.bf16.gmra.mrb[164].mxu1 %v7393_v13 }
0x1914   :  { %7847 = vmatprep.mubr.bf16.mxu1 %v7398_v20 }
0x191b   :  { %7848 = vmatmul.mubr.bf16.gmra.mrb[168].mxu1 %v7397_v1 }
0x19de   :  { %v7829_v51 = vpop.f32.mrb[160].mxu1 }
0x19df   :  { %v9287_v37 = vadd.f32 %v7829_v51, %v7405_v54  ;;  %v7831_v19 = vpop.f32.mrb[161].mxu1 }
0x19e0   :  { %v9288_v34 = vadd.f32 %v7831_v19, %v7409_v25  ;;  %v7833_v22 = vpop.f32.mrb[162].mxu1 }
0x19e1   :  { %v7858_v23 = vadd.f32 %v9287_v37, %v13091_v29  ;;  %v9289_v3 = vadd.f32 %v7833_v22, %v7405_v54  ;;  %v7835_v43 = vpop.f32.mrb[163].mxu1 }
0x19e2   :  { %v7859_v12 = vadd.f32 %v9288_v34, %v13085_v44  ;;  %v9290_v4 = vadd.f32 %v7835_v43, %v7409_v25 }
0x19e3   :  { %v7860_v7 = vadd.f32 %v9289_v3, %v13094_v24 }
0x19e4   :  { %v7861_v13 = vadd.f32 %v9290_v4, %v13088_v62  ;;  %v7874_v6 = vadd.f32 %v7859_v12, %v7858_v23 }
0x19e6   :  { %v7839_v63 = vpop.f32.mrb[164].mxu1  ;;  %7875 = vadd.xlane.f32.xlu0 %v7874_v6  ;;  %v7877_v42 = vadd.f32 %v7861_v13, %v7860_v7 }
0x19e7   :  { %v9291_v35 = vadd.f32 %v7839_v63, %v7405_v54  ;;  %v7841_v61 = vpop.f32.mrb[165].mxu1 }
0x19e8   :  { %v9292_v55 = vadd.f32 %v7841_v61, %v7409_v25  ;;  %v7843_v41 = vpop.f32.mrb[166].mxu1 }
0x19e9   :  { %v7862_v38 = vadd.f32 %v9291_v35, %v13115_v30  ;;  %v9293_v29 = vadd.f32 %v7843_v41, %v7405_v54  ;;  %v7845_v27 = vpop.f32.mrb[167].mxu1 }
0x19ea   :  { %v7863_v17 = vadd.f32 %v9292_v55, %v13109_v15  ;;  %v9294_v44 = vadd.f32 %v7845_v27, %v7409_v25  ;;  %7878 = vadd.xlane.f32.xlu0 %v7877_v42 }
0x19eb   :  { %v7864_v24 = vadd.f32 %v9293_v29, %v13118_v46 }
0x19ec   :  { %v7865_v62 = vadd.f32 %v9294_v44, %v13112_v32  ;;  %v7880_v58 = vadd.f32 %v7863_v17, %v7862_v38  ;;  %v8077_v44 = vld [vmem:[%s13422_s16 + $0x88] sm:$0xff] }
0x19ee   :  { %v7849_v48 = vpop.f32.mrb[168].mxu1  ;;  %7881 = vadd.xlane.f32.xlu1 %v7880_v58  ;;  %v7883_v28 = vadd.f32 %v7865_v62, %v7864_v24  ;;  %v8061_v58 = vld [vmem:[%s13422_s16 + $0x8] sm:$0xff] }
0x19ef   :  { %v9295_v39 = vadd.f32 %v7849_v48, %v7405_v54  ;;  %v7851_v49 = vpop.f32.mrb[169].mxu1 }
0x19f0   :  { %v9296_v53 = vadd.f32 %v7851_v49, %v7409_v25  ;;  %v7853_v36 = vpop.f32.mrb[170].mxu1  ;;  %v8079_v49 = vld [vmem:[%s13422_s16 + $0x98] sm:$0xff] }
0x19f1   :  { %v7866_v30 = vadd.f32 %v9295_v39, %v13136_v59  ;;  %v9297_v60 = vadd.f32 %v7853_v36, %v7405_v54  ;;  %v7855_v40 = vpop.f32.mrb[171].mxu1  ;;  %v8078_v39 = vld [vmem:[%s13422_s16 + $0x90] sm:$0xff] }
0x19f2   :  { %v7867_v15 = vadd.f32 %v9296_v53, %v13132_v33  ;;  %v9298_v50 = vadd.f32 %v7855_v40, %v7409_v25  ;;  %7884 = vadd.xlane.f32.xlu1 %v7883_v28  ;;  %v9247_v53 = vpack.c.bf16 %v8079_v49, %v8078_v39  ;;  %v8062_v36 = vld [vmem:[%s13422_s16 + $0x10] sm:$0xff]  ;;  %v8063_v28 = vld [vmem:[%s13422_s16 + $0x18] sm:$0xff]  ;;  %v8081_v40 = vld [vmem:[%s13422_s16 + $0xa8] sm:$0xff] }
0x19f3   :  { %v7868_v46 = vadd.f32 %v9297_v60, %v13142_v45  ;;  %v8080_v60 = vld [vmem:[%s13422_s16 + $0xa0] sm:$0xff] }
0x19f4   :  { %v7869_v32 = vadd.f32 %v9298_v50, %v13139_v18  ;;  %v7886_v5 = vadd.f32 %v7867_v15, %v7866_v30  ;;  %v8064_v50 = vld [vmem:[%s13422_s16 + $0x20] sm:$0xff] }
0x19f6   :  { %7887 = vadd.xlane.f32.xlu0 %v7886_v5  ;;  %v7889_v8 = vadd.f32 %v7869_v32, %v7868_v46  ;;  %v8082_v5 = vld [vmem:[%s13422_s16 + $0xb0] sm:$0xff] }
0x19f8   :  { %7890 = vadd.xlane.f32.xlu1 %v7889_v8  ;;  %v8083_v8 = vld [vmem:[%s13422_s16 + $0xb8] sm:$0xff] }
0x1a73   :  { %v7876_v9 = vpop.xlane.xlu0 %7875 }
0x1a74   :  { %v7892_v0 = vmul.f32 0.00390625, %v7876_v9  ;;  %v9255_v9 = vpack.c.bf16 %v8083_v8, %v8082_v5 }
0x1a76   :  { %v13234_v56 = vsub.f32 %v7858_v23, %v7892_v0  ;;  %v13236_v2 = vsub.f32 %v7859_v12, %v7892_v0  ;;  %v8066_v0 = vld [vmem:[%s13422_s16 + $0x30] sm:$0xff] }
0x1a77   :  { %v7879_v59 = vpop.xlane.xlu0 %7878 }
0x1a78   :  { %v7910_v33 = vmul.f32 %v13234_v56, %v13234_v56  ;;  %v7911_v52 = vmul.f32 %v13236_v2, %v13236_v2  ;;  %v7893_v45 = vmul.f32 0.00390625, %v7879_v59  ;;  %v8067_v59 = vld [vmem:[%s13422_s16 + $0x38] sm:$0xff] }
0x1a7a   :  { %v13242_v31 = vsub.f32 %v7860_v7, %v7893_v45  ;;  %v13244_v18 = vsub.f32 %v7861_v13, %v7893_v45  ;;  %v7922_v16 = vadd.f32 %v7911_v52, %v7910_v33  ;;  %v9257_v33 = vpack.c.bf16 %v8067_v59, %v8066_v0  ;;  %v8084_v52 = vld [vmem:[%s13422_s16 + $0xc0] sm:$0xff]  ;;  %v8085_v45 = vld [vmem:[%s13422_s16 + $0xc8] sm:$0xff] }
0x1a7b   :  { %v7882_v57 = vpop.xlane.xlu1 %7881 }
0x1a7c   :  { %v7912_v47 = vmul.f32 %v13242_v31, %v13242_v31  ;;  %v7913_v21 = vmul.f32 %v13244_v18, %v13244_v18  ;;  %v7894_v1 = vmul.f32 0.00390625, %v7882_v57  ;;  %7923 = vadd.xlane.f32.xlu0 %v7922_v16  ;;  %v9259_v16 = vpack.c.bf16 %v8085_v45, %v8084_v52  ;;  %v8068_v57 = vld [vmem:[%s13422_s16 + $0x40] sm:$0xff] }
0x1a7e   :  { %v13250_v26 = vsub.f32 %v7862_v38, %v7894_v1  ;;  %v13252_v20 = vsub.f32 %v7863_v17, %v7894_v1  ;;  %v7925_v14 = vadd.f32 %v7913_v21, %v7912_v47  ;;  %v8076_v17 = vld [vmem:[%s13422_s16 + $0x80] sm:$0xff]  ;;  %v8069_v47 = vld [vmem:[%s13422_s16 + $0x48] sm:$0xff]  ;;  %v8086_v1 = vld [vmem:[%s13422_s16 + $0xd0] sm:$0xff] }
0x1a7f   :  { %v7885_v54 = vpop.xlane.xlu1 %7884  ;;  %v9261_v21 = vpack.c.bf16 %v8069_v47, %v8068_v57 }
0x1a80   :  { %v7914_v25 = vmul.f32 %v13250_v26, %v13250_v26  ;;  %v7915_v51 = vmul.f32 %v13252_v20, %v13252_v20  ;;  %v7895_v37 = vmul.f32 0.00390625, %v7885_v54  ;;  %7926 = vadd.xlane.f32.xlu0 %v7925_v14  ;;  %v8087_v14 = vld [vmem:[%s13422_s16 + $0xd8] sm:$0xff] }
0x1a81   :  { %v9263_v54 = vpack.c.bf16 %v8087_v14, %v8086_v1 }
0x1a82   :  { %v13258_v19 = vsub.f32 %v7864_v24, %v7895_v37  ;;  %v13260_v34 = vsub.f32 %v7865_v62, %v7895_v37  ;;  %v7928_v22 = vadd.f32 %v7915_v51, %v7914_v25  ;;  %v9243_v24 = vpack.c.bf16 %v8077_v44, %v8076_v17  ;;  %v8060_v62 = vld [vmem:[%s13422_s16] sm:$0xff]  ;;  %v8070_v25 = vld [vmem:[%s13422_s16 + $0x50] sm:$0xff]  ;;  %v8071_v51 = vld [vmem:[%s13422_s16 + $0x58] sm:$0xff] }
0x1a83   :  { %v7888_v23 = vpop.xlane.xlu0 %7887  ;;  %v9245_v48 = vpack.c.bf16 %v8061_v58, %v8060_v62  ;;  %v9265_v37 = vpack.c.bf16 %v8071_v51, %v8070_v25 }
0x1a84   :  { %v7916_v3 = vmul.f32 %v13258_v19, %v13258_v19  ;;  %v7917_v43 = vmul.f32 %v13260_v34, %v13260_v34  ;;  %v7896_v12 = vmul.f32 0.00390625, %v7888_v23  ;;  %7929 = vadd.xlane.f32.xlu1 %v7928_v22  ;;  %9244 = vmatprep.subr.bf16.mxu0 %v9243_v24  ;;  %v8088_v22 = vld [vmem:[%s13422_s16 + $0xe0] sm:$0xff]  ;;  %v8089_v23 = vld [vmem:[%s13422_s16 + $0xe8] sm:$0xff] }
0x1a85   :  { %v7891_v4 = vpop.xlane.xlu1 %7890  ;;  %9246 = vmatpush3.bf16.msra.mxu0 %v9245_v48 }
0x1a86   :  { %v13266_v7 = vsub.f32 %v7866_v30, %v7896_v12  ;;  %v13268_v13 = vsub.f32 %v7867_v15, %v7896_v12  ;;  %v7897_v6 = vmul.f32 0.00390625, %v7891_v4  ;;  %v7931_v63 = vadd.f32 %v7917_v43, %v7916_v3  ;;  %9248 = vmatprep.subr.bf16.mxu0 %v9247_v53  ;;  %v8072_v3 = vld [vmem:[%s13422_s16 + $0x60] sm:$0xff]  ;;  %v8073_v12 = vld [vmem:[%s13422_s16 + $0x68] sm:$0xff]  ;;  %v8090_v4 = vld [vmem:[%s13422_s16 + $0xf0] sm:$0xff] }
0x1a87   :  { %v9249_v30 = vpack.c.bf16 %v8063_v28, %v8062_v36  ;;  %v9251_v15 = vpack.c.bf16 %v8081_v40, %v8080_v60  ;;  %v9267_v43 = vpack.c.bf16 %v8089_v23, %v8088_v22  ;;  %v7871_v60 = vld [vmem:[#allocation16 + $0x2] sm:$0x3] }
0x1a88   :  { %v7918_v35 = vmul.f32 %v13266_v7, %v13266_v7  ;;  %v7919_v61 = vmul.f32 %v13268_v13, %v13268_v13  ;;  %v13274_v55 = vsub.f32 %v7868_v46, %v7897_v6  ;;  %v13276_v41 = vsub.f32 %v7869_v32, %v7897_v6  ;;  %7932 = vadd.xlane.f32.xlu1 %v7931_v63  ;;  %v8065_v46 = vld [vmem:[%s13422_s16 + $0x28] sm:$0xff]  ;;  %v8091_v6 = vld [vmem:[%s13422_s16 + $0xf8] sm:$0xff] }
0x1a89   :  { %9250 = vmatpush3.bf16.msra.mxu0 %v9249_v30  ;;  %v9253_v32 = vpack.c.bf16 %v8065_v46, %v8064_v50  ;;  %v9269_v63 = vpack.c.bf16 %v8073_v12, %v8072_v3  ;;  %v7978_v0 = vrot.slane %v7871_v60, %v11216_v10 }
0x1a8a   :  { %v7920_v42 = vmul.f32 %v13274_v55, %v13274_v55  ;;  %v7921_v38 = vmul.f32 %v13276_v41, %v13276_v41  ;;  %v7934_v29 = vadd.f32 %v7919_v61, %v7918_v35  ;;  %9252 = vmatprep.subr.bf16.mxu0 %v9251_v15  ;;  %v9271_v35 = vpack.c.bf16 %v8091_v6, %v8090_v4  ;;  %v8074_v61 = vld [vmem:[%s13422_s16 + $0x70] sm:$0xff] }
0x1a8c   :  { %7935 = vadd.xlane.f32.xlu0 %v7934_v29  ;;  %v7937_v27 = vadd.f32 %v7921_v38, %v7920_v42  ;;  %v8075_v42 = vld [vmem:[%s13422_s16 + $0x78] sm:$0xff] }
0x1a8d   :  { %9254 = vmatpush3.bf16.msra.mxu0 %v9253_v32  ;;  %v9273_v38 = vpack.c.bf16 %v8075_v42, %v8074_v61 }
0x1a8e   :  { %7938 = vadd.xlane.f32.xlu1 %v7937_v27  ;;  %9256 = vmatprep.subr.bf16.mxu0 %v9255_v9  ;;  %v7974_v9 = vrot.slane %v7871_v60, %v11219_v11 }
0x1a91   :  { %9258 = vmatpush3.bf16.msra.mxu0 %v9257_v33  ;;  %v7873_v33 = vld [vmem:[#allocation18 + $0x2] sm:$0x3] }
0x1a92   :  { %9260 = vmatprep.subr.bf16.mxu0 %v9259_v16  ;;  %v8001_v1 = vrot.slane %v7873_v33, %v11216_v10 }
0x1a95   :  { %9262 = vmatpush3.bf16.msra.mxu0 %v9261_v21 }
0x1a96   :  { %9264 = vmatprep.subr.bf16.mxu0 %v9263_v54 }
0x1a99   :  { %9266 = vmatpush3.bf16.msra.mxu0 %v9265_v37 }
0x1a9a   :  { %9268 = vmatprep.subr.bf16.mxu0 %v9267_v43 }
0x1a9d   :  { %9270 = vmatpush3.bf16.msra.mxu0 %v9269_v63 }
0x1a9e   :  { %9272 = vmatprep.subr.bf16.mxu0 %v9271_v35 }
0x1aa1   :  { %9274 = vmatpush3.bf16.msra.mxu0 %v9273_v38 }
0x1b09   :  { %v7924_v29 = vpop.xlane.xlu0 %7923 }
0x1b0a   :  { %v7940_v27 = vmul.f32 0.00390625, %v7924_v29 }
0x1b0c   :  { %v7946_v24 = vadd.f32 1e-12, %v7940_v27 }
0x1b0d   :  { %v7927_v17 = vpop.xlane.xlu0 %7926 }
0x1b0e   :  { %v7941_v44 = vmul.f32 0.00390625, %v7927_v17 }
0x1b10   :  { %v7947_v62 = vadd.f32 1e-12, %v7941_v44 }
0x1b11   :  { %v7930_v58 = vpop.xlane.xlu1 %7929 }
0x1b12   :  { %10352 = vrsqrt.f32 %v7947_v62  ;;  %v7942_v48 = vmul.f32 0.00390625, %v7930_v58 }
0x1b13   :  { %10354 = vrsqrt.f32 %v7946_v24 }
0x1b14   :  { %v7948_v39 = vadd.f32 1e-12, %v7942_v48 }
0x1b15   :  { %v7933_v49 = vpop.xlane.xlu1 %7932 }
0x1b16   :  { %10356 = vrsqrt.f32 %v7948_v39  ;;  %v7943_v53 = vmul.f32 0.00390625, %v7933_v49 }
0x1b18   :  { %v7949_v36 = vadd.f32 1e-12, %v7943_v53 }
0x1b19   :  { %v7936_v28 = vpop.xlane.xlu0 %7935 }
0x1b1a   :  { %10358 = vrsqrt.f32 %v7949_v36  ;;  %v7944_v30 = vmul.f32 0.00390625, %v7936_v28 }
0x1b1b   :  { %v7939_v40 = vpop.xlane.xlu1 %7938 }
0x1b1c   :  { %v10353_v15 = vpop.eup %10352  ;;  %v7950_v50 = vadd.f32 1e-12, %v7944_v30  ;;  %v7945_v46 = vmul.f32 0.00390625, %v7939_v40 }
0x1b1d   :  { %v7960_v32 = vmul.f32 %v10353_v15, %v13242_v31  ;;  %v7961_v5 = vmul.f32 %v10353_v15, %v13244_v18  ;;  %v10355_v8 = vpop.eup %10354  ;;  %v7997_v18 = vrot.slane %v7873_v33, %v11219_v11 }
0x1b1e   :  { %10360 = vrsqrt.f32 %v7950_v50  ;;  %v7951_v59 = vadd.f32 1e-12, %v7945_v46  ;;  %v7958_v57 = vmul.f32 %v10355_v8, %v13234_v56  ;;  %v7959_v21 = vmul.f32 %v10355_v8, %v13236_v2 }
0x1b1f   :  { %v7983_v45 = vmul.f32 %v7974_v9, %v7960_v32  ;;  %v7984_v16 = vmul.f32 %v7978_v0, %v7961_v5 }
0x1b20   :  { %v10357_v52 = vpop.eup %10356  ;;  %10362 = vrsqrt.f32 %v7951_v59  ;;  %v7981_v22 = vmul.f32 %v7974_v9, %v7958_v57  ;;  %v7982_v3 = vmul.f32 %v7978_v0, %v7959_v21 }
0x1b21   :  { %v7962_v47 = vmul.f32 %v10357_v52, %v13250_v26  ;;  %v7963_v31 = vmul.f32 %v10357_v52, %v13252_v20  ;;  %v8006_v51 = vadd.f32 %v7997_v18, %v7983_v45  ;;  %v8007_v37 = vadd.f32 %v8001_v1, %v7984_v16 }
0x1b22   :  { %v8004_v10 = vadd.f32 %v7997_v18, %v7981_v22  ;;  %v8005_v61 = vadd.f32 %v8001_v1, %v7982_v3  ;;  %v13446_v16 = vlaneseq }
0x1b23   :  { %v7985_v14 = vmul.f32 %v7974_v9, %v7962_v47  ;;  %v7986_v54 = vmul.f32 %v7978_v0, %v7963_v31  ;;  %v8018_v2 = vrot.slane %v8006_v51, 7  ;;  %v8019_v4 = vrot.slane %v8007_v37, 7 }
0x1b24   :  { %v10359_v25 = vpop.eup %10358  ;;  %v8163_v57 = vand.u32 127, %v13446_v16 }
0x1b25   :  { %v7964_v23 = vmul.f32 %v10359_v25, %v13258_v19  ;;  %v7965_v56 = vmul.f32 %v10359_v25, %v13260_v34  ;;  %v8008_v26 = vadd.f32 %v7997_v18, %v7985_v14  ;;  %v8009_v43 = vadd.f32 %v8001_v1, %v7986_v54 }
0x1b26   :  { %v8048_v62 = vsel %vm8046_vm3, %v8005_v61, %v8019_v4  ;;  %vm8164_vm7 = vcmp.eq.s32.totalorder %v8163_v57, 0 }
0x1b27   :  { %v7987_v20 = vmul.f32 %v7974_v9, %v7964_v23  ;;  %v7988_v12 = vmul.f32 %v7978_v0, %v7965_v56  ;;  %v8025_v34 = vrot.slane %v8009_v43, 6  ;;  %v8024_v38 = vrot.slane %v8008_v26, 6 }
0x1b28   :  { %v10361_v11 = vpop.eup %10360 }
0x1b29   :  { %v7966_v6 = vmul.f32 %v10361_v11, %v13266_v7  ;;  %v7967_v63 = vmul.f32 %v10361_v11, %v13268_v13  ;;  %v8011_v35 = vadd.f32 %v8001_v1, %v7988_v12  ;;  %v8010_v42 = vadd.f32 %v7997_v18, %v7987_v20 }
0x1b2a   :  { %v10363_v19 = vpop.eup %10362  ;;  %v8047_v7 = vsel %vm8046_vm3, %v8004_v10, %v8018_v2  ;;  %v8051_v53 = vsel %vm8049_vm4, %v8048_v62, %v8025_v34 }
0x1b2b   :  { %v7989_v29 = vmul.f32 %v7974_v9, %v7966_v6  ;;  %v7968_v27 = vmul.f32 %v10363_v19, %v13274_v55  ;;  %v7969_v17 = vmul.f32 %v10363_v19, %v13276_v41  ;;  %v7990_v44 = vmul.f32 %v7978_v0, %v7967_v63 }
0x1b2c   :  { %v8031_v24 = vrot.slane %v8011_v35, 5  ;;  %v8030_v58 = vrot.slane %v8010_v42, 5  ;;  %v8050_v36 = vsel %vm8049_vm4, %v8047_v7, %v8024_v38 }
0x1b2d   :  { %v7992_v48 = vmul.f32 %v7978_v0, %v7969_v17  ;;  %v8013_v13 = vadd.f32 %v8001_v1, %v7990_v44  ;;  %v7991_v39 = vmul.f32 %v7974_v9, %v7968_v27  ;;  %v8012_v49 = vadd.f32 %v7997_v18, %v7989_v29 }
0x1b2e   :  { %v8054_v41 = vsel %vm8052_vm5, %v8051_v53, %v8031_v24  ;;  %v8053_v40 = vsel %vm8052_vm5, %v8050_v36, %v8030_v58 }
0x1b2f   :  { %v8015_v28 = vadd.f32 %v8001_v1, %v7992_v48  ;;  %v8037_v30 = vrot.slane %v8013_v13, 4  ;;  %v8014_v55 = vadd.f32 %v7997_v18, %v7991_v39  ;;  %v8036_v60 = vrot.slane %v8012_v49, 4 }
0x1b31   :  { %v8043_v15 = vrot.slane %v8015_v28, 3  ;;  %v8056_v50 = vsel %vm1224_vm1, %v8054_v41, %v8037_v30  ;;  %v8042_v46 = vrot.slane %v8014_v55, 3  ;;  %v8055_v32 = vsel %vm1224_vm1, %v8053_v40, %v8036_v60 }
0x1b33   :  { %v8059_v5 = vsel %vm8057_vm6, %v8056_v50, %v8043_v15  ;;  %v8058_v8 = vsel %vm8057_vm6, %v8055_v32, %v8042_v46 }
0x1b34   :  { %8156 = vmatprep.mubr.f32.mxu0 %v8059_v5 }
0x1b35   :  { %8157 = vmatmul.mubr.f32.vlgmr.msra.gmra.mrb[188].mxu0 %v8058_v8 }
0x1c08   :  { %v8952_v9 = vpop.f32.mrb[188].mxu0 }
0x1c09   :  { %v8953_v0 = vpop.f32.mrb[189].mxu0 }
0x1c0a   :  { %v8954_v59 = vadd.f32 %v8953_v0, %v8952_v9 }
0x1c0c   :  { %v8823_v33 = vmul.f32 -1.442695, %v8954_v59 }
0x1c0e   :  { %10364 = vpow2.f32 %v8823_v33 }
0x1c18   :  { %v10365_v52 = vpop.eup %10364 }
0x1c19   :  { %v8168_v45 = vadd.f32 1.0, %v10365_v52 }
0x1c1b   :  { %10366 = vrcp.f32 %v8168_v45 }
0x1c25   :  { %v10367_v47 = vpop.eup %10366 }
0x1c26   :  { %v8171_v31 = vsel %vm8164_vm7, %v8954_v59, %v10367_v47 }
0x1c27   :  { %8173 = vst.msk [vmem:[%s13423_s17] sm:$0x3f] %vm8172_vm8, %v8171_v31 }
0x1c28   :  { %8178 = vsyncpa [#allocation3], 1 }
0x1c29   :  { %8179 = vsyncpa [#allocation5], 1 }
0x1c2a   :  { %8180 = vsyncpa [#allocation8], 1 }
0x1c2b   :  { %8181 = vsyncpa [#allocation11], 1 }
0x1c2c   :  { %8182 = vsyncpa [#allocation14], 1 }
0x1c2d   :  { %8183 = vsyncpa [#allocation17], 1 }

</bundles_post_ra>
